<compile_context>
chip_gen: v6e
topology: v6e:2x2x1
jax: 0.10.0
libtpu: 0.0.40
codegen_flags: <defaults>
</compile_context>

<pallas_src>
import functools
import math

import jax
import jax.numpy as jnp
from jax.experimental import pallas as pl
from jax.experimental.pallas import tpu as pltpu

F32 = jnp.float32

# ---------------- hyper-parameters (small, synthetic) ----------------
EMB_DIMS = 32        # module default 512; small for the demo
FF_DIMS = 64         # CustomTransformer default 1024; scaled down
N_HEADS = 4
K_NEIGHBORS = 4      # DGCNN default k=20; scaled down for N=16 points
LN_EPS = 1e-6
BN_EPS = 1e-5

# ---------------- canonical parameter orders (static) ----------------
DG_W_ORDER = ["w1", "w2", "w3", "w4", "w5"]
DG_V_ORDER = ["b1", "b2", "b3", "b4", "b5"]

TF_W_ORDER = (["enc_wqkv", "enc_wo", "enc_ff_w1", "enc_ff_w2",
               "dec_sa_wqkv", "dec_sa_wo",
               "dec_ca_wq", "dec_ca_wkv", "dec_ca_wo",
               "dec_ff_w1", "dec_ff_w2"]
              + [f"hf_w{i}" for i in range(3)] + ["hf_wf"]
              + [f"hw_w{i}" for i in range(5)] + ["hw_wf"])

TF_V_ORDER = (["enc_ln0_g", "enc_ln0_b", "enc_bqkv", "enc_bo",
               "enc_ln1_g", "enc_ln1_b", "enc_ff_b1", "enc_ff_b2",
               "enc_lnf_g", "enc_lnf_b",
               "dec_ln0_g", "dec_ln0_b", "dec_sa_bqkv", "dec_sa_bo",
               "dec_ln1_g", "dec_ln1_b", "dec_ca_bq", "dec_ca_bkv", "dec_ca_bo",
               "dec_ln2_g", "dec_ln2_b", "dec_ff_b1", "dec_ff_b2",
               "dec_lnf_g", "dec_lnf_b"]
              + [f"hf_b{i}" for i in range(3)]
              + [f"hw_b{i}" for i in range(5)])

FLOW_CONVS = [(f"hf_w{i}", f"hf_b{i}") for i in range(3)]     # proj_flow PointNet
WEIGHT_CONVS = [(f"hw_w{i}", f"hw_b{i}") for i in range(5)]   # proj_flow_weight PointNet


# ======================================================================
# BlockSpec helpers
# ======================================================================

def _stack_spec(shape):
    """Select direction slice `g` of a direction-stacked (leading dim 2) array."""
    zeros = (0,) * (len(shape) - 1)
    return pl.BlockSpec((None,) + tuple(shape[1:]), lambda g: (g,) + zeros)


def _full_spec(shape):
    """Whole array resident across both grid steps (constant block index)."""
    zeros = (0,) * len(shape)
    return pl.BlockSpec(tuple(shape), lambda g: zeros)


# ======================================================================
# Kernel 1: fused DGCNN (conv1..conv5, k folded into the matmul M dim)
# ======================================================================

def _make_dgcnn_kernel(w_order, vec_off, k, bn_rows):
    n_w = len(w_order)

    def kernel(g_ref, *rest):
        w_refs = rest[:n_w]
        vec_ref = rest[n_w]            # (1, total) packed conv biases
        out_ref = rest[n_w + 1]        # (B*N, emb)
        cat_ref = rest[n_w + 2]        # (B*N, 512) VMEM scratch for the skip concat
        W = dict(zip(w_order, w_refs))

        def vec(name):
            off, width = vec_off[name]
            return vec_ref[:, off:off + width]

        def conv(x, wname, bname):     # 1x1 conv (BN folded into weight) + bias + ReLU
            y = jnp.dot(x, W[wname][...], preferred_element_type=jnp.float32)
            return jnp.maximum(y + vec(bname), 0.0)

        def segmax(h):                 # max over the k neighbor groups (static sublane slices)
            m = h[0:bn_rows]
            for kk in range(1, k):
                m = jnp.maximum(m, h[kk * bn_rows:(kk + 1) * bn_rows])
            return m

        g = g_ref[...]                 # (k*B*N, 6) graph features, k-major rows
        h1 = conv(g, "w1", "b1")       # (k*B*N, 64)
        h2 = conv(h1, "w2", "b2")      # (k*B*N, 64)
        h3 = conv(h2, "w3", "b3")      # (k*B*N, 128)
        h4 = conv(h3, "w4", "b4")      # (k*B*N, 256)

        off = 0                        # x1..x4 written at static column offsets (no lane concat)
        for h in (h1, h2, h3, h4):
            c = h.shape[-1]
            cat_ref[:, off:off + c] = segmax(h)
            off += c

        out_ref[...] = conv(cat_ref[...], "w5", "b5")   # (B*N, emb)

    return kernel


def fused_dgcnn(weights, vec, vec_off, graph_stack, k):
    """graph_stack: (2, k*B*N, 6); weights: dict name -> (2, cin, cout); vec: (2, 1, total)."""
    n_dir, kbn, _ = graph_stack.shape
    bn = kbn // k
    emb = weights["w5"].shape[-1]
    cat_dim = weights["w5"].shape[1]
    w_list = [weights[n] for n in DG_W_ORDER]
    in_specs = ([_stack_spec(graph_stack.shape)]
                + [_stack_spec(w.shape) for w in w_list]
                + [_stack_spec(vec.shape)])
    return pl.pallas_call(
        _make_dgcnn_kernel(DG_W_ORDER, vec_off, k, bn),
        out_shape=jax.ShapeDtypeStruct((n_dir, bn, emb), F32),
        grid=(n_dir,),
        in_specs=in_specs,
        out_specs=pl.BlockSpec((None, bn, emb), lambda g: (g, 0, 0)),
        scratch_shapes=[pltpu.VMEM((bn, cat_dim), F32)],
        compiler_params=pltpu.CompilerParams(dimension_semantics=("parallel",)),
    )(graph_stack, *w_list, vec)


# ======================================================================
# Kernel 2: fused CustomTransformer (enc + dec) + ResidualMLPHead
# ======================================================================

def _make_tf_head_kernel(w_order, vec_off, batch, n_pts, n_heads):
    n_w = len(w_order)
    inv_h = 1.0 / n_heads

    def kernel(emb_ref, pts_ref, *rest):
        w_refs = rest[:n_w]
        vec_ref = rest[n_w]            # (1, total) packed biases / LN params
        out_ref = rest[n_w + 1]        # (B*N, 4)
        W = dict(zip(w_order, w_refs))

        def vec(name):
            off, width = vec_off[name]
            return vec_ref[:, off:off + width]

        def linear(x, wname, bname):
            return jnp.dot(x, W[wname][...], preferred_element_type=jnp.float32) + vec(bname)

        def ln(x, prefix):             # DCP-style LayerNorm: (x-mean)/(std_unbiased+eps)*g + b
            d = x.shape[-1]
            mean = jnp.mean(x, axis=-1, keepdims=True)
            diff = x - mean
            var = jnp.sum(diff * diff, axis=-1, keepdims=True) * (1.0 / (d - 1))
            return vec(prefix + "_g") * (diff / (jnp.sqrt(var) + LN_EPS)) + vec(prefix + "_b")

        def mha(q, k, v):
            # q/k/v: (B*N, E) -> output (B*N, E), head-mean attention probs (B, Nq, Nk)
            e = q.shape[-1]
            dk = e // n_heads
            scale = 1.0 / math.sqrt(dk)
            q3 = q.reshape(batch, n_pts, e)
            k3 = k.reshape(batch, n_pts, e)
            v3 = v.reshape(batch, n_pts, e)
            outs, attn_sum = [], None
            for h in range(n_heads):   # short static unroll over heads only; batch is batched
                lo, hi = h * dk, (h + 1) * dk
                s = jnp.einsum("bqd,bkd->bqk", q3[:, :, lo:hi], k3[:, :, lo:hi],
                               preferred_element_type=jnp.float32) * scale
                s = s - jnp.max(s, axis=-1, keepdims=True)
                es = jnp.exp(s)
                p = es * pl.reciprocal(jnp.sum(es, axis=-1, keepdims=True), approx=True)
                attn_sum = p if attn_sum is None else attn_sum + p
                outs.append(jnp.einsum("bqk,bkd->bqd", p, v3[:, :, lo:hi],
                                       preferred_element_type=jnp.float32))
            o = jnp.concatenate(outs, axis=-1).reshape(batch * n_pts, e)
            return o, attn_sum * inv_h

        def self_attn(x, pre):          # packed QKV projection
            e = x.shape[-1]
            qkv = linear(x, pre + "_wqkv", pre + "_bqkv")
            o, _ = mha(qkv[:, :e], qkv[:, e:2 * e], qkv[:, 2 * e:])
            return linear(o, pre + "_wo", pre + "_bo")

        def cross_attn(x, memv, pre):   # separate Q, packed KV projection
            e = x.shape[-1]
            q = linear(x, pre + "_wq", pre + "_bq")
            kv = linear(memv, pre + "_wkv", pre + "_bkv")
            o, attn = mha(q, kv[:, :e], kv[:, e:])
            return linear(o, pre + "_wo", pre + "_bo"), attn

        def ff(x, pre):
            h = jnp.maximum(linear(x, pre + "_w1", pre + "_b1"), 0.0)
            return linear(h, pre + "_w2", pre + "_b2")

        def pointnet(x, conv_names, final_wname):
            h = x
            for wn, bname in conv_names:  # conv1x1 (BN folded) + bias + ReLU
                h = jnp.maximum(linear(h, wn, bname), 0.0)
            return jnp.dot(h, W[final_wname][...], preferred_element_type=jnp.float32)

        g = pl.program_id(0)
        src = emb_ref[g]               # (B*N, E) query-side DGCNN embedding
        mem = emb_ref[1 - g]           # (B*N, E) memory-side DGCNN embedding
        qpts = pts_ref[g]              # (B*N, 3) query points
        mpts = pts_ref[1 - g]          # (B*N, 3) memory points

        # ---------------- encoder on the memory side ----------------
        x = mem
        x = x + self_attn(ln(x, "enc_ln0"), "enc")
        x = x + ff(ln(x, "enc_ln1"), "enc_ff")
        memory = ln(x, "enc_lnf")

        # ---------------- decoder on the query side ----------------
        x = src
        x = x + self_attn(ln(x, "dec_ln0"), "dec_sa")
        a, attn = cross_attn(ln(x, "dec_ln1"), memory, "dec_ca")   # attn: (B, Nq, Nk) head-mean
        x = x + a
        x = x + ff(ln(x, "dec_ln2"), "dec_ff")
        dec_out = ln(x, "dec_lnf")

        emb_tf = src + dec_out          # top-level residual: emb + transformer(emb)

        # ---------------- ResidualMLPHead ----------------
        resid_flow = pointnet(emb_tf, FLOW_CONVS, "hf_wf")         # (B*N, 3)
        weight = pointnet(emb_tf, WEIGHT_CONVS, "hw_wf")           # (B*N, 1)
        # corr_points (channels-last) = scores @ memory_points (head-mean cross-attn scores)
        corr = jnp.einsum("bqk,bkd->bqd", attn, mpts.reshape(batch, n_pts, 3),
                          preferred_element_type=jnp.float32).reshape(batch * n_pts, 3)
        flow = resid_flow + corr - qpts
        out_ref[...] = jnp.concatenate([flow, weight], axis=-1)    # single (B*N, 4) store

    return kernel


def fused_transformer_head(weights, vec, vec_off, emb_stack, pts_stack,
                           batch, n_pts, n_heads):
    """emb_stack: (2, B*N, E); pts_stack: (2, B*N, 3); weights: name -> (2, cin, cout)."""
    n_dir, bn, _ = emb_stack.shape
    w_list = [weights[n] for n in TF_W_ORDER]
    in_specs = ([_full_spec(emb_stack.shape),   # resident, kernel picks ref[g] / ref[1-g]
                 _full_spec(pts_stack.shape)]
                + [_stack_spec(w.shape) for w in w_list]
                + [_stack_spec(vec.shape)])
    return pl.pallas_call(
        _make_tf_head_kernel(TF_W_ORDER, vec_off, batch, n_pts, n_heads),
        out_shape=jax.ShapeDtypeStruct((n_dir, bn, 4), F32),
        grid=(n_dir,),
        in_specs=in_specs,
        out_specs=pl.BlockSpec((None, bn, 4), lambda g: (g, 0, 0)),
        compiler_params=pltpu.CompilerParams(dimension_semantics=("parallel",)),
    )(emb_stack, pts_stack, *w_list, vec)


# ======================================================================
# JAX glue: DGCNN graph features (knn gather) and top-level forward
# ======================================================================

def graph_features(pts, k):
    """get_graph_feature: (B, N, 3) -> (k*B*N, 6) channels-last [neighbor - center | center]."""
    b, n, _ = pts.shape
    inner = jnp.einsum("bnd,bmd->bnm", pts, pts)
    sq = jnp.sum(pts * pts, axis=-1)
    neg_sqdist = 2.0 * inner - sq[:, :, None] - sq[:, None, :]     # -||xi - xj||^2
    # TODO(synk): knn top-k + data-dependent neighbor gather stays in plain-JAX glue.
    idx = jax.lax.top_k(neg_sqdist, k)[1]                          # (B, N, k)
    neigh = jax.vmap(lambda p, i: p[i])(pts, idx)                  # (B, N, k, 3)
    center = jnp.broadcast_to(pts[:, :, None, :], neigh.shape)
    graph = jnp.concatenate([neigh - center, center], axis=-1)     # (B, N, k, 6)
    return jnp.transpose(graph, (2, 0, 1, 3)).reshape(k * b * n, 6)   # k-major rows


def model_forward(meta, arrays, action_in, anchor_in):
    """action_in, anchor_in: (B, N, >=3). Returns (flow_action, flow_anchor), each (B, N, 4)."""
    action_pts = action_in[..., :3]      # channels-last (B, N, 3)
    anchor_pts = anchor_in[..., :3]
    # center_feature=False -> raw points feed the embedding nets.
    b, n, _ = action_pts.shape

    graph_stack = jnp.stack([graph_features(action_pts, K_NEIGHBORS),
                             graph_features(anchor_pts, K_NEIGHBORS)], axis=0)  # (2, k*B*N, 6)
    emb_stack = fused_dgcnn(arrays["dg_w"], arrays["dg_vec"], meta["dg_vec_off"],
                            graph_stack, K_NEIGHBORS)                           # (2, B*N, E)

    pts_stack = jnp.stack([action_pts.reshape(b * n, 3),
                           anchor_pts.reshape(b * n, 3)], axis=0)               # (2, B*N, 3)
    flow_flat = fused_transformer_head(arrays["tf_w"], arrays["tf_vec"], meta["tf_vec_off"],
                                       emb_stack, pts_stack, b, n, N_HEADS)     # (2, B*N, 4)
    flow = flow_flat.reshape(2, b, n, 4)
    return flow[0], flow[1]


# ======================================================================
# Deterministic parameter initialization (channels-last, BN folded, packed)
# ======================================================================

class KeyGen:
    def __init__(self, seed):
        self._key = jax.random.PRNGKey(seed)

    def __call__(self):
        self._key, sub = jax.random.split(self._key)
        return sub


def init_folded_conv(kg, cin, cout, std=0.1):
    """1x1 conv (bias=False) + eval-mode BatchNorm folded into (weight, bias)."""
    w = std * jax.random.normal(kg(), (cin, cout), dtype=F32)
    scale = 1.0 / math.sqrt(1.0 + BN_EPS)     # default running stats / affine
    return w * scale, jnp.zeros((1, cout), F32)


def init_plain_conv(kg, cin, cout, std=0.1):
    return std * jax.random.normal(kg(), (cin, cout), dtype=F32)


def init_linear(kg, din, dout, std=0.1):
    return std * jax.random.normal(kg(), (din, dout), dtype=F32), jnp.zeros((1, dout), F32)


def init_dgcnn_dir(kg, emb):
    dims = [(6, 64), (64, 64), (64, 128), (128, 256), (512, emb)]
    W, V = {}, {}
    for i, (cin, cout) in enumerate(dims, start=1):
        w, b = init_folded_conv(kg, cin, cout)
        W[f"w{i}"] = w
        V[f"b{i}"] = b
    return W, V


def init_tf_dir(kg, d, dff):
    W, V = {}, {}

    def lin(name_w, name_b, din, dout):
        w, b = init_linear(kg, din, dout)
        W[name_w] = w
        V[name_b] = b

    def lnp(prefix):
        V[prefix + "_g"] = jnp.ones((1, d), F32)
        V[prefix + "_b"] = jnp.zeros((1, d), F32)

    def packed_qkv(name_w, name_b):
        wq, bq = init_linear(kg, d, d)
        wk, bk = init_linear(kg, d, d)
        wv, bv = init_linear(kg, d, d)
        W[name_w] = jnp.concatenate([wq, wk, wv], axis=1)
        V[name_b] = jnp.concatenate([bq, bk, bv], axis=1)

    # encoder (1 block, pre-norm sublayers + final norm)
    lnp("enc_ln0")
    packed_qkv("enc_wqkv", "enc_bqkv")
    lin("enc_wo", "enc_bo", d, d)
    lnp("enc_ln1")
    lin("enc_ff_w1", "enc_ff_b1", d, dff)
    lin("enc_ff_w2", "enc_ff_b2", dff, d)
    lnp("enc_lnf")

    # decoder (1 block)
    lnp("dec_ln0")
    packed_qkv("dec_sa_wqkv", "dec_sa_bqkv")
    lin("dec_sa_wo", "dec_sa_bo", d, d)
    lnp("dec_ln1")
    lin("dec_ca_wq", "dec_ca_bq", d, d)
    wk, bk = init_linear(kg, d, d)
    wv, bv = init_linear(kg, d, d)
    W["dec_ca_wkv"] = jnp.concatenate([wk, wv], axis=1)
    V["dec_ca_bkv"] = jnp.concatenate([bk, bv], axis=1)
    lin("dec_ca_wo", "dec_ca_bo", d, d)
    lnp("dec_ln2")
    lin("dec_ff_w1", "dec_ff_b1", d, dff)
    lin("dec_ff_w2", "dec_ff_b2", dff, d)
    lnp("dec_lnf")

    # ResidualMLPHead (emb >= 10 branch)
    flow_dims = [d, d // 2, d // 4, d // 8]
    for i in range(3):
        w, b = init_folded_conv(kg, flow_dims[i], flow_dims[i + 1])
        W[f"hf_w{i}"] = w
        V[f"hf_b{i}"] = b
    W["hf_wf"] = init_plain_conv(kg, flow_dims[-1], 3)
    wdims = [d, 64, 64, 64, 128, 512]
    for i in range(5):
        w, b = init_folded_conv(kg, wdims[i], wdims[i + 1])
        W[f"hw_w{i}"] = w
        V[f"hw_b{i}"] = b
    W["hw_wf"] = init_plain_conv(kg, wdims[-1], 1)
    return W, V


def _pack_vec_slab(vec_dicts, order):
    """Pack per-direction small vectors into one (2, 1, total) slab + static offsets."""
    offs, off = {}, 0
    for name in order:
        w = int(vec_dicts[0][name].shape[-1])
        offs[name] = (off, w)
        off += w
    slab = jnp.stack([jnp.concatenate([d[name] for name in order], axis=-1)
                      for d in vec_dicts], axis=0)
    return slab, offs


def _stack_weight_dicts(w_dicts, order):
    return {name: jnp.stack([d[name] for d in w_dicts], axis=0) for name in order}


def prepare_params(emb, dff, seed=7):
    kg = KeyGen(seed)
    dg_w_a, dg_v_a = init_dgcnn_dir(kg, emb)     # emb_nn_action
    dg_w_b, dg_v_b = init_dgcnn_dir(kg, emb)     # emb_nn_anchor
    tf_w_a, tf_v_a = init_tf_dir(kg, emb, dff)   # transformer_action + head_action
    tf_w_b, tf_v_b = init_tf_dir(kg, emb, dff)   # transformer_anchor + head_anchor

    dg_vec, dg_off = _pack_vec_slab([dg_v_a, dg_v_b], DG_V_ORDER)
    tf_vec, tf_off = _pack_vec_slab([tf_v_a, tf_v_b], TF_V_ORDER)
    arrays = {"dg_w": _stack_weight_dicts([dg_w_a, dg_w_b], DG_W_ORDER),
              "dg_vec": dg_vec,
              "tf_w": _stack_weight_dicts([tf_w_a, tf_w_b], TF_W_ORDER),
              "tf_vec": tf_vec}
    meta = {"dg_vec_off": dg_off, "tf_vec_off": tf_off}   # static python (slice offsets)
    return arrays, meta


# ======================================================================
# Main
# ======================================================================

if __name__ == "__main__":
    B, N_PTS = 2, 16

    key = jax.random.PRNGKey(0)
    k1, k2 = jax.random.split(key)
    action_in = jax.random.normal(k1, (B, N_PTS, 3), dtype=F32)
    anchor_in = jax.random.normal(k2, (B, N_PTS, 3), dtype=F32)

    arrays, meta = prepare_params(EMB_DIMS, FF_DIMS, seed=7)

    fwd = jax.jit(functools.partial(model_forward, meta))
    flow_action, flow_anchor = fwd(arrays, action_in, anchor_in)
    jax.block_until_ready((flow_action, flow_anchor))

    assert flow_action.shape == (B, N_PTS, 4), flow_action.shape
    assert flow_anchor.shape == (B, N_PTS, 4), flow_anchor.shape
    assert bool(jnp.all(jnp.isfinite(flow_action))) and bool(jnp.all(jnp.isfinite(flow_anchor)))

    print("KERNEL_OK")
</pallas_src>

<mosaic_0001>
module attributes {stable_mosaic.version = 11 : i64} {
  func.func @kernel(%arg0: i32, %arg1: memref<1x128x6xf32, #tpu.memory_space<vmem>>, %arg2: memref<1x6x64xf32, #tpu.memory_space<vmem>>, %arg3: memref<1x64x64xf32, #tpu.memory_space<vmem>>, %arg4: memref<1x64x128xf32, #tpu.memory_space<vmem>>, %arg5: memref<1x128x256xf32, #tpu.memory_space<vmem>>, %arg6: memref<1x512x32xf32, #tpu.memory_space<vmem>>, %arg7: memref<1x1x544xf32, #tpu.memory_space<vmem>>, %arg8: memref<1x32x32xf32, #tpu.memory_space<vmem>>, %arg9: memref<32x512xf32, #tpu.memory_space<vmem>>) attributes {dimension_semantics = [#tpu.dimension_semantics<parallel>], iteration_bounds = array<i64: 2>, scalar_prefetch = 0 : i64, scratch_operands = 1 : i64, tpu.core_type = #tpu.core_type<tc>, window_params = [{transform_indices = @transform_0, window_bounds = array<i64: 1, 128, 6>}, {transform_indices = @transform_1, window_bounds = array<i64: 1, 6, 64>}, {transform_indices = @transform_2, window_bounds = array<i64: 1, 64, 64>}, {transform_indices = @transform_3, window_bounds = array<i64: 1, 64, 128>}, {transform_indices = @transform_4, window_bounds = array<i64: 1, 128, 256>}, {transform_indices = @transform_5, window_bounds = array<i64: 1, 512, 32>}, {transform_indices = @transform_6, window_bounds = array<i64: 1, 1, 544>}, {transform_indices = @transform_7, window_bounds = array<i64: 1, 32, 32>}]} {
    %c0 = arith.constant 0 : index
    %c0_0 = arith.constant 0 : index
    %c0_1 = arith.constant 0 : index
    %0 = vector.load %arg1[%c0, %c0_0, %c0_1] : memref<1x128x6xf32, #tpu.memory_space<vmem>>, vector<1x128x6xf32>
    %1 = vector.shape_cast %0 : vector<1x128x6xf32> to vector<128x6xf32>
    %c0_2 = arith.constant 0 : index
    %c0_3 = arith.constant 0 : index
    %c0_4 = arith.constant 0 : index
    %2 = vector.load %arg2[%c0_2, %c0_3, %c0_4] : memref<1x6x64xf32, #tpu.memory_space<vmem>>, vector<1x6x64xf32>
    %3 = vector.shape_cast %2 : vector<1x6x64xf32> to vector<6x64xf32>
    %cst = arith.constant dense<0.000000e+00> : vector<128x64xf32>
    %4 = tpu.matmul %1, %3, %cst {dimension_numbers = #tpu.dot_dimension_numbers<[1], [0], [0], [1], [0, 0, 1, 1], [], []>} : vector<128x6xf32>, vector<6x64xf32>, vector<128x64xf32> -> vector<128x64xf32>
    %c0_5 = arith.constant 0 : index
    %c0_6 = arith.constant 0 : index
    %c0_7 = arith.constant 0 : index
    %5 = vector.load %arg7[%c0_5, %c0_6, %c0_7] : memref<1x1x544xf32, #tpu.memory_space<vmem>>, vector<1x1x64xf32>
    %6 = vector.shape_cast %5 : vector<1x1x64xf32> to vector<1x64xf32>
    %7 = vector.broadcast %6 : vector<1x64xf32> to vector<128x64xf32>
    %8 = arith.addf %4, %7 : vector<128x64xf32>
    %cst_8 = arith.constant 0.000000e+00 : f32
    %9 = vector.broadcast %cst_8 : f32 to vector<128x64xf32>
    %10 = arith.maximumf %8, %9 : vector<128x64xf32>
    %c0_9 = arith.constant 0 : index
    %c0_10 = arith.constant 0 : index
    %c0_11 = arith.constant 0 : index
    %11 = vector.load %arg3[%c0_9, %c0_10, %c0_11] : memref<1x64x64xf32, #tpu.memory_space<vmem>>, vector<1x64x64xf32>
    %12 = vector.shape_cast %11 : vector<1x64x64xf32> to vector<64x64xf32>
    %cst_12 = arith.constant dense<0.000000e+00> : vector<128x64xf32>
    %13 = tpu.matmul %10, %12, %cst_12 {dimension_numbers = #tpu.dot_dimension_numbers<[1], [0], [0], [1], [0, 0, 1, 1], [], []>} : vector<128x64xf32>, vector<64x64xf32>, vector<128x64xf32> -> vector<128x64xf32>
    %c0_13 = arith.constant 0 : index
    %c0_14 = arith.constant 0 : index
    %c64 = arith.constant 64 : index
    %14 = vector.load %arg7[%c0_13, %c0_14, %c64] : memref<1x1x544xf32, #tpu.memory_space<vmem>>, vector<1x1x64xf32>
    %15 = vector.shape_cast %14 : vector<1x1x64xf32> to vector<1x64xf32>
    %16 = vector.broadcast %15 : vector<1x64xf32> to vector<128x64xf32>
    %17 = arith.addf %13, %16 : vector<128x64xf32>
    %cst_15 = arith.constant 0.000000e+00 : f32
    %18 = vector.broadcast %cst_15 : f32 to vector<128x64xf32>
    %19 = arith.maximumf %17, %18 : vector<128x64xf32>
    %c0_16 = arith.constant 0 : index
    %c0_17 = arith.constant 0 : index
    %c0_18 = arith.constant 0 : index
    %20 = vector.load %arg4[%c0_16, %c0_17, %c0_18] : memref<1x64x128xf32, #tpu.memory_space<vmem>>, vector<1x64x128xf32>
    %21 = vector.shape_cast %20 : vector<1x64x128xf32> to vector<64x128xf32>
    %cst_19 = arith.constant dense<0.000000e+00> : vector<128x128xf32>
    %22 = tpu.matmul %19, %21, %cst_19 {dimension_numbers = #tpu.dot_dimension_numbers<[1], [0], [0], [1], [0, 0, 1, 1], [], []>} : vector<128x64xf32>, vector<64x128xf32>, vector<128x128xf32> -> vector<128x128xf32>
    %c0_20 = arith.constant 0 : index
    %c0_21 = arith.constant 0 : index
    %c128 = arith.constant 128 : index
    %23 = vector.load %arg7[%c0_20, %c0_21, %c128] : memref<1x1x544xf32, #tpu.memory_space<vmem>>, vector<1x1x128xf32>
    %24 = vector.shape_cast %23 : vector<1x1x128xf32> to vector<1x128xf32>
    %25 = vector.broadcast %24 : vector<1x128xf32> to vector<128x128xf32>
    %26 = arith.addf %22, %25 : vector<128x128xf32>
    %cst_22 = arith.constant 0.000000e+00 : f32
    %27 = vector.broadcast %cst_22 : f32 to vector<128x128xf32>
    %28 = arith.maximumf %26, %27 : vector<128x128xf32>
    %c0_23 = arith.constant 0 : index
    %c0_24 = arith.constant 0 : index
    %c0_25 = arith.constant 0 : index
    %29 = vector.load %arg5[%c0_23, %c0_24, %c0_25] : memref<1x128x256xf32, #tpu.memory_space<vmem>>, vector<1x128x256xf32>
    %30 = vector.shape_cast %29 : vector<1x128x256xf32> to vector<128x256xf32>
    %cst_26 = arith.constant dense<0.000000e+00> : vector<128x256xf32>
    %31 = tpu.matmul %28, %30, %cst_26 {dimension_numbers = #tpu.dot_dimension_numbers<[1], [0], [0], [1], [0, 0, 1, 1], [], []>} : vector<128x128xf32>, vector<128x256xf32>, vector<128x256xf32> -> vector<128x256xf32>
    %c0_27 = arith.constant 0 : index
    %c0_28 = arith.constant 0 : index
    %c256 = arith.constant 256 : index
    %32 = vector.load %arg7[%c0_27, %c0_28, %c256] : memref<1x1x544xf32, #tpu.memory_space<vmem>>, vector<1x1x256xf32>
    %33 = vector.shape_cast %32 : vector<1x1x256xf32> to vector<1x256xf32>
    %34 = vector.broadcast %33 : vector<1x256xf32> to vector<128x256xf32>
    %35 = arith.addf %31, %34 : vector<128x256xf32>
    %cst_29 = arith.constant 0.000000e+00 : f32
    %36 = vector.broadcast %cst_29 : f32 to vector<128x256xf32>
    %37 = arith.maximumf %35, %36 : vector<128x256xf32>
    %38 = vector.extract_strided_slice %10 {offsets = [0, 0], sizes = [32, 64], strides = [1, 1]} : vector<128x64xf32> to vector<32x64xf32>
    %39 = vector.extract_strided_slice %10 {offsets = [32, 0], sizes = [32, 64], strides = [1, 1]} : vector<128x64xf32> to vector<32x64xf32>
    %40 = arith.maximumf %38, %39 : vector<32x64xf32>
    %41 = vector.extract_strided_slice %10 {offsets = [64, 0], sizes = [32, 64], strides = [1, 1]} : vector<128x64xf32> to vector<32x64xf32>
    %42 = arith.maximumf %40, %41 : vector<32x64xf32>
    %43 = vector.extract_strided_slice %10 {offsets = [96, 0], sizes = [32, 64], strides = [1, 1]} : vector<128x64xf32> to vector<32x64xf32>
    %44 = arith.maximumf %42, %43 : vector<32x64xf32>
    %c0_30 = arith.constant 0 : index
    %c0_31 = arith.constant 0 : index
    %45 = vector.load %arg9[%c0_30, %c0_31] : memref<32x512xf32, #tpu.memory_space<vmem>>, vector<32x64xf32>
    tpu.vector_store %arg9[%c0_30, %c0_31], %44 {strides = array<i32>} : memref<32x512xf32, #tpu.memory_space<vmem>>, vector<32x64xf32>,
    %46 = vector.extract_strided_slice %19 {offsets = [0, 0], sizes = [32, 64], strides = [1, 1]} : vector<128x64xf32> to vector<32x64xf32>
    %47 = vector.extract_strided_slice %19 {offsets = [32, 0], sizes = [32, 64], strides = [1, 1]} : vector<128x64xf32> to vector<32x64xf32>
    %48 = arith.maximumf %46, %47 : vector<32x64xf32>
    %49 = vector.extract_strided_slice %19 {offsets = [64, 0], sizes = [32, 64], strides = [1, 1]} : vector<128x64xf32> to vector<32x64xf32>
    %50 = arith.maximumf %48, %49 : vector<32x64xf32>
    %51 = vector.extract_strided_slice %19 {offsets = [96, 0], sizes = [32, 64], strides = [1, 1]} : vector<128x64xf32> to vector<32x64xf32>
    %52 = arith.maximumf %50, %51 : vector<32x64xf32>
    %c0_32 = arith.constant 0 : index
    %c64_33 = arith.constant 64 : index
    %53 = vector.load %arg9[%c0_32, %c64_33] : memref<32x512xf32, #tpu.memory_space<vmem>>, vector<32x64xf32>
    tpu.vector_store %arg9[%c0_32, %c64_33], %52 {strides = array<i32>} : memref<32x512xf32, #tpu.memory_space<vmem>>, vector<32x64xf32>,
    %54 = vector.extract_strided_slice %28 {offsets = [0, 0], sizes = [32, 128], strides = [1, 1]} : vector<128x128xf32> to vector<32x128xf32>
    %55 = vector.extract_strided_slice %28 {offsets = [32, 0], sizes = [32, 128], strides = [1, 1]} : vector<128x128xf32> to vector<32x128xf32>
    %56 = arith.maximumf %54, %55 : vector<32x128xf32>
    %57 = vector.extract_strided_slice %28 {offsets = [64, 0], sizes = [32, 128], strides = [1, 1]} : vector<128x128xf32> to vector<32x128xf32>
    %58 = arith.maximumf %56, %57 : vector<32x128xf32>
    %59 = vector.extract_strided_slice %28 {offsets = [96, 0], sizes = [32, 128], strides = [1, 1]} : vector<128x128xf32> to vector<32x128xf32>
    %60 = arith.maximumf %58, %59 : vector<32x128xf32>
    %c0_34 = arith.constant 0 : index
    %c128_35 = arith.constant 128 : index
    %61 = vector.load %arg9[%c0_34, %c128_35] : memref<32x512xf32, #tpu.memory_space<vmem>>, vector<32x128xf32>
    tpu.vector_store %arg9[%c0_34, %c128_35], %60 {strides = array<i32>} : memref<32x512xf32, #tpu.memory_space<vmem>>, vector<32x128xf32>,
    %62 = vector.extract_strided_slice %37 {offsets = [0, 0], sizes = [32, 256], strides = [1, 1]} : vector<128x256xf32> to vector<32x256xf32>
    %63 = vector.extract_strided_slice %37 {offsets = [32, 0], sizes = [32, 256], strides = [1, 1]} : vector<128x256xf32> to vector<32x256xf32>
    %64 = arith.maximumf %62, %63 : vector<32x256xf32>
    %65 = vector.extract_strided_slice %37 {offsets = [64, 0], sizes = [32, 256], strides = [1, 1]} : vector<128x256xf32> to vector<32x256xf32>
    %66 = arith.maximumf %64, %65 : vector<32x256xf32>
    %67 = vector.extract_strided_slice %37 {offsets = [96, 0], sizes = [32, 256], strides = [1, 1]} : vector<128x256xf32> to vector<32x256xf32>
    %68 = arith.maximumf %66, %67 : vector<32x256xf32>
    %c0_36 = arith.constant 0 : index
    %c256_37 = arith.constant 256 : index
    %69 = vector.load %arg9[%c0_36, %c256_37] : memref<32x512xf32, #tpu.memory_space<vmem>>, vector<32x256xf32>
    tpu.vector_store %arg9[%c0_36, %c256_37], %68 {strides = array<i32>} : memref<32x512xf32, #tpu.memory_space<vmem>>, vector<32x256xf32>,
    %c0_38 = arith.constant 0 : index
    %c0_39 = arith.constant 0 : index
    %70 = vector.load %arg9[%c0_38, %c0_39] : memref<32x512xf32, #tpu.memory_space<vmem>>, vector<32x512xf32>
    %c0_40 = arith.constant 0 : index
    %c0_41 = arith.constant 0 : index
    %c0_42 = arith.constant 0 : index
    %71 = vector.load %arg6[%c0_40, %c0_41, %c0_42] : memref<1x512x32xf32, #tpu.memory_space<vmem>>, vector<1x512x32xf32>
    %72 = vector.shape_cast %71 : vector<1x512x32xf32> to vector<512x32xf32>
    %cst_43 = arith.constant dense<0.000000e+00> : vector<32x32xf32>
    %73 = tpu.matmul %70, %72, %cst_43 {dimension_numbers = #tpu.dot_dimension_numbers<[1], [0], [0], [1], [0, 0, 1, 1], [], []>} : vector<32x512xf32>, vector<512x32xf32>, vector<32x32xf32> -> vector<32x32xf32>
    %c0_44 = arith.constant 0 : index
    %c0_45 = arith.constant 0 : index
    %c512 = arith.constant 512 : index
    %74 = vector.load %arg7[%c0_44, %c0_45, %c512] : memref<1x1x544xf32, #tpu.memory_space<vmem>>, vector<1x1x32xf32>
    %75 = vector.shape_cast %74 : vector<1x1x32xf32> to vector<1x32xf32>
    %76 = vector.broadcast %75 : vector<1x32xf32> to vector<32x32xf32>
    %77 = arith.addf %73, %76 : vector<32x32xf32>
    %cst_46 = arith.constant 0.000000e+00 : f32
    %78 = vector.broadcast %cst_46 : f32 to vector<32x32xf32>
    %79 = arith.maximumf %77, %78 : vector<32x32xf32>
    %c0_47 = arith.constant 0 : index
    %c0_48 = arith.constant 0 : index
    %c0_49 = arith.constant 0 : index
    %80 = vector.load %arg8[%c0_47, %c0_48, %c0_49] : memref<1x32x32xf32, #tpu.memory_space<vmem>>, vector<1x32x32xf32>
    %81 = vector.shape_cast %80 : vector<1x32x32xf32> to vector<32x32xf32>
    %82 = vector.shape_cast %79 : vector<32x32xf32> to vector<1x32x32xf32>
    tpu.vector_store %arg8[%c0_47, %c0_48, %c0_49], %82 {strides = array<i32>} : memref<1x32x32xf32, #tpu.memory_space<vmem>>, vector<1x32x32xf32>,
    return
  }
  func.func @transform_0(%arg0: i32) -> (i32, i32, i32) {
    %c0_i32 = arith.constant 0 : i32
    %c0_i32_0 = arith.constant 0 : i32
    %c0_i32_1 = arith.constant 0 : i32
    return %arg0, %c0_i32, %c0_i32_0 : i32, i32, i32
  }
  func.func @transform_1(%arg0: i32) -> (i32, i32, i32) {
    %c0_i32 = arith.constant 0 : i32
    %c0_i32_0 = arith.constant 0 : i32
    %c0_i32_1 = arith.constant 0 : i32
    return %arg0, %c0_i32, %c0_i32_0 : i32, i32, i32
  }
  func.func @transform_2(%arg0: i32) -> (i32, i32, i32) {
    %c0_i32 = arith.constant 0 : i32
    %c0_i32_0 = arith.constant 0 : i32
    %c0_i32_1 = arith.constant 0 : i32
    return %arg0, %c0_i32, %c0_i32_0 : i32, i32, i32
  }
  func.func @transform_3(%arg0: i32) -> (i32, i32, i32) {
    %c0_i32 = arith.constant 0 : i32
    %c0_i32_0 = arith.constant 0 : i32
    %c0_i32_1 = arith.constant 0 : i32
    return %arg0, %c0_i32, %c0_i32_0 : i32, i32, i32
  }
  func.func @transform_4(%arg0: i32) -> (i32, i32, i32) {
    %c0_i32 = arith.constant 0 : i32
    %c0_i32_0 = arith.constant 0 : i32
    %c0_i32_1 = arith.constant 0 : i32
    return %arg0, %c0_i32, %c0_i32_0 : i32, i32, i32
  }
  func.func @transform_5(%arg0: i32) -> (i32, i32, i32) {
    %c0_i32 = arith.constant 0 : i32
    %c0_i32_0 = arith.constant 0 : i32
    %c0_i32_1 = arith.constant 0 : i32
    return %arg0, %c0_i32, %c0_i32_0 : i32, i32, i32
  }
  func.func @transform_6(%arg0: i32) -> (i32, i32, i32) {
    %c0_i32 = arith.constant 0 : i32
    %c0_i32_0 = arith.constant 0 : i32
    %c0_i32_1 = arith.constant 0 : i32
    return %arg0, %c0_i32, %c0_i32_0 : i32, i32, i32
  }
  func.func @transform_7(%arg0: i32) -> (i32, i32, i32) {
    %c0_i32 = arith.constant 0 : i32
    %c0_i32_0 = arith.constant 0 : i32
    %c0_i32_1 = arith.constant 0 : i32
    return %arg0, %c0_i32, %c0_i32_0 : i32, i32, i32
  }
}

module attributes {stable_mosaic.version = 11 : i64} {
  func.func @kernel(%arg0: i32, %arg1: memref<2x32x32xf32, #tpu.memory_space<vmem>>, %arg2: memref<2x32x3xf32, #tpu.memory_space<vmem>>, %arg3: memref<1x32x96xf32, #tpu.memory_space<vmem>>, %arg4: memref<1x32x32xf32, #tpu.memory_space<vmem>>, %arg5: memref<1x32x64xf32, #tpu.memory_space<vmem>>, %arg6: memref<1x64x32xf32, #tpu.memory_space<vmem>>, %arg7: memref<1x32x96xf32, #tpu.memory_space<vmem>>, %arg8: memref<1x32x32xf32, #tpu.memory_space<vmem>>, %arg9: memref<1x32x32xf32, #tpu.memory_space<vmem>>, %arg10: memref<1x32x64xf32, #tpu.memory_space<vmem>>, %arg11: memref<1x32x32xf32, #tpu.memory_space<vmem>>, %arg12: memref<1x32x64xf32, #tpu.memory_space<vmem>>, %arg13: memref<1x64x32xf32, #tpu.memory_space<vmem>>, %arg14: memref<1x32x16xf32, #tpu.memory_space<vmem>>, %arg15: memref<1x16x8xf32, #tpu.memory_space<vmem>>, %arg16: memref<1x8x4xf32, #tpu.memory_space<vmem>>, %arg17: memref<1x4x3xf32, #tpu.memory_space<vmem>>, %arg18: memref<1x32x64xf32, #tpu.memory_space<vmem>>, %arg19: memref<1x64x64xf32, #tpu.memory_space<vmem>>, %arg20: memref<1x64x64xf32, #tpu.memory_space<vmem>>, %arg21: memref<1x64x128xf32, #tpu.memory_space<vmem>>, %arg22: memref<1x128x512xf32, #tpu.memory_space<vmem>>, %arg23: memref<1x512x1xf32, #tpu.memory_space<vmem>>, %arg24: memref<1x1x1884xf32, #tpu.memory_space<vmem>>, %arg25: memref<1x32x4xf32, #tpu.memory_space<vmem>>) attributes {dimension_semantics = [#tpu.dimension_semantics<parallel>], iteration_bounds = array<i64: 2>, scalar_prefetch = 0 : i64, scratch_operands = 0 : i64, tpu.core_type = #tpu.core_type<tc>, window_params = [{pipeline_mode = #tpu.pipeline_mode<synchronous>, transform_indices = @transform_0, window_bounds = array<i64: 2, 32, 32>}, {pipeline_mode = #tpu.pipeline_mode<synchronous>, transform_indices = @transform_1, window_bounds = array<i64: 2, 32, 3>}, {transform_indices = @transform_2, window_bounds = array<i64: 1, 32, 96>}, {transform_indices = @transform_3, window_bounds = array<i64: 1, 32, 32>}, {transform_indices = @transform_4, window_bounds = array<i64: 1, 32, 64>}, {transform_indices = @transform_5, window_bounds = array<i64: 1, 64, 32>}, {transform_indices = @transform_6, window_bounds = array<i64: 1, 32, 96>}, {transform_indices = @transform_7, window_bounds = array<i64: 1, 32, 32>}, {transform_indices = @transform_8, window_bounds = array<i64: 1, 32, 32>}, {transform_indices = @transform_9, window_bounds = array<i64: 1, 32, 64>}, {transform_indices = @transform_10, window_bounds = array<i64: 1, 32, 32>}, {transform_indices = @transform_11, window_bounds = array<i64: 1, 32, 64>}, {transform_indices = @transform_12, window_bounds = array<i64: 1, 64, 32>}, {transform_indices = @transform_13, window_bounds = array<i64: 1, 32, 16>}, {transform_indices = @transform_14, window_bounds = array<i64: 1, 16, 8>}, {transform_indices = @transform_15, window_bounds = array<i64: 1, 8, 4>}, {transform_indices = @transform_16, window_bounds = array<i64: 1, 4, 3>}, {transform_indices = @transform_17, window_bounds = array<i64: 1, 32, 64>}, {transform_indices = @transform_18, window_bounds = array<i64: 1, 64, 64>}, {transform_indices = @transform_19, window_bounds = array<i64: 1, 64, 64>}, {transform_indices = @transform_20, window_bounds = array<i64: 1, 64, 128>}, {transform_indices = @transform_21, window_bounds = array<i64: 1, 128, 512>}, {transform_indices = @transform_22, window_bounds = array<i64: 1, 512, 1>}, {transform_indices = @transform_23, window_bounds = array<i64: 1, 1, 1884>}, {transform_indices = @transform_24, window_bounds = array<i64: 1, 32, 4>}]} {
    %0 = arith.index_cast %arg0 : i32 to index
    %c0 = arith.constant 0 : index
    %c0_0 = arith.constant 0 : index
    %1 = vector.load %arg1[%0, %c0, %c0_0] : memref<2x32x32xf32, #tpu.memory_space<vmem>>, vector<1x32x32xf32>
    %2 = vector.shape_cast %1 : vector<1x32x32xf32> to vector<32x32xf32>
    %c1_i32 = arith.constant 1 : i32
    %3 = arith.subi %c1_i32, %arg0 : i32
    %4 = arith.index_cast %3 : i32 to index
    %c0_1 = arith.constant 0 : index
    %c0_2 = arith.constant 0 : index
    %5 = vector.load %arg1[%4, %c0_1, %c0_2] : memref<2x32x32xf32, #tpu.memory_space<vmem>>, vector<1x32x32xf32>
    %6 = vector.shape_cast %5 : vector<1x32x32xf32> to vector<32x32xf32>
    %7 = arith.index_cast %arg0 : i32 to index
    %c0_3 = arith.constant 0 : index
    %c0_4 = arith.constant 0 : index
    %8 = vector.load %arg2[%7, %c0_3, %c0_4] : memref<2x32x3xf32, #tpu.memory_space<vmem>>, vector<1x32x3xf32>
    %9 = vector.shape_cast %8 : vector<1x32x3xf32> to vector<32x3xf32>
    %c1_i32_5 = arith.constant 1 : i32
    %10 = arith.subi %c1_i32_5, %arg0 : i32
    %11 = arith.index_cast %10 : i32 to index
    %c0_6 = arith.constant 0 : index
    %c0_7 = arith.constant 0 : index
    %12 = vector.load %arg2[%11, %c0_6, %c0_7] : memref<2x32x3xf32, #tpu.memory_space<vmem>>, vector<1x32x3xf32>
    %13 = vector.shape_cast %12 : vector<1x32x3xf32> to vector<32x3xf32>
    %cst = arith.constant dense<0.000000e+00> : vector<32xf32>
    %14 = vector.multi_reduction <add>, %6, %cst [1] : vector<32x32xf32> to vector<32xf32>
    %15 = vector.shape_cast %14 : vector<32xf32> to vector<32x1xf32>
    %cst_8 = arith.constant 3.200000e+01 : f32
    %16 = vector.broadcast %cst_8 : f32 to vector<32x1xf32>
    %17 = arith.divf %15, %16 : vector<32x1xf32>
    %18 = vector.broadcast %17 : vector<32x1xf32> to vector<32x32xf32>
    %19 = arith.subf %6, %18 : vector<32x32xf32>
    %20 = arith.mulf %19, %19 : vector<32x32xf32>
    %cst_9 = arith.constant dense<0.000000e+00> : vector<32xf32>
    %21 = vector.multi_reduction <add>, %20, %cst_9 [1] : vector<32x32xf32> to vector<32xf32>
    %22 = vector.shape_cast %21 : vector<32xf32> to vector<32x1xf32>
    %cst_10 = arith.constant 0.0322580636 : f32
    %23 = vector.broadcast %cst_10 : f32 to vector<32x1xf32>
    %24 = arith.mulf %22, %23 : vector<32x1xf32>
    %c0_11 = arith.constant 0 : index
    %c0_12 = arith.constant 0 : index
    %c0_13 = arith.constant 0 : index
    %25 = vector.load %arg24[%c0_11, %c0_12, %c0_13] : memref<1x1x1884xf32, #tpu.memory_space<vmem>>, vector<1x1x32xf32>
    %26 = vector.shape_cast %25 : vector<1x1x32xf32> to vector<1x32xf32>
    %27 = math.sqrt %24 : vector<32x1xf32>
    %cst_14 = arith.constant 9.99999997E-7 : f32
    %28 = vector.broadcast %cst_14 : f32 to vector<32x1xf32>
    %29 = arith.addf %27, %28 : vector<32x1xf32>
    %30 = vector.broadcast %29 : vector<32x1xf32> to vector<32x32xf32>
    %31 = arith.divf %19, %30 : vector<32x32xf32>
    %32 = vector.broadcast %26 : vector<1x32xf32> to vector<32x32xf32>
    %33 = arith.mulf %32, %31 : vector<32x32xf32>
    %c0_15 = arith.constant 0 : index
    %c0_16 = arith.constant 0 : index
    %c32 = arith.constant 32 : index
    %34 = vector.load %arg24[%c0_15, %c0_16, %c32] : memref<1x1x1884xf32, #tpu.memory_space<vmem>>, vector<1x1x32xf32>
    %35 = vector.shape_cast %34 : vector<1x1x32xf32> to vector<1x32xf32>
    %36 = vector.broadcast %35 : vector<1x32xf32> to vector<32x32xf32>
    %37 = arith.addf %33, %36 : vector<32x32xf32>
    %c0_17 = arith.constant 0 : index
    %c0_18 = arith.constant 0 : index
    %c0_19 = arith.constant 0 : index
    %38 = vector.load %arg3[%c0_17, %c0_18, %c0_19] : memref<1x32x96xf32, #tpu.memory_space<vmem>>, vector<1x32x96xf32>
    %39 = vector.shape_cast %38 : vector<1x32x96xf32> to vector<32x96xf32>
    %cst_20 = arith.constant dense<0.000000e+00> : vector<32x96xf32>
    %40 = tpu.matmul %37, %39, %cst_20 {dimension_numbers = #tpu.dot_dimension_numbers<[1], [0], [0], [1], [0, 0, 1, 1], [], []>} : vector<32x32xf32>, vector<32x96xf32>, vector<32x96xf32> -> vector<32x96xf32>
    %c0_21 = arith.constant 0 : index
    %c0_22 = arith.constant 0 : index
    %c64 = arith.constant 64 : index
    %41 = vector.load %arg24[%c0_21, %c0_22, %c64] : memref<1x1x1884xf32, #tpu.memory_space<vmem>>, vector<1x1x96xf32>
    %42 = vector.shape_cast %41 : vector<1x1x96xf32> to vector<1x96xf32>
    %43 = vector.broadcast %42 : vector<1x96xf32> to vector<32x96xf32>
    %44 = arith.addf %40, %43 : vector<32x96xf32>
    %45 = vector.extract_strided_slice %44 {offsets = [0, 0], sizes = [32, 32], strides = [1, 1]} : vector<32x96xf32> to vector<32x32xf32>
    %46 = vector.extract_strided_slice %44 {offsets = [0, 32], sizes = [32, 32], strides = [1, 1]} : vector<32x96xf32> to vector<32x32xf32>
    %47 = vector.extract_strided_slice %44 {offsets = [0, 64], sizes = [32, 32], strides = [1, 1]} : vector<32x96xf32> to vector<32x32xf32>
    %48 = vector.shape_cast %45 : vector<32x32xf32> to vector<2x16x32xf32>
    %49 = vector.shape_cast %46 : vector<32x32xf32> to vector<2x16x32xf32>
    %50 = vector.shape_cast %47 : vector<32x32xf32> to vector<2x16x32xf32>
    %51 = vector.extract_strided_slice %48 {offsets = [0, 0, 0], sizes = [2, 16, 8], strides = [1, 1, 1]} : vector<2x16x32xf32> to vector<2x16x8xf32>
    %52 = vector.extract_strided_slice %49 {offsets = [0, 0, 0], sizes = [2, 16, 8], strides = [1, 1, 1]} : vector<2x16x32xf32> to vector<2x16x8xf32>
    "tpu.trace_start"() <{level = 10 : i32, message = "bqd,bkd->bqk"}> : () -> ()
    %cst_23 = arith.constant dense<0.000000e+00> : vector<2x16x16xf32>
    %53 = tpu.matmul %51, %52, %cst_23 {dimension_numbers = #tpu.dot_dimension_numbers<[2], [2], [1], [1], [0, 0, 0, 1, 1, 1], [0], [0]>} : vector<2x16x8xf32>, vector<2x16x8xf32>, vector<2x16x16xf32> -> vector<2x16x16xf32>
    "tpu.trace_stop"() : () -> ()
    %cst_24 = arith.constant 0.353553385 : f32
    %54 = vector.broadcast %cst_24 : f32 to vector<2x16x16xf32>
    %55 = arith.mulf %53, %54 : vector<2x16x16xf32>
    %cst_25 = arith.constant dense<0xFF800000> : vector<2x16xf32>
    %56 = vector.multi_reduction <maximumf>, %55, %cst_25 [2] : vector<2x16x16xf32> to vector<2x16xf32>
    %57 = vector.shape_cast %56 : vector<2x16xf32> to vector<2x16x1xf32>
    %58 = vector.broadcast %57 : vector<2x16x1xf32> to vector<2x16x16xf32>
    %59 = arith.subf %55, %58 : vector<2x16x16xf32>
    %60 = math.exp %59 : vector<2x16x16xf32>
    %cst_26 = arith.constant dense<0.000000e+00> : vector<2x16xf32>
    %61 = vector.multi_reduction <add>, %60, %cst_26 [2] : vector<2x16x16xf32> to vector<2x16xf32>
    %62 = vector.shape_cast %61 : vector<2x16xf32> to vector<2x16x1xf32>
    %63 = tpu.reciprocal %62 {approx = true} : vector<2x16x1xf32> -> vector<2x16x1xf32>
    %64 = vector.broadcast %63 : vector<2x16x1xf32> to vector<2x16x16xf32>
    %65 = arith.mulf %60, %64 : vector<2x16x16xf32>
    %66 = vector.extract_strided_slice %50 {offsets = [0, 0, 0], sizes = [2, 16, 8], strides = [1, 1, 1]} : vector<2x16x32xf32> to vector<2x16x8xf32>
    "tpu.trace_start"() <{level = 10 : i32, message = "bqk,bkd->bqd"}> : () -> ()
    %cst_27 = arith.constant dense<0.000000e+00> : vector<2x16x8xf32>
    %67 = tpu.matmul %65, %66, %cst_27 {dimension_numbers = #tpu.dot_dimension_numbers<[2], [1], [1], [2], [0, 0, 0, 1, 1, 2], [0], [0]>} : vector<2x16x16xf32>, vector<2x16x8xf32>, vector<2x16x8xf32> -> vector<2x16x8xf32>
    "tpu.trace_stop"() : () -> ()
    %68 = vector.extract_strided_slice %48 {offsets = [0, 0, 8], sizes = [2, 16, 8], strides = [1, 1, 1]} : vector<2x16x32xf32> to vector<2x16x8xf32>
    %69 = vector.extract_strided_slice %49 {offsets = [0, 0, 8], sizes = [2, 16, 8], strides = [1, 1, 1]} : vector<2x16x32xf32> to vector<2x16x8xf32>
    "tpu.trace_start"() <{level = 10 : i32, message = "bqd,bkd->bqk"}> : () -> ()
    %cst_28 = arith.constant dense<0.000000e+00> : vector<2x16x16xf32>
    %70 = tpu.matmul %68, %69, %cst_28 {dimension_numbers = #tpu.dot_dimension_numbers<[2], [2], [1], [1], [0, 0, 0, 1, 1, 1], [0], [0]>} : vector<2x16x8xf32>, vector<2x16x8xf32>, vector<2x16x16xf32> -> vector<2x16x16xf32>
    "tpu.trace_stop"() : () -> ()
    %cst_29 = arith.constant 0.353553385 : f32
    %71 = vector.broadcast %cst_29 : f32 to vector<2x16x16xf32>
    %72 = arith.mulf %70, %71 : vector<2x16x16xf32>
    %cst_30 = arith.constant dense<0xFF800000> : vector<2x16xf32>
    %73 = vector.multi_reduction <maximumf>, %72, %cst_30 [2] : vector<2x16x16xf32> to vector<2x16xf32>
    %74 = vector.shape_cast %73 : vector<2x16xf32> to vector<2x16x1xf32>
    %75 = vector.broadcast %74 : vector<2x16x1xf32> to vector<2x16x16xf32>
    %76 = arith.subf %72, %75 : vector<2x16x16xf32>
    %77 = math.exp %76 : vector<2x16x16xf32>
    %cst_31 = arith.constant dense<0.000000e+00> : vector<2x16xf32>
    %78 = vector.multi_reduction <add>, %77, %cst_31 [2] : vector<2x16x16xf32> to vector<2x16xf32>
    %79 = vector.shape_cast %78 : vector<2x16xf32> to vector<2x16x1xf32>
    %80 = tpu.reciprocal %79 {approx = true} : vector<2x16x1xf32> -> vector<2x16x1xf32>
    %81 = vector.broadcast %80 : vector<2x16x1xf32> to vector<2x16x16xf32>
    %82 = arith.mulf %77, %81 : vector<2x16x16xf32>
    %83 = vector.extract_strided_slice %50 {offsets = [0, 0, 8], sizes = [2, 16, 8], strides = [1, 1, 1]} : vector<2x16x32xf32> to vector<2x16x8xf32>
    "tpu.trace_start"() <{level = 10 : i32, message = "bqk,bkd->bqd"}> : () -> ()
    %cst_32 = arith.constant dense<0.000000e+00> : vector<2x16x8xf32>
    %84 = tpu.matmul %82, %83, %cst_32 {dimension_numbers = #tpu.dot_dimension_numbers<[2], [1], [1], [2], [0, 0, 0, 1, 1, 2], [0], [0]>} : vector<2x16x16xf32>, vector<2x16x8xf32>, vector<2x16x8xf32> -> vector<2x16x8xf32>
    "tpu.trace_stop"() : () -> ()
    %85 = vector.extract_strided_slice %48 {offsets = [0, 0, 16], sizes = [2, 16, 8], strides = [1, 1, 1]} : vector<2x16x32xf32> to vector<2x16x8xf32>
    %86 = vector.extract_strided_slice %49 {offsets = [0, 0, 16], sizes = [2, 16, 8], strides = [1, 1, 1]} : vector<2x16x32xf32> to vector<2x16x8xf32>
    "tpu.trace_start"() <{level = 10 : i32, message = "bqd,bkd->bqk"}> : () -> ()
    %cst_33 = arith.constant dense<0.000000e+00> : vector<2x16x16xf32>
    %87 = tpu.matmul %85, %86, %cst_33 {dimension_numbers = #tpu.dot_dimension_numbers<[2], [2], [1], [1], [0, 0, 0, 1, 1, 1], [0], [0]>} : vector<2x16x8xf32>, vector<2x16x8xf32>, vector<2x16x16xf32> -> vector<2x16x16xf32>
    "tpu.trace_stop"() : () -> ()
    %cst_34 = arith.constant 0.353553385 : f32
    %88 = vector.broadcast %cst_34 : f32 to vector<2x16x16xf32>
    %89 = arith.mulf %87, %88 : vector<2x16x16xf32>
    %cst_35 = arith.constant dense<0xFF800000> : vector<2x16xf32>
    %90 = vector.multi_reduction <maximumf>, %89, %cst_35 [2] : vector<2x16x16xf32> to vector<2x16xf32>
    %91 = vector.shape_cast %90 : vector<2x16xf32> to vector<2x16x1xf32>
    %92 = vector.broadcast %91 : vector<2x16x1xf32> to vector<2x16x16xf32>
    %93 = arith.subf %89, %92 : vector<2x16x16xf32>
    %94 = math.exp %93 : vector<2x16x16xf32>
    %cst_36 = arith.constant dense<0.000000e+00> : vector<2x16xf32>
    %95 = vector.multi_reduction <add>, %94, %cst_36 [2] : vector<2x16x16xf32> to vector<2x16xf32>
    %96 = vector.shape_cast %95 : vector<2x16xf32> to vector<2x16x1xf32>
    %97 = tpu.reciprocal %96 {approx = true} : vector<2x16x1xf32> -> vector<2x16x1xf32>
    %98 = vector.broadcast %97 : vector<2x16x1xf32> to vector<2x16x16xf32>
    %99 = arith.mulf %94, %98 : vector<2x16x16xf32>
    %100 = vector.extract_strided_slice %50 {offsets = [0, 0, 16], sizes = [2, 16, 8], strides = [1, 1, 1]} : vector<2x16x32xf32> to vector<2x16x8xf32>
    "tpu.trace_start"() <{level = 10 : i32, message = "bqk,bkd->bqd"}> : () -> ()
    %cst_37 = arith.constant dense<0.000000e+00> : vector<2x16x8xf32>
    %101 = tpu.matmul %99, %100, %cst_37 {dimension_numbers = #tpu.dot_dimension_numbers<[2], [1], [1], [2], [0, 0, 0, 1, 1, 2], [0], [0]>} : vector<2x16x16xf32>, vector<2x16x8xf32>, vector<2x16x8xf32> -> vector<2x16x8xf32>
    "tpu.trace_stop"() : () -> ()
    %102 = vector.extract_strided_slice %48 {offsets = [0, 0, 24], sizes = [2, 16, 8], strides = [1, 1, 1]} : vector<2x16x32xf32> to vector<2x16x8xf32>
    %103 = vector.extract_strided_slice %49 {offsets = [0, 0, 24], sizes = [2, 16, 8], strides = [1, 1, 1]} : vector<2x16x32xf32> to vector<2x16x8xf32>
    "tpu.trace_start"() <{level = 10 : i32, message = "bqd,bkd->bqk"}> : () -> ()
    %cst_38 = arith.constant dense<0.000000e+00> : vector<2x16x16xf32>
    %104 = tpu.matmul %102, %103, %cst_38 {dimension_numbers = #tpu.dot_dimension_numbers<[2], [2], [1], [1], [0, 0, 0, 1, 1, 1], [0], [0]>} : vector<2x16x8xf32>, vector<2x16x8xf32>, vector<2x16x16xf32> -> vector<2x16x16xf32>
    "tpu.trace_stop"() : () -> ()
    %cst_39 = arith.constant 0.353553385 : f32
    %105 = vector.broadcast %cst_39 : f32 to vector<2x16x16xf32>
    %106 = arith.mulf %104, %105 : vector<2x16x16xf32>
    %cst_40 = arith.constant dense<0xFF800000> : vector<2x16xf32>
    %107 = vector.multi_reduction <maximumf>, %106, %cst_40 [2] : vector<2x16x16xf32> to vector<2x16xf32>
    %108 = vector.shape_cast %107 : vector<2x16xf32> to vector<2x16x1xf32>
    %109 = vector.broadcast %108 : vector<2x16x1xf32> to vector<2x16x16xf32>
    %110 = arith.subf %106, %109 : vector<2x16x16xf32>
    %111 = math.exp %110 : vector<2x16x16xf32>
    %cst_41 = arith.constant dense<0.000000e+00> : vector<2x16xf32>
    %112 = vector.multi_reduction <add>, %111, %cst_41 [2] : vector<2x16x16xf32> to vector<2x16xf32>
    %113 = vector.shape_cast %112 : vector<2x16xf32> to vector<2x16x1xf32>
    %114 = tpu.reciprocal %113 {approx = true} : vector<2x16x1xf32> -> vector<2x16x1xf32>
    %115 = vector.broadcast %114 : vector<2x16x1xf32> to vector<2x16x16xf32>
    %116 = arith.mulf %111, %115 : vector<2x16x16xf32>
    %117 = vector.extract_strided_slice %50 {offsets = [0, 0, 24], sizes = [2, 16, 8], strides = [1, 1, 1]} : vector<2x16x32xf32> to vector<2x16x8xf32>
    "tpu.trace_start"() <{level = 10 : i32, message = "bqk,bkd->bqd"}> : () -> ()
    %cst_42 = arith.constant dense<0.000000e+00> : vector<2x16x8xf32>
    %118 = tpu.matmul %116, %117, %cst_42 {dimension_numbers = #tpu.dot_dimension_numbers<[2], [1], [1], [2], [0, 0, 0, 1, 1, 2], [0], [0]>} : vector<2x16x16xf32>, vector<2x16x8xf32>, vector<2x16x8xf32> -> vector<2x16x8xf32>
    "tpu.trace_stop"() : () -> ()
    %119 = tpu.concatenate %67, %84, %101, %118 in 2 : vector<2x16x8xf32>, vector<2x16x8xf32>, vector<2x16x8xf32>, vector<2x16x8xf32> -> vector<2x16x32xf32>
    %120 = vector.shape_cast %119 : vector<2x16x32xf32> to vector<32x32xf32>
    %c0_43 = arith.constant 0 : index
    %c0_44 = arith.constant 0 : index
    %c0_45 = arith.constant 0 : index
    %121 = vector.load %arg4[%c0_43, %c0_44, %c0_45] : memref<1x32x32xf32, #tpu.memory_space<vmem>>, vector<1x32x32xf32>
    %122 = vector.shape_cast %121 : vector<1x32x32xf32> to vector<32x32xf32>
    %cst_46 = arith.constant dense<0.000000e+00> : vector<32x32xf32>
    %123 = tpu.matmul %120, %122, %cst_46 {dimension_numbers = #tpu.dot_dimension_numbers<[1], [0], [0], [1], [0, 0, 1, 1], [], []>} : vector<32x32xf32>, vector<32x32xf32>, vector<32x32xf32> -> vector<32x32xf32>
    %c0_47 = arith.constant 0 : index
    %c0_48 = arith.constant 0 : index
    %c160 = arith.constant 160 : index
    %124 = vector.load %arg24[%c0_47, %c0_48, %c160] : memref<1x1x1884xf32, #tpu.memory_space<vmem>>, vector<1x1x32xf32>
    %125 = vector.shape_cast %124 : vector<1x1x32xf32> to vector<1x32xf32>
    %126 = vector.broadcast %125 : vector<1x32xf32> to vector<32x32xf32>
    %127 = arith.addf %123, %126 : vector<32x32xf32>
    %128 = arith.addf %6, %127 : vector<32x32xf32>
    %cst_49 = arith.constant dense<0.000000e+00> : vector<32xf32>
    %129 = vector.multi_reduction <add>, %128, %cst_49 [1] : vector<32x32xf32> to vector<32xf32>
    %130 = vector.shape_cast %129 : vector<32xf32> to vector<32x1xf32>
    %cst_50 = arith.constant 3.200000e+01 : f32
    %131 = vector.broadcast %cst_50 : f32 to vector<32x1xf32>
    %132 = arith.divf %130, %131 : vector<32x1xf32>
    %133 = vector.broadcast %132 : vector<32x1xf32> to vector<32x32xf32>
    %134 = arith.subf %128, %133 : vector<32x32xf32>
    %135 = arith.mulf %134, %134 : vector<32x32xf32>
    %cst_51 = arith.constant dense<0.000000e+00> : vector<32xf32>
    %136 = vector.multi_reduction <add>, %135, %cst_51 [1] : vector<32x32xf32> to vector<32xf32>
    %137 = vector.shape_cast %136 : vector<32xf32> to vector<32x1xf32>
    %cst_52 = arith.constant 0.0322580636 : f32
    %138 = vector.broadcast %cst_52 : f32 to vector<32x1xf32>
    %139 = arith.mulf %137, %138 : vector<32x1xf32>
    %c0_53 = arith.constant 0 : index
    %c0_54 = arith.constant 0 : index
    %c192 = arith.constant 192 : index
    %140 = vector.load %arg24[%c0_53, %c0_54, %c192] : memref<1x1x1884xf32, #tpu.memory_space<vmem>>, vector<1x1x32xf32>
    %141 = vector.shape_cast %140 : vector<1x1x32xf32> to vector<1x32xf32>
    %142 = math.sqrt %139 : vector<32x1xf32>
    %cst_55 = arith.constant 9.99999997E-7 : f32
    %143 = vector.broadcast %cst_55 : f32 to vector<32x1xf32>
    %144 = arith.addf %142, %143 : vector<32x1xf32>
    %145 = vector.broadcast %144 : vector<32x1xf32> to vector<32x32xf32>
    %146 = arith.divf %134, %145 : vector<32x32xf32>
    %147 = vector.broadcast %141 : vector<1x32xf32> to vector<32x32xf32>
    %148 = arith.mulf %147, %146 : vector<32x32xf32>
    %c0_56 = arith.constant 0 : index
    %c0_57 = arith.constant 0 : index
    %c224 = arith.constant 224 : index
    %149 = vector.load %arg24[%c0_56, %c0_57, %c224] : memref<1x1x1884xf32, #tpu.memory_space<vmem>>, vector<1x1x32xf32>
    %150 = vector.shape_cast %149 : vector<1x1x32xf32> to vector<1x32xf32>
    %151 = vector.broadcast %150 : vector<1x32xf32> to vector<32x32xf32>
    %152 = arith.addf %148, %151 : vector<32x32xf32>
    %c0_58 = arith.constant 0 : index
    %c0_59 = arith.constant 0 : index
    %c0_60 = arith.constant 0 : index
    %153 = vector.load %arg5[%c0_58, %c0_59, %c0_60] : memref<1x32x64xf32, #tpu.memory_space<vmem>>, vector<1x32x64xf32>
    %154 = vector.shape_cast %153 : vector<1x32x64xf32> to vector<32x64xf32>
    %cst_61 = arith.constant dense<0.000000e+00> : vector<32x64xf32>
    %155 = tpu.matmul %152, %154, %cst_61 {dimension_numbers = #tpu.dot_dimension_numbers<[1], [0], [0], [1], [0, 0, 1, 1], [], []>} : vector<32x32xf32>, vector<32x64xf32>, vector<32x64xf32> -> vector<32x64xf32>
    %c0_62 = arith.constant 0 : index
    %c0_63 = arith.constant 0 : index
    %c256 = arith.constant 256 : index
    %156 = vector.load %arg24[%c0_62, %c0_63, %c256] : memref<1x1x1884xf32, #tpu.memory_space<vmem>>, vector<1x1x64xf32>
    %157 = vector.shape_cast %156 : vector<1x1x64xf32> to vector<1x64xf32>
    %158 = vector.broadcast %157 : vector<1x64xf32> to vector<32x64xf32>
    %159 = arith.addf %155, %158 : vector<32x64xf32>
    %cst_64 = arith.constant 0.000000e+00 : f32
    %160 = vector.broadcast %cst_64 : f32 to vector<32x64xf32>
    %161 = arith.maximumf %159, %160 : vector<32x64xf32>
    %c0_65 = arith.constant 0 : index
    %c0_66 = arith.constant 0 : index
    %c0_67 = arith.constant 0 : index
    %162 = vector.load %arg6[%c0_65, %c0_66, %c0_67] : memref<1x64x32xf32, #tpu.memory_space<vmem>>, vector<1x64x32xf32>
    %163 = vector.shape_cast %162 : vector<1x64x32xf32> to vector<64x32xf32>
    %cst_68 = arith.constant dense<0.000000e+00> : vector<32x32xf32>
    %164 = tpu.matmul %161, %163, %cst_68 {dimension_numbers = #tpu.dot_dimension_numbers<[1], [0], [0], [1], [0, 0, 1, 1], [], []>} : vector<32x64xf32>, vector<64x32xf32>, vector<32x32xf32> -> vector<32x32xf32>
    %c0_69 = arith.constant 0 : index
    %c0_70 = arith.constant 0 : index
    %c320 = arith.constant 320 : index
    %165 = vector.load %arg24[%c0_69, %c0_70, %c320] : memref<1x1x1884xf32, #tpu.memory_space<vmem>>, vector<1x1x32xf32>
    %166 = vector.shape_cast %165 : vector<1x1x32xf32> to vector<1x32xf32>
    %167 = vector.broadcast %166 : vector<1x32xf32> to vector<32x32xf32>
    %168 = arith.addf %164, %167 : vector<32x32xf32>
    %169 = arith.addf %128, %168 : vector<32x32xf32>
    %cst_71 = arith.constant dense<0.000000e+00> : vector<32xf32>
    %170 = vector.multi_reduction <add>, %169, %cst_71 [1] : vector<32x32xf32> to vector<32xf32>
    %171 = vector.shape_cast %170 : vector<32xf32> to vector<32x1xf32>
    %cst_72 = arith.constant 3.200000e+01 : f32
    %172 = vector.broadcast %cst_72 : f32 to vector<32x1xf32>
    %173 = arith.divf %171, %172 : vector<32x1xf32>
    %174 = vector.broadcast %173 : vector<32x1xf32> to vector<32x32xf32>
    %175 = arith.subf %169, %174 : vector<32x32xf32>
    %176 = arith.mulf %175, %175 : vector<32x32xf32>
    %cst_73 = arith.constant dense<0.000000e+00> : vector<32xf32>
    %177 = vector.multi_reduction <add>, %176, %cst_73 [1] : vector<32x32xf32> to vector<32xf32>
    %178 = vector.shape_cast %177 : vector<32xf32> to vector<32x1xf32>
    %cst_74 = arith.constant 0.0322580636 : f32
    %179 = vector.broadcast %cst_74 : f32 to vector<32x1xf32>
    %180 = arith.mulf %178, %179 : vector<32x1xf32>
    %c0_75 = arith.constant 0 : index
    %c0_76 = arith.constant 0 : index
    %c352 = arith.constant 352 : index
    %181 = vector.load %arg24[%c0_75, %c0_76, %c352] : memref<1x1x1884xf32, #tpu.memory_space<vmem>>, vector<1x1x32xf32>
    %182 = vector.shape_cast %181 : vector<1x1x32xf32> to vector<1x32xf32>
    %183 = math.sqrt %180 : vector<32x1xf32>
    %cst_77 = arith.constant 9.99999997E-7 : f32
    %184 = vector.broadcast %cst_77 : f32 to vector<32x1xf32>
    %185 = arith.addf %183, %184 : vector<32x1xf32>
    %186 = vector.broadcast %185 : vector<32x1xf32> to vector<32x32xf32>
    %187 = arith.divf %175, %186 : vector<32x32xf32>
    %188 = vector.broadcast %182 : vector<1x32xf32> to vector<32x32xf32>
    %189 = arith.mulf %188, %187 : vector<32x32xf32>
    %c0_78 = arith.constant 0 : index
    %c0_79 = arith.constant 0 : index
    %c384 = arith.constant 384 : index
    %190 = vector.load %arg24[%c0_78, %c0_79, %c384] : memref<1x1x1884xf32, #tpu.memory_space<vmem>>, vector<1x1x32xf32>
    %191 = vector.shape_cast %190 : vector<1x1x32xf32> to vector<1x32xf32>
    %192 = vector.broadcast %191 : vector<1x32xf32> to vector<32x32xf32>
    %193 = arith.addf %189, %192 : vector<32x32xf32>
    %cst_80 = arith.constant dense<0.000000e+00> : vector<32xf32>
    %194 = vector.multi_reduction <add>, %2, %cst_80 [1] : vector<32x32xf32> to vector<32xf32>
    %195 = vector.shape_cast %194 : vector<32xf32> to vector<32x1xf32>
    %cst_81 = arith.constant 3.200000e+01 : f32
    %196 = vector.broadcast %cst_81 : f32 to vector<32x1xf32>
    %197 = arith.divf %195, %196 : vector<32x1xf32>
    %198 = vector.broadcast %197 : vector<32x1xf32> to vector<32x32xf32>
    %199 = arith.subf %2, %198 : vector<32x32xf32>
    %200 = arith.mulf %199, %199 : vector<32x32xf32>
    %cst_82 = arith.constant dense<0.000000e+00> : vector<32xf32>
    %201 = vector.multi_reduction <add>, %200, %cst_82 [1] : vector<32x32xf32> to vector<32xf32>
    %202 = vector.shape_cast %201 : vector<32xf32> to vector<32x1xf32>
    %cst_83 = arith.constant 0.0322580636 : f32
    %203 = vector.broadcast %cst_83 : f32 to vector<32x1xf32>
    %204 = arith.mulf %202, %203 : vector<32x1xf32>
    %c0_84 = arith.constant 0 : index
    %c0_85 = arith.constant 0 : index
    %c416 = arith.constant 416 : index
    %205 = vector.load %arg24[%c0_84, %c0_85, %c416] : memref<1x1x1884xf32, #tpu.memory_space<vmem>>, vector<1x1x32xf32>
    %206 = vector.shape_cast %205 : vector<1x1x32xf32> to vector<1x32xf32>
    %207 = math.sqrt %204 : vector<32x1xf32>
    %cst_86 = arith.constant 9.99999997E-7 : f32
    %208 = vector.broadcast %cst_86 : f32 to vector<32x1xf32>
    %209 = arith.addf %207, %208 : vector<32x1xf32>
    %210 = vector.broadcast %209 : vector<32x1xf32> to vector<32x32xf32>
    %211 = arith.divf %199, %210 : vector<32x32xf32>
    %212 = vector.broadcast %206 : vector<1x32xf32> to vector<32x32xf32>
    %213 = arith.mulf %212, %211 : vector<32x32xf32>
    %c0_87 = arith.constant 0 : index
    %c0_88 = arith.constant 0 : index
    %c448 = arith.constant 448 : index
    %214 = vector.load %arg24[%c0_87, %c0_88, %c448] : memref<1x1x1884xf32, #tpu.memory_space<vmem>>, vector<1x1x32xf32>
    %215 = vector.shape_cast %214 : vector<1x1x32xf32> to vector<1x32xf32>
    %216 = vector.broadcast %215 : vector<1x32xf32> to vector<32x32xf32>
    %217 = arith.addf %213, %216 : vector<32x32xf32>
    %c0_89 = arith.constant 0 : index
    %c0_90 = arith.constant 0 : index
    %c0_91 = arith.constant 0 : index
    %218 = vector.load %arg7[%c0_89, %c0_90, %c0_91] : memref<1x32x96xf32, #tpu.memory_space<vmem>>, vector<1x32x96xf32>
    %219 = vector.shape_cast %218 : vector<1x32x96xf32> to vector<32x96xf32>
    %cst_92 = arith.constant dense<0.000000e+00> : vector<32x96xf32>
    %220 = tpu.matmul %217, %219, %cst_92 {dimension_numbers = #tpu.dot_dimension_numbers<[1], [0], [0], [1], [0, 0, 1, 1], [], []>} : vector<32x32xf32>, vector<32x96xf32>, vector<32x96xf32> -> vector<32x96xf32>
    %c0_93 = arith.constant 0 : index
    %c0_94 = arith.constant 0 : index
    %c480 = arith.constant 480 : index
    %221 = vector.load %arg24[%c0_93, %c0_94, %c480] : memref<1x1x1884xf32, #tpu.memory_space<vmem>>, vector<1x1x96xf32>
    %222 = vector.shape_cast %221 : vector<1x1x96xf32> to vector<1x96xf32>
    %223 = vector.broadcast %222 : vector<1x96xf32> to vector<32x96xf32>
    %224 = arith.addf %220, %223 : vector<32x96xf32>
    %225 = vector.extract_strided_slice %224 {offsets = [0, 0], sizes = [32, 32], strides = [1, 1]} : vector<32x96xf32> to vector<32x32xf32>
    %226 = vector.extract_strided_slice %224 {offsets = [0, 32], sizes = [32, 32], strides = [1, 1]} : vector<32x96xf32> to vector<32x32xf32>
    %227 = vector.extract_strided_slice %224 {offsets = [0, 64], sizes = [32, 32], strides = [1, 1]} : vector<32x96xf32> to vector<32x32xf32>
    %228 = vector.shape_cast %225 : vector<32x32xf32> to vector<2x16x32xf32>
    %229 = vector.shape_cast %226 : vector<32x32xf32> to vector<2x16x32xf32>
    %230 = vector.shape_cast %227 : vector<32x32xf32> to vector<2x16x32xf32>
    %231 = vector.extract_strided_slice %228 {offsets = [0, 0, 0], sizes = [2, 16, 8], strides = [1, 1, 1]} : vector<2x16x32xf32> to vector<2x16x8xf32>
    %232 = vector.extract_strided_slice %229 {offsets = [0, 0, 0], sizes = [2, 16, 8], strides = [1, 1, 1]} : vector<2x16x32xf32> to vector<2x16x8xf32>
    "tpu.trace_start"() <{level = 10 : i32, message = "bqd,bkd->bqk"}> : () -> ()
    %cst_95 = arith.constant dense<0.000000e+00> : vector<2x16x16xf32>
    %233 = tpu.matmul %231, %232, %cst_95 {dimension_numbers = #tpu.dot_dimension_numbers<[2], [2], [1], [1], [0, 0, 0, 1, 1, 1], [0], [0]>} : vector<2x16x8xf32>, vector<2x16x8xf32>, vector<2x16x16xf32> -> vector<2x16x16xf32>
    "tpu.trace_stop"() : () -> ()
    %cst_96 = arith.constant 0.353553385 : f32
    %234 = vector.broadcast %cst_96 : f32 to vector<2x16x16xf32>
    %235 = arith.mulf %233, %234 : vector<2x16x16xf32>
    %cst_97 = arith.constant dense<0xFF800000> : vector<2x16xf32>
    %236 = vector.multi_reduction <maximumf>, %235, %cst_97 [2] : vector<2x16x16xf32> to vector<2x16xf32>
    %237 = vector.shape_cast %236 : vector<2x16xf32> to vector<2x16x1xf32>
    %238 = vector.broadcast %237 : vector<2x16x1xf32> to vector<2x16x16xf32>
    %239 = arith.subf %235, %238 : vector<2x16x16xf32>
    %240 = math.exp %239 : vector<2x16x16xf32>
    %cst_98 = arith.constant dense<0.000000e+00> : vector<2x16xf32>
    %241 = vector.multi_reduction <add>, %240, %cst_98 [2] : vector<2x16x16xf32> to vector<2x16xf32>
    %242 = vector.shape_cast %241 : vector<2x16xf32> to vector<2x16x1xf32>
    %243 = tpu.reciprocal %242 {approx = true} : vector<2x16x1xf32> -> vector<2x16x1xf32>
    %244 = vector.broadcast %243 : vector<2x16x1xf32> to vector<2x16x16xf32>
    %245 = arith.mulf %240, %244 : vector<2x16x16xf32>
    %246 = vector.extract_strided_slice %230 {offsets = [0, 0, 0], sizes = [2, 16, 8], strides = [1, 1, 1]} : vector<2x16x32xf32> to vector<2x16x8xf32>
    "tpu.trace_start"() <{level = 10 : i32, message = "bqk,bkd->bqd"}> : () -> ()
    %cst_99 = arith.constant dense<0.000000e+00> : vector<2x16x8xf32>
    %247 = tpu.matmul %245, %246, %cst_99 {dimension_numbers = #tpu.dot_dimension_numbers<[2], [1], [1], [2], [0, 0, 0, 1, 1, 2], [0], [0]>} : vector<2x16x16xf32>, vector<2x16x8xf32>, vector<2x16x8xf32> -> vector<2x16x8xf32>
    "tpu.trace_stop"() : () -> ()
    %248 = vector.extract_strided_slice %228 {offsets = [0, 0, 8], sizes = [2, 16, 8], strides = [1, 1, 1]} : vector<2x16x32xf32> to vector<2x16x8xf32>
    %249 = vector.extract_strided_slice %229 {offsets = [0, 0, 8], sizes = [2, 16, 8], strides = [1, 1, 1]} : vector<2x16x32xf32> to vector<2x16x8xf32>
    "tpu.trace_start"() <{level = 10 : i32, message = "bqd,bkd->bqk"}> : () -> ()
    %cst_100 = arith.constant dense<0.000000e+00> : vector<2x16x16xf32>
    %250 = tpu.matmul %248, %249, %cst_100 {dimension_numbers = #tpu.dot_dimension_numbers<[2], [2], [1], [1], [0, 0, 0, 1, 1, 1], [0], [0]>} : vector<2x16x8xf32>, vector<2x16x8xf32>, vector<2x16x16xf32> -> vector<2x16x16xf32>
    "tpu.trace_stop"() : () -> ()
    %cst_101 = arith.constant 0.353553385 : f32
    %251 = vector.broadcast %cst_101 : f32 to vector<2x16x16xf32>
    %252 = arith.mulf %250, %251 : vector<2x16x16xf32>
    %cst_102 = arith.constant dense<0xFF800000> : vector<2x16xf32>
    %253 = vector.multi_reduction <maximumf>, %252, %cst_102 [2] : vector<2x16x16xf32> to vector<2x16xf32>
    %254 = vector.shape_cast %253 : vector<2x16xf32> to vector<2x16x1xf32>
    %255 = vector.broadcast %254 : vector<2x16x1xf32> to vector<2x16x16xf32>
    %256 = arith.subf %252, %255 : vector<2x16x16xf32>
    %257 = math.exp %256 : vector<2x16x16xf32>
    %cst_103 = arith.constant dense<0.000000e+00> : vector<2x16xf32>
    %258 = vector.multi_reduction <add>, %257, %cst_103 [2] : vector<2x16x16xf32> to vector<2x16xf32>
    %259 = vector.shape_cast %258 : vector<2x16xf32> to vector<2x16x1xf32>
    %260 = tpu.reciprocal %259 {approx = true} : vector<2x16x1xf32> -> vector<2x16x1xf32>
    %261 = vector.broadcast %260 : vector<2x16x1xf32> to vector<2x16x16xf32>
    %262 = arith.mulf %257, %261 : vector<2x16x16xf32>
    %263 = vector.extract_strided_slice %230 {offsets = [0, 0, 8], sizes = [2, 16, 8], strides = [1, 1, 1]} : vector<2x16x32xf32> to vector<2x16x8xf32>
    "tpu.trace_start"() <{level = 10 : i32, message = "bqk,bkd->bqd"}> : () -> ()
    %cst_104 = arith.constant dense<0.000000e+00> : vector<2x16x8xf32>
    %264 = tpu.matmul %262, %263, %cst_104 {dimension_numbers = #tpu.dot_dimension_numbers<[2], [1], [1], [2], [0, 0, 0, 1, 1, 2], [0], [0]>} : vector<2x16x16xf32>, vector<2x16x8xf32>, vector<2x16x8xf32> -> vector<2x16x8xf32>
    "tpu.trace_stop"() : () -> ()
    %265 = vector.extract_strided_slice %228 {offsets = [0, 0, 16], sizes = [2, 16, 8], strides = [1, 1, 1]} : vector<2x16x32xf32> to vector<2x16x8xf32>
    %266 = vector.extract_strided_slice %229 {offsets = [0, 0, 16], sizes = [2, 16, 8], strides = [1, 1, 1]} : vector<2x16x32xf32> to vector<2x16x8xf32>
    "tpu.trace_start"() <{level = 10 : i32, message = "bqd,bkd->bqk"}> : () -> ()
    %cst_105 = arith.constant dense<0.000000e+00> : vector<2x16x16xf32>
    %267 = tpu.matmul %265, %266, %cst_105 {dimension_numbers = #tpu.dot_dimension_numbers<[2], [2], [1], [1], [0, 0, 0, 1, 1, 1], [0], [0]>} : vector<2x16x8xf32>, vector<2x16x8xf32>, vector<2x16x16xf32> -> vector<2x16x16xf32>
    "tpu.trace_stop"() : () -> ()
    %cst_106 = arith.constant 0.353553385 : f32
    %268 = vector.broadcast %cst_106 : f32 to vector<2x16x16xf32>
    %269 = arith.mulf %267, %268 : vector<2x16x16xf32>
    %cst_107 = arith.constant dense<0xFF800000> : vector<2x16xf32>
    %270 = vector.multi_reduction <maximumf>, %269, %cst_107 [2] : vector<2x16x16xf32> to vector<2x16xf32>
    %271 = vector.shape_cast %270 : vector<2x16xf32> to vector<2x16x1xf32>
    %272 = vector.broadcast %271 : vector<2x16x1xf32> to vector<2x16x16xf32>
    %273 = arith.subf %269, %272 : vector<2x16x16xf32>
    %274 = math.exp %273 : vector<2x16x16xf32>
    %cst_108 = arith.constant dense<0.000000e+00> : vector<2x16xf32>
    %275 = vector.multi_reduction <add>, %274, %cst_108 [2] : vector<2x16x16xf32> to vector<2x16xf32>
    %276 = vector.shape_cast %275 : vector<2x16xf32> to vector<2x16x1xf32>
    %277 = tpu.reciprocal %276 {approx = true} : vector<2x16x1xf32> -> vector<2x16x1xf32>
    %278 = vector.broadcast %277 : vector<2x16x1xf32> to vector<2x16x16xf32>
    %279 = arith.mulf %274, %278 : vector<2x16x16xf32>
    %280 = vector.extract_strided_slice %230 {offsets = [0, 0, 16], sizes = [2, 16, 8], strides = [1, 1, 1]} : vector<2x16x32xf32> to vector<2x16x8xf32>
    "tpu.trace_start"() <{level = 10 : i32, message = "bqk,bkd->bqd"}> : () -> ()
    %cst_109 = arith.constant dense<0.000000e+00> : vector<2x16x8xf32>
    %281 = tpu.matmul %279, %280, %cst_109 {dimension_numbers = #tpu.dot_dimension_numbers<[2], [1], [1], [2], [0, 0, 0, 1, 1, 2], [0], [0]>} : vector<2x16x16xf32>, vector<2x16x8xf32>, vector<2x16x8xf32> -> vector<2x16x8xf32>
    "tpu.trace_stop"() : () -> ()
    %282 = vector.extract_strided_slice %228 {offsets = [0, 0, 24], sizes = [2, 16, 8], strides = [1, 1, 1]} : vector<2x16x32xf32> to vector<2x16x8xf32>
    %283 = vector.extract_strided_slice %229 {offsets = [0, 0, 24], sizes = [2, 16, 8], strides = [1, 1, 1]} : vector<2x16x32xf32> to vector<2x16x8xf32>
    "tpu.trace_start"() <{level = 10 : i32, message = "bqd,bkd->bqk"}> : () -> ()
    %cst_110 = arith.constant dense<0.000000e+00> : vector<2x16x16xf32>
    %284 = tpu.matmul %282, %283, %cst_110 {dimension_numbers = #tpu.dot_dimension_numbers<[2], [2], [1], [1], [0, 0, 0, 1, 1, 1], [0], [0]>} : vector<2x16x8xf32>, vector<2x16x8xf32>, vector<2x16x16xf32> -> vector<2x16x16xf32>
    "tpu.trace_stop"() : () -> ()
    %cst_111 = arith.constant 0.353553385 : f32
    %285 = vector.broadcast %cst_111 : f32 to vector<2x16x16xf32>
    %286 = arith.mulf %284, %285 : vector<2x16x16xf32>
    %cst_112 = arith.constant dense<0xFF800000> : vector<2x16xf32>
    %287 = vector.multi_reduction <maximumf>, %286, %cst_112 [2] : vector<2x16x16xf32> to vector<2x16xf32>
    %288 = vector.shape_cast %287 : vector<2x16xf32> to vector<2x16x1xf32>
    %289 = vector.broadcast %288 : vector<2x16x1xf32> to vector<2x16x16xf32>
    %290 = arith.subf %286, %289 : vector<2x16x16xf32>
    %291 = math.exp %290 : vector<2x16x16xf32>
    %cst_113 = arith.constant dense<0.000000e+00> : vector<2x16xf32>
    %292 = vector.multi_reduction <add>, %291, %cst_113 [2] : vector<2x16x16xf32> to vector<2x16xf32>
    %293 = vector.shape_cast %292 : vector<2x16xf32> to vector<2x16x1xf32>
    %294 = tpu.reciprocal %293 {approx = true} : vector<2x16x1xf32> -> vector<2x16x1xf32>
    %295 = vector.broadcast %294 : vector<2x16x1xf32> to vector<2x16x16xf32>
    %296 = arith.mulf %291, %295 : vector<2x16x16xf32>
    %297 = vector.extract_strided_slice %230 {offsets = [0, 0, 24], sizes = [2, 16, 8], strides = [1, 1, 1]} : vector<2x16x32xf32> to vector<2x16x8xf32>
    "tpu.trace_start"() <{level = 10 : i32, message = "bqk,bkd->bqd"}> : () -> ()
    %cst_114 = arith.constant dense<0.000000e+00> : vector<2x16x8xf32>
    %298 = tpu.matmul %296, %297, %cst_114 {dimension_numbers = #tpu.dot_dimension_numbers<[2], [1], [1], [2], [0, 0, 0, 1, 1, 2], [0], [0]>} : vector<2x16x16xf32>, vector<2x16x8xf32>, vector<2x16x8xf32> -> vector<2x16x8xf32>
    "tpu.trace_stop"() : () -> ()
    %299 = tpu.concatenate %247, %264, %281, %298 in 2 : vector<2x16x8xf32>, vector<2x16x8xf32>, vector<2x16x8xf32>, vector<2x16x8xf32> -> vector<2x16x32xf32>
    %300 = vector.shape_cast %299 : vector<2x16x32xf32> to vector<32x32xf32>
    %c0_115 = arith.constant 0 : index
    %c0_116 = arith.constant 0 : index
    %c0_117 = arith.constant 0 : index
    %301 = vector.load %arg8[%c0_115, %c0_116, %c0_117] : memref<1x32x32xf32, #tpu.memory_space<vmem>>, vector<1x32x32xf32>
    %302 = vector.shape_cast %301 : vector<1x32x32xf32> to vector<32x32xf32>
    %cst_118 = arith.constant dense<0.000000e+00> : vector<32x32xf32>
    %303 = tpu.matmul %300, %302, %cst_118 {dimension_numbers = #tpu.dot_dimension_numbers<[1], [0], [0], [1], [0, 0, 1, 1], [], []>} : vector<32x32xf32>, vector<32x32xf32>, vector<32x32xf32> -> vector<32x32xf32>
    %c0_119 = arith.constant 0 : index
    %c0_120 = arith.constant 0 : index
    %c576 = arith.constant 576 : index
    %304 = vector.load %arg24[%c0_119, %c0_120, %c576] : memref<1x1x1884xf32, #tpu.memory_space<vmem>>, vector<1x1x32xf32>
    %305 = vector.shape_cast %304 : vector<1x1x32xf32> to vector<1x32xf32>
    %306 = vector.broadcast %305 : vector<1x32xf32> to vector<32x32xf32>
    %307 = arith.addf %303, %306 : vector<32x32xf32>
    %308 = arith.addf %2, %307 : vector<32x32xf32>
    %cst_121 = arith.constant dense<0.000000e+00> : vector<32xf32>
    %309 = vector.multi_reduction <add>, %308, %cst_121 [1] : vector<32x32xf32> to vector<32xf32>
    %310 = vector.shape_cast %309 : vector<32xf32> to vector<32x1xf32>
    %cst_122 = arith.constant 3.200000e+01 : f32
    %311 = vector.broadcast %cst_122 : f32 to vector<32x1xf32>
    %312 = arith.divf %310, %311 : vector<32x1xf32>
    %313 = vector.broadcast %312 : vector<32x1xf32> to vector<32x32xf32>
    %314 = arith.subf %308, %313 : vector<32x32xf32>
    %315 = arith.mulf %314, %314 : vector<32x32xf32>
    %cst_123 = arith.constant dense<0.000000e+00> : vector<32xf32>
    %316 = vector.multi_reduction <add>, %315, %cst_123 [1] : vector<32x32xf32> to vector<32xf32>
    %317 = vector.shape_cast %316 : vector<32xf32> to vector<32x1xf32>
    %cst_124 = arith.constant 0.0322580636 : f32
    %318 = vector.broadcast %cst_124 : f32 to vector<32x1xf32>
    %319 = arith.mulf %317, %318 : vector<32x1xf32>
    %c0_125 = arith.constant 0 : index
    %c0_126 = arith.constant 0 : index
    %c608 = arith.constant 608 : index
    %320 = vector.load %arg24[%c0_125, %c0_126, %c608] : memref<1x1x1884xf32, #tpu.memory_space<vmem>>, vector<1x1x32xf32>
    %321 = vector.shape_cast %320 : vector<1x1x32xf32> to vector<1x32xf32>
    %322 = math.sqrt %319 : vector<32x1xf32>
    %cst_127 = arith.constant 9.99999997E-7 : f32
    %323 = vector.broadcast %cst_127 : f32 to vector<32x1xf32>
    %324 = arith.addf %322, %323 : vector<32x1xf32>
    %325 = vector.broadcast %324 : vector<32x1xf32> to vector<32x32xf32>
    %326 = arith.divf %314, %325 : vector<32x32xf32>
    %327 = vector.broadcast %321 : vector<1x32xf32> to vector<32x32xf32>
    %328 = arith.mulf %327, %326 : vector<32x32xf32>
    %c0_128 = arith.constant 0 : index
    %c0_129 = arith.constant 0 : index
    %c640 = arith.constant 640 : index
    %329 = vector.load %arg24[%c0_128, %c0_129, %c640] : memref<1x1x1884xf32, #tpu.memory_space<vmem>>, vector<1x1x32xf32>
    %330 = vector.shape_cast %329 : vector<1x1x32xf32> to vector<1x32xf32>
    %331 = vector.broadcast %330 : vector<1x32xf32> to vector<32x32xf32>
    %332 = arith.addf %328, %331 : vector<32x32xf32>
    %c0_130 = arith.constant 0 : index
    %c0_131 = arith.constant 0 : index
    %c0_132 = arith.constant 0 : index
    %333 = vector.load %arg9[%c0_130, %c0_131, %c0_132] : memref<1x32x32xf32, #tpu.memory_space<vmem>>, vector<1x32x32xf32>
    %334 = vector.shape_cast %333 : vector<1x32x32xf32> to vector<32x32xf32>
    %cst_133 = arith.constant dense<0.000000e+00> : vector<32x32xf32>
    %335 = tpu.matmul %332, %334, %cst_133 {dimension_numbers = #tpu.dot_dimension_numbers<[1], [0], [0], [1], [0, 0, 1, 1], [], []>} : vector<32x32xf32>, vector<32x32xf32>, vector<32x32xf32> -> vector<32x32xf32>
    %c0_134 = arith.constant 0 : index
    %c0_135 = arith.constant 0 : index
    %c672 = arith.constant 672 : index
    %336 = vector.load %arg24[%c0_134, %c0_135, %c672] : memref<1x1x1884xf32, #tpu.memory_space<vmem>>, vector<1x1x32xf32>
    %337 = vector.shape_cast %336 : vector<1x1x32xf32> to vector<1x32xf32>
    %338 = vector.broadcast %337 : vector<1x32xf32> to vector<32x32xf32>
    %339 = arith.addf %335, %338 : vector<32x32xf32>
    %c0_136 = arith.constant 0 : index
    %c0_137 = arith.constant 0 : index
    %c0_138 = arith.constant 0 : index
    %340 = vector.load %arg10[%c0_136, %c0_137, %c0_138] : memref<1x32x64xf32, #tpu.memory_space<vmem>>, vector<1x32x64xf32>
    %341 = vector.shape_cast %340 : vector<1x32x64xf32> to vector<32x64xf32>
    %cst_139 = arith.constant dense<0.000000e+00> : vector<32x64xf32>
    %342 = tpu.matmul %193, %341, %cst_139 {dimension_numbers = #tpu.dot_dimension_numbers<[1], [0], [0], [1], [0, 0, 1, 1], [], []>} : vector<32x32xf32>, vector<32x64xf32>, vector<32x64xf32> -> vector<32x64xf32>
    %c0_140 = arith.constant 0 : index
    %c0_141 = arith.constant 0 : index
    %c704 = arith.constant 704 : index
    %343 = vector.load %arg24[%c0_140, %c0_141, %c704] : memref<1x1x1884xf32, #tpu.memory_space<vmem>>, vector<1x1x64xf32>
    %344 = vector.shape_cast %343 : vector<1x1x64xf32> to vector<1x64xf32>
    %345 = vector.broadcast %344 : vector<1x64xf32> to vector<32x64xf32>
    %346 = arith.addf %342, %345 : vector<32x64xf32>
    %347 = vector.extract_strided_slice %346 {offsets = [0, 0], sizes = [32, 32], strides = [1, 1]} : vector<32x64xf32> to vector<32x32xf32>
    %348 = vector.extract_strided_slice %346 {offsets = [0, 32], sizes = [32, 32], strides = [1, 1]} : vector<32x64xf32> to vector<32x32xf32>
    %349 = vector.shape_cast %339 : vector<32x32xf32> to vector<2x16x32xf32>
    %350 = vector.shape_cast %347 : vector<32x32xf32> to vector<2x16x32xf32>
    %351 = vector.shape_cast %348 : vector<32x32xf32> to vector<2x16x32xf32>
    %352 = vector.extract_strided_slice %349 {offsets = [0, 0, 0], sizes = [2, 16, 8], strides = [1, 1, 1]} : vector<2x16x32xf32> to vector<2x16x8xf32>
    %353 = vector.extract_strided_slice %350 {offsets = [0, 0, 0], sizes = [2, 16, 8], strides = [1, 1, 1]} : vector<2x16x32xf32> to vector<2x16x8xf32>
    "tpu.trace_start"() <{level = 10 : i32, message = "bqd,bkd->bqk"}> : () -> ()
    %cst_142 = arith.constant dense<0.000000e+00> : vector<2x16x16xf32>
    %354 = tpu.matmul %352, %353, %cst_142 {dimension_numbers = #tpu.dot_dimension_numbers<[2], [2], [1], [1], [0, 0, 0, 1, 1, 1], [0], [0]>} : vector<2x16x8xf32>, vector<2x16x8xf32>, vector<2x16x16xf32> -> vector<2x16x16xf32>
    "tpu.trace_stop"() : () -> ()
    %cst_143 = arith.constant 0.353553385 : f32
    %355 = vector.broadcast %cst_143 : f32 to vector<2x16x16xf32>
    %356 = arith.mulf %354, %355 : vector<2x16x16xf32>
    %cst_144 = arith.constant dense<0xFF800000> : vector<2x16xf32>
    %357 = vector.multi_reduction <maximumf>, %356, %cst_144 [2] : vector<2x16x16xf32> to vector<2x16xf32>
    %358 = vector.shape_cast %357 : vector<2x16xf32> to vector<2x16x1xf32>
    %359 = vector.broadcast %358 : vector<2x16x1xf32> to vector<2x16x16xf32>
    %360 = arith.subf %356, %359 : vector<2x16x16xf32>
    %361 = math.exp %360 : vector<2x16x16xf32>
    %cst_145 = arith.constant dense<0.000000e+00> : vector<2x16xf32>
    %362 = vector.multi_reduction <add>, %361, %cst_145 [2] : vector<2x16x16xf32> to vector<2x16xf32>
    %363 = vector.shape_cast %362 : vector<2x16xf32> to vector<2x16x1xf32>
    %364 = tpu.reciprocal %363 {approx = true} : vector<2x16x1xf32> -> vector<2x16x1xf32>
    %365 = vector.broadcast %364 : vector<2x16x1xf32> to vector<2x16x16xf32>
    %366 = arith.mulf %361, %365 : vector<2x16x16xf32>
    %367 = vector.extract_strided_slice %351 {offsets = [0, 0, 0], sizes = [2, 16, 8], strides = [1, 1, 1]} : vector<2x16x32xf32> to vector<2x16x8xf32>
    "tpu.trace_start"() <{level = 10 : i32, message = "bqk,bkd->bqd"}> : () -> ()
    %cst_146 = arith.constant dense<0.000000e+00> : vector<2x16x8xf32>
    %368 = tpu.matmul %366, %367, %cst_146 {dimension_numbers = #tpu.dot_dimension_numbers<[2], [1], [1], [2], [0, 0, 0, 1, 1, 2], [0], [0]>} : vector<2x16x16xf32>, vector<2x16x8xf32>, vector<2x16x8xf32> -> vector<2x16x8xf32>
    "tpu.trace_stop"() : () -> ()
    %369 = vector.extract_strided_slice %349 {offsets = [0, 0, 8], sizes = [2, 16, 8], strides = [1, 1, 1]} : vector<2x16x32xf32> to vector<2x16x8xf32>
    %370 = vector.extract_strided_slice %350 {offsets = [0, 0, 8], sizes = [2, 16, 8], strides = [1, 1, 1]} : vector<2x16x32xf32> to vector<2x16x8xf32>
    "tpu.trace_start"() <{level = 10 : i32, message = "bqd,bkd->bqk"}> : () -> ()
    %cst_147 = arith.constant dense<0.000000e+00> : vector<2x16x16xf32>
    %371 = tpu.matmul %369, %370, %cst_147 {dimension_numbers = #tpu.dot_dimension_numbers<[2], [2], [1], [1], [0, 0, 0, 1, 1, 1], [0], [0]>} : vector<2x16x8xf32>, vector<2x16x8xf32>, vector<2x16x16xf32> -> vector<2x16x16xf32>
    "tpu.trace_stop"() : () -> ()
    %cst_148 = arith.constant 0.353553385 : f32
    %372 = vector.broadcast %cst_148 : f32 to vector<2x16x16xf32>
    %373 = arith.mulf %371, %372 : vector<2x16x16xf32>
    %cst_149 = arith.constant dense<0xFF800000> : vector<2x16xf32>
    %374 = vector.multi_reduction <maximumf>, %373, %cst_149 [2] : vector<2x16x16xf32> to vector<2x16xf32>
    %375 = vector.shape_cast %374 : vector<2x16xf32> to vector<2x16x1xf32>
    %376 = vector.broadcast %375 : vector<2x16x1xf32> to vector<2x16x16xf32>
    %377 = arith.subf %373, %376 : vector<2x16x16xf32>
    %378 = math.exp %377 : vector<2x16x16xf32>
    %cst_150 = arith.constant dense<0.000000e+00> : vector<2x16xf32>
    %379 = vector.multi_reduction <add>, %378, %cst_150 [2] : vector<2x16x16xf32> to vector<2x16xf32>
    %380 = vector.shape_cast %379 : vector<2x16xf32> to vector<2x16x1xf32>
    %381 = tpu.reciprocal %380 {approx = true} : vector<2x16x1xf32> -> vector<2x16x1xf32>
    %382 = vector.broadcast %381 : vector<2x16x1xf32> to vector<2x16x16xf32>
    %383 = arith.mulf %378, %382 : vector<2x16x16xf32>
    %384 = arith.addf %366, %383 : vector<2x16x16xf32>
    %385 = vector.extract_strided_slice %351 {offsets = [0, 0, 8], sizes = [2, 16, 8], strides = [1, 1, 1]} : vector<2x16x32xf32> to vector<2x16x8xf32>
    "tpu.trace_start"() <{level = 10 : i32, message = "bqk,bkd->bqd"}> : () -> ()
    %cst_151 = arith.constant dense<0.000000e+00> : vector<2x16x8xf32>
    %386 = tpu.matmul %383, %385, %cst_151 {dimension_numbers = #tpu.dot_dimension_numbers<[2], [1], [1], [2], [0, 0, 0, 1, 1, 2], [0], [0]>} : vector<2x16x16xf32>, vector<2x16x8xf32>, vector<2x16x8xf32> -> vector<2x16x8xf32>
    "tpu.trace_stop"() : () -> ()
    %387 = vector.extract_strided_slice %349 {offsets = [0, 0, 16], sizes = [2, 16, 8], strides = [1, 1, 1]} : vector<2x16x32xf32> to vector<2x16x8xf32>
    %388 = vector.extract_strided_slice %350 {offsets = [0, 0, 16], sizes = [2, 16, 8], strides = [1, 1, 1]} : vector<2x16x32xf32> to vector<2x16x8xf32>
    "tpu.trace_start"() <{level = 10 : i32, message = "bqd,bkd->bqk"}> : () -> ()
    %cst_152 = arith.constant dense<0.000000e+00> : vector<2x16x16xf32>
    %389 = tpu.matmul %387, %388, %cst_152 {dimension_numbers = #tpu.dot_dimension_numbers<[2], [2], [1], [1], [0, 0, 0, 1, 1, 1], [0], [0]>} : vector<2x16x8xf32>, vector<2x16x8xf32>, vector<2x16x16xf32> -> vector<2x16x16xf32>
    "tpu.trace_stop"() : () -> ()
    %cst_153 = arith.constant 0.353553385 : f32
    %390 = vector.broadcast %cst_153 : f32 to vector<2x16x16xf32>
    %391 = arith.mulf %389, %390 : vector<2x16x16xf32>
    %cst_154 = arith.constant dense<0xFF800000> : vector<2x16xf32>
    %392 = vector.multi_reduction <maximumf>, %391, %cst_154 [2] : vector<2x16x16xf32> to vector<2x16xf32>
    %393 = vector.shape_cast %392 : vector<2x16xf32> to vector<2x16x1xf32>
    %394 = vector.broadcast %393 : vector<2x16x1xf32> to vector<2x16x16xf32>
    %395 = arith.subf %391, %394 : vector<2x16x16xf32>
    %396 = math.exp %395 : vector<2x16x16xf32>
    %cst_155 = arith.constant dense<0.000000e+00> : vector<2x16xf32>
    %397 = vector.multi_reduction <add>, %396, %cst_155 [2] : vector<2x16x16xf32> to vector<2x16xf32>
    %398 = vector.shape_cast %397 : vector<2x16xf32> to vector<2x16x1xf32>
    %399 = tpu.reciprocal %398 {approx = true} : vector<2x16x1xf32> -> vector<2x16x1xf32>
    %400 = vector.broadcast %399 : vector<2x16x1xf32> to vector<2x16x16xf32>
    %401 = arith.mulf %396, %400 : vector<2x16x16xf32>
    %402 = arith.addf %384, %401 : vector<2x16x16xf32>
    %403 = vector.extract_strided_slice %351 {offsets = [0, 0, 16], sizes = [2, 16, 8], strides = [1, 1, 1]} : vector<2x16x32xf32> to vector<2x16x8xf32>
    "tpu.trace_start"() <{level = 10 : i32, message = "bqk,bkd->bqd"}> : () -> ()
    %cst_156 = arith.constant dense<0.000000e+00> : vector<2x16x8xf32>
    %404 = tpu.matmul %401, %403, %cst_156 {dimension_numbers = #tpu.dot_dimension_numbers<[2], [1], [1], [2], [0, 0, 0, 1, 1, 2], [0], [0]>} : vector<2x16x16xf32>, vector<2x16x8xf32>, vector<2x16x8xf32> -> vector<2x16x8xf32>
    "tpu.trace_stop"() : () -> ()
    %405 = vector.extract_strided_slice %349 {offsets = [0, 0, 24], sizes = [2, 16, 8], strides = [1, 1, 1]} : vector<2x16x32xf32> to vector<2x16x8xf32>
    %406 = vector.extract_strided_slice %350 {offsets = [0, 0, 24], sizes = [2, 16, 8], strides = [1, 1, 1]} : vector<2x16x32xf32> to vector<2x16x8xf32>
    "tpu.trace_start"() <{level = 10 : i32, message = "bqd,bkd->bqk"}> : () -> ()
    %cst_157 = arith.constant dense<0.000000e+00> : vector<2x16x16xf32>
    %407 = tpu.matmul %405, %406, %cst_157 {dimension_numbers = #tpu.dot_dimension_numbers<[2], [2], [1], [1], [0, 0, 0, 1, 1, 1], [0], [0]>} : vector<2x16x8xf32>, vector<2x16x8xf32>, vector<2x16x16xf32> -> vector<2x16x16xf32>
    "tpu.trace_stop"() : () -> ()
    %cst_158 = arith.constant 0.353553385 : f32
    %408 = vector.broadcast %cst_158 : f32 to vector<2x16x16xf32>
    %409 = arith.mulf %407, %408 : vector<2x16x16xf32>
    %cst_159 = arith.constant dense<0xFF800000> : vector<2x16xf32>
    %410 = vector.multi_reduction <maximumf>, %409, %cst_159 [2] : vector<2x16x16xf32> to vector<2x16xf32>
    %411 = vector.shape_cast %410 : vector<2x16xf32> to vector<2x16x1xf32>
    %412 = vector.broadcast %411 : vector<2x16x1xf32> to vector<2x16x16xf32>
    %413 = arith.subf %409, %412 : vector<2x16x16xf32>
    %414 = math.exp %413 : vector<2x16x16xf32>
    %cst_160 = arith.constant dense<0.000000e+00> : vector<2x16xf32>
    %415 = vector.multi_reduction <add>, %414, %cst_160 [2] : vector<2x16x16xf32> to vector<2x16xf32>
    %416 = vector.shape_cast %415 : vector<2x16xf32> to vector<2x16x1xf32>
    %417 = tpu.reciprocal %416 {approx = true} : vector<2x16x1xf32> -> vector<2x16x1xf32>
    %418 = vector.broadcast %417 : vector<2x16x1xf32> to vector<2x16x16xf32>
    %419 = arith.mulf %414, %418 : vector<2x16x16xf32>
    %420 = arith.addf %402, %419 : vector<2x16x16xf32>
    %421 = vector.extract_strided_slice %351 {offsets = [0, 0, 24], sizes = [2, 16, 8], strides = [1, 1, 1]} : vector<2x16x32xf32> to vector<2x16x8xf32>
    "tpu.trace_start"() <{level = 10 : i32, message = "bqk,bkd->bqd"}> : () -> ()
    %cst_161 = arith.constant dense<0.000000e+00> : vector<2x16x8xf32>
    %422 = tpu.matmul %419, %421, %cst_161 {dimension_numbers = #tpu.dot_dimension_numbers<[2], [1], [1], [2], [0, 0, 0, 1, 1, 2], [0], [0]>} : vector<2x16x16xf32>, vector<2x16x8xf32>, vector<2x16x8xf32> -> vector<2x16x8xf32>
    "tpu.trace_stop"() : () -> ()
    %423 = tpu.concatenate %368, %386, %404, %422 in 2 : vector<2x16x8xf32>, vector<2x16x8xf32>, vector<2x16x8xf32>, vector<2x16x8xf32> -> vector<2x16x32xf32>
    %424 = vector.shape_cast %423 : vector<2x16x32xf32> to vector<32x32xf32>
    %cst_162 = arith.constant 2.500000e-01 : f32
    %425 = vector.broadcast %cst_162 : f32 to vector<2x16x16xf32>
    %426 = arith.mulf %420, %425 : vector<2x16x16xf32>
    %c0_163 = arith.constant 0 : index
    %c0_164 = arith.constant 0 : index
    %c0_165 = arith.constant 0 : index
    %427 = vector.load %arg11[%c0_163, %c0_164, %c0_165] : memref<1x32x32xf32, #tpu.memory_space<vmem>>, vector<1x32x32xf32>
    %428 = vector.shape_cast %427 : vector<1x32x32xf32> to vector<32x32xf32>
    %cst_166 = arith.constant dense<0.000000e+00> : vector<32x32xf32>
    %429 = tpu.matmul %424, %428, %cst_166 {dimension_numbers = #tpu.dot_dimension_numbers<[1], [0], [0], [1], [0, 0, 1, 1], [], []>} : vector<32x32xf32>, vector<32x32xf32>, vector<32x32xf32> -> vector<32x32xf32>
    %c0_167 = arith.constant 0 : index
    %c0_168 = arith.constant 0 : index
    %c768 = arith.constant 768 : index
    %430 = vector.load %arg24[%c0_167, %c0_168, %c768] : memref<1x1x1884xf32, #tpu.memory_space<vmem>>, vector<1x1x32xf32>
    %431 = vector.shape_cast %430 : vector<1x1x32xf32> to vector<1x32xf32>
    %432 = vector.broadcast %431 : vector<1x32xf32> to vector<32x32xf32>
    %433 = arith.addf %429, %432 : vector<32x32xf32>
    %434 = arith.addf %308, %433 : vector<32x32xf32>
    %cst_169 = arith.constant dense<0.000000e+00> : vector<32xf32>
    %435 = vector.multi_reduction <add>, %434, %cst_169 [1] : vector<32x32xf32> to vector<32xf32>
    %436 = vector.shape_cast %435 : vector<32xf32> to vector<32x1xf32>
    %cst_170 = arith.constant 3.200000e+01 : f32
    %437 = vector.broadcast %cst_170 : f32 to vector<32x1xf32>
    %438 = arith.divf %436, %437 : vector<32x1xf32>
    %439 = vector.broadcast %438 : vector<32x1xf32> to vector<32x32xf32>
    %440 = arith.subf %434, %439 : vector<32x32xf32>
    %441 = arith.mulf %440, %440 : vector<32x32xf32>
    %cst_171 = arith.constant dense<0.000000e+00> : vector<32xf32>
    %442 = vector.multi_reduction <add>, %441, %cst_171 [1] : vector<32x32xf32> to vector<32xf32>
    %443 = vector.shape_cast %442 : vector<32xf32> to vector<32x1xf32>
    %cst_172 = arith.constant 0.0322580636 : f32
    %444 = vector.broadcast %cst_172 : f32 to vector<32x1xf32>
    %445 = arith.mulf %443, %444 : vector<32x1xf32>
    %c0_173 = arith.constant 0 : index
    %c0_174 = arith.constant 0 : index
    %c800 = arith.constant 800 : index
    %446 = vector.load %arg24[%c0_173, %c0_174, %c800] : memref<1x1x1884xf32, #tpu.memory_space<vmem>>, vector<1x1x32xf32>
    %447 = vector.shape_cast %446 : vector<1x1x32xf32> to vector<1x32xf32>
    %448 = math.sqrt %445 : vector<32x1xf32>
    %cst_175 = arith.constant 9.99999997E-7 : f32
    %449 = vector.broadcast %cst_175 : f32 to vector<32x1xf32>
    %450 = arith.addf %448, %449 : vector<32x1xf32>
    %451 = vector.broadcast %450 : vector<32x1xf32> to vector<32x32xf32>
    %452 = arith.divf %440, %451 : vector<32x32xf32>
    %453 = vector.broadcast %447 : vector<1x32xf32> to vector<32x32xf32>
    %454 = arith.mulf %453, %452 : vector<32x32xf32>
    %c0_176 = arith.constant 0 : index
    %c0_177 = arith.constant 0 : index
    %c832 = arith.constant 832 : index
    %455 = vector.load %arg24[%c0_176, %c0_177, %c832] : memref<1x1x1884xf32, #tpu.memory_space<vmem>>, vector<1x1x32xf32>
    %456 = vector.shape_cast %455 : vector<1x1x32xf32> to vector<1x32xf32>
    %457 = vector.broadcast %456 : vector<1x32xf32> to vector<32x32xf32>
    %458 = arith.addf %454, %457 : vector<32x32xf32>
    %c0_178 = arith.constant 0 : index
    %c0_179 = arith.constant 0 : index
    %c0_180 = arith.constant 0 : index
    %459 = vector.load %arg12[%c0_178, %c0_179, %c0_180] : memref<1x32x64xf32, #tpu.memory_space<vmem>>, vector<1x32x64xf32>
    %460 = vector.shape_cast %459 : vector<1x32x64xf32> to vector<32x64xf32>
    %cst_181 = arith.constant dense<0.000000e+00> : vector<32x64xf32>
    %461 = tpu.matmul %458, %460, %cst_181 {dimension_numbers = #tpu.dot_dimension_numbers<[1], [0], [0], [1], [0, 0, 1, 1], [], []>} : vector<32x32xf32>, vector<32x64xf32>, vector<32x64xf32> -> vector<32x64xf32>
    %c0_182 = arith.constant 0 : index
    %c0_183 = arith.constant 0 : index
    %c864 = arith.constant 864 : index
    %462 = vector.load %arg24[%c0_182, %c0_183, %c864] : memref<1x1x1884xf32, #tpu.memory_space<vmem>>, vector<1x1x64xf32>
    %463 = vector.shape_cast %462 : vector<1x1x64xf32> to vector<1x64xf32>
    %464 = vector.broadcast %463 : vector<1x64xf32> to vector<32x64xf32>
    %465 = arith.addf %461, %464 : vector<32x64xf32>
    %cst_184 = arith.constant 0.000000e+00 : f32
    %466 = vector.broadcast %cst_184 : f32 to vector<32x64xf32>
    %467 = arith.maximumf %465, %466 : vector<32x64xf32>
    %c0_185 = arith.constant 0 : index
    %c0_186 = arith.constant 0 : index
    %c0_187 = arith.constant 0 : index
    %468 = vector.load %arg13[%c0_185, %c0_186, %c0_187] : memref<1x64x32xf32, #tpu.memory_space<vmem>>, vector<1x64x32xf32>
    %469 = vector.shape_cast %468 : vector<1x64x32xf32> to vector<64x32xf32>
    %cst_188 = arith.constant dense<0.000000e+00> : vector<32x32xf32>
    %470 = tpu.matmul %467, %469, %cst_188 {dimension_numbers = #tpu.dot_dimension_numbers<[1], [0], [0], [1], [0, 0, 1, 1], [], []>} : vector<32x64xf32>, vector<64x32xf32>, vector<32x32xf32> -> vector<32x32xf32>
    %c0_189 = arith.constant 0 : index
    %c0_190 = arith.constant 0 : index
    %c928 = arith.constant 928 : index
    %471 = vector.load %arg24[%c0_189, %c0_190, %c928] : memref<1x1x1884xf32, #tpu.memory_space<vmem>>, vector<1x1x32xf32>
    %472 = vector.shape_cast %471 : vector<1x1x32xf32> to vector<1x32xf32>
    %473 = vector.broadcast %472 : vector<1x32xf32> to vector<32x32xf32>
    %474 = arith.addf %470, %473 : vector<32x32xf32>
    %475 = arith.addf %434, %474 : vector<32x32xf32>
    %cst_191 = arith.constant dense<0.000000e+00> : vector<32xf32>
    %476 = vector.multi_reduction <add>, %475, %cst_191 [1] : vector<32x32xf32> to vector<32xf32>
    %477 = vector.shape_cast %476 : vector<32xf32> to vector<32x1xf32>
    %cst_192 = arith.constant 3.200000e+01 : f32
    %478 = vector.broadcast %cst_192 : f32 to vector<32x1xf32>
    %479 = arith.divf %477, %478 : vector<32x1xf32>
    %480 = vector.broadcast %479 : vector<32x1xf32> to vector<32x32xf32>
    %481 = arith.subf %475, %480 : vector<32x32xf32>
    %482 = arith.mulf %481, %481 : vector<32x32xf32>
    %cst_193 = arith.constant dense<0.000000e+00> : vector<32xf32>
    %483 = vector.multi_reduction <add>, %482, %cst_193 [1] : vector<32x32xf32> to vector<32xf32>
    %484 = vector.shape_cast %483 : vector<32xf32> to vector<32x1xf32>
    %cst_194 = arith.constant 0.0322580636 : f32
    %485 = vector.broadcast %cst_194 : f32 to vector<32x1xf32>
    %486 = arith.mulf %484, %485 : vector<32x1xf32>
    %c0_195 = arith.constant 0 : index
    %c0_196 = arith.constant 0 : index
    %c960 = arith.constant 960 : index
    %487 = vector.load %arg24[%c0_195, %c0_196, %c960] : memref<1x1x1884xf32, #tpu.memory_space<vmem>>, vector<1x1x32xf32>
    %488 = vector.shape_cast %487 : vector<1x1x32xf32> to vector<1x32xf32>
    %489 = math.sqrt %486 : vector<32x1xf32>
    %cst_197 = arith.constant 9.99999997E-7 : f32
    %490 = vector.broadcast %cst_197 : f32 to vector<32x1xf32>
    %491 = arith.addf %489, %490 : vector<32x1xf32>
    %492 = vector.broadcast %491 : vector<32x1xf32> to vector<32x32xf32>
    %493 = arith.divf %481, %492 : vector<32x32xf32>
    %494 = vector.broadcast %488 : vector<1x32xf32> to vector<32x32xf32>
    %495 = arith.mulf %494, %493 : vector<32x32xf32>
    %c0_198 = arith.constant 0 : index
    %c0_199 = arith.constant 0 : index
    %c992 = arith.constant 992 : index
    %496 = vector.load %arg24[%c0_198, %c0_199, %c992] : memref<1x1x1884xf32, #tpu.memory_space<vmem>>, vector<1x1x32xf32>
    %497 = vector.shape_cast %496 : vector<1x1x32xf32> to vector<1x32xf32>
    %498 = vector.broadcast %497 : vector<1x32xf32> to vector<32x32xf32>
    %499 = arith.addf %495, %498 : vector<32x32xf32>
    %500 = arith.addf %2, %499 : vector<32x32xf32>
    %c0_200 = arith.constant 0 : index
    %c0_201 = arith.constant 0 : index
    %c0_202 = arith.constant 0 : index
    %501 = vector.load %arg14[%c0_200, %c0_201, %c0_202] : memref<1x32x16xf32, #tpu.memory_space<vmem>>, vector<1x32x16xf32>
    %502 = vector.shape_cast %501 : vector<1x32x16xf32> to vector<32x16xf32>
    %cst_203 = arith.constant dense<0.000000e+00> : vector<32x16xf32>
    %503 = tpu.matmul %500, %502, %cst_203 {dimension_numbers = #tpu.dot_dimension_numbers<[1], [0], [0], [1], [0, 0, 1, 1], [], []>} : vector<32x32xf32>, vector<32x16xf32>, vector<32x16xf32> -> vector<32x16xf32>
    %c0_204 = arith.constant 0 : index
    %c0_205 = arith.constant 0 : index
    %c1024 = arith.constant 1024 : index
    %504 = vector.load %arg24[%c0_204, %c0_205, %c1024] : memref<1x1x1884xf32, #tpu.memory_space<vmem>>, vector<1x1x16xf32>
    %505 = vector.shape_cast %504 : vector<1x1x16xf32> to vector<1x16xf32>
    %506 = vector.broadcast %505 : vector<1x16xf32> to vector<32x16xf32>
    %507 = arith.addf %503, %506 : vector<32x16xf32>
    %cst_206 = arith.constant 0.000000e+00 : f32
    %508 = vector.broadcast %cst_206 : f32 to vector<32x16xf32>
    %509 = arith.maximumf %507, %508 : vector<32x16xf32>
    %c0_207 = arith.constant 0 : index
    %c0_208 = arith.constant 0 : index
    %c0_209 = arith.constant 0 : index
    %510 = vector.load %arg15[%c0_207, %c0_208, %c0_209] : memref<1x16x8xf32, #tpu.memory_space<vmem>>, vector<1x16x8xf32>
    %511 = vector.shape_cast %510 : vector<1x16x8xf32> to vector<16x8xf32>
    %cst_210 = arith.constant dense<0.000000e+00> : vector<32x8xf32>
    %512 = tpu.matmul %509, %511, %cst_210 {dimension_numbers = #tpu.dot_dimension_numbers<[1], [0], [0], [1], [0, 0, 1, 1], [], []>} : vector<32x16xf32>, vector<16x8xf32>, vector<32x8xf32> -> vector<32x8xf32>
    %c0_211 = arith.constant 0 : index
    %c0_212 = arith.constant 0 : index
    %c1040 = arith.constant 1040 : index
    %513 = vector.load %arg24[%c0_211, %c0_212, %c1040] : memref<1x1x1884xf32, #tpu.memory_space<vmem>>, vector<1x1x8xf32>
    %514 = vector.shape_cast %513 : vector<1x1x8xf32> to vector<1x8xf32>
    %515 = vector.broadcast %514 : vector<1x8xf32> to vector<32x8xf32>
    %516 = arith.addf %512, %515 : vector<32x8xf32>
    %cst_213 = arith.constant 0.000000e+00 : f32
    %517 = vector.broadcast %cst_213 : f32 to vector<32x8xf32>
    %518 = arith.maximumf %516, %517 : vector<32x8xf32>
    %c0_214 = arith.constant 0 : index
    %c0_215 = arith.constant 0 : index
    %c0_216 = arith.constant 0 : index
    %519 = vector.load %arg16[%c0_214, %c0_215, %c0_216] : memref<1x8x4xf32, #tpu.memory_space<vmem>>, vector<1x8x4xf32>
    %520 = vector.shape_cast %519 : vector<1x8x4xf32> to vector<8x4xf32>
    %cst_217 = arith.constant dense<0.000000e+00> : vector<32x4xf32>
    %521 = tpu.matmul %518, %520, %cst_217 {dimension_numbers = #tpu.dot_dimension_numbers<[1], [0], [0], [1], [0, 0, 1, 1], [], []>} : vector<32x8xf32>, vector<8x4xf32>, vector<32x4xf32> -> vector<32x4xf32>
    %c0_218 = arith.constant 0 : index
    %c0_219 = arith.constant 0 : index
    %c1048 = arith.constant 1048 : index
    %522 = vector.load %arg24[%c0_218, %c0_219, %c1048] : memref<1x1x1884xf32, #tpu.memory_space<vmem>>, vector<1x1x4xf32>
    %523 = vector.shape_cast %522 : vector<1x1x4xf32> to vector<1x4xf32>
    %524 = vector.broadcast %523 : vector<1x4xf32> to vector<32x4xf32>
    %525 = arith.addf %521, %524 : vector<32x4xf32>
    %cst_220 = arith.constant 0.000000e+00 : f32
    %526 = vector.broadcast %cst_220 : f32 to vector<32x4xf32>
    %527 = arith.maximumf %525, %526 : vector<32x4xf32>
    %c0_221 = arith.constant 0 : index
    %c0_222 = arith.constant 0 : index
    %c0_223 = arith.constant 0 : index
    %528 = vector.load %arg17[%c0_221, %c0_222, %c0_223] : memref<1x4x3xf32, #tpu.memory_space<vmem>>, vector<1x4x3xf32>
    %529 = vector.shape_cast %528 : vector<1x4x3xf32> to vector<4x3xf32>
    %cst_224 = arith.constant dense<0.000000e+00> : vector<32x3xf32>
    %530 = tpu.matmul %527, %529, %cst_224 {dimension_numbers = #tpu.dot_dimension_numbers<[1], [0], [0], [1], [0, 0, 1, 1], [], []>} : vector<32x4xf32>, vector<4x3xf32>, vector<32x3xf32> -> vector<32x3xf32>
    %c0_225 = arith.constant 0 : index
    %c0_226 = arith.constant 0 : index
    %c0_227 = arith.constant 0 : index
    %531 = vector.load %arg18[%c0_225, %c0_226, %c0_227] : memref<1x32x64xf32, #tpu.memory_space<vmem>>, vector<1x32x64xf32>
    %532 = vector.shape_cast %531 : vector<1x32x64xf32> to vector<32x64xf32>
    %cst_228 = arith.constant dense<0.000000e+00> : vector<32x64xf32>
    %533 = tpu.matmul %500, %532, %cst_228 {dimension_numbers = #tpu.dot_dimension_numbers<[1], [0], [0], [1], [0, 0, 1, 1], [], []>} : vector<32x32xf32>, vector<32x64xf32>, vector<32x64xf32> -> vector<32x64xf32>
    %c0_229 = arith.constant 0 : index
    %c0_230 = arith.constant 0 : index
    %c1052 = arith.constant 1052 : index
    %534 = vector.load %arg24[%c0_229, %c0_230, %c1052] : memref<1x1x1884xf32, #tpu.memory_space<vmem>>, vector<1x1x64xf32>
    %535 = vector.shape_cast %534 : vector<1x1x64xf32> to vector<1x64xf32>
    %536 = vector.broadcast %535 : vector<1x64xf32> to vector<32x64xf32>
    %537 = arith.addf %533, %536 : vector<32x64xf32>
    %cst_231 = arith.constant 0.000000e+00 : f32
    %538 = vector.broadcast %cst_231 : f32 to vector<32x64xf32>
    %539 = arith.maximumf %537, %538 : vector<32x64xf32>
    %c0_232 = arith.constant 0 : index
    %c0_233 = arith.constant 0 : index
    %c0_234 = arith.constant 0 : index
    %540 = vector.load %arg19[%c0_232, %c0_233, %c0_234] : memref<1x64x64xf32, #tpu.memory_space<vmem>>, vector<1x64x64xf32>
    %541 = vector.shape_cast %540 : vector<1x64x64xf32> to vector<64x64xf32>
    %cst_235 = arith.constant dense<0.000000e+00> : vector<32x64xf32>
    %542 = tpu.matmul %539, %541, %cst_235 {dimension_numbers = #tpu.dot_dimension_numbers<[1], [0], [0], [1], [0, 0, 1, 1], [], []>} : vector<32x64xf32>, vector<64x64xf32>, vector<32x64xf32> -> vector<32x64xf32>
    %c0_236 = arith.constant 0 : index
    %c0_237 = arith.constant 0 : index
    %c1116 = arith.constant 1116 : index
    %543 = vector.load %arg24[%c0_236, %c0_237, %c1116] : memref<1x1x1884xf32, #tpu.memory_space<vmem>>, vector<1x1x64xf32>
    %544 = vector.shape_cast %543 : vector<1x1x64xf32> to vector<1x64xf32>
    %545 = vector.broadcast %544 : vector<1x64xf32> to vector<32x64xf32>
    %546 = arith.addf %542, %545 : vector<32x64xf32>
    %cst_238 = arith.constant 0.000000e+00 : f32
    %547 = vector.broadcast %cst_238 : f32 to vector<32x64xf32>
    %548 = arith.maximumf %546, %547 : vector<32x64xf32>
    %c0_239 = arith.constant 0 : index
    %c0_240 = arith.constant 0 : index
    %c0_241 = arith.constant 0 : index
    %549 = vector.load %arg20[%c0_239, %c0_240, %c0_241] : memref<1x64x64xf32, #tpu.memory_space<vmem>>, vector<1x64x64xf32>
    %550 = vector.shape_cast %549 : vector<1x64x64xf32> to vector<64x64xf32>
    %cst_242 = arith.constant dense<0.000000e+00> : vector<32x64xf32>
    %551 = tpu.matmul %548, %550, %cst_242 {dimension_numbers = #tpu.dot_dimension_numbers<[1], [0], [0], [1], [0, 0, 1, 1], [], []>} : vector<32x64xf32>, vector<64x64xf32>, vector<32x64xf32> -> vector<32x64xf32>
    %c0_243 = arith.constant 0 : index
    %c0_244 = arith.constant 0 : index
    %c1180 = arith.constant 1180 : index
    %552 = vector.load %arg24[%c0_243, %c0_244, %c1180] : memref<1x1x1884xf32, #tpu.memory_space<vmem>>, vector<1x1x64xf32>
    %553 = vector.shape_cast %552 : vector<1x1x64xf32> to vector<1x64xf32>
    %554 = vector.broadcast %553 : vector<1x64xf32> to vector<32x64xf32>
    %555 = arith.addf %551, %554 : vector<32x64xf32>
    %cst_245 = arith.constant 0.000000e+00 : f32
    %556 = vector.broadcast %cst_245 : f32 to vector<32x64xf32>
    %557 = arith.maximumf %555, %556 : vector<32x64xf32>
    %c0_246 = arith.constant 0 : index
    %c0_247 = arith.constant 0 : index
    %c0_248 = arith.constant 0 : index
    %558 = vector.load %arg21[%c0_246, %c0_247, %c0_248] : memref<1x64x128xf32, #tpu.memory_space<vmem>>, vector<1x64x128xf32>
    %559 = vector.shape_cast %558 : vector<1x64x128xf32> to vector<64x128xf32>
    %cst_249 = arith.constant dense<0.000000e+00> : vector<32x128xf32>
    %560 = tpu.matmul %557, %559, %cst_249 {dimension_numbers = #tpu.dot_dimension_numbers<[1], [0], [0], [1], [0, 0, 1, 1], [], []>} : vector<32x64xf32>, vector<64x128xf32>, vector<32x128xf32> -> vector<32x128xf32>
    %c0_250 = arith.constant 0 : index
    %c0_251 = arith.constant 0 : index
    %c1244 = arith.constant 1244 : index
    %561 = vector.load %arg24[%c0_250, %c0_251, %c1244] : memref<1x1x1884xf32, #tpu.memory_space<vmem>>, vector<1x1x128xf32>
    %562 = vector.shape_cast %561 : vector<1x1x128xf32> to vector<1x128xf32>
    %563 = vector.broadcast %562 : vector<1x128xf32> to vector<32x128xf32>
    %564 = arith.addf %560, %563 : vector<32x128xf32>
    %cst_252 = arith.constant 0.000000e+00 : f32
    %565 = vector.broadcast %cst_252 : f32 to vector<32x128xf32>
    %566 = arith.maximumf %564, %565 : vector<32x128xf32>
    %c0_253 = arith.constant 0 : index
    %c0_254 = arith.constant 0 : index
    %c0_255 = arith.constant 0 : index
    %567 = vector.load %arg22[%c0_253, %c0_254, %c0_255] : memref<1x128x512xf32, #tpu.memory_space<vmem>>, vector<1x128x512xf32>
    %568 = vector.shape_cast %567 : vector<1x128x512xf32> to vector<128x512xf32>
    %cst_256 = arith.constant dense<0.000000e+00> : vector<32x512xf32>
    %569 = tpu.matmul %566, %568, %cst_256 {dimension_numbers = #tpu.dot_dimension_numbers<[1], [0], [0], [1], [0, 0, 1, 1], [], []>} : vector<32x128xf32>, vector<128x512xf32>, vector<32x512xf32> -> vector<32x512xf32>
    %c0_257 = arith.constant 0 : index
    %c0_258 = arith.constant 0 : index
    %c1372 = arith.constant 1372 : index
    %570 = vector.load %arg24[%c0_257, %c0_258, %c1372] : memref<1x1x1884xf32, #tpu.memory_space<vmem>>, vector<1x1x512xf32>
    %571 = vector.shape_cast %570 : vector<1x1x512xf32> to vector<1x512xf32>
    %572 = vector.broadcast %571 : vector<1x512xf32> to vector<32x512xf32>
    %573 = arith.addf %569, %572 : vector<32x512xf32>
    %cst_259 = arith.constant 0.000000e+00 : f32
    %574 = vector.broadcast %cst_259 : f32 to vector<32x512xf32>
    %575 = arith.maximumf %573, %574 : vector<32x512xf32>
    %c0_260 = arith.constant 0 : index
    %c0_261 = arith.constant 0 : index
    %c0_262 = arith.constant 0 : index
    %576 = vector.load %arg23[%c0_260, %c0_261, %c0_262] : memref<1x512x1xf32, #tpu.memory_space<vmem>>, vector<1x512x1xf32>
    %577 = vector.shape_cast %576 : vector<1x512x1xf32> to vector<512x1xf32>
    %cst_263 = arith.constant dense<0.000000e+00> : vector<32x1xf32>
    %578 = tpu.matmul %575, %577, %cst_263 {dimension_numbers = #tpu.dot_dimension_numbers<[1], [0], [0], [1], [0, 0, 1, 1], [], []>} : vector<32x512xf32>, vector<512x1xf32>, vector<32x1xf32> -> vector<32x1xf32>
    %579 = vector.shape_cast %13 : vector<32x3xf32> to vector<2x16x3xf32>
    "tpu.trace_start"() <{level = 10 : i32, message = "bqk,bkd->bqd"}> : () -> ()
    %cst_264 = arith.constant dense<0.000000e+00> : vector<2x16x3xf32>
    %580 = tpu.matmul %426, %579, %cst_264 {dimension_numbers = #tpu.dot_dimension_numbers<[2], [1], [1], [2], [0, 0, 0, 1, 1, 2], [0], [0]>} : vector<2x16x16xf32>, vector<2x16x3xf32>, vector<2x16x3xf32> -> vector<2x16x3xf32>
    "tpu.trace_stop"() : () -> ()
    %581 = vector.shape_cast %580 : vector<2x16x3xf32> to vector<32x3xf32>
    %582 = arith.addf %530, %581 : vector<32x3xf32>
    %583 = arith.subf %582, %9 : vector<32x3xf32>
    %584 = tpu.concatenate %583, %578 in 1 : vector<32x3xf32>, vector<32x1xf32> -> vector<32x4xf32>
    %c0_265 = arith.constant 0 : index
    %c0_266 = arith.constant 0 : index
    %c0_267 = arith.constant 0 : index
    %585 = vector.load %arg25[%c0_265, %c0_266, %c0_267] : memref<1x32x4xf32, #tpu.memory_space<vmem>>, vector<1x32x4xf32>
    %586 = vector.shape_cast %585 : vector<1x32x4xf32> to vector<32x4xf32>
    %587 = vector.shape_cast %584 : vector<32x4xf32> to vector<1x32x4xf32>
    tpu.vector_store %arg25[%c0_265, %c0_266, %c0_267], %587 {strides = array<i32>} : memref<1x32x4xf32, #tpu.memory_space<vmem>>, vector<1x32x4xf32>,
    return
  }
  func.func @transform_0(%arg0: i32) -> (i32, i32, i32) {
    %c0_i32 = arith.constant 0 : i32
    %c0_i32_0 = arith.constant 0 : i32
    %c0_i32_1 = arith.constant 0 : i32
    %c0_i32_2 = arith.constant 0 : i32
    return %c0_i32, %c0_i32_0, %c0_i32_1 : i32, i32, i32
  }
  func.func @transform_1(%arg0: i32) -> (i32, i32, i32) {
    %c0_i32 = arith.constant 0 : i32
    %c0_i32_0 = arith.constant 0 : i32
    %c0_i32_1 = arith.constant 0 : i32
    %c0_i32_2 = arith.constant 0 : i32
    return %c0_i32, %c0_i32_0, %c0_i32_1 : i32, i32, i32
  }
  func.func @transform_2(%arg0: i32) -> (i32, i32, i32) {
    %c0_i32 = arith.constant 0 : i32
    %c0_i32_0 = arith.constant 0 : i32
    %c0_i32_1 = arith.constant 0 : i32
    return %arg0, %c0_i32, %c0_i32_0 : i32, i32, i32
  }
  func.func @transform_3(%arg0: i32) -> (i32, i32, i32) {
    %c0_i32 = arith.constant 0 : i32
    %c0_i32_0 = arith.constant 0 : i32
    %c0_i32_1 = arith.constant 0 : i32
    return %arg0, %c0_i32, %c0_i32_0 : i32, i32, i32
  }
  func.func @transform_4(%arg0: i32) -> (i32, i32, i32) {
    %c0_i32 = arith.constant 0 : i32
    %c0_i32_0 = arith.constant 0 : i32
    %c0_i32_1 = arith.constant 0 : i32
    return %arg0, %c0_i32, %c0_i32_0 : i32, i32, i32
  }
  func.func @transform_5(%arg0: i32) -> (i32, i32, i32) {
    %c0_i32 = arith.constant 0 : i32
    %c0_i32_0 = arith.constant 0 : i32
    %c0_i32_1 = arith.constant 0 : i32
    return %arg0, %c0_i32, %c0_i32_0 : i32, i32, i32
  }
  func.func @transform_6(%arg0: i32) -> (i32, i32, i32) {
    %c0_i32 = arith.constant 0 : i32
    %c0_i32_0 = arith.constant 0 : i32
    %c0_i32_1 = arith.constant 0 : i32
    return %arg0, %c0_i32, %c0_i32_0 : i32, i32, i32
  }
  func.func @transform_7(%arg0: i32) -> (i32, i32, i32) {
    %c0_i32 = arith.constant 0 : i32
    %c0_i32_0 = arith.constant 0 : i32
    %c0_i32_1 = arith.constant 0 : i32
    return %arg0, %c0_i32, %c0_i32_0 : i32, i32, i32
  }
  func.func @transform_8(%arg0: i32) -> (i32, i32, i32) {
    %c0_i32 = arith.constant 0 : i32
    %c0_i32_0 = arith.constant 0 : i32
    %c0_i32_1 = arith.constant 0 : i32
    return %arg0, %c0_i32, %c0_i32_0 : i32, i32, i32
  }
  func.func @transform_9(%arg0: i32) -> (i32, i32, i32) {
    %c0_i32 = arith.constant 0 : i32
    %c0_i32_0 = arith.constant 0 : i32
    %c0_i32_1 = arith.constant 0 : i32
    return %arg0, %c0_i32, %c0_i32_0 : i32, i32, i32
  }
  func.func @transform_10(%arg0: i32) -> (i32, i32, i32) {
    %c0_i32 = arith.constant 0 : i32
    %c0_i32_0 = arith.constant 0 : i32
    %c0_i32_1 = arith.constant 0 : i32
    return %arg0, %c0_i32, %c0_i32_0 : i32, i32, i32
  }
  func.func @transform_11(%arg0: i32) -> (i32, i32, i32) {
    %c0_i32 = arith.constant 0 : i32
    %c0_i32_0 = arith.constant 0 : i32
    %c0_i32_1 = arith.constant 0 : i32
    return %arg0, %c0_i32, %c0_i32_0 : i32, i32, i32
  }
  func.func @transform_12(%arg0: i32) -> (i32, i32, i32) {
    %c0_i32 = arith.constant 0 : i32
    %c0_i32_0 = arith.constant 0 : i32
    %c0_i32_1 = arith.constant 0 : i32
    return %arg0, %c0_i32, %c0_i32_0 : i32, i32, i32
  }
  func.func @transform_13(%arg0: i32) -> (i32, i32, i32) {
    %c0_i32 = arith.constant 0 : i32
    %c0_i32_0 = arith.constant 0 : i32
    %c0_i32_1 = arith.constant 0 : i32
    return %arg0, %c0_i32, %c0_i32_0 : i32, i32, i32
  }
  func.func @transform_14(%arg0: i32) -> (i32, i32, i32) {
    %c0_i32 = arith.constant 0 : i32
    %c0_i32_0 = arith.constant 0 : i32
    %c0_i32_1 = arith.constant 0 : i32
    return %arg0, %c0_i32, %c0_i32_0 : i32, i32, i32
  }
  func.func @transform_15(%arg0: i32) -> (i32, i32, i32) {
    %c0_i32 = arith.constant 0 : i32
    %c0_i32_0 = arith.constant 0 : i32
    %c0_i32_1 = arith.constant 0 : i32
    return %arg0, %c0_i32, %c0_i32_0 : i32, i32, i32
  }
  func.func @transform_16(%arg0: i32) -> (i32, i32, i32) {
    %c0_i32 = arith.constant 0 : i32
    %c0_i32_0 = arith.constant 0 : i32
    %c0_i32_1 = arith.constant 0 : i32
    return %arg0, %c0_i32, %c0_i32_0 : i32, i32, i32
  }
  func.func @transform_17(%arg0: i32) -> (i32, i32, i32) {
    %c0_i32 = arith.constant 0 : i32
    %c0_i32_0 = arith.constant 0 : i32
    %c0_i32_1 = arith.constant 0 : i32
    return %arg0, %c0_i32, %c0_i32_0 : i32, i32, i32
  }
  func.func @transform_18(%arg0: i32) -> (i32, i32, i32) {
    %c0_i32 = arith.constant 0 : i32
    %c0_i32_0 = arith.constant 0 : i32
    %c0_i32_1 = arith.constant 0 : i32
    return %arg0, %c0_i32, %c0_i32_0 : i32, i32, i32
  }
  func.func @transform_19(%arg0: i32) -> (i32, i32, i32) {
    %c0_i32 = arith.constant 0 : i32
    %c0_i32_0 = arith.constant 0 : i32
    %c0_i32_1 = arith.constant 0 : i32
    return %arg0, %c0_i32, %c0_i32_0 : i32, i32, i32
  }
  func.func @transform_20(%arg0: i32) -> (i32, i32, i32) {
    %c0_i32 = arith.constant 0 : i32
    %c0_i32_0 = arith.constant 0 : i32
    %c0_i32_1 = arith.constant 0 : i32
    return %arg0, %c0_i32, %c0_i32_0 : i32, i32, i32
  }
  func.func @transform_21(%arg0: i32) -> (i32, i32, i32) {
    %c0_i32 = arith.constant 0 : i32
    %c0_i32_0 = arith.constant 0 : i32
    %c0_i32_1 = arith.constant 0 : i32
    return %arg0, %c0_i32, %c0_i32_0 : i32, i32, i32
  }
  func.func @transform_22(%arg0: i32) -> (i32, i32, i32) {
    %c0_i32 = arith.constant 0 : i32
    %c0_i32_0 = arith.constant 0 : i32
    %c0_i32_1 = arith.constant 0 : i32
    return %arg0, %c0_i32, %c0_i32_0 : i32, i32, i32
  }
  func.func @transform_23(%arg0: i32) -> (i32, i32, i32) {
    %c0_i32 = arith.constant 0 : i32
    %c0_i32_0 = arith.constant 0 : i32
    %c0_i32_1 = arith.constant 0 : i32
    return %arg0, %c0_i32, %c0_i32_0 : i32, i32, i32
  }
  func.func @transform_24(%arg0: i32) -> (i32, i32, i32) {
    %c0_i32 = arith.constant 0 : i32
    %c0_i32_0 = arith.constant 0 : i32
    %c0_i32_1 = arith.constant 0 : i32
    return %arg0, %c0_i32, %c0_i32_0 : i32, i32, i32
  }
}

</mosaic_0001>

<bundles_post_ra>
// kernel: model_forward.2
= control target key start
LH: loop header
LB: loop body
LE: loop exit
PB: predicated region body
PF: predicated region fallthrough
CT: control target
= control target key end

     0   :  { %s2201_s24 = smov 0   ;;  %s2580_s0 = inlined_call_operand.vmem [shape: f32[2,128,6], index: 0, kind: input, shape index: {}]   ;;  %s2581_s1 = inlined_call_operand.vmem [shape: f32[2,6,64], index: 1, kind: input, shape index: {}]   ;;  %s2582_s2 = inlined_call_operand.vmem [shape: f32[2,64,64], index: 2, kind: input, shape index: {}]   ;;  %s2583_s3 = inlined_call_operand.vmem [shape: f32[2,64,128], index: 3, kind: input, shape index: {}]   ;;  %s2584_s4 = inlined_call_operand.vmem [shape: f32[2,128,256], index: 4, kind: input, shape index: {}]   ;;  %s2585_s5 = inlined_call_operand.vmem [shape: f32[2,512,32], index: 5, kind: input, shape index: {}]   ;;  %s2586_s6 = inlined_call_operand.vmem [shape: f32[2,1,544], index: 6, kind: input, shape index: {}]   ;;  %s2587_s7 = inlined_call_operand.vmem [shape: f32[2,32,32], index: 7, kind: output, shape index: {}]  }
   0x1 LB: > { %s1803_s25 = sadd.s32 4294967295, %s2157_s24   ;;  %p1807_p0 = scmp.ge.s32.totalorder %s2157_s24, 1  ;;  %s2157_s24 = sphi %s2201_s24, %s17_s24  }
   0x2   : > { %p295_p1 = scmp.lt.s32.totalorder %s2157_s24, 3 }
   0x4   : > { %p296_p2 = pnand %p1807_p0, %p295_p1 }
   0x5   : > { %p355_p3 = scmp.lt.s32.totalorder (!%p296_p2), %s1803_s25, 1  ;;  %s2159_s22 = smov (!%p296_p2), 64  }
   0x6   : > { %299 = sbr.rel (%p296_p2) target bundleno = 1080 (0x438), region = 48 }
   0xb   : > { %s2589_s25 = smov (!%p355_p3, %s1803_s25), 1  ;;  %vm466_vm0 = vcmask 1045504   ;;  %vm417_vm1 = vcmask 48128   ;;  %vm642_vm2 = vcmask 523264   ;;  %vm1357_vm3 = vcmask 1048064  }
   0xc   : > { %s1875_s26 = sshll.u32 %s2589_s25, 7  ;;  %s1810_s27 = sshll.u32 %s2589_s25, 3  ;;  %vm1671_vm4 = vcmask 261120  }
   0xd   : > { %s2216_s30 = scalar_lea.vmem %s2580_s0, %s1875_s26  ;;  %s363_s10 = scalar_lea.vmem %s2581_s1, %s1810_s27 }
   0xe   : > { %v409_v0 = vld [vmem:[%s363_s10] sm:$0x3f]  ;;  %v394_v2 = vld [vmem:[%s2216_s30 + $0x8] sm:$0xff]  ;;  %v395_v3 = vld [vmem:[%s2216_s30 + $0x10] sm:$0xff]  ;;  %s1876_s11 = sshll.u32 %s2589_s25, 6  ;;  %s2140_s15 = smul.u32 5, %s2589_s25 }
   0xf   : > { %v393_v1 = vld [vmem:[%s2216_s30] sm:$0xff]  ;;  %2034 = vmatprep.subr.msk.mxu0 %vm466_vm0, %v409_v0  ;;  %s2232_s14 = scalar_lea.vmem %s2582_s2, %s1876_s11  ;;  %v396_v4 = vld [vmem:[%s2216_s30 + $0x18] sm:$0xff]  ;;  %v398_v9 = vld [vmem:[%s2216_s30 + $0x28] sm:$0xff]  ;;  %s2283_s21 = scalar_lea.vmem %s2583_s3, %s1876_s11 }
  0x10   : > { %2036 = vmatprep.mubr.msk.f32.mxu0 %vm417_vm1, %v393_v1  ;;  %2035 = vmatpush3.msk.msra.mxu0 %vm466_vm0, %v409_v0  ;;  %v397_v5 = vld [vmem:[%s2216_s30 + $0x20] sm:$0xff]  ;;  %v638_v6 = vld [vmem:[%s2232_s14 + $0x38] sm:$0xff]  ;;  %v637_v7 = vld [vmem:[%s2232_s14 + $0x30] sm:$0xff]  ;;  %s2273_s18 = scalar_lea.vmem %s2586_s6, %s2140_s15  ;;  %s1878_s23 = sshll.u32 %s2589_s25, 8 }
  0x11   : > { %2037 = vmatmul.mubr.msk.f32.vlgmr.msra.gmra.mxu0 %vm417_vm1, %v394_v2  ;;  %2060 = vmatprep.subr.mxu1 %v638_v6  ;;  %v636_v8 = vld [vmem:[%s2232_s14 + $0x28] sm:$0xff]  ;;  %v399_v10 = vld [vmem:[%s2216_s30 + $0x30] sm:$0xff]  ;;  %v635_v11 = vld [vmem:[%s2232_s14 + $0x20] sm:$0xff]  ;;  %s2363_s28 = scalar_lea.vmem %s2584_s4, %s1878_s23  ;;  %s1879_s29 = sshll.u32 %s2589_s25, 9 }
  0x12   : > { %2039 = vmatprep.mubr.msk.f32.mxu0 %vm417_vm1, %v395_v3  ;;  %2061 = vmatpush3.msra.mxu1 %v638_v6  ;;  %v400_v12 = vld [vmem:[%s2216_s30 + $0x38] sm:$0xff]  ;;  %v401_v13 = vld [vmem:[%s2216_s30 + $0x40] sm:$0xff]  ;;  %v402_v14 = vld [vmem:[%s2216_s30 + $0x48] sm:$0xff]  ;;  %s2415_s9 = scalar_lea.vmem %s2585_s5, %s1879_s29  ;;  %s1880_s10 = sshll.u32 %s2589_s25, 5 }
  0x13   : > { %2062 = vmatprep.subr.mxu1 %v637_v7  ;;  %v403_v15 = vld [vmem:[%s2216_s30 + $0x50] sm:$0xff]  ;;  %v404_v16 = vld [vmem:[%s2216_s30 + $0x58] sm:$0xff]  ;;  %v405_v17 = vld [vmem:[%s2216_s30 + $0x60] sm:$0xff]  ;;  %s392_s13 = scalar_lea.vmem %s2587_s7, %s1880_s10 }
  0x14   : > { %2063 = vmatpush3.msra.mxu1 %v637_v7  ;;  %v406_v18 = vld [vmem:[%s2216_s30 + $0x68] sm:$0xff]  ;;  %v407_v19 = vld [vmem:[%s2216_s30 + $0x70] sm:$0xff]  ;;  %v408_v20 = vld [vmem:[%s2216_s30 + $0x78] sm:$0xff] }
  0x15   : > { %2040 = vmatmul.mubr.msk.f32.gmra.mxu0 %vm417_vm1, %v396_v4  ;;  %2064 = vmatprep.subr.mxu1 %v636_v8  ;;  %v634_v21 = vld [vmem:[%s2232_s14 + $0x18] sm:$0xff]  ;;  %v633_v22 = vld [vmem:[%s2232_s14 + $0x10] sm:$0xff]  ;;  %v632_v23 = vld [vmem:[%s2232_s14 + $0x8] sm:$0xff] }
  0x16   : > { %2042 = vmatprep.mubr.msk.f32.mxu0 %vm417_vm1, %v397_v5  ;;  %2065 = vmatpush3.msra.mxu1 %v636_v8  ;;  %v631_v24 = vld [vmem:[%s2232_s14] sm:$0xff]  ;;  %v859_v26 = vld [vmem:[%s2283_s21 + $0x38] sm:$0xff]  ;;  %v858_v27 = vld [vmem:[%s2283_s21 + $0x30] sm:$0xff] }
  0x17   : > { %2066 = vmatprep.subr.mxu1 %v635_v11  ;;  %v2276_v25 = vld [vmem:[%s2273_s18] ss:$0 sm:$0xff]  ;;  %2100 = vmatprep.subr.mxu0 %v859_v26  ;;  %v857_v28 = vld [vmem:[%s2283_s21 + $0x28] sm:$0xff]  ;;  %v855_v30 = vld [vmem:[%s2283_s21 + $0x18] sm:$0xff] }
  0x18   : > { %2067 = vmatpush3.msra.mxu1 %v635_v11  ;;  %639 = vrot.lane.b32.xlu0 %v2276_v25, %s2159_s22  ;;  %v856_v29 = vld [vmem:[%s2283_s21 + $0x20] sm:$0xff]  ;;  %v854_v31 = vld [vmem:[%s2283_s21 + $0x10] sm:$0xff]  ;;  %v853_v32 = vld [vmem:[%s2283_s21 + $0x8] sm:$0xff] }
  0x19   : > { %2043 = vmatmul.mubr.msk.f32.gmra.mxu0 %vm417_vm1, %v398_v9  ;;  %2068 = vmatprep.subr.mxu1 %v634_v21 }
  0x1a   : > { %2045 = vmatprep.mubr.msk.f32.mxu0 %vm417_vm1, %v399_v10  ;;  %2069 = vmatpush3.msra.mxu1 %v634_v21 }
  0x1b   : > { %2070 = vmatprep.subr.mxu1 %v633_v22  ;;  %2101 = vmatpush3.msra.mxu0 %v859_v26 }
  0x1c   : > { %2071 = vmatpush3.msra.mxu1 %v633_v22  ;;  %2102 = vmatprep.subr.mxu0 %v858_v27 }
  0x1d   : > { %2046 = vmatmul.mubr.msk.f32.gmra.mxu0 %vm417_vm1, %v400_v12  ;;  %2072 = vmatprep.subr.mxu1 %v632_v23 }
  0x1e   : > { %2048 = vmatprep.mubr.msk.f32.mxu0 %vm417_vm1, %v401_v13  ;;  %2073 = vmatpush3.msra.mxu1 %v632_v23 }
  0x1f   : > { %2074 = vmatprep.subr.mxu1 %v631_v24  ;;  %2103 = vmatpush3.msra.mxu0 %v858_v27 }
  0x20   : > { %2075 = vmatpush3.msra.mxu1 %v631_v24  ;;  %2104 = vmatprep.subr.mxu0 %v857_v28 }
  0x21   : > { %2049 = vmatmul.mubr.msk.f32.gmra.mxu0 %vm417_vm1, %v402_v14 }
  0x22   : > { %2051 = vmatprep.mubr.msk.f32.mxu0 %vm417_vm1, %v403_v15  ;;  %2105 = vmatpush3.msra.mxu0 %v857_v28 }
  0x23   : > { %2106 = vmatprep.subr.mxu0 %v856_v29 }
  0x24   : > { %2107 = vmatpush3.msra.mxu0 %v856_v29 }
  0x25   : > { %2052 = vmatmul.mubr.msk.f32.gmra.mxu0 %vm417_vm1, %v404_v16  ;;  %2108 = vmatprep.subr.mxu0 %v855_v30 }
  0x26   : > { %2054 = vmatprep.mubr.msk.f32.mxu0 %vm417_vm1, %v405_v17  ;;  %2109 = vmatpush3.msra.mxu0 %v855_v30  ;;  %v852_v30 = vld [vmem:[%s2283_s21] sm:$0xff] }
  0x27   : > { %2110 = vmatprep.subr.mxu0 %v854_v31 }
  0x28   : > { %2111 = vmatpush3.msra.mxu0 %v854_v31 }
  0x29   : > { %2055 = vmatmul.mubr.msk.f32.gmra.mxu0 %vm417_vm1, %v406_v18  ;;  %2112 = vmatprep.subr.mxu0 %v853_v32 }
  0x2a   : > { %2057 = vmatprep.mubr.msk.f32.mxu0 %vm417_vm1, %v407_v19  ;;  %2113 = vmatpush3.msra.mxu0 %v853_v32 }
  0x2b   : > { %2114 = vmatprep.subr.mxu0 %v852_v30 }
  0x2c   : > { %2115 = vmatpush3.msra.mxu0 %v852_v30 }
  0x2d   : > { %2058 = vmatmul.mubr.msk.f32.gmra.mxu0 %vm417_vm1, %v408_v20 }
  0xd1   : > { %v2038_v33 = vpop.f32.mrf.mxu0 }
  0xd2   : > { %v542_v34 = vadd.f32 %v2038_v33, %v2276_v25 }
  0xd3   : > { %v536_v35 = vpop.f32.mrf.mxu0 }
  0xd4   : > { %v537_v36 = vadd.f32 %v2276_v25, %v536_v35  ;;  %v616_v40 = vmax.f32 %v542_v34, 0.0 }
  0xd5   : > { %v2041_v37 = vpop.f32.mrf.mxu0 }
  0xd6   : > { %v615_v38 = vmax.f32 %v537_v36, 0.0  ;;  %v552_v39 = vadd.f32 %v2041_v37, %v2276_v25 }
  0xd7   : > { %v546_v41 = vpop.f32.mrf.mxu0 }
  0xd8   : > { %v547_v42 = vadd.f32 %v2276_v25, %v546_v41  ;;  %2076 = vmatprep.mubr.msk.f32.mxu1 %vm642_vm2, %v615_v38  ;;  %v618_v43 = vmax.f32 %v552_v39, 0.0 }
  0xd9   : > { %v2044_v44 = vpop.f32.mrf.mxu0  ;;  %2077 = vmatmul.mubr.msk.f32.vlgmr.msra.gmra.mxu1 %vm642_vm2, %v616_v40 }
  0xda   : > { %v617_v45 = vmax.f32 %v547_v42, 0.0  ;;  %v562_v46 = vadd.f32 %v2044_v44, %v2276_v25 }
  0xdb   : > { %v556_v47 = vpop.f32.mrf.mxu0 }
  0xdc   : > { %v557_v48 = vadd.f32 %v2276_v25, %v556_v47  ;;  %2079 = vmatprep.mubr.msk.f32.mxu1 %vm642_vm2, %v617_v45  ;;  %v620_v51 = vmax.f32 %v562_v46, 0.0 }
  0xdd   : > { %v2047_v49 = vpop.f32.mrf.mxu0  ;;  %2080 = vmatmul.mubr.msk.f32.gmra.mxu1 %vm642_vm2, %v618_v43 }
  0xde   : > { %v619_v50 = vmax.f32 %v557_v48, 0.0  ;;  %v572_v52 = vadd.f32 %v2047_v49, %v2276_v25  ;;  %v1314_v4 = vmax.f32 %v616_v40, %v620_v51 }
  0xdf   : > { %v566_v53 = vpop.f32.mrf.mxu0 }
  0xe0   : > { %v567_v54 = vadd.f32 %v2276_v25, %v566_v53  ;;  %2082 = vmatprep.mubr.msk.f32.mxu1 %vm642_vm2, %v619_v50  ;;  %v622_v57 = vmax.f32 %v572_v52, 0.0  ;;  %v1313_v9 = vmax.f32 %v615_v38, %v619_v50 }
  0xe1   : > { %v2050_v55 = vpop.f32.mrf.mxu0  ;;  %2083 = vmatmul.mubr.msk.f32.gmra.mxu1 %vm642_vm2, %v620_v51 }
  0xe2   : > { %v621_v56 = vmax.f32 %v567_v54, 0.0  ;;  %v582_v58 = vadd.f32 %v2050_v55, %v2276_v25  ;;  %v1316_v13 = vmax.f32 %v618_v43, %v622_v57 }
  0xe3   : > { %v576_v59 = vpop.f32.mrf.mxu0 }
  0xe4   : > { %v577_v60 = vadd.f32 %v2276_v25, %v576_v59  ;;  %2085 = vmatprep.mubr.msk.f32.mxu1 %vm642_vm2, %v621_v56  ;;  %v624_v63 = vmax.f32 %v582_v58, 0.0  ;;  %v1315_v19 = vmax.f32 %v617_v45, %v621_v56 }
  0xe5   : > { %v2053_v61 = vpop.f32.mrf.mxu0  ;;  %2086 = vmatmul.mubr.msk.f32.gmra.mxu1 %vm642_vm2, %v622_v57 }
  0xe6   : > { %v623_v62 = vmax.f32 %v577_v60, 0.0  ;;  %v592_v0 = vadd.f32 %v2053_v61, %v2276_v25  ;;  %v1318_v10 = vmax.f32 %v1314_v4, %v624_v63  ;;  %v1105_v4 = vld [vmem:[%s2363_s28 + $0xe8] sm:$0xff] }
  0xe7   : > { %v586_v1 = vpop.f32.mrf.mxu0 }
  0xe8   : > { %v587_v2 = vadd.f32 %v2276_v25, %v586_v1  ;;  %2088 = vmatprep.mubr.msk.f32.mxu1 %vm642_vm2, %v623_v62  ;;  %v626_v7 = vmax.f32 %v592_v0, 0.0  ;;  %v1317_v15 = vmax.f32 %v1313_v9, %v623_v62 }
  0xe9   : > { %v2056_v3 = vpop.f32.mrf.mxu0  ;;  %2089 = vmatmul.mubr.msk.f32.gmra.mxu1 %vm642_vm2, %v624_v63 }
  0xea   : > { %v625_v5 = vmax.f32 %v587_v2, 0.0  ;;  %v602_v6 = vadd.f32 %v2056_v3, %v2276_v25  ;;  %v1320_v21 = vmax.f32 %v1316_v13, %v626_v7  ;;  %v1107_v2 = vld [vmem:[%s2363_s28 + $0xf8] sm:$0xff]  ;;  %v1106_v3 = vld [vmem:[%s2363_s28 + $0xf0] sm:$0xff] }
  0xeb   : > { %v596_v8 = vpop.f32.mrf.mxu0  ;;  %1120 = vmatprep.subr.mxu1 %v1107_v2  ;;  %v1454_v2 = vld [vmem:[%s2415_s9 + $0xe0] sm:$0xff] }
  0xec   : > { %v628_v11 = vmax.f32 %v602_v6, 0.0  ;;  %v597_v12 = vadd.f32 %v2276_v25, %v596_v8  ;;  %2091 = vmatprep.mubr.msk.f32.mxu1 %vm642_vm2, %v625_v5  ;;  %v1319_v26 = vmax.f32 %v1315_v19, %v625_v5  ;;  %v1104_v8 = vld [vmem:[%s2363_s28 + $0xe0] sm:$0xff]  ;;  %1121 = vmatpush1.msra.mxu1 %v1106_v3 }
  0xed   : > { %v2059_v14 = vpop.f32.mrf.mxu0  ;;  %2092 = vmatmul.mubr.msk.f32.gmra.mxu1 %vm642_vm2, %v626_v7  ;;  %1122 = vmatprep.subr.mxu1 %v1105_v4  ;;  %v1438_v3 = vld [vmem:[%s2415_s9 + $0x60] sm:$0xff]  ;;  %v1453_v4 = vld [vmem:[%s2415_s9 + $0xd8] sm:$0xff] }
  0xee   : > { %v1322_v16 = vmax.f32 %v1318_v10, %v628_v11  ;;  %v627_v17 = vmax.f32 %v597_v12, 0.0  ;;  %v612_v18 = vadd.f32 %v2059_v14, %v2276_v25  ;;  %1123 = vmatpush1.msra.mxu1 %v1104_v8  ;;  %v1451_v8 = vld [vmem:[%s2415_s9 + $0xc8] sm:$0xff] }
  0xef   : > { %v606_v20 = vpop.f32.mrf.mxu0 }
  0xf0   : > { %1326 = vst.msk [vmem:[#allocation2 + $0x20] sm:$0xff] %vm642_vm2, %v1322_v16  ;;  %v1321_v22 = vmax.f32 %v1317_v15, %v627_v17  ;;  %v630_v23 = vmax.f32 %v612_v18, 0.0  ;;  %v607_v24 = vadd.f32 %v2276_v25, %v606_v20  ;;  %2094 = vmatprep.mubr.msk.f32.mxu1 %vm642_vm2, %v627_v17  ;;  %v2331_v25 = vpop.permute.xlu0 %639  ;;  %v1102_v16 = vld [vmem:[%s2363_s28 + $0xd0] sm:$0xff] }
  0xf1   : > { %2095 = vmatmul.mubr.msk.f32.gmra.mxu1 %vm642_vm2, %v628_v11  ;;  %v1103_v11 = vld [vmem:[%s2363_s28 + $0xd8] sm:$0xff] }
  0xf2   : > { %1325 = vst.msk [vmem:[#allocation2] sm:$0xff] %vm642_vm2, %v1321_v22  ;;  %v1324_v27 = vmax.f32 %v1320_v21, %v630_v23  ;;  %v629_v28 = vmax.f32 %v607_v24, 0.0  ;;  %1124 = vmatprep.subr.mxu1 %v1103_v11  ;;  %v1101_v22 = vld [vmem:[%s2363_s28 + $0xc8] sm:$0xff]  ;;  %v1434_v11 = vld [vmem:[%s2415_s9 + $0x40] sm:$0xff] }
  0xf3   : > { %1125 = vmatpush1.msra.mxu1 %v1102_v16  ;;  %v1447_v16 = vld [vmem:[%s2415_s9 + $0xa8] sm:$0xff] }
  0xf4   : > { %1328 = vst.msk [vmem:[#allocation2 + $0x60] sm:$0xff] %vm642_vm2, %v1324_v27  ;;  %v1323_v29 = vmax.f32 %v1319_v26, %v629_v28  ;;  %2097 = vmatprep.mubr.msk.f32.mxu1 %vm642_vm2, %v629_v28  ;;  %v1100_v26 = vld [vmem:[%s2363_s28 + $0xc0] sm:$0xff]  ;;  %1126 = vmatprep.subr.mxu1 %v1101_v22  ;;  %v1444_v22 = vld [vmem:[%s2415_s9 + $0x90] sm:$0xff] }
  0xf5   : > { %2098 = vmatmul.mubr.msk.f32.gmra.mxu1 %vm642_vm2, %v630_v23 }
  0xf6   : > { %1327 = vst.msk [vmem:[#allocation2 + $0x40] sm:$0xff] %vm642_vm2, %v1323_v29  ;;  %1127 = vmatpush1.msra.mxu1 %v1100_v26  ;;  %v1427_v26 = vld [vmem:[%s2415_s9 + $0x8] sm:$0xff] }
 0x199   : > { %v2078_v31 = vpop.f32.mrf.mxu1 }
 0x19a   : > { %v763_v32 = vadd.f32 %v2078_v31, %v2331_v25  ;;  %v1099_v31 = vld [vmem:[%s2363_s28 + $0xb8] sm:$0xff] }
 0x19b   : > { %v757_v33 = vpop.f32.mrf.mxu1  ;;  %1128 = vmatprep.subr.mxu1 %v1099_v31 }
 0x19c   : > { %v758_v34 = vadd.f32 %v757_v33, %v2331_v25  ;;  %v837_v37 = vmax.f32 %v763_v32, 0.0  ;;  %v1098_v32 = vld [vmem:[%s2363_s28 + $0xb0] sm:$0xff] }
 0x19d   : > { %v2081_v35 = vpop.f32.mrf.mxu1  ;;  %1129 = vmatpush1.msra.mxu1 %v1098_v32 }
 0x19e   : > { %v836_v36 = vmax.f32 %v758_v34, 0.0  ;;  %v2336_v38 = vadd.f32 %v2081_v35, %v2331_v25 }
 0x19f   : > { %v767_v39 = vpop.f32.mrf.mxu1 }
 0x1a0   : > { %v2339_v40 = vadd.f32 %v767_v39, %v2331_v25  ;;  %2116 = vmatprep.mubr.msk.f32.mxu0 %vm642_vm2, %v836_v36  ;;  %v839_v43 = vmax.f32 %v2336_v38, 0.0  ;;  %v1096_v38 = vld [vmem:[%s2363_s28 + $0xa0] sm:$0xff]  ;;  %v1095_v39 = vld [vmem:[%s2363_s28 + $0x98] sm:$0xff] }
 0x1a1   : > { %v2084_v41 = vpop.f32.mrf.mxu1  ;;  %2117 = vmatmul.mubr.msk.f32.vlgmr.msra.gmra.mxu0 %vm642_vm2, %v837_v37 }
 0x1a2   : > { %v838_v42 = vmax.f32 %v2339_v40, 0.0  ;;  %v783_v44 = vadd.f32 %v2084_v41, %v2331_v25  ;;  %v1094_v40 = vld [vmem:[%s2363_s28 + $0x90] sm:$0xff]  ;;  %v1093_v41 = vld [vmem:[%s2363_s28 + $0x88] sm:$0xff] }
 0x1a3   : > { %v777_v45 = vpop.f32.mrf.mxu1 }
 0x1a4   : > { %v778_v46 = vadd.f32 %v777_v45, %v2331_v25  ;;  %2119 = vmatprep.mubr.msk.f32.mxu0 %vm642_vm2, %v838_v42  ;;  %v841_v49 = vmax.f32 %v783_v44, 0.0  ;;  %v1090_v44 = vld [vmem:[%s2363_s28 + $0x70] sm:$0xff]  ;;  %v1089_v45 = vld [vmem:[%s2363_s28 + $0x68] sm:$0xff] }
 0x1a5   : > { %v2087_v47 = vpop.f32.mrf.mxu1  ;;  %2120 = vmatmul.mubr.msk.f32.gmra.mxu0 %vm642_vm2, %v839_v43 }
 0x1a6   : > { %v840_v48 = vmax.f32 %v778_v46, 0.0  ;;  %v793_v50 = vadd.f32 %v2087_v47, %v2331_v25  ;;  %v1330_v5 = vmax.f32 %v837_v37, %v841_v49  ;;  %v1088_v46 = vld [vmem:[%s2363_s28 + $0x60] sm:$0xff]  ;;  %v1087_v47 = vld [vmem:[%s2363_s28 + $0x58] sm:$0xff] }
 0x1a7   : > { %v787_v51 = vpop.f32.mrf.mxu1 }
 0x1a8   : > { %v788_v52 = vadd.f32 %v787_v51, %v2331_v25  ;;  %2122 = vmatprep.mubr.msk.f32.mxu0 %vm642_vm2, %v840_v48  ;;  %v843_v55 = vmax.f32 %v793_v50, 0.0  ;;  %v1329_v12 = vmax.f32 %v836_v36, %v840_v48  ;;  %v1086_v48 = vld [vmem:[%s2363_s28 + $0x50] sm:$0xff]  ;;  %v1084_v50 = vld [vmem:[%s2363_s28 + $0x40] sm:$0xff]  ;;  %v1083_v51 = vld [vmem:[%s2363_s28 + $0x38] sm:$0xff] }
 0x1a9   : > { %v2090_v53 = vpop.f32.mrf.mxu1  ;;  %2123 = vmatmul.mubr.msk.f32.gmra.mxu0 %vm642_vm2, %v841_v49  ;;  %v1085_v49 = vld [vmem:[%s2363_s28 + $0x48] sm:$0xff] }
 0x1aa   : > { %v842_v54 = vmax.f32 %v788_v52, 0.0  ;;  %v803_v56 = vadd.f32 %v2090_v53, %v2331_v25  ;;  %v1332_v23 = vmax.f32 %v839_v43, %v843_v55  ;;  %v1091_v43 = vld [vmem:[%s2363_s28 + $0x78] sm:$0xff]  ;;  %v1082_v52 = vld [vmem:[%s2363_s28 + $0x30] sm:$0xff]  ;;  %v1081_v53 = vld [vmem:[%s2363_s28 + $0x28] sm:$0xff] }
 0x1ab   : > { %v797_v57 = vpop.f32.mrf.mxu1 }
 0x1ac   : > { %v798_v58 = vadd.f32 %v797_v57, %v2331_v25  ;;  %2125 = vmatprep.mubr.msk.f32.mxu0 %vm642_vm2, %v842_v54  ;;  %v845_v61 = vmax.f32 %v803_v56, 0.0  ;;  %v1331_v27 = vmax.f32 %v838_v42, %v842_v54  ;;  %v1092_v42 = vld [vmem:[%s2363_s28 + $0x80] sm:$0xff]  ;;  %v1079_v56 = vld [vmem:[%s2363_s28 + $0x18] sm:$0xff] }
 0x1ad   : > { %v2093_v59 = vpop.f32.mrf.mxu1  ;;  %2126 = vmatmul.mubr.msk.f32.gmra.mxu0 %vm642_vm2, %v843_v55  ;;  %v1080_v54 = vld [vmem:[%s2363_s28 + $0x20] sm:$0xff]  ;;  %v1457_v55 = vld [vmem:[%s2415_s9 + $0xf8] sm:$0xff] }
 0x1ae   : > { %v844_v60 = vmax.f32 %v798_v58, 0.0  ;;  %v813_v62 = vadd.f32 %v2093_v59, %v2331_v25  ;;  %v1334_v13 = vmax.f32 %v1330_v5, %v845_v61  ;;  %1946 = vmatprep.subr.mxu0 %v1457_v55  ;;  %v1441_v57 = vld [vmem:[%s2415_s9 + $0x78] sm:$0xff]  ;;  %v1078_v58 = vld [vmem:[%s2363_s28 + $0x10] sm:$0xff] }
 0x1af   : > { %v807_v63 = vpop.f32.mrf.mxu1  ;;  %1947 = vmatpush3.msra.mxu0 %v1441_v57  ;;  %v1456_v59 = vld [vmem:[%s2415_s9 + $0xf0] sm:$0xff]  ;;  %v1437_v5 = vld [vmem:[%s2415_s9 + $0x58] sm:$0xff] }
 0x1b0   : > { %v808_v0 = vadd.f32 %v807_v63, %v2331_v25  ;;  %2128 = vmatprep.mubr.msk.f32.mxu0 %vm642_vm2, %v844_v60  ;;  %v847_v9 = vmax.f32 %v813_v62, 0.0  ;;  %v1333_v18 = vmax.f32 %v1329_v12, %v844_v60  ;;  %v1077_v60 = vld [vmem:[%s2363_s28 + $0x8] sm:$0xff]  ;;  %1948 = vmatprep.subr.mxu0 %v1456_v59  ;;  %v1076_v62 = vld [vmem:[%s2363_s28] sm:$0xff]  ;;  %v1449_v12 = vld [vmem:[%s2415_s9 + $0xb8] sm:$0xff] }
 0x1b1   : > { %v2096_v1 = vpop.f32.mrf.mxu1  ;;  %2129 = vmatmul.mubr.msk.f32.gmra.mxu0 %vm642_vm2, %v845_v61  ;;  %v1440_v61 = vld [vmem:[%s2415_s9 + $0x70] sm:$0xff]  ;;  %v1455_v63 = vld [vmem:[%s2415_s9 + $0xe8] sm:$0xff] }
 0x1b2   : > { %v846_v6 = vmax.f32 %v808_v0, 0.0  ;;  %v823_v7 = vadd.f32 %v2096_v1, %v2331_v25  ;;  %v1336_v33 = vmax.f32 %v1332_v23, %v847_v9  ;;  %1949 = vmatpush3.msra.mxu0 %v1440_v61  ;;  %v2160_v0 = vmov 0.0   ;;  %v1439_v1 = vld [vmem:[%s2415_s9 + $0x68] sm:$0xff]  ;;  %v1428_v23 = vld [vmem:[%s2415_s9 + $0x10] sm:$0xff] }
 0x1b3   : > { %v817_v10 = vpop.f32.mrf.mxu1  ;;  %1184 = vmatprep.mubr.f32.mxu1 %v2160_v0  ;;  %1950 = vmatprep.subr.mxu0 %v1455_v63 }
 0x1b4   : > { %v849_v14 = vmax.f32 %v823_v7, 0.0  ;;  %v818_v15 = vadd.f32 %v817_v10, %v2331_v25  ;;  %2131 = vmatprep.mubr.msk.f32.mxu0 %vm642_vm2, %v846_v6  ;;  %v1335_v34 = vmax.f32 %v1331_v27, %v846_v6  ;;  %1951 = vmatpush3.msra.mxu0 %v1439_v1  ;;  %v1452_v6 = vld [vmem:[%s2415_s9 + $0xd0] sm:$0xff]  ;;  %v1450_v10 = vld [vmem:[%s2415_s9 + $0xc0] sm:$0xff] }
 0x1b5   : > { %v2099_v17 = vpop.f32.mrf.mxu1  ;;  %2132 = vmatmul.mubr.msk.f32.gmra.mxu0 %vm642_vm2, %v847_v9  ;;  %1952 = vmatprep.subr.mxu0 %v1454_v2  ;;  %v1436_v7 = vld [vmem:[%s2415_s9 + $0x50] sm:$0xff]  ;;  %v1435_v9 = vld [vmem:[%s2415_s9 + $0x48] sm:$0xff]  ;;  %v1442_v27 = vld [vmem:[%s2415_s9 + $0x80] sm:$0xff] }
 0x1b6   : > { %v848_v19 = vmax.f32 %v818_v15, 0.0  ;;  %v833_v20 = vadd.f32 %v2099_v17, %v2331_v25  ;;  %v1338_v21 = vmax.f32 %v1334_v13, %v849_v14  ;;  %1953 = vmatpush3.msra.mxu0 %v1438_v3  ;;  %v1433_v13 = vld [vmem:[%s2415_s9 + $0x38] sm:$0xff]  ;;  %v1432_v15 = vld [vmem:[%s2415_s9 + $0x30] sm:$0xff]  ;;  %v1431_v17 = vld [vmem:[%s2415_s9 + $0x28] sm:$0xff] }
 0x1b7   : > { %v827_v24 = vpop.f32.mrf.mxu1  ;;  %1954 = vmatprep.subr.mxu0 %v1453_v4 }
 0x1b8   : > { %v1337_v28 = vmax.f32 %v1333_v18, %v848_v19  ;;  %v851_v29 = vmax.f32 %v833_v20, 0.0  ;;  %v828_v30 = vadd.f32 %v827_v24, %v2331_v25  ;;  %1347 = vrot.lane.b32.xlu1 %v1338_v21, %s2159_s22  ;;  %2134 = vmatprep.mubr.msk.f32.mxu0 %vm642_vm2, %v848_v19  ;;  %v1097_v25 = vld [vmem:[%s2363_s28 + $0xa8] sm:$0xff]  ;;  %v1446_v18 = vld [vmem:[%s2415_s9 + $0xa0] sm:$0xff]  ;;  %v1445_v20 = vld [vmem:[%s2415_s9 + $0x98] sm:$0xff] }
 0x1b9   : > { %2135 = vmatmul.mubr.msk.f32.gmra.mxu0 %vm642_vm2, %v849_v14  ;;  %1130 = vmatprep.subr.mxu1 %v1097_v25  ;;  %v1448_v14 = vld [vmem:[%s2415_s9 + $0xb0] sm:$0xff]  ;;  %v1430_v19 = vld [vmem:[%s2415_s9 + $0x20] sm:$0xff]  ;;  %v1429_v21 = vld [vmem:[%s2415_s9 + $0x18] sm:$0xff] }
 0x1ba   : > { %v850_v35 = vmax.f32 %v828_v30, 0.0  ;;  %1345 = vrot.lane.b32.xlu0 %v1337_v28, %s2159_s22  ;;  %v1340_v36 = vmax.f32 %v1336_v33, %v851_v29  ;;  %1131 = vmatpush1.msra.mxu1 %v1096_v38  ;;  %v1443_v24 = vld [vmem:[%s2415_s9 + $0x88] sm:$0xff]  ;;  %v1426_v28 = vld [vmem:[%s2415_s9] sm:$0xff] }
 0x1bb   : > { %1132 = vmatprep.subr.mxu1 %v1095_v39  ;;  %1955 = vmatpush3.msra.mxu0 %v1437_v5 }
 0x1bc   : > { %v1339_v37 = vmax.f32 %v1335_v34, %v850_v35  ;;  %2137 = vmatprep.mubr.msk.f32.mxu0 %vm642_vm2, %v850_v35  ;;  %1133 = vmatpush1.msra.mxu1 %v1094_v40  ;;  %v2457_v34 = vld [vmem:[%s2273_s18 + $0x1] ss:$0 sm:$0xff] }
 0x1bd   : > { %2138 = vmatmul.mubr.msk.f32.gmra.mxu0 %vm642_vm2, %v851_v29  ;;  %1134 = vmatprep.subr.mxu1 %v1093_v41 }
 0x1be   : > { %1349 = vrot.lane.b32.xlu1 %v1339_v37, %s2159_s22  ;;  %1351 = vrot.lane.b32.xlu0 %v1340_v36, %s2159_s22 }
 0x1bf   : > { %1135 = vmatpush1.msra.mxu1 %v1092_v42  ;;  %1956 = vmatprep.subr.mxu0 %v1452_v6 }
 0x1c0   : > { %1136 = vmatprep.subr.mxu1 %v1091_v43  ;;  %1957 = vmatpush3.msra.mxu0 %v1436_v7 }
 0x1c1   : > { %1137 = vmatpush1.msra.mxu1 %v1090_v44  ;;  %1958 = vmatprep.subr.mxu0 %v1451_v8 }
 0x1c2   : > { %1138 = vmatprep.subr.mxu1 %v1089_v45  ;;  %1959 = vmatpush3.msra.mxu0 %v1435_v9 }
 0x1c3   : > { %1139 = vmatpush1.msra.mxu1 %v1088_v46  ;;  %1960 = vmatprep.subr.mxu0 %v1450_v10 }
 0x1c4   : > { %1140 = vmatprep.subr.mxu1 %v1087_v47  ;;  %1961 = vmatpush3.msra.mxu0 %v1434_v11 }
 0x1c5   : > { %1141 = vmatpush1.msra.mxu1 %v1086_v48  ;;  %1962 = vmatprep.subr.mxu0 %v1449_v12 }
 0x1c6   : > { %1142 = vmatprep.subr.mxu1 %v1085_v49  ;;  %1963 = vmatpush3.msra.mxu0 %v1433_v13 }
 0x1c7   : > { %1143 = vmatpush1.msra.mxu1 %v1084_v50  ;;  %1964 = vmatprep.subr.mxu0 %v1448_v14 }
 0x1c8   : > { %1144 = vmatprep.subr.mxu1 %v1083_v51  ;;  %1965 = vmatpush3.msra.mxu0 %v1432_v15 }
 0x1c9   : > { %1145 = vmatpush1.msra.mxu1 %v1082_v52  ;;  %1966 = vmatprep.subr.mxu0 %v1447_v16 }
 0x1ca   : > { %1146 = vmatprep.subr.mxu1 %v1081_v53  ;;  %1967 = vmatpush3.msra.mxu0 %v1431_v17 }
 0x1cb   : > { %1147 = vmatpush1.msra.mxu1 %v1080_v54  ;;  %1968 = vmatprep.subr.mxu0 %v1446_v18 }
 0x1cc   : > { %1148 = vmatprep.subr.mxu1 %v1079_v56  ;;  %1969 = vmatpush3.msra.mxu0 %v1430_v19 }
 0x1cd   : > { %1149 = vmatpush1.msra.mxu1 %v1078_v58  ;;  %1970 = vmatprep.subr.mxu0 %v1445_v20 }
 0x1ce   : > { %1150 = vmatprep.subr.mxu1 %v1077_v60  ;;  %1971 = vmatpush3.msra.mxu0 %v1429_v21 }
 0x1cf   : > { %1151 = vmatpush1.msra.mxu1 %v1076_v62  ;;  %1972 = vmatprep.subr.mxu0 %v1444_v22 }
 0x1d0   : > { %1973 = vmatpush3.msra.mxu0 %v1428_v23 }
 0x1d1   : > { %1974 = vmatprep.subr.mxu0 %v1443_v24 }
 0x1d2   : > { %1975 = vmatpush3.msra.mxu0 %v1427_v26 }
 0x1d3   : > { %1976 = vmatprep.subr.mxu0 %v1442_v27 }
 0x1d4   : > { %1977 = vmatpush3.msra.mxu0 %v1426_v28 }
 0x22a   : > { %v1348_v29 = vpop.permute.xlu1 %1347 }
 0x22b   : > { %1359 = vst.msk [vmem:[#allocation2 + $0x20] sm:$0xff] %vm1357_vm3, %v1348_v29 }
 0x22c   : > { %v1346_v30 = vpop.permute.xlu0 %1345 }
 0x22d   : > { %1358 = vst.msk [vmem:[#allocation2] sm:$0xff] %vm1357_vm3, %v1346_v30 }
 0x230   : > { %v1350_v31 = vpop.permute.xlu1 %1349  ;;  %v1352_v32 = vpop.permute.xlu0 %1351 }
 0x231   : > { %1360 = vst.msk [vmem:[#allocation2 + $0x40] sm:$0xff] %vm1357_vm3, %v1350_v31  ;;  %1361 = vst.msk [vmem:[#allocation2 + $0x60] sm:$0xff] %vm1357_vm3, %v1352_v32 }
 0x232   : > { %v1414_v32 = vld [vmem:[#allocation2 + $0x20] sm:$0xff] }
 0x234   : > { %v1410_v30 = vld [vmem:[#allocation2] sm:$0xff] }
 0x261   : > { %v2118_v33 = vpop.f32.mrf.mxu0 }
 0x262   : > { %v987_v37 = vadd.f32 %v2118_v33, %v2457_v34  ;;  %v1418_v33 = vld [vmem:[#allocation2 + $0x40] sm:$0xff] }
 0x263   : > { %v981_v35 = vpop.f32.mrf.mxu0 }
 0x264   : > { %v982_v25 = vadd.f32 %v2457_v34, %v981_v35  ;;  %v1061_v41 = vmax.f32 %v987_v37, 0.0  ;;  %v1489_v35 = vld [vmem:[%s2415_s9 + $0x1f8] sm:$0xff]  ;;  %v1472_v37 = vld [vmem:[%s2415_s9 + $0x170] sm:$0xff] }
 0x265   : > { %v2121_v36 = vpop.f32.mrf.mxu0  ;;  %1990 = vmatprep.subr.mxu0 %v1489_v35 }
 0x266   : > { %v1060_v38 = vmax.f32 %v982_v25, 0.0  ;;  %v997_v45 = vadd.f32 %v2121_v36, %v2457_v34  ;;  %v1473_v25 = vld [vmem:[%s2415_s9 + $0x178] sm:$0xff]  ;;  %v1488_v36 = vld [vmem:[%s2415_s9 + $0x1f0] sm:$0xff] }
 0x267   : > { %v991_v39 = vpop.f32.mrf.mxu0 }
 0x268   : > { %1185 = vmatmul.mubr.f32.vlgmr.msra.gmra.mxu1 %v1060_v38  ;;  %v992_v42 = vadd.f32 %v2457_v34, %v991_v39  ;;  %v1063_v49 = vmax.f32 %v997_v45, 0.0  ;;  %v1471_v39 = vld [vmem:[%s2415_s9 + $0x168] sm:$0xff] }
 0x269   : > { %v2124_v40 = vpop.f32.mrf.mxu0  ;;  %1190 = vmatprep.mubr.f32.mxu1 %v2160_v0  ;;  %v1483_v45 = vld [vmem:[%s2415_s9 + $0x1c8] sm:$0xff] }
 0x26a   : > { %v1062_v46 = vmax.f32 %v992_v42, 0.0  ;;  %v1007_v50 = vadd.f32 %v2124_v40, %v2457_v34  ;;  %v1470_v40 = vld [vmem:[%s2415_s9 + $0x160] sm:$0xff]  ;;  %v1469_v42 = vld [vmem:[%s2415_s9 + $0x158] sm:$0xff] }
 0x26b   : > { %v1001_v43 = vpop.f32.mrf.mxu0 }
 0x26c   : > { %1191 = vmatmul.mubr.f32.gmra.mxu1 %v1061_v41  ;;  %v1002_v51 = vadd.f32 %v2457_v34, %v1001_v43  ;;  %v1065_v57 = vmax.f32 %v1007_v50, 0.0  ;;  %v1484_v43 = vld [vmem:[%s2415_s9 + $0x1d0] sm:$0xff]  ;;  %v1465_v50 = vld [vmem:[%s2415_s9 + $0x138] sm:$0xff] }
 0x26d   : > { %v2127_v44 = vpop.f32.mrf.mxu0  ;;  %1196 = vmatprep.mubr.f32.mxu1 %v2160_v0 }
 0x26e   : > { %v1017_v54 = vadd.f32 %v2127_v44, %v2457_v34  ;;  %v1064_v58 = vmax.f32 %v1002_v51, 0.0  ;;  %v1363_v3 = vmax.f32 %v1061_v41, %v1065_v57  ;;  %v1485_v41 = vld [vmem:[%s2415_s9 + $0x1d8] sm:$0xff]  ;;  %v1468_v44 = vld [vmem:[%s2415_s9 + $0x150] sm:$0xff] }
 0x26f   : > { %v1011_v47 = vpop.f32.mrf.mxu0  ;;  %v1480_v51 = vld [vmem:[%s2415_s9 + $0x1b0] sm:$0xff] }
 0x270   : > { %1197 = vmatmul.mubr.f32.gmra.mxu1 %v1062_v46  ;;  %v1012_v59 = vadd.f32 %v2457_v34, %v1011_v47  ;;  %v1067_v63 = vmax.f32 %v1017_v54, 0.0  ;;  %v1362_v6 = vmax.f32 %v1060_v38, %v1064_v58  ;;  %v1487_v38 = vld [vmem:[%s2415_s9 + $0x1e8] sm:$0xff]  ;;  %v1482_v47 = vld [vmem:[%s2415_s9 + $0x1c0] sm:$0xff] }
 0x271   : > { %v2130_v48 = vpop.f32.mrf.mxu0  ;;  %1202 = vmatprep.mubr.f32.mxu1 %v2160_v0  ;;  %v1463_v54 = vld [vmem:[%s2415_s9 + $0x128] sm:$0xff] }
 0x272   : > { %v1027_v53 = vadd.f32 %v2130_v48, %v2457_v34  ;;  %v1066_v7 = vmax.f32 %v1012_v59, 0.0  ;;  %v1365_v13 = vmax.f32 %v1063_v49, %v1067_v63  ;;  %v1466_v48 = vld [vmem:[%s2415_s9 + $0x140] sm:$0xff]  ;;  %v1476_v59 = vld [vmem:[%s2415_s9 + $0x190] sm:$0xff] }
 0x273   : > { %v1021_v52 = vpop.f32.mrf.mxu0 }
 0x274   : > { %1203 = vmatmul.mubr.f32.gmra.mxu1 %v1063_v49  ;;  %v1022_v55 = vadd.f32 %v2457_v34, %v1021_v52  ;;  %v1069_v61 = vmax.f32 %v1027_v53, 0.0  ;;  %v1364_v20 = vmax.f32 %v1062_v46, %v1066_v7  ;;  %v1467_v46 = vld [vmem:[%s2415_s9 + $0x148] sm:$0xff]  ;;  %v1481_v49 = vld [vmem:[%s2415_s9 + $0x1b8] sm:$0xff]  ;;  %v1464_v52 = vld [vmem:[%s2415_s9 + $0x130] sm:$0xff] }
 0x275   : > { %v2133_v56 = vpop.f32.mrf.mxu0  ;;  %1208 = vmatprep.mubr.f32.mxu1 %v2160_v0  ;;  %v1479_v53 = vld [vmem:[%s2415_s9 + $0x1a8] sm:$0xff] }
 0x276   : > { %v1037_v62 = vadd.f32 %v2133_v56, %v2457_v34  ;;  %v1068_v1 = vmax.f32 %v1022_v55, 0.0  ;;  %v1367_v9 = vmax.f32 %v1363_v3, %v1069_v61  ;;  %v1478_v55 = vld [vmem:[%s2415_s9 + $0x1a0] sm:$0xff] }
 0x277   : > { %v1031_v60 = vpop.f32.mrf.mxu0  ;;  %v1462_v56 = vld [vmem:[%s2415_s9 + $0x120] sm:$0xff] }
 0x278   : > { %1209 = vmatmul.mubr.f32.gmra.mxu1 %v1064_v58  ;;  %v1032_v4 = vadd.f32 %v2457_v34, %v1031_v60  ;;  %v1071_v10 = vmax.f32 %v1037_v62, 0.0  ;;  %v1366_v14 = vmax.f32 %v1362_v6, %v1068_v1  ;;  %v1461_v58 = vld [vmem:[%s2415_s9 + $0x118] sm:$0xff]  ;;  %v1460_v60 = vld [vmem:[%s2415_s9 + $0x110] sm:$0xff]  ;;  %v1459_v62 = vld [vmem:[%s2415_s9 + $0x108] sm:$0xff] }
 0x279   : > { %v2136_v2 = vpop.f32.mrf.mxu0  ;;  %1214 = vmatprep.mubr.f32.mxu1 %v2160_v0 }
 0x27a   : > { %v1047_v5 = vadd.f32 %v2136_v2, %v2457_v34  ;;  %v1070_v16 = vmax.f32 %v1032_v4, 0.0  ;;  %v1369_v22 = vmax.f32 %v1365_v13, %v1071_v10 }
 0x27b   : > { %v1041_v8 = vpop.f32.mrf.mxu0 }
 0x27c   : > { %v1073_v11 = vmax.f32 %v1047_v5, 0.0  ;;  %v1042_v12 = vadd.f32 %v2457_v34, %v1041_v8  ;;  %1215 = vmatmul.mubr.f32.gmra.mxu1 %v1065_v57  ;;  %v1368_v27 = vmax.f32 %v1364_v20, %v1070_v16  ;;  %v1477_v57 = vld [vmem:[%s2415_s9 + $0x198] sm:$0xff] }
 0x27d   : > { %v2139_v15 = vpop.f32.mrf.mxu0  ;;  %1220 = vmatprep.mubr.f32.mxu1 %v2160_v0 }
 0x27e   : > { %v1371_v17 = vmax.f32 %v1367_v9, %v1073_v11  ;;  %v1072_v18 = vmax.f32 %v1042_v12, 0.0  ;;  %v1057_v19 = vadd.f32 %v2139_v15, %v2457_v34 }
 0x27f   : > { %v1051_v21 = vpop.f32.mrf.mxu0 }
 0x280   : > { %v1370_v23 = vmax.f32 %v1366_v14, %v1072_v18  ;;  %v1075_v24 = vmax.f32 %v1057_v19, 0.0  ;;  %v1052_v26 = vadd.f32 %v2457_v34, %v1051_v21  ;;  %1221 = vmatmul.mubr.f32.gmra.mxu1 %v1066_v7  ;;  %v1422_v34 = vld [vmem:[#allocation2 + $0x60] sm:$0xff]  ;;  %v1110_v14 = vlaneseq }
 0x281   : > { %1226 = vmatprep.mubr.f32.mxu1 %v2160_v0 }
 0x282   : > { %v1373_v28 = vmax.f32 %v1369_v22, %v1075_v24  ;;  %v1074_v29 = vmax.f32 %v1052_v26, 0.0  ;;  %1561 = vmatprep.mubr.f32.mxu0 %v1370_v23  ;;  %v1108_v22 = vld [vmem:[%s2273_s18 + $0x2] sm:$0x3] }
 0x283   : > { %1562 = vmatmul.mubr.f32.vlgmr.msra.gmra.mxu0 %v1410_v30 }
 0x284   : > { %v1372_v31 = vmax.f32 %v1368_v27, %v1074_v29  ;;  %1227 = vmatmul.mubr.f32.gmra.mxu1 %v1067_v63  ;;  %1566 = vmatprep.mubr.f32.mxu0 %v1371_v17  ;;  %v1474_v63 = vld [vmem:[%s2415_s9 + $0x180] sm:$0xff]  ;;  %v1111_v17 = vshrl.u32 %v1110_v14, 7 }
 0x285   : > { %1232 = vmatprep.mubr.f32.mxu1 %v2160_v0  ;;  %1991 = vmatpush3.msra.mxu0 %v1473_v25 }
 0x286   : > { %1992 = vmatprep.subr.mxu0 %v1488_v36  ;;  %v1112_v20 = vsub.s32 0, %v1111_v17  ;;  %v1116_v23 = vsub.s32 1, %v1111_v17 }
 0x287   : > { %1567 = vmatmul.mubr.f32.gmra.mxu0 %v1414_v32 }
 0x288   : > { %1233 = vmatmul.mubr.f32.gmra.mxu1 %v1068_v1  ;;  %1571 = vmatprep.mubr.f32.mxu0 %v1372_v31  ;;  %v1458_v1 = vld [vmem:[%s2415_s9 + $0x100] sm:$0xff]  ;;  %v2525_v26 = vrot.slane %v1108_v22, %v1112_v20 }
 0x289   : > { %1238 = vmatprep.mubr.f32.mxu1 %v2160_v0  ;;  %1993 = vmatpush3.msra.mxu0 %v1472_v37 }
 0x28a   : > { %1994 = vmatprep.subr.mxu0 %v1487_v38 }
 0x28b   : > { %1572 = vmatmul.mubr.f32.gmra.mxu0 %v1418_v33 }
 0x28c   : > { %1239 = vmatmul.mubr.f32.gmra.mxu1 %v1069_v61  ;;  %1576 = vmatprep.mubr.f32.mxu0 %v1373_v28  ;;  %v1475_v61 = vld [vmem:[%s2415_s9 + $0x188] sm:$0xff]  ;;  %v2527_v28 = vrot.slane %v1108_v22, %v1116_v23 }
 0x28d   : > { %1244 = vmatprep.mubr.f32.mxu1 %v2160_v0  ;;  %1995 = vmatpush3.msra.mxu0 %v1471_v39 }
 0x28f   : > { %1577 = vmatmul.mubr.f32.gmra.mxu0 %v1422_v34 }
 0x290   : > { %1245 = vmatmul.mubr.f32.gmra.mxu1 %v1070_v16 }
 0x291   : > { %1250 = vmatprep.mubr.f32.mxu1 %v2160_v0 }
 0x294   : > { %1251 = vmatmul.mubr.f32.gmra.mxu1 %v1071_v10 }
 0x295   : > { %1256 = vmatprep.mubr.f32.mxu1 %v2160_v0 }
 0x298   : > { %1257 = vmatmul.mubr.f32.gmra.mxu1 %v1072_v18 }
 0x299   : > { %1262 = vmatprep.mubr.f32.mxu1 %v2160_v0 }
 0x29c   : > { %1263 = vmatmul.mubr.f32.gmra.mxu1 %v1073_v11 }
 0x29d   : > { %1268 = vmatprep.mubr.f32.mxu1 %v2160_v0 }
 0x2a0   : > { %1269 = vmatmul.mubr.f32.gmra.mxu1 %v1074_v29 }
 0x2a1   : > { %1274 = vmatprep.mubr.f32.mxu1 %v2160_v0  ;;  %v1486_v0 = vld [vmem:[%s2415_s9 + $0x1e0] sm:$0xff] }
 0x2a2   : > { %1996 = vmatprep.subr.mxu0 %v1486_v0 }
 0x2a3   : > { %1997 = vmatpush3.msra.mxu0 %v1470_v40 }
 0x2a4   : > { %1275 = vmatmul.mubr.f32.gmra.mxu1 %v1075_v24  ;;  %1998 = vmatprep.subr.mxu0 %v1485_v41 }
 0x2a5   : > { %1999 = vmatpush3.msra.mxu0 %v1469_v42 }
 0x2a6   : > { %2000 = vmatprep.subr.mxu0 %v1484_v43 }
 0x2a7   : > { %2001 = vmatpush3.msra.mxu0 %v1468_v44 }
 0x2a8   : > { %2002 = vmatprep.subr.mxu0 %v1483_v45 }
 0x2a9   : > { %2003 = vmatpush3.msra.mxu0 %v1467_v46 }
 0x2aa   : > { %2004 = vmatprep.subr.mxu0 %v1482_v47 }
 0x2ab   : > { %2005 = vmatpush3.msra.mxu0 %v1466_v48 }
 0x2ac   : > { %2006 = vmatprep.subr.mxu0 %v1481_v49 }
 0x2ad   : > { %2007 = vmatpush3.msra.mxu0 %v1465_v50 }
 0x2ae   : > { %2008 = vmatprep.subr.mxu0 %v1480_v51 }
 0x2af   : > { %2009 = vmatpush3.msra.mxu0 %v1464_v52 }
 0x2b0   : > { %2010 = vmatprep.subr.mxu0 %v1479_v53 }
 0x2b1   : > { %2011 = vmatpush3.msra.mxu0 %v1463_v54 }
 0x2b2   : > { %2012 = vmatprep.subr.mxu0 %v1478_v55 }
 0x2b3   : > { %2013 = vmatpush3.msra.mxu0 %v1462_v56 }
 0x2b4   : > { %2014 = vmatprep.subr.mxu0 %v1477_v57 }
 0x2b5   : > { %2015 = vmatpush3.msra.mxu0 %v1461_v58 }
 0x2b6   : > { %2016 = vmatprep.subr.mxu0 %v1476_v59 }
 0x2b7   : > { %2017 = vmatpush3.msra.mxu0 %v1460_v60 }
 0x2b8   : > { %2018 = vmatprep.subr.mxu0 %v1475_v61 }
 0x2b9   : > { %2019 = vmatpush3.msra.mxu0 %v1459_v62 }
 0x2ba   : > { %2020 = vmatprep.subr.mxu0 %v1474_v63 }
 0x2bb   : > { %2021 = vmatpush3.msra.mxu0 %v1458_v1 }
 0x328   : > { %v1186_v2 = vpop.f32.mrf.mxu1 }
 0x329   : > { %v1187_v30 = vadd.f32 %v1186_v2, %v2525_v26 }
 0x32a   : > { %v1188_v3 = vpop.f32.mrf.mxu1 }
 0x32b   : > { %v1189_v32 = vadd.f32 %v1188_v3, %v2527_v28  ;;  %v1281_v41 = vmax.f32 %v1187_v30, 0.0 }
 0x32c   : > { %v1192_v4 = vpop.f32.mrf.mxu1 }
 0x32d   : > { %v1193_v35 = vadd.f32 %v1192_v4, %v2525_v26  ;;  %v1282_v43 = vmax.f32 %v1189_v32, 0.0 }
 0x32e   : > { %v1194_v5 = vpop.f32.mrf.mxu1 }
 0x32f   : > { %v1195_v25 = vadd.f32 %v1194_v5, %v2527_v28  ;;  %v1283_v47 = vmax.f32 %v1193_v35, 0.0 }
 0x330   : > { %v1198_v6 = vpop.f32.mrf.mxu1 }
 0x331   : > { %v1199_v38 = vadd.f32 %v1198_v6, %v2525_v26  ;;  %v1284_v48 = vmax.f32 %v1195_v25, 0.0 }
 0x332   : > { %v1200_v7 = vpop.f32.mrf.mxu1 }
 0x333   : > { %v2538_v39 = vadd.f32 %v1200_v7, %v2527_v28  ;;  %v1285_v52 = vmax.f32 %v1199_v38, 0.0 }
 0x334   : > { %v1204_v8 = vpop.f32.mrf.mxu1 }
 0x335   : > { %v1286_v53 = vmax.f32 %v2538_v39, 0.0  ;;  %v1205_v56 = vadd.f32 %v1204_v8, %v2525_v26 }
 0x336   : > { %v1206_v9 = vpop.f32.mrf.mxu1 }
 0x337   : > { %v2547_v57 = vadd.f32 %v1206_v9, %v2527_v28 }
 0x338   : > { %v1210_v10 = vpop.f32.mrf.mxu1 }
 0x339   : > { %v1211_v33 = vadd.f32 %v1210_v10, %v2525_v26 }
 0x33a   : > { %v1212_v11 = vpop.f32.mrf.mxu1 }
 0x33b   : > { %v1213_v34 = vadd.f32 %v1212_v11, %v2527_v28  ;;  %v1289_v44 = vmax.f32 %v1211_v33, 0.0 }
 0x33c   : > { %v1216_v12 = vpop.f32.mrf.mxu1 }
 0x33d   : > { %v1217_v36 = vadd.f32 %v1216_v12, %v2525_v26  ;;  %v1290_v45 = vmax.f32 %v1213_v34, 0.0  ;;  %v1378_v61 = vmax.f32 %v1281_v41, %v1289_v44 }
 0x33e   : > { %v1218_v13 = vpop.f32.mrf.mxu1 }
 0x33f   : > { %v1219_v0 = vadd.f32 %v1218_v13, %v2527_v28  ;;  %v1291_v49 = vmax.f32 %v1217_v36, 0.0  ;;  %v1379_v62 = vmax.f32 %v1282_v43, %v1290_v45 }
 0x340   : > { %v1222_v15 = vpop.f32.mrf.mxu1 }
 0x341   : > { %v1292_v54 = vmax.f32 %v1219_v0, 0.0  ;;  %v1223_v58 = vadd.f32 %v1222_v15, %v2525_v26  ;;  %v1380_v2 = vmax.f32 %v1283_v47, %v1291_v49  ;;  %v1287_v0 = vmax.f32 %v1205_v56, 0.0 }
 0x342   : > { %v1224_v16 = vpop.f32.mrf.mxu1 }
 0x343   : > { %v1225_v3 = vadd.f32 %v1224_v16, %v2527_v28  ;;  %v1381_v7 = vmax.f32 %v1284_v48, %v1292_v54  ;;  %v1293_v11 = vmax.f32 %v1223_v58, 0.0  ;;  %v1288_v48 = vmax.f32 %v2547_v57, 0.0 }
 0x344   : > { %v1228_v18 = vpop.f32.mrf.mxu1 }
 0x345   : > { %v1229_v12 = vadd.f32 %v1228_v18, %v2525_v26  ;;  %v1294_v22 = vmax.f32 %v1225_v3, 0.0  ;;  %v1382_v33 = vmax.f32 %v1285_v52, %v1293_v11 }
 0x346   : > { %v2522_v19 = vpop.f32.mrf.mxu1 }
 0x347   : > { %v1231_v23 = vadd.f32 %v2522_v19, %v2527_v28  ;;  %v1295_v34 = vmax.f32 %v1229_v12, 0.0 }
 0x348   : > { %v1234_v21 = vpop.f32.mrf.mxu1 }
 0x349   : > { %v1235_v40 = vadd.f32 %v1234_v21, %v2525_v26  ;;  %v1296_v41 = vmax.f32 %v1231_v23, 0.0  ;;  %v1384_v49 = vmax.f32 %v1287_v0, %v1295_v34 }
 0x34a   : > { %v1236_v24 = vpop.f32.mrf.mxu1 }
 0x34b   : > { %v1237_v46 = vadd.f32 %v1236_v24, %v2527_v28  ;;  %v1297_v55 = vmax.f32 %v1235_v40, 0.0  ;;  %v1383_v40 = vmax.f32 %v1286_v53, %v1294_v22  ;;  %v1385_v53 = vmax.f32 %v1288_v48, %v1296_v41 }
 0x34c   : > { %v1240_v27 = vpop.f32.mrf.mxu1 }
 0x34d   : > { %v1241_v50 = vadd.f32 %v1240_v27, %v2525_v26  ;;  %v1298_v63 = vmax.f32 %v1237_v46, 0.0  ;;  %v1386_v8 = vmax.f32 %v1378_v61, %v1297_v55 }
 0x34e   : > { %v1242_v29 = vpop.f32.mrf.mxu1 }
 0x34f   : > { %v1243_v59 = vadd.f32 %v1242_v29, %v2527_v28  ;;  %v1299_v4 = vmax.f32 %v1241_v50, 0.0  ;;  %v1387_v17 = vmax.f32 %v1379_v62, %v1298_v63 }
 0x350   : > { %v1246_v31 = vpop.f32.mrf.mxu1 }
 0x351   : > { %v1247_v5 = vadd.f32 %v1246_v31, %v2525_v26  ;;  %v1300_v13 = vmax.f32 %v1243_v59, 0.0  ;;  %v1388_v24 = vmax.f32 %v1380_v2, %v1299_v4 }
 0x352   : > { %v1248_v37 = vpop.f32.mrf.mxu1 }
 0x353   : > { %v1249_v14 = vadd.f32 %v1248_v37, %v2527_v28  ;;  %v1301_v27 = vmax.f32 %v1247_v5, 0.0  ;;  %v1389_v35 = vmax.f32 %v1381_v7, %v1300_v13 }
 0x354   : > { %v1252_v42 = vpop.f32.mrf.mxu1 }
 0x355   : > { %v1253_v30 = vadd.f32 %v1252_v42, %v2525_v26  ;;  %v1302_v25 = vmax.f32 %v1249_v14, 0.0  ;;  %v1390_v42 = vmax.f32 %v1382_v33, %v1301_v27 }
 0x356   : > { %v1254_v51 = vpop.f32.mrf.mxu1 }
 0x357   : > { %v1255_v37 = vadd.f32 %v1254_v51, %v2527_v28  ;;  %v1303_v44 = vmax.f32 %v1253_v30, 0.0  ;;  %v1391_v50 = vmax.f32 %v1383_v40, %v1302_v25 }
 0x358   : > { %v1258_v60 = vpop.f32.mrf.mxu1 }
 0x359   : > { %v1259_v1 = vadd.f32 %v1258_v60, %v2525_v26  ;;  %v1304_v52 = vmax.f32 %v1255_v37, 0.0  ;;  %v1392_v59 = vmax.f32 %v1384_v49, %v1303_v44 }
 0x35a   : > { %v1260_v6 = vpop.f32.mrf.mxu1 }
 0x35b   : > { %v1305_v9 = vmax.f32 %v1259_v1, 0.0  ;;  %v1261_v10 = vadd.f32 %v1260_v6, %v2527_v28  ;;  %v1393_v63 = vmax.f32 %v1385_v53, %v1304_v52 }
 0x35c   : > { %v1264_v15 = vpop.f32.mrf.mxu1 }
 0x35d   : > { %v1394_v20 = vmax.f32 %v1386_v8, %v1305_v9  ;;  %v1306_v21 = vmax.f32 %v1261_v10, 0.0  ;;  %v1265_v16 = vadd.f32 %v1264_v15, %v2525_v26 }
 0x35e   : > { %v1266_v29 = vpop.f32.mrf.mxu1 }
 0x35f   : > { %v1395_v31 = vmax.f32 %v1387_v17, %v1306_v21  ;;  %v1307_v18 = vmax.f32 %v1265_v16, 0.0  ;;  %v1267_v32 = vadd.f32 %v1266_v29, %v2527_v28 }
 0x360   : > { %v1270_v36 = vpop.f32.mrf.mxu1 }
 0x361   : > { %v1396_v38 = vmax.f32 %v1388_v24, %v1307_v18  ;;  %v1308_v39 = vmax.f32 %v1267_v32, 0.0  ;;  %v1271_v19 = vadd.f32 %v1270_v36, %v2525_v26  ;;  %1646 = vmatprep.mubr.f32.mxu0 %v1395_v31 }
 0x362   : > { %v1272_v43 = vpop.f32.mrf.mxu1  ;;  %1647 = vmatmul.mubr.f32.vlgmr.msra.gmra.mxu0 %v1394_v20 }
 0x363   : > { %v1397_v45 = vmax.f32 %v1389_v35, %v1308_v39  ;;  %v1309_v46 = vmax.f32 %v1271_v19, 0.0  ;;  %v1273_v47 = vadd.f32 %v1272_v43, %v2527_v28 }
 0x364   : > { %v1276_v51 = vpop.f32.mrf.mxu1 }
 0x365   : > { %v1398_v54 = vmax.f32 %v1390_v42, %v1309_v46  ;;  %v1310_v55 = vmax.f32 %v1273_v47, 0.0  ;;  %v1277_v56 = vadd.f32 %v1276_v51, %v2525_v26  ;;  %1651 = vmatprep.mubr.f32.mxu0 %v1397_v45  ;;  %v1978_v26 = vpop.f32.mrf.mxu0 }
 0x366   : > { %v1278_v58 = vpop.f32.mrf.mxu1  ;;  %1652 = vmatmul.mubr.f32.gmra.mxu0 %v1396_v38 }
 0x367   : > { %v1399_v60 = vmax.f32 %v1391_v50, %v1310_v55  ;;  %v1311_v61 = vmax.f32 %v1277_v56, 0.0  ;;  %v1279_v62 = vadd.f32 %v1278_v58, %v2527_v28  ;;  %v1979_v3 = vpop.f32.mrf.mxu0  ;;  %v1872_v28 = vld [vmem:[%s2273_s18 + $0x4] ss:$0 sm:$0xff] }
 0x368   : > { %v1980_v10 = vadd.f32 %v1979_v3, %v1978_v26 }
 0x369   : > { %v1400_v1 = vmax.f32 %v1392_v59, %v1311_v61  ;;  %v1312_v57 = vmax.f32 %v1279_v62, 0.0  ;;  %1656 = vmatprep.mubr.f32.mxu0 %v1399_v60  ;;  %v1981_v4 = vpop.f32.mrf.mxu0 }
 0x36a   : > { %1657 = vmatmul.mubr.f32.gmra.mxu0 %v1398_v54  ;;  %v1564_v13 = vadd.f32 %v1980_v10, %v1872_v28 }
 0x36b   : > { %v1401_v2 = vmax.f32 %v1393_v63, %v1312_v57  ;;  %v1982_v5 = vpop.f32.mrf.mxu0 }
 0x36c   : > { %v1983_v14 = vadd.f32 %v1982_v5, %v1981_v4 }
 0x36d   : > { %1661 = vmatprep.mubr.f32.mxu0 %v1401_v2  ;;  %v1984_v6 = vpop.f32.mrf.mxu0 }
 0x36e   : > { %1662 = vmatmul.mubr.f32.gmra.mxu0 %v1400_v1  ;;  %v1569_v16 = vadd.f32 %v1983_v14, %v1872_v28 }
 0x36f   : > { %v1985_v7 = vpop.f32.mrf.mxu0 }
 0x370   : > { %v1986_v22 = vadd.f32 %v1985_v7, %v1984_v6 }
 0x371   : > { %v1987_v8 = vpop.f32.mrf.mxu0 }
 0x372   : > { %v1574_v31 = vadd.f32 %v1986_v22, %v1872_v28 }
 0x373   : > { %v1988_v9 = vpop.f32.mrf.mxu0 }
 0x374   : > { %v1989_v18 = vadd.f32 %v1988_v9, %v1987_v8 }
 0x376   : > { %v1579_v36 = vadd.f32 %v1989_v18, %v1872_v28 }
 0x422   : > { %v2022_v11 = vpop.f32.mrf.mxu0 }
 0x424   : > { %v2023_v12 = vpop.f32.mrf.mxu0 }
 0x425   : > { %v2024_v15 = vadd.f32 %v2023_v12, %v2022_v11 }
 0x426   : > { %v2025_v17 = vpop.f32.mrf.mxu0 }
 0x427   : > { %v1649_v20 = vadd.f32 %v2024_v15, %v1564_v13 }
 0x428   : > { %v2026_v21 = vpop.f32.mrf.mxu0 }
 0x429   : > { %v1667_v23 = vmax.f32 %v1649_v20, 0.0  ;;  %v2027_v24 = vadd.f32 %v2026_v21, %v2025_v17 }
 0x42a   : > { %v2028_v27 = vpop.f32.mrf.mxu0 }
 0x42b   : > { %1672 = vst.msk [vmem:[%s392_s13] sm:$0xff] %vm1671_vm4, %v1667_v23  ;;  %v1654_v29 = vadd.f32 %v2027_v24, %v1569_v16 }
 0x42c   : > { %v2029_v30 = vpop.f32.mrf.mxu0 }
 0x42d   : > { %v1668_v32 = vmax.f32 %v1654_v29, 0.0  ;;  %v2030_v33 = vadd.f32 %v2029_v30, %v2028_v27 }
 0x42e   : > { %v2031_v34 = vpop.f32.mrf.mxu0 }
 0x42f   : > { %1673 = vst.msk [vmem:[%s392_s13 + $0x8] sm:$0xff] %vm1671_vm4, %v1668_v32  ;;  %v1659_v35 = vadd.f32 %v2030_v33, %v1574_v31 }
 0x430   : > { %v2032_v25 = vpop.f32.mrf.mxu0 }
 0x431   : > { %v1669_v37 = vmax.f32 %v1659_v35, 0.0  ;;  %v2033_v38 = vadd.f32 %v2032_v25, %v2031_v34 }
 0x433   : > { %1674 = vst.msk [vmem:[%s392_s13 + $0x10] sm:$0xff] %vm1671_vm4, %v1669_v37  ;;  %v1664_v39 = vadd.f32 %v2033_v38, %v1579_v36 }
 0x435   : > { %v1670_v19 = vmax.f32 %v1664_v39, 0.0 }
 0x437   : > { %1675 = vst.msk [vmem:[%s392_s13 + $0x18] sm:$0xff] %vm1671_vm4, %v1670_v19 }
 0x438 PF: > { %s17_s24 = sadd.s32 1, %s2157_s24  }
 0x439   : > { %p14_p4 = scmp.ge.s32.totalorder %s17_s24, 4  }
 0x43b   :  { %16 = sbr.rel (!%p14_p4) target bundleno = 1 (0x1), region = 96 }

// kernel: model_forward.3
= control target key start
LH: loop header
LB: loop body
LE: loop exit
PB: predicated region body
PF: predicated region fallthrough
CT: control target
= control target key end

     0   :  { %s13856_s0 = inlined_call_operand.vmem [shape: f32[2,32,32], index: 0, kind: input, shape index: {}]   ;;  %s13857_s1 = inlined_call_operand.vmem [shape: f32[2,32,3], index: 1, kind: input, shape index: {}]   ;;  %s13858_s2 = inlined_call_operand.vmem [shape: f32[2,32,96], index: 2, kind: input, shape index: {}]   ;;  %s13859_s3 = inlined_call_operand.vmem [shape: f32[2,32,32], index: 3, kind: input, shape index: {}]   ;;  %s13860_s4 = inlined_call_operand.vmem [shape: f32[2,32,64], index: 4, kind: input, shape index: {}]   ;;  %s13861_s5 = inlined_call_operand.vmem [shape: f32[2,64,32], index: 5, kind: input, shape index: {}]   ;;  %s13862_s6 = inlined_call_operand.vmem [shape: f32[2,32,96], index: 6, kind: input, shape index: {}]   ;;  %s13863_s7 = inlined_call_operand.vmem [shape: f32[2,32,32], index: 7, kind: input, shape index: {}]   ;;  %s13864_s8 = inlined_call_operand.vmem [shape: f32[2,32,32], index: 8, kind: input, shape index: {}]   ;;  %s13865_s9 = inlined_call_operand.vmem [shape: f32[2,32,64], index: 9, kind: input, shape index: {}]   ;;  %s13866_s10 = inlined_call_operand.vmem [shape: f32[2,32,32], index: 10, kind: input, shape index: {}]   ;;  %s13867_s11 = inlined_call_operand.vmem [shape: f32[2,32,64], index: 11, kind: input, shape index: {}]   ;;  %s13868_s12 = inlined_call_operand.vmem [shape: f32[2,64,32], index: 12, kind: input, shape index: {}]   ;;  %s13869_s13 = inlined_call_operand.vmem [shape: f32[2,32,16], index: 13, kind: input, shape index: {}]   ;;  %s13870_s14 = inlined_call_operand.vmem [shape: f32[2,16,8], index: 14, kind: input, shape index: {}]   ;;  %s13871_s15 = inlined_call_operand.vmem [shape: f32[2,8,4], index: 15, kind: input, shape index: {}]   ;;  %s13872_s16 = inlined_call_operand.vmem [shape: f32[2,4,3], index: 16, kind: input, shape index: {}]   ;;  %s13873_s17 = inlined_call_operand.vmem [shape: f32[2,32,64], index: 17, kind: input, shape index: {}]   ;;  %s13874_s18 = inlined_call_operand.vmem [shape: f32[2,64,64], index: 18, kind: input, shape index: {}]   ;;  %s13875_s19 = inlined_call_operand.vmem [shape: f32[2,64,64], index: 19, kind: input, shape index: {}]   ;;  %s13876_s20 = inlined_call_operand.vmem [shape: f32[2,64,128], index: 20, kind: input, shape index: {}]   ;;  %s13877_s21 = inlined_call_operand.vmem [shape: f32[2,128,512], index: 21, kind: input, shape index: {}]   ;;  %s13878_s22 = inlined_call_operand.vmem [shape: f32[2,512,1], index: 22, kind: input, shape index: {}]   ;;  %s13879_s23 = inlined_call_operand.vmem [shape: f32[2,1,1884], index: 23, kind: input, shape index: {}]   ;;  %s13880_s24 = inlined_call_operand.vmem [shape: f32[2,32,4], index: 24, kind: output, shape index: {}]  }
   0x1   :  { %13918 = sst [smem:[#allocation5_spill]] %s13856_s0 }
   0x2   :  { %13919 = sst [smem:[#allocation6_spill]] %s13857_s1 }
   0x3   :  { %13920 = sst [smem:[#allocation7_spill]] %s13858_s2 }
   0x4   :  { %13921 = sst [smem:[#allocation8_spill]] %s13859_s3 }
   0x5   :  { %13922 = sst [smem:[#allocation9_spill]] %s13860_s4 }
   0x6   :  { %13923 = sst [smem:[#allocation10_spill]] %s13861_s5  ;;  %s12079_s5 = smov 0  }
   0x7   :  { %13924 = sst [smem:[#allocation11_spill]] %s13862_s6 }
   0x8   :  { %13925 = sst [smem:[#allocation12_spill]] %s13863_s7 }
   0x9   :  { %13926 = sst [smem:[#allocation13_spill]] %s13864_s8 }
   0xa   :  { %13927 = sst [smem:[#allocation14_spill]] %s13865_s9 }
   0xb   :  { %13928 = sst [smem:[#allocation15_spill]] %s13872_s16 }
   0xc   :  { %13929 = sst [smem:[#allocation16_spill]] %s13877_s21 }
   0xd   :  { %13930 = sst [smem:[#allocation17_spill]] %s13878_s22 }
   0xe   :  { %13931 = sst [smem:[#allocation18_spill]] %s13879_s23 }
   0xf   :  { %13932 = sst [smem:[#allocation19_spill]] %s13880_s24 }
  0x10 LB: > { %13933 = sst [smem:[#allocation2_spill]] %s11933_s5  ;;  %s12085_s26 = sadd.s32 4294967295, %s11933_s5   ;;  %s11933_s5 = sphi %s12079_s5, %s34_s5  }
  0x11   : > { %13934 = sst [smem:[#allocation3_spill]] %s12085_s26  ;;  %p10188_p0 = scmp.ge.s32.totalorder %s11933_s5, 1 }
  0x12   : > { %p869_p1 = scmp.lt.s32.totalorder %s11933_s5, 3 }
  0x14   : > { %p870_p2 = pnand %p10188_p0, %p869_p1 }
  0x16   : > { %873 = sbr.rel (%p870_p2) target bundleno = 13213 (0x339d), region = 116 }
  0x1b   : > { %s1155_s27 = ssub.s32 1, %s12085_s26  ;;  %vm1172_vm0 = vcmask 261120   ;;  %s13936_s29 = sld [smem:[#allocation5_spill]]  ;;  %v1278_v33 = vlaneseq  ;;  %vm1290_vm9 = vcmask 523264   ;;  %vm1396_vm10 = vcmask 64512  }
  0x1c   : > { %s12090_s28 = sshll.u32 %s1155_s27, 5  ;;  %p1037_p3 = scmp.lt.s32.totalorder %s12085_s26, 1  ;;  %vm1573_vm11 = vcmask 130048   ;;  %vm3060_vm12 = vcmask 195584  }
  0x1d   : > { %13935 = sst [smem:[#allocation4_spill]] %s12090_s28  ;;  %s13913_s4 = smov 96   ;;  %v12148_v34 = vshrl.u32 %v1278_v33, 7 }
  0x1e   : > { %s12128_s7 = scalar_select %p1037_p3, %s12085_s26, 1 }
  0x1f   : > { %s13937_s23 = sld [smem:[#allocation18_spill]]  ;;  %v12152_v36 = vsub.s32 0, %v12148_v34  ;;  %v12155_v37 = vsub.s32 1, %v12148_v34  ;;  %s13898_s3 = smov 120  }
  0x20   : > { %s11582_s30 = smul.u32 15, %s12128_s7  ;;  %s12142_s1 = sshll.u32 %s12128_s7, 5 }
  0x21   : > { %s12096_s0 = scalar_lea.vmem %s13936_s29, %s12090_s28  ;;  %s13938_s2 = sld [smem:[#allocation7_spill]] }
  0x22   : > { %v1158_v0 = vld [vmem:[%s12096_s0] sm:$0xff]  ;;  %v1160_v1 = vld [vmem:[%s12096_s0 + $0x10] sm:$0xff]  ;;  %v1159_v2 = vld [vmem:[%s12096_s0 + $0x8] sm:$0xff]  ;;  %s13896_s25 = smov 56   ;;  %s13886_s27 = smov 80  }
  0x23   : > { %v1173_v3 = vsel %vm1172_vm0, %v1158_v0, 0.0  ;;  %v1179_v4 = vsel %vm1172_vm0, %v1160_v1, 0.0  ;;  %v1161_v5 = vld [vmem:[%s12096_s0 + $0x18] sm:$0xff]  ;;  %v1176_v6 = vsel %vm1172_vm0, %v1159_v2, 0.0  ;;  %s13884_s6 = smov 112   ;;  %s13954_s24 = smov 8  }
  0x24   : > { %1174 = vadd.xlane.f32.xlu0 %v1173_v3  ;;  %1180 = vadd.xlane.f32.xlu1 %v1179_v4  ;;  %v1182_v7 = vsel %vm1172_vm0, %v1161_v5, 0.0  ;;  %s13956_s28 = sld [smem:[#allocation12_spill]]  ;;  %s13957_s21 = smov 24  }
  0x25   : > { %s12134_s8 = scalar_lea.vmem %s13937_s23, %s11582_s30  ;;  %s13902_s30 = smov 64  }
  0x26   : > { %v12137_v28 = vld [vmem:[%s12134_s8] ss:$0 sm:$0xff]  ;;  %s13951_s23 = smov 72   ;;  %s13958_s16 = smov 96  }
  0x27   : > { %s1041_s5 = scalar_lea.vmem %s13938_s2, %s12142_s1  ;;  %v1276_v35 = vld [vmem:[%s12134_s8] sm:$0x3]  ;;  %s13892_s2 = smov 48  }
  0x28   : > { %1177 = vadd.xlane.f32.xlu0 %v1176_v6  ;;  %1183 = vadd.xlane.f32.xlu1 %v1182_v7  ;;  %v1275_v29 = vld [vmem:[%s1041_s5 + $0x18] sm:$0xff]  ;;  %v1274_v30 = vld [vmem:[%s1041_s5 + $0x10] sm:$0xff]  ;;  %v1273_v31 = vld [vmem:[%s1041_s5 + $0x8] sm:$0xff]  ;;  %v1281_v38 = vrot.slane %v1276_v35, %v12152_v36  ;;  %v1285_v39 = vrot.slane %v1276_v35, %v12155_v37  ;;  %s13959_s9 = sld [smem:[#allocation14_spill]] }
  0x29   : > { %10942 = vmatprep.subr.mxu0 %v1275_v29  ;;  %v1272_v32 = vld [vmem:[%s1041_s5] sm:$0xff]  ;;  %s13900_s5 = smov 88  }
  0x2a   : > { %10943 = vmatpush3.msra.mxu0 %v1275_v29  ;;  %s1066_s22 = scalar_lea.vmem %s13956_s28, %s12142_s1  ;;  %s1096_s28 = scalar_lea.vmem %s13869_s13, %s12142_s1 }
  0x2b   : > { %10944 = vmatprep.subr.mxu0 %v1274_v30 }
  0x2c   : > { %10945 = vmatpush3.msra.mxu0 %v1274_v30 }
  0x2d   : > { %10946 = vmatprep.subr.mxu0 %v1273_v31 }
  0x2e   : > { %10947 = vmatpush3.msra.mxu0 %v1273_v31 }
  0x2f   : > { %10948 = vmatprep.subr.mxu0 %v1272_v32 }
  0x30   : > { %10949 = vmatpush3.msra.mxu0 %v1272_v32 }
  0xad   : > { %v1175_v8 = vpop.xlane.xlu0 %1174  ;;  %v1181_v9 = vpop.xlane.xlu1 %1180 }
  0xae   : > { %v1186_v10 = vmul.f32 0.03125, %v1175_v8  ;;  %v1188_v11 = vmul.f32 0.03125, %v1181_v9 }
  0xb0   : > { %v12106_v12 = vsub.f32 %v1158_v0, %v1186_v10  ;;  %v12108_v13 = vsub.f32 %v1160_v1, %v1188_v11 }
  0xb1   : > { %v1178_v14 = vpop.xlane.xlu0 %1177  ;;  %v1184_v15 = vpop.xlane.xlu1 %1183 }
  0xb2   : > { %v1187_v16 = vmul.f32 0.03125, %v1178_v14  ;;  %v1189_v17 = vmul.f32 0.03125, %v1184_v15  ;;  %v1194_v18 = vmul.f32 %v12106_v12, %v12106_v12  ;;  %v1196_v19 = vmul.f32 %v12108_v13, %v12108_v13 }
  0xb4   : > { %v12114_v20 = vsub.f32 %v1159_v2, %v1187_v16  ;;  %v12116_v21 = vsub.f32 %v1161_v5, %v1189_v17  ;;  %v1198_v22 = vsel %vm1172_vm0, %v1194_v18, 0.0  ;;  %v1204_v23 = vsel %vm1172_vm0, %v1196_v19, 0.0 }
  0xb5   : > { %1199 = vadd.xlane.f32.xlu0 %v1198_v22 }
  0xb6   : > { %v1195_v24 = vmul.f32 %v12114_v20, %v12114_v20  ;;  %v1197_v25 = vmul.f32 %v12116_v21, %v12116_v21 }
  0xb8   : > { %v1201_v26 = vsel %vm1172_vm0, %v1195_v24, 0.0  ;;  %v1207_v27 = vsel %vm1172_vm0, %v1197_v25, 0.0 }
  0xb9   : > { %1205 = vadd.xlane.f32.xlu0 %v1204_v23  ;;  %1202 = vadd.xlane.f32.xlu1 %v1201_v26 }
  0xbd   : > { %1208 = vadd.xlane.f32.xlu1 %v1207_v27 }
  0xce   : > { %1286 = vrot.lane.b32.xlu1 %v1281_v38, %s13902_s30 }
  0xcf   : > { %1265 = vrot.lane.b32.xlu0 %v12137_v28, %s13913_s4 }
  0xd2   : > { %1288 = vrot.lane.b32.xlu1 %v1285_v39, %s13902_s30 }
 0x13e   : > { %v1200_v40 = vpop.xlane.xlu0 %1199 }
 0x13f   : > { %v1210_v41 = vmul.f32 0.032258064, %v1200_v40 }
 0x141   : > { %11610 = vrsqrt.f32 %v1210_v41  ;;  %vm1217_vm1 = vcmp.eq.f32.partialorder %v1210_v41, inf  ;;  %v1220_v50 = vand.u32 2147483648, %v1210_v41  ;;  %vm1219_vm2 = vcmp.eq.f32.partialorder %v1210_v41, 0.0 }
 0x142   : > { %v1203_v42 = vpop.xlane.xlu1 %1202  ;;  %v1206_v43 = vpop.xlane.xlu0 %1205 }
 0x143   : > { %v1211_v44 = vmul.f32 0.032258064, %v1203_v42  ;;  %v1212_v45 = vmul.f32 0.032258064, %v1206_v43 }
 0x145   : > { %11612 = vrsqrt.f32 %v1211_v44  ;;  %vm1224_vm3 = vcmp.eq.f32.partialorder %v1211_v44, inf  ;;  %vm1226_vm4 = vcmp.eq.f32.partialorder %v1211_v44, 0.0  ;;  %v1227_v57 = vand.u32 2147483648, %v1211_v44 }
 0x146   : > { %11614 = vrsqrt.f32 %v1212_v45  ;;  %v1209_v46 = vpop.xlane.xlu1 %1208  ;;  %vm1231_vm5 = vcmp.eq.f32.partialorder %v1212_v45, inf  ;;  %v1234_v60 = vand.u32 2147483648, %v1212_v45  ;;  %vm1233_vm6 = vcmp.eq.f32.partialorder %v1212_v45, 0.0  ;;  %v1266_v10 = vpop.permute.xlu0 %1265 }
 0x147   : > { %v1213_v47 = vmul.f32 0.032258064, %v1209_v46 }
 0x149   : > { %11616 = vrsqrt.f32 %v1213_v47  ;;  %vm1238_vm7 = vcmp.eq.f32.partialorder %v1213_v47, inf  ;;  %v1241_v4 = vand.u32 2147483648, %v1213_v47  ;;  %vm1240_vm8 = vcmp.eq.f32.partialorder %v1213_v47, 0.0 }
 0x14e   : > { %v11611_v48 = vpop.eup %11610 }
 0x14f   : > { %v1216_v49 = vmul.f32 %v11611_v48, %v1210_v41 }
 0x151   : > { %v1218_v51 = vsel %vm1217_vm1, %v1210_v41, %v1216_v49 }
 0x152   : > { %v11613_v52 = vpop.eup %11612  ;;  %v1221_v53 = vsel %vm1219_vm2, %v1220_v50, %v1218_v51 }
 0x153   : > { %v11615_v54 = vpop.eup %11614  ;;  %v1223_v55 = vmul.f32 %v11613_v52, %v1211_v44  ;;  %v1243_v56 = vadd.f32 1e-06, %v1221_v53 }
 0x154   : > { %v1230_v58 = vmul.f32 %v11615_v54, %v1212_v45 }
 0x155   : > { %v1225_v59 = vsel %vm1224_vm3, %v1211_v44, %v1223_v55  ;;  %11618 = vrcp.f32 %v1243_v56 }
 0x156   : > { %v11617_v61 = vpop.eup %11616  ;;  %v1228_v62 = vsel %vm1226_vm4, %v1227_v57, %v1225_v59  ;;  %v1232_v63 = vsel %vm1231_vm5, %v1212_v45, %v1230_v58 }
 0x157   : > { %v1244_v0 = vadd.f32 1e-06, %v1228_v62  ;;  %v1235_v1 = vsel %vm1233_vm6, %v1234_v60, %v1232_v63  ;;  %v1237_v2 = vmul.f32 %v11617_v61, %v1213_v47 }
 0x158   : > { %v1245_v3 = vadd.f32 1e-06, %v1235_v1 }
 0x159   : > { %11620 = vrcp.f32 %v1244_v0  ;;  %v1239_v5 = vsel %vm1238_vm7, %v1213_v47, %v1237_v2 }
 0x15a   : > { %11622 = vrcp.f32 %v1245_v3  ;;  %v1242_v6 = vsel %vm1240_vm8, %v1241_v4, %v1239_v5 }
 0x15b   : > { %v1246_v7 = vadd.f32 1e-06, %v1242_v6 }
 0x15d   : > { %11624 = vrcp.f32 %v1246_v7 }
 0x162   : > { %v11619_v8 = vpop.eup %11618 }
 0x163   : > { %v1248_v9 = vmul.f32 %v11619_v8, %v12106_v12 }
 0x165   : > { %v1261_v11 = vmul.f32 %v12137_v28, %v1248_v9 }
 0x166   : > { %v11621_v14 = vpop.eup %11620 }
 0x167   : > { %v11623_v15 = vpop.eup %11622  ;;  %v1268_v16 = vadd.f32 %v1266_v10, %v1261_v11  ;;  %v1250_v17 = vmul.f32 %v11621_v14, %v12114_v20 }
 0x168   : > { %v1252_v18 = vmul.f32 %v11623_v15, %v12108_v13  ;;  %v1287_v13 = vpop.permute.xlu1 %1286 }
 0x169   : > { %10950 = vmatprep.mubr.msk.f32.mxu0 %vm1172_vm0, %v1268_v16  ;;  %v1262_v19 = vmul.f32 %v12137_v28, %v1250_v17 }
 0x16a   : > { %v11625_v22 = vpop.eup %11624  ;;  %v1263_v23 = vmul.f32 %v12137_v28, %v1252_v18 }
 0x16b   : > { %v1269_v24 = vadd.f32 %v1266_v10, %v1262_v19  ;;  %v1254_v12 = vmul.f32 %v11625_v22, %v12116_v21 }
 0x16c   : > { %v1270_v25 = vadd.f32 %v1266_v10, %v1263_v23  ;;  %v1289_v27 = vpop.permute.xlu1 %1288 }
 0x16d   : > { %10951 = vmatmul.mubr.msk.f32.vlgmr.msra.gmra.mxu0 %vm1172_vm0, %v1269_v24  ;;  %v1264_v26 = vmul.f32 %v12137_v28, %v1254_v12  ;;  %v1291_v29 = vsel %vm1290_vm9, %v1287_v13, %v1289_v27 }
 0x16e   : > { %10953 = vmatprep.mubr.msk.f32.mxu0 %vm1172_vm0, %v1270_v25 }
 0x16f   : > { %v1271_v20 = vadd.f32 %v1266_v10, %v1264_v26 }
 0x171   : > { %10954 = vmatmul.mubr.msk.f32.gmra.mxu0 %vm1172_vm0, %v1271_v20 }
 0x22d   : > { %v10952_v30 = vpop.f32.mrf.mxu0 }
 0x22e   : > { %v12174_v31 = vadd.f32 %v10952_v30, %v1291_v29 }
 0x22f   : > { %v1371_v32 = vpop.f32.mrf.mxu0 }
 0x230   : > { %v12176_v21 = vadd.f32 %v1371_v32, %v1291_v29  ;;  %1394 = vrot.lane.b32.xlu1 %v12174_v31, %s13913_s4 }
 0x231   : > { %v10955_v28 = vpop.f32.mrf.mxu0 }
 0x232   : > { %v12180_v33 = vadd.f32 %v10955_v28, %v1291_v29  ;;  %1392 = vrot.lane.b32.xlu0 %v12176_v21, %s13913_s4  ;;  %10960 = vmatprep.mubr.msk.f32.mxu1 %vm1396_vm10, %v12176_v21 }
 0x233   : > { %v1381_v35 = vpop.f32.mrf.mxu0 }
 0x234   : > { %v12186_v38 = vadd.f32 %v1381_v35, %v1291_v29  ;;  %1484 = vrot.lane.b32.xlu1 %v12180_v33, %s13913_s4 }
 0x236   : > { %10967 = vmatprep.mubr.msk.f32.mxu0 %vm1396_vm10, %v12186_v38  ;;  %1482 = vrot.lane.b32.xlu0 %v12186_v38, %s13913_s4 }
 0x2a2   : > { %v1395_v39 = vpop.permute.xlu1 %1394 }
 0x2a3   : > { %10956 = vmatprep.subr.msk.mxu1 %vm1396_vm10, %v1395_v39 }
 0x2a4   : > { %10957 = vmatpush3.xpose.msk.msra.mxu1 %vm1396_vm10, %v1395_v39  ;;  %v1393_v40 = vpop.permute.xlu0 %1392 }
 0x2a5   : > { %10958 = vmatprep.subr.msk.mxu1 %vm1396_vm10, %v1393_v40 }
 0x2a6   : > { %v1485_v41 = vpop.permute.xlu1 %1484 }
 0x2a7   : > { %10963 = vmatprep.subr.msk.mxu0 %vm1396_vm10, %v1485_v41 }
 0x2a8   : > { %10959 = vmatpush3.xpose.msk.msra.mxu1 %vm1396_vm10, %v1393_v40  ;;  %10964 = vmatpush3.xpose.msk.msra.mxu0 %vm1396_vm10, %v1485_v41  ;;  %v1483_v42 = vpop.permute.xlu0 %1482 }
 0x2a9   : > { %10965 = vmatprep.subr.msk.mxu0 %vm1396_vm10, %v1483_v42 }
 0x2ab   : > { %10961 = vmatmul.mubr.msk.f32.vlgmr.msra.gmra.mxu1 %vm1396_vm10, %v12174_v31 }
 0x2ac   : > { %10966 = vmatpush3.xpose.msk.msra.mxu0 %vm1396_vm10, %v1483_v42 }
 0x2af   : > { %10968 = vmatmul.mubr.msk.f32.vlgmr.msra.gmra.mxu0 %vm1396_vm10, %v12180_v33 }
 0x36b   : > { %v10962_v43 = vpop.f32.mrf.mxu1 }
 0x36c   : > { %v1570_v44 = vmul.f32 0.35355338, %v10962_v43 }
 0x36d   : > { %v1471_v45 = vpop.f32.mrf.mxu1 }
 0x36e   : > { %v1569_v46 = vmul.f32 0.35355338, %v1471_v45  ;;  %v1577_v47 = vsel %vm1573_vm11, %v1570_v44, -inf }
 0x36f   : > { %v10969_v48 = vpop.f32.mrf.mxu0  ;;  %1578 = vmax.xlane.f32.xlu0 %v1577_v47 }
 0x370   : > { %v1574_v49 = vsel %vm1573_vm11, %v1569_v46, -inf  ;;  %v1572_v52 = vmul.f32 0.35355338, %v10969_v48 }
 0x371   : > { %v1560_v50 = vpop.f32.mrf.mxu0  ;;  %1575 = vmax.xlane.f32.xlu1 %v1574_v49 }
 0x372   : > { %v1571_v51 = vmul.f32 0.35355338, %v1560_v50  ;;  %v1583_v54 = vsel %vm1573_vm11, %v1572_v52, -inf }
 0x374   : > { %v1580_v53 = vsel %vm1573_vm11, %v1571_v51, -inf }
 0x375   : > { %1581 = vmax.xlane.f32.xlu0 %v1580_v53 }
 0x379   : > { %1584 = vmax.xlane.f32.xlu0 %v1583_v54 }
 0x382   : > { %1620 = vrot.lane.b32.xlu1 %v12174_v31, %s13902_s30 }
 0x386   : > { %1707 = vrot.lane.b32.xlu1 %v12180_v33, %s13902_s30 }
 0x38a   : > { %1798 = vrot.lane.b32.xlu1 %v12174_v31, %s13900_s5 }
 0x38e   : > { %1705 = vrot.lane.b32.xlu1 %v12186_v38, %s13902_s30 }
 0x38f   : > { %1618 = vrot.lane.b32.xlu0 %v12176_v21, %s13902_s30  ;;  %s13905_s30 = smov 24  }
 0x392   : > { %1889 = vrot.lane.b32.xlu1 %v12180_v33, %s13900_s5 }
 0x393   : > { %1796 = vrot.lane.b32.xlu0 %v12176_v21, %s13900_s5 }
 0x396   : > { %1794 = vrot.lane.b32.xlu1 %v12174_v31, %s13898_s3 }
 0x397   : > { %1792 = vrot.lane.b32.xlu0 %v12176_v21, %s13898_s3 }
 0x3f8   : > { %v1579_v55 = vpop.xlane.xlu0 %1578 }
 0x3f9   : > { %v1587_v56 = vsub.f32 %v1570_v44, %v1579_v55 }
 0x3fa   : > { %v1576_v57 = vpop.xlane.xlu1 %1575 }
 0x3fb   : > { %v1592_v58 = vmul.f32 1.442695, %v1587_v56  ;;  %v1586_v59 = vsub.f32 %v1569_v46, %v1576_v57 }
 0x3fd   : > { %11626 = vpow2.f32 %v1592_v58  ;;  %v1590_v60 = vmul.f32 1.442695, %v1586_v59 }
 0x3fe   : > { %v1582_v61 = vpop.xlane.xlu0 %1581  ;;  %v1621_v62 = vpop.permute.xlu1 %1620 }
 0x3ff   : > { %11628 = vpow2.f32 %v1590_v60  ;;  %v1588_v63 = vsub.f32 %v1571_v51, %v1582_v61  ;;  %10970 = vmatprep.subr.mxu1 %v1621_v62 }
 0x400   : > { %10971 = vmatpush3.msra.mxu1 %v1621_v62 }
 0x401   : > { %v1594_v0 = vmul.f32 1.442695, %v1588_v63 }
 0x402   : > { %v1585_v1 = vpop.xlane.xlu0 %1584  ;;  %v1708_v2 = vpop.permute.xlu1 %1707 }
 0x403   : > { %11630 = vpow2.f32 %v1594_v0  ;;  %v1589_v3 = vsub.f32 %v1572_v52, %v1585_v1 }
 0x405   : > { %v1596_v4 = vmul.f32 1.442695, %v1589_v3 }
 0x406   : > { %v1619_v5 = vpop.permute.xlu0 %1618  ;;  %v1799_v6 = vpop.permute.xlu1 %1798 }
 0x407   : > { %11632 = vpow2.f32 %v1596_v4  ;;  %10972 = vmatprep.subr.mxu1 %v1619_v5  ;;  %10984 = vmatprep.subr.msk.mxu0 %vm1396_vm10, %v1799_v6 }
 0x408   : > { %10973 = vmatpush3.msra.mxu1 %v1619_v5  ;;  %10985 = vmatpush3.xpose.msk.msra.mxu0 %vm1396_vm10, %v1799_v6 }
 0x409   : > { %10977 = vmatprep.subr.mxu1 %v1708_v2 }
 0x40a   : > { %v11627_v7 = vpop.eup %11626  ;;  %v1797_v8 = vpop.permute.xlu0 %1796 }
 0x40b   : > { %v1706_v9 = vpop.permute.xlu1 %1705  ;;  %10986 = vmatprep.subr.msk.mxu0 %vm1396_vm10, %v1797_v8  ;;  %v1601_v10 = vsel %vm1573_vm11, %v11627_v7, 0.0 }
 0x40c   : > { %v11629_v11 = vpop.eup %11628  ;;  %1602 = vadd.xlane.f32.xlu0 %v1601_v10  ;;  %10987 = vmatpush3.xpose.msk.msra.mxu0 %vm1396_vm10, %v1797_v8 }
 0x40d   : > { %v1598_v14 = vsel %vm1573_vm11, %v11629_v11, 0.0 }
 0x40e   : > { %v1793_v15 = vpop.permute.xlu0 %1792  ;;  %1599 = vadd.xlane.f32.xlu1 %v1598_v14 }
 0x40f   : > { %v1890_v16 = vpop.permute.xlu1 %1889  ;;  %10988 = vmatprep.mubr.msk.f32.mxu0 %vm1396_vm10, %v1793_v15 }
 0x410   : > { %v11631_v17 = vpop.eup %11630 }
 0x411   : > { %v1604_v18 = vsel %vm1573_vm11, %v11631_v17, 0.0 }
 0x412   : > { %1605 = vadd.xlane.f32.xlu1 %v1604_v18 }
 0x413   : > { %v1795_v19 = vpop.permute.xlu1 %1794 }
 0x414   : > { %10989 = vmatmul.mubr.msk.f32.vlgmr.msra.gmra.mxu0 %vm1396_vm10, %v1795_v19  ;;  %v11633_v22 = vpop.eup %11632 }
 0x415   : > { %v1607_v23 = vsel %vm1573_vm11, %v11633_v22, 0.0 }
 0x416   : > { %1608 = vadd.xlane.f32.xlu0 %v1607_v23 }
 0x423   : > { %1883 = vrot.lane.b32.xlu1 %v12186_v38, %s13898_s3 }
 0x42c   : > { %1887 = vrot.lane.b32.xlu0 %v12186_v38, %s13900_s5 }
 0x430   : > { %1885 = vrot.lane.b32.xlu0 %v12180_v33, %s13898_s3  ;;  %s13939_s3 = sld [smem:[#allocation8_spill]] }
 0x436   : > { %s1046_s5 = scalar_lea.vmem %s13939_s3, %s12142_s1  ;;  %s13947_s3 = smov 56  }
 0x495   : > { %v1603_v24 = vpop.xlane.xlu0 %1602 }
 0x496   : > { %11634 = vrcp.f32 %v1603_v24 }
 0x497   : > { %v1600_v12 = vpop.xlane.xlu1 %1599 }
 0x498   : > { %11636 = vrcp.f32 %v1600_v12 }
 0x49b   : > { %v1606_v25 = vpop.xlane.xlu1 %1605 }
 0x49c   : > { %11638 = vrcp.f32 %v1606_v25 }
 0x49f   : > { %v1609_v26 = vpop.xlane.xlu0 %1608  ;;  %v1884_v39 = vpop.permute.xlu1 %1883 }
 0x4a0   : > { %11640 = vrcp.f32 %v1609_v26 }
 0x4a3   : > { %v11635_v20 = vpop.eup %11634  ;;  %v1888_v40 = vpop.permute.xlu0 %1887 }
 0x4a4   : > { %v1615_v29 = vmul.f32 %v11635_v20, %v11627_v7 }
 0x4a5   : > { %v11637_v13 = vpop.eup %11636 }
 0x4a6   : > { %v1614_v27 = vmul.f32 %v11637_v13, %v11629_v11 }
 0x4a7   : > { %v1886_v41 = vpop.permute.xlu0 %1885 }
 0x4a8   : > { %10974 = vmatprep.mubr.msk.f32.mxu1 %vm1573_vm11, %v1614_v27 }
 0x4a9   : > { %v11639_v30 = vpop.eup %11638  ;;  %10975 = vmatmul.mubr.msk.f32.vlgmr.msra.gmra.mxu1 %vm1573_vm11, %v1615_v29 }
 0x4aa   : > { %10978 = vmatpush3.msra.mxu1 %v1708_v2  ;;  %v1616_v32 = vmul.f32 %v11639_v30, %v11631_v17 }
 0x4ab   : > { %10979 = vmatprep.subr.mxu1 %v1706_v9 }
 0x4ac   : > { %10980 = vmatpush3.msra.mxu1 %v1706_v9  ;;  %10981 = vmatprep.mubr.msk.f32.mxu1 %vm1573_vm11, %v1616_v32 }
 0x4ad   : > { %v11641_v28 = vpop.eup %11640  ;;  %10991 = vmatprep.subr.msk.mxu1 %vm1396_vm10, %v1890_v16 }
 0x4ae   : > { %v1617_v35 = vmul.f32 %v11641_v28, %v11633_v22 }
 0x4b0   : > { %10982 = vmatmul.mubr.msk.f32.vlgmr.msra.gmra.mxu1 %vm1573_vm11, %v1617_v35 }
 0x4b1   : > { %10992 = vmatpush3.xpose.msk.msra.mxu1 %vm1396_vm10, %v1890_v16  ;;  %10995 = vmatprep.mubr.msk.f32.mxu1 %vm1396_vm10, %v1884_v39 }
 0x4b2   : > { %10993 = vmatprep.subr.msk.mxu1 %vm1396_vm10, %v1888_v40 }
 0x4b5   : > { %10994 = vmatpush3.xpose.msk.msra.mxu1 %vm1396_vm10, %v1888_v40 }
 0x4b8   : > { %10996 = vmatmul.mubr.msk.f32.vlgmr.msra.gmra.mxu1 %vm1396_vm10, %v1886_v41 }
 0x4d4   : > { %v10990_v42 = vpop.f32.mrf.mxu0 }
 0x4d5   : > { %v1975_v43 = vmul.f32 0.35355338, %v10990_v42 }
 0x4d6   : > { %v1874_v44 = vpop.f32.mrf.mxu0 }
 0x4d7   : > { %v1974_v45 = vmul.f32 0.35355338, %v1874_v44  ;;  %v1981_v46 = vsel %vm1573_vm11, %v1975_v43, -inf }
 0x4d8   : > { %1982 = vmax.xlane.f32.xlu0 %v1981_v46 }
 0x4d9   : > { %v1978_v47 = vsel %vm1573_vm11, %v1974_v45, -inf }
 0x4da   : > { %1979 = vmax.xlane.f32.xlu1 %v1978_v47 }
 0x561   : > { %v1983_v51 = vpop.xlane.xlu0 %1982 }
 0x562   : > { %v1991_v53 = vsub.f32 %v1975_v43, %v1983_v51 }
 0x563   : > { %v1980_v48 = vpop.xlane.xlu1 %1979 }
 0x564   : > { %v1990_v49 = vsub.f32 %v1974_v45, %v1980_v48  ;;  %v1996_v55 = vmul.f32 1.442695, %v1991_v53 }
 0x566   : > { %v1994_v50 = vmul.f32 1.442695, %v1990_v49 }
 0x568   : > { %11642 = vpow2.f32 %v1994_v50 }
 0x569   : > { %v12256_v52 = vpop.f32.mrf.mxu1  ;;  %11644 = vpow2.f32 %v1996_v55 }
 0x56b   : > { %v12258_v54 = vpop.f32.mrf.mxu1 }
 0x570   : > { %v12260_v56 = vpop.f32.mrf.mxu1 }
 0x572   : > { %v12263_v59 = vpop.f32.mrf.mxu1 }
 0x575   : > { %v11643_v57 = vpop.eup %11642 }
 0x576   : > { %v2002_v58 = vsel %vm1573_vm11, %v11643_v57, 0.0  ;;  %v11645_v2 = vpop.eup %11644 }
 0x577   : > { %2003 = vadd.xlane.f32.xlu1 %v2002_v58  ;;  %v2005_v3 = vsel %vm1573_vm11, %v11645_v2, 0.0 }
 0x578   : > { %v10997_v60 = vpop.f32.mrf.mxu1 }
 0x579   : > { %v1977_v63 = vmul.f32 0.35355338, %v10997_v60 }
 0x57a   : > { %v1965_v61 = vpop.f32.mrf.mxu1 }
 0x57b   : > { %v1976_v62 = vmul.f32 0.35355338, %v1965_v61  ;;  %v1987_v1 = vsel %vm1573_vm11, %v1977_v63, -inf }
 0x57d   : > { %v1984_v0 = vsel %vm1573_vm11, %v1976_v62, -inf }
 0x57e   : > { %1985 = vmax.xlane.f32.xlu0 %v1984_v0 }
 0x582   : > { %1988 = vmax.xlane.f32.xlu0 %v1987_v1 }
 0x586   : > { %2006 = vadd.xlane.f32.xlu0 %v2005_v3 }
 0x588   : > { %2024 = vrot.lane.b32.xlu1 %v12174_v31, %s13896_s25 }
 0x58c   : > { %2111 = vrot.lane.b32.xlu1 %v12180_v33, %s13896_s25 }
 0x590   : > { %2202 = vrot.lane.b32.xlu1 %v12174_v31, %s13886_s27 }
 0x594   : > { %2109 = vrot.lane.b32.xlu1 %v12186_v38, %s13896_s25 }
 0x598   : > { %2293 = vrot.lane.b32.xlu1 %v12180_v33, %s13886_s27 }
 0x59c   : > { %2198 = vrot.lane.b32.xlu1 %v12174_v31, %s13884_s6  ;;  %2022 = vrot.lane.b32.xlu0 %v12176_v21, %s13896_s25  ;;  %s13942_s25 = sld [smem:[#allocation11_spill]] }
 0x5a0   : > { %2200 = vrot.lane.b32.xlu0 %v12176_v21, %s13886_s27 }
 0x5a4   : > { %2196 = vrot.lane.b32.xlu0 %v12176_v21, %s13884_s6 }
 0x600   : > { %v2004_v4 = vpop.xlane.xlu1 %2003 }
 0x601   : > { %11646 = vrcp.f32 %v2004_v4 }
 0x604   : > { %v2025_v5 = vpop.permute.xlu1 %2024 }
 0x605   : > { %10998 = vmatprep.subr.mxu0 %v2025_v5 }
 0x606   : > { %10999 = vmatpush3.msra.mxu0 %v2025_v5 }
 0x607   : > { %v1986_v6 = vpop.xlane.xlu0 %1985 }
 0x608   : > { %v2112_v7 = vpop.permute.xlu1 %2111  ;;  %v1992_v8 = vsub.f32 %v1976_v62, %v1986_v6 }
 0x609   : > { %11005 = vmatprep.subr.mxu1 %v2112_v7 }
 0x60a   : > { %11006 = vmatpush3.msra.mxu1 %v2112_v7  ;;  %v1998_v9 = vmul.f32 1.442695, %v1992_v8 }
 0x60b   : > { %v1989_v10 = vpop.xlane.xlu0 %1988 }
 0x60c   : > { %v2203_v11 = vpop.permute.xlu1 %2202  ;;  %11648 = vpow2.f32 %v1998_v9  ;;  %v1993_v14 = vsub.f32 %v1977_v63, %v1989_v10 }
 0x60e   : > { %v11647_v15 = vpop.eup %11646  ;;  %v2000_v16 = vmul.f32 1.442695, %v1993_v14 }
 0x60f   : > { %v2018_v17 = vmul.f32 %v11647_v15, %v11643_v57  ;;  %v2007_v18 = vpop.xlane.xlu0 %2006 }
 0x610   : > { %v2110_v19 = vpop.permute.xlu1 %2109  ;;  %11650 = vpow2.f32 %v2000_v16 }
 0x611   : > { %11002 = vmatprep.mubr.msk.f32.mxu0 %vm1573_vm11, %v2018_v17  ;;  %11007 = vmatprep.subr.mxu1 %v2110_v19  ;;  %11652 = vrcp.f32 %v2007_v18 }
 0x612   : > { %11008 = vmatpush3.msra.mxu1 %v2110_v19 }
 0x613   : > { %v2023_v22 = vpop.permute.xlu0 %2022 }
 0x614   : > { %v2294_v23 = vpop.permute.xlu1 %2293  ;;  %11000 = vmatprep.subr.mxu0 %v2023_v22 }
 0x615   : > { %11019 = vmatprep.subr.msk.mxu1 %vm1396_vm10, %v2294_v23  ;;  %11001 = vmatpush3.msra.mxu0 %v2023_v22 }
 0x616   : > { %11012 = vmatprep.subr.msk.mxu0 %vm1396_vm10, %v2203_v11 }
 0x617   : > { %v2201_v25 = vpop.permute.xlu0 %2200 }
 0x618   : > { %v2199_v30 = vpop.permute.xlu1 %2198 }
 0x619   : > { %v11649_v24 = vpop.eup %11648 }
 0x61a   : > { %v2008_v12 = vsel %vm1573_vm11, %v11649_v24, 0.0 }
 0x61b   : > { %2009 = vadd.xlane.f32.xlu1 %v2008_v12  ;;  %v2197_v29 = vpop.permute.xlu0 %2196 }
 0x61d   : > { %v11651_v26 = vpop.eup %11650 }
 0x61e   : > { %v11653_v20 = vpop.eup %11652  ;;  %v2011_v13 = vsel %vm1573_vm11, %v11651_v26, 0.0 }
 0x61f   : > { %2012 = vadd.xlane.f32.xlu0 %v2011_v13  ;;  %v2019_v27 = vmul.f32 %v11653_v20, %v11645_v2 }
 0x621   : > { %11003 = vmatmul.mubr.msk.f32.vlgmr.msra.gmra.mxu0 %vm1573_vm11, %v2019_v27 }
 0x622   : > { %11013 = vmatpush3.xpose.msk.msra.mxu0 %vm1396_vm10, %v2203_v11  ;;  %11016 = vmatprep.mubr.msk.f32.mxu0 %vm1396_vm10, %v2197_v29 }
 0x623   : > { %11014 = vmatprep.subr.msk.mxu0 %vm1396_vm10, %v2201_v25 }
 0x626   : > { %11015 = vmatpush3.xpose.msk.msra.mxu0 %vm1396_vm10, %v2201_v25 }
 0x629   : > { %11017 = vmatmul.mubr.msk.f32.vlgmr.msra.gmra.mxu0 %vm1396_vm10, %v2199_v30 }
 0x62c   : > { %2287 = vrot.lane.b32.xlu1 %v12186_v38, %s13884_s6 }
 0x635   : > { %2291 = vrot.lane.b32.xlu0 %v12186_v38, %s13886_s27  ;;  %s13888_s27 = smov 104  }
 0x639   : > { %2289 = vrot.lane.b32.xlu0 %v12180_v33, %s13884_s6  ;;  %s13890_s6 = smov 72  }
 0x6a4   : > { %v2010_v32 = vpop.xlane.xlu1 %2009 }
 0x6a5   : > { %11654 = vrcp.f32 %v2010_v32 }
 0x6a8   : > { %v2013_v28 = vpop.xlane.xlu0 %2012  ;;  %v2288_v42 = vpop.permute.xlu1 %2287 }
 0x6a9   : > { %11656 = vrcp.f32 %v2013_v28 }
 0x6ac   : > { %v2292_v43 = vpop.permute.xlu0 %2291 }
 0x6b0   : > { %v2290_v44 = vpop.permute.xlu0 %2289 }
 0x6b2   : > { %v11655_v35 = vpop.eup %11654 }
 0x6b3   : > { %v2020_v39 = vmul.f32 %v11655_v35, %v11649_v24 }
 0x6b5   : > { %11009 = vmatprep.mubr.msk.f32.mxu1 %vm1573_vm11, %v2020_v39 }
 0x6b6   : > { %v11657_v40 = vpop.eup %11656 }
 0x6b7   : > { %v2021_v41 = vmul.f32 %v11657_v40, %v11651_v26 }
 0x6b9   : > { %11010 = vmatmul.mubr.msk.f32.vlgmr.msra.gmra.mxu1 %vm1573_vm11, %v2021_v41 }
 0x6ba   : > { %11020 = vmatpush3.xpose.msk.msra.mxu1 %vm1396_vm10, %v2294_v23  ;;  %11023 = vmatprep.mubr.msk.f32.mxu1 %vm1396_vm10, %v2288_v42 }
 0x6bb   : > { %11021 = vmatprep.subr.msk.mxu1 %vm1396_vm10, %v2292_v43 }
 0x6be   : > { %11022 = vmatpush3.xpose.msk.msra.mxu1 %vm1396_vm10, %v2292_v43 }
 0x6c1   : > { %11024 = vmatmul.mubr.msk.f32.vlgmr.msra.gmra.mxu1 %vm1396_vm10, %v2290_v44 }
 0x6e1   : > { %v12310_v45 = vpop.f32.mrf.mxu0 }
 0x6e3   : > { %v12312_v46 = vpop.f32.mrf.mxu0 }
 0x6e9   : > { %v11018_v47 = vpop.f32.mrf.mxu0 }
 0x6ea   : > { %v2379_v48 = vmul.f32 0.35355338, %v11018_v47 }
 0x6eb   : > { %v2278_v49 = vpop.f32.mrf.mxu0 }
 0x6ec   : > { %v2378_v50 = vmul.f32 0.35355338, %v2278_v49  ;;  %v2385_v51 = vsel %vm1573_vm11, %v2379_v48, -inf }
 0x6ed   : > { %2386 = vmax.xlane.f32.xlu0 %v2385_v51 }
 0x6ee   : > { %v2382_v53 = vsel %vm1573_vm11, %v2378_v50, -inf }
 0x6ef   : > { %2383 = vmax.xlane.f32.xlu1 %v2382_v53 }
 0x776   : > { %v2387_v55 = vpop.xlane.xlu0 %2386 }
 0x777   : > { %v2395_v57 = vsub.f32 %v2379_v48, %v2387_v55 }
 0x778   : > { %v2384_v58 = vpop.xlane.xlu1 %2383 }
 0x779   : > { %v2394_v60 = vsub.f32 %v2378_v50, %v2384_v58  ;;  %v2400_v61 = vmul.f32 1.442695, %v2395_v57  ;;  %v12316_v63 = vpop.f32.mrf.mxu1 }
 0x77b   : > { %v2398_v62 = vmul.f32 1.442695, %v2394_v60  ;;  %v12318_v0 = vpop.f32.mrf.mxu1 }
 0x77d   : > { %11658 = vpow2.f32 %v2398_v62 }
 0x77e   : > { %11660 = vpow2.f32 %v2400_v61 }
 0x781   : > { %v11025_v1 = vpop.f32.mrf.mxu1 }
 0x782   : > { %v2381_v4 = vmul.f32 0.35355338, %v11025_v1 }
 0x783   : > { %v2369_v2 = vpop.f32.mrf.mxu1 }
 0x784   : > { %v2380_v3 = vmul.f32 0.35355338, %v2369_v2  ;;  %v2391_v7 = vsel %vm1573_vm11, %v2381_v4, -inf }
 0x786   : > { %v2388_v5 = vsel %vm1573_vm11, %v2380_v3, -inf }
 0x787   : > { %2389 = vmax.xlane.f32.xlu0 %v2388_v5 }
 0x78a   : > { %v11659_v6 = vpop.eup %11658 }
 0x78b   : > { %v11661_v8 = vpop.eup %11660  ;;  %2392 = vmax.xlane.f32.xlu0 %v2391_v7  ;;  %v2406_v9 = vsel %vm1573_vm11, %v11659_v6, 0.0 }
 0x78c   : > { %2407 = vadd.xlane.f32.xlu1 %v2406_v9  ;;  %v2409_v10 = vsel %vm1573_vm11, %v11661_v8, 0.0 }
 0x78f   : > { %2410 = vadd.xlane.f32.xlu0 %v2409_v10 }
 0x79d   : > { %2428 = vrot.lane.b32.xlu1 %v12174_v31, %s13892_s2 }
 0x7a1   : > { %2515 = vrot.lane.b32.xlu1 %v12180_v33, %s13892_s2 }
 0x7a5   : > { %2606 = vrot.lane.b32.xlu1 %v12174_v31, %s13890_s6  ;;  %2426 = vrot.lane.b32.xlu0 %v12176_v21, %s13892_s2 }
 0x7a9   : > { %2513 = vrot.lane.b32.xlu1 %v12186_v38, %s13892_s2  ;;  %2604 = vrot.lane.b32.xlu0 %v12176_v21, %s13890_s6  ;;  %s13907_s2 = smov 16  }
 0x7ad   : > { %2697 = vrot.lane.b32.xlu1 %v12180_v33, %s13890_s6  ;;  %2600 = vrot.lane.b32.xlu0 %v12176_v21, %s13888_s27 }
 0x7b1   : > { %2602 = vrot.lane.b32.xlu1 %v12174_v31, %s13888_s27 }
 0x810   : > { %v2390_v11 = vpop.xlane.xlu0 %2389 }
 0x811   : > { %v2396_v14 = vsub.f32 %v2380_v3, %v2390_v11 }
 0x813   : > { %v2402_v15 = vmul.f32 1.442695, %v2396_v14 }
 0x814   : > { %v2393_v16 = vpop.xlane.xlu0 %2392 }
 0x815   : > { %11662 = vpow2.f32 %v2402_v15  ;;  %v2397_v17 = vsub.f32 %v2381_v4, %v2393_v16  ;;  %v2408_v18 = vpop.xlane.xlu1 %2407 }
 0x816   : > { %11664 = vrcp.f32 %v2408_v18 }
 0x817   : > { %v2404_v19 = vmul.f32 1.442695, %v2397_v17 }
 0x818   : > { %v2411_v22 = vpop.xlane.xlu0 %2410 }
 0x819   : > { %11666 = vpow2.f32 %v2404_v19  ;;  %v2429_v23 = vpop.permute.xlu1 %2428 }
 0x81a   : > { %11668 = vrcp.f32 %v2411_v22  ;;  %11026 = vmatprep.subr.mxu0 %v2429_v23 }
 0x81b   : > { %11027 = vmatpush3.msra.mxu0 %v2429_v23 }
 0x81c   : > { %v2427_v24 = vpop.permute.xlu0 %2426 }
 0x81d   : > { %v2516_v12 = vpop.permute.xlu1 %2515  ;;  %11028 = vmatprep.subr.mxu0 %v2427_v24 }
 0x81e   : > { %11033 = vmatprep.subr.mxu1 %v2516_v12  ;;  %11029 = vmatpush3.msra.mxu0 %v2427_v24 }
 0x81f   : > { %11034 = vmatpush3.msra.mxu1 %v2516_v12 }
 0x820   : > { %v2605_v27 = vpop.permute.xlu0 %2604 }
 0x821   : > { %v2607_v25 = vpop.permute.xlu1 %2606 }
 0x822   : > { %v11663_v26 = vpop.eup %11662  ;;  %11040 = vmatprep.subr.msk.mxu0 %vm1396_vm10, %v2607_v25 }
 0x823   : > { %v11665_v20 = vpop.eup %11664  ;;  %v2412_v13 = vsel %vm1573_vm11, %v11663_v26, 0.0 }
 0x824   : > { %2413 = vadd.xlane.f32.xlu1 %v2412_v13  ;;  %v2422_v29 = vmul.f32 %v11665_v20, %v11659_v6  ;;  %v2601_v41 = vpop.permute.xlu0 %2600 }
 0x825   : > { %v2514_v30 = vpop.permute.xlu1 %2513 }
 0x826   : > { %v11667_v32 = vpop.eup %11666  ;;  %11030 = vmatprep.mubr.msk.f32.mxu0 %vm1573_vm11, %v2422_v29  ;;  %11035 = vmatprep.subr.mxu1 %v2514_v30 }
 0x827   : > { %v11669_v28 = vpop.eup %11668  ;;  %11036 = vmatpush3.msra.mxu1 %v2514_v30  ;;  %v2415_v35 = vsel %vm1573_vm11, %v11667_v32, 0.0 }
 0x828   : > { %2416 = vadd.xlane.f32.xlu0 %v2415_v35  ;;  %v2423_v39 = vmul.f32 %v11669_v28, %v11661_v8 }
 0x829   : > { %v2698_v40 = vpop.permute.xlu1 %2697 }
 0x82a   : > { %11031 = vmatmul.mubr.msk.f32.vlgmr.msra.gmra.mxu0 %vm1573_vm11, %v2423_v39  ;;  %11047 = vmatprep.subr.msk.mxu1 %vm1396_vm10, %v2698_v40 }
 0x82b   : > { %11041 = vmatpush3.xpose.msk.msra.mxu0 %vm1396_vm10, %v2607_v25  ;;  %11044 = vmatprep.mubr.msk.f32.mxu0 %vm1396_vm10, %v2601_v41 }
 0x82c   : > { %11042 = vmatprep.subr.msk.mxu0 %vm1396_vm10, %v2605_v27 }
 0x82d   : > { %v2603_v42 = vpop.permute.xlu1 %2602 }
 0x82f   : > { %11043 = vmatpush3.xpose.msk.msra.mxu0 %vm1396_vm10, %v2605_v27 }
 0x832   : > { %11045 = vmatmul.mubr.msk.f32.vlgmr.msra.gmra.mxu0 %vm1396_vm10, %v2603_v42 }
 0x835   : > { %2691 = vrot.lane.b32.xlu1 %v12186_v38, %s13888_s27 }
 0x83e   : > { %2695 = vrot.lane.b32.xlu0 %v12186_v38, %s13890_s6  ;;  %s13909_s6 = smov 8  }
 0x842   : > { %2693 = vrot.lane.b32.xlu0 %v12180_v33, %s13888_s27  ;;  %s13894_s27 = smov 40  }
 0x8ad   : > { %v2414_v43 = vpop.xlane.xlu1 %2413 }
 0x8ae   : > { %11670 = vrcp.f32 %v2414_v43 }
 0x8b1   : > { %v2417_v44 = vpop.xlane.xlu0 %2416  ;;  %v2692_v51 = vpop.permute.xlu1 %2691 }
 0x8b2   : > { %11672 = vrcp.f32 %v2417_v44 }
 0x8b5   : > { %v2696_v53 = vpop.permute.xlu0 %2695 }
 0x8b9   : > { %v2694_v55 = vpop.permute.xlu0 %2693 }
 0x8bb   : > { %v11671_v47 = vpop.eup %11670 }
 0x8bc   : > { %v2424_v48 = vmul.f32 %v11671_v47, %v11663_v26 }
 0x8be   : > { %11037 = vmatprep.mubr.msk.f32.mxu1 %vm1573_vm11, %v2424_v48 }
 0x8bf   : > { %v11673_v49 = vpop.eup %11672 }
 0x8c0   : > { %v2425_v50 = vmul.f32 %v11673_v49, %v11667_v32 }
 0x8c2   : > { %11038 = vmatmul.mubr.msk.f32.vlgmr.msra.gmra.mxu1 %vm1573_vm11, %v2425_v50 }
 0x8c3   : > { %11048 = vmatpush3.xpose.msk.msra.mxu1 %vm1396_vm10, %v2698_v40  ;;  %11051 = vmatprep.mubr.msk.f32.mxu1 %vm1396_vm10, %v2692_v51  ;;  %v3068_v51 = vld [vmem:[%s1046_s5 + $0x18] sm:$0xff] }
 0x8c4   : > { %11049 = vmatprep.subr.msk.mxu1 %vm1396_vm10, %v2696_v53 }
 0x8c7   : > { %11050 = vmatpush3.xpose.msk.msra.mxu1 %vm1396_vm10, %v2696_v53  ;;  %v3067_v53 = vld [vmem:[%s1046_s5 + $0x10] sm:$0xff] }
 0x8ca   : > { %11052 = vmatmul.mubr.msk.f32.vlgmr.msra.gmra.mxu1 %vm1396_vm10, %v2694_v55  ;;  %v3066_v55 = vld [vmem:[%s1046_s5 + $0x8] sm:$0xff] }
 0x8ea   : > { %v12366_v57 = vpop.f32.mrf.mxu0 }
 0x8ec   : > { %v12368_v58 = vpop.f32.mrf.mxu0 }
 0x8f2   : > { %v11046_v60 = vpop.f32.mrf.mxu0 }
 0x8f3   : > { %v2783_v61 = vmul.f32 0.35355338, %v11046_v60 }
 0x8f4   : > { %v2682_v62 = vpop.f32.mrf.mxu0 }
 0x8f5   : > { %v2782_v1 = vmul.f32 0.35355338, %v2682_v62  ;;  %v2789_v2 = vsel %vm1573_vm11, %v2783_v61, -inf }
 0x8f6   : > { %2790 = vmax.xlane.f32.xlu0 %v2789_v2 }
 0x8f7   : > { %v2786_v3 = vsel %vm1573_vm11, %v2782_v1, -inf }
 0x8f8   : > { %2787 = vmax.xlane.f32.xlu1 %v2786_v3 }
 0x97f   : > { %v2791_v4 = vpop.xlane.xlu0 %2790 }
 0x980   : > { %v2799_v5 = vsub.f32 %v2783_v61, %v2791_v4 }
 0x981   : > { %v2788_v6 = vpop.xlane.xlu1 %2787 }
 0x982   : > { %v2798_v7 = vsub.f32 %v2782_v1, %v2788_v6  ;;  %v2804_v8 = vmul.f32 1.442695, %v2799_v5  ;;  %v12372_v10 = vpop.f32.mrf.mxu1  ;;  %v12419_v1 = vld [vmem:[%s12134_s8 + $0x1] ss:$0 sm:$0xff] }
 0x984   : > { %v2802_v9 = vmul.f32 1.442695, %v2798_v7  ;;  %v12374_v11 = vpop.f32.mrf.mxu1 }
 0x986   : > { %11674 = vpow2.f32 %v2802_v9 }
 0x987   : > { %11676 = vpow2.f32 %v2804_v8 }
 0x98a   : > { %v11053_v14 = vpop.f32.mrf.mxu1 }
 0x98b   : > { %v2785_v17 = vmul.f32 0.35355338, %v11053_v14 }
 0x98c   : > { %v2773_v15 = vpop.f32.mrf.mxu1 }
 0x98d   : > { %v2784_v16 = vmul.f32 0.35355338, %v2773_v15  ;;  %v2795_v22 = vsel %vm1573_vm11, %v2785_v17, -inf }
 0x98f   : > { %v2792_v18 = vsel %vm1573_vm11, %v2784_v16, -inf }
 0x990   : > { %2793 = vmax.xlane.f32.xlu0 %v2792_v18 }
 0x993   : > { %v11675_v19 = vpop.eup %11674 }
 0x994   : > { %v11677_v23 = vpop.eup %11676  ;;  %2796 = vmax.xlane.f32.xlu0 %v2795_v22  ;;  %v2810_v24 = vsel %vm1573_vm11, %v11675_v19, 0.0 }
 0x995   : > { %2811 = vadd.xlane.f32.xlu1 %v2810_v24  ;;  %v2813_v12 = vsel %vm1573_vm11, %v11677_v23, 0.0 }
 0x998   : > { %2814 = vadd.xlane.f32.xlu0 %v2813_v12 }
 0x9a6   : > { %2832 = vrot.lane.b32.xlu1 %v12174_v31, %s13894_s27 }
 0x9aa   : > { %2919 = vrot.lane.b32.xlu1 %v12180_v33, %s13894_s27 }
 0xa19   : > { %v2794_v25 = vpop.xlane.xlu0 %2793 }
 0xa1a   : > { %v2800_v26 = vsub.f32 %v2784_v16, %v2794_v25 }
 0xa1c   : > { %v2806_v20 = vmul.f32 1.442695, %v2800_v26 }
 0xa1d   : > { %v2797_v13 = vpop.xlane.xlu0 %2796 }
 0xa1e   : > { %11678 = vpow2.f32 %v2806_v20  ;;  %v2801_v27 = vsub.f32 %v2785_v17, %v2797_v13  ;;  %v2812_v29 = vpop.xlane.xlu1 %2811  ;;  %v11914_v13 = vld [vmem:[%s12096_s0 + $0x8] sm:$0xff] }
 0xa1f   : > { %11680 = vrcp.f32 %v2812_v29 }
 0xa20   : > { %v2808_v30 = vmul.f32 1.442695, %v2801_v27 }
 0xa21   : > { %v2815_v42 = vpop.xlane.xlu0 %2814 }
 0xa22   : > { %11682 = vpow2.f32 %v2808_v30  ;;  %v2833_v32 = vpop.permute.xlu1 %2832  ;;  %v11915_v30 = vld [vmem:[%s12096_s0] sm:$0xff] }
 0xa23   : > { %11054 = vmatprep.subr.mxu0 %v2833_v32  ;;  %11684 = vrcp.f32 %v2815_v42 }
 0xa24   : > { %11055 = vmatpush3.msra.mxu0 %v2833_v32 }
 0xa26   : > { %v2920_v28 = vpop.permute.xlu1 %2919 }
 0xa27   : > { %11061 = vmatprep.subr.mxu1 %v2920_v28 }
 0xa28   : > { %11062 = vmatpush3.msra.mxu1 %v2920_v28 }
 0xa2b   : > { %v11679_v31 = vpop.eup %11678 }
 0xa2c   : > { %v11681_v35 = vpop.eup %11680  ;;  %v2816_v33 = vsel %vm1573_vm11, %v11679_v31, 0.0 }
 0xa2d   : > { %2817 = vadd.xlane.f32.xlu1 %v2816_v33  ;;  %v2826_v39 = vmul.f32 %v11681_v35, %v11675_v19 }
 0xa2f   : > { %v11683_v40 = vpop.eup %11682  ;;  %11058 = vmatprep.mubr.msk.f32.mxu0 %vm1573_vm11, %v2826_v39 }
 0xa30   : > { %v2819_v41 = vsel %vm1573_vm11, %v11683_v40, 0.0 }
 0xa31   : > { %2820 = vadd.xlane.f32.xlu0 %v2819_v41 }
 0xa3e   : > { %2917 = vrot.lane.b32.xlu1 %v12186_v38, %s13894_s27 }
 0xa42   : > { %3008 = vrot.lane.b32.xlu1 %v12312_v46, %s13909_s6  ;;  %v11685_v46 = vpop.eup %11684 }
 0xa46   : > { %3024 = vrot.lane.b32.xlu1 %v12368_v58, %s13907_s2 }
 0xa47   : > { %2830 = vrot.lane.b32.xlu0 %v12176_v21, %s13894_s27  ;;  %v2827_v21 = vmul.f32 %v11685_v46, %v11677_v23  ;;  %v11917_v46 = vld [vmem:[%s12096_s0 + $0x10] sm:$0xff] }
 0xa4b   : > { %3010 = vrot.lane.b32.xlu0 %v12310_v45, %s13909_s6 }
 0xa4f   : > { %3026 = vrot.lane.b32.xlu0 %v12366_v57, %s13907_s2  ;;  %v3065_v57 = vld [vmem:[%s1046_s5] sm:$0xff]  ;;  %s13904_s5 = sshll.u32 %s12085_s26, 5  ;;  %s13955_s26 = smov 16  }
 0xa50   : > { %s12452_s27 = scalar_lea.vmem %s13936_s29, %s13904_s5  ;;  %s13941_s5 = sld [smem:[#allocation9_spill]] }
 0xa51   : > { %v1152_v29 = vld [vmem:[%s12452_s27 + $0x8] sm:$0xff]  ;;  %v1154_v33 = vld [vmem:[%s12452_s27 + $0x18] sm:$0xff]  ;;  %s13952_s29 = smov 104  }
 0xa52   : > { %v3632_v35 = vsel %vm1172_vm0, %v1152_v29, 0.0  ;;  %v3638_v39 = vsel %vm1172_vm0, %v1154_v33, 0.0 }
 0xab6   : > { %v2818_v38 = vpop.xlane.xlu1 %2817 }
 0xab7   : > { %11686 = vrcp.f32 %v2818_v38  ;;  %v11916_v38 = vld [vmem:[%s12096_s0 + $0x18] sm:$0xff]  ;;  %s13940_s0 = smov 64  }
 0xaba   : > { %v2821_v43 = vpop.xlane.xlu0 %2820  ;;  %v2918_v44 = vpop.permute.xlu1 %2917 }
 0xabb   : > { %11688 = vrcp.f32 %v2821_v43  ;;  %11063 = vmatprep.subr.mxu1 %v2918_v44 }
 0xabc   : > { %11064 = vmatpush3.msra.mxu1 %v2918_v44 }
 0xabe   : > { %v2831_v47 = vpop.permute.xlu0 %2830  ;;  %v3009_v2 = vpop.permute.xlu1 %3008 }
 0xabf   : > { %11056 = vmatprep.subr.mxu0 %v2831_v47  ;;  %v3052_v5 = vsel %vm1396_vm10, %v12258_v54, %v3009_v2 }
 0xac0   : > { %11057 = vmatpush3.msra.mxu0 %v2831_v47 }
 0xac1   : > { %11059 = vmatmul.mubr.msk.f32.vlgmr.msra.gmra.mxu0 %vm1573_vm11, %v2827_v21  ;;  %11068 = vmatprep.subr.mxu0 %v3068_v51 }
 0xac2   : > { %11069 = vmatpush3.msra.mxu0 %v3068_v51  ;;  %v3025_v3 = vpop.permute.xlu1 %3024 }
 0xac3   : > { %11070 = vmatprep.subr.mxu0 %v3067_v53  ;;  %v3056_v7 = vsel %vm1573_vm11, %v3052_v5, %v3025_v3 }
 0xac4   : > { %v11687_v45 = vpop.eup %11686  ;;  %11071 = vmatpush3.msra.mxu0 %v3067_v53 }
 0xac5   : > { %v2828_v48 = vmul.f32 %v11687_v45, %v11679_v31  ;;  %11072 = vmatprep.subr.mxu0 %v3066_v55  ;;  %v1151_v45 = vld [vmem:[%s12452_s27] sm:$0xff] }
 0xac6   : > { %11073 = vmatpush3.msra.mxu0 %v3066_v55 }
 0xac7   : > { %11065 = vmatprep.mubr.msk.f32.mxu1 %vm1573_vm11, %v2828_v48  ;;  %11074 = vmatprep.subr.mxu0 %v3065_v57 }
 0xac8   : > { %v11689_v49 = vpop.eup %11688  ;;  %11075 = vmatpush3.msra.mxu0 %v3065_v57 }
 0xac9   : > { %v2829_v50 = vmul.f32 %v11689_v49, %v11683_v40  ;;  %v3629_v49 = vsel %vm1172_vm0, %v1151_v45, 0.0 }
 0xacb   : > { %11066 = vmatmul.mubr.msk.f32.vlgmr.msra.gmra.mxu1 %vm1573_vm11, %v2829_v50  ;;  %v1153_v50 = vld [vmem:[%s12452_s27 + $0x10] sm:$0xff] }
 0xacc   : > { %v3635_v51 = vsel %vm1172_vm0, %v1153_v50, 0.0 }
 0xb81   : > { %v11060_v58 = vpop.f32.mrf.mxu0 }
 0xb82   : > { %3042 = vrot.lane.b32.xlu0 %v11060_v58, %s13905_s30 }
 0xb83   : > { %v2908_v60 = vpop.f32.mrf.mxu0 }
 0xb84   : > { %3040 = vrot.lane.b32.xlu1 %v2908_v60, %s13905_s30 }
 0xb86   : > { %3014 = vrot.lane.b32.xlu0 %v12316_v63, %s13909_s6  ;;  %v3011_v63 = vpop.permute.xlu0 %3010 }
 0xb87   : > { %v3053_v6 = vsel %vm1396_vm10, %v12256_v52, %v3011_v63 }
 0xb88   : > { %3012 = vrot.lane.b32.xlu1 %v12318_v0, %s13909_s6  ;;  %s12566_s6 = scalar_lea.vmem %s13942_s25, %s12142_s1  ;;  %s13943_s25 = sld [smem:[#allocation10_spill]] }
 0xb8a   : > { %3030 = vrot.lane.b32.xlu0 %v12372_v10, %s13907_s2  ;;  %v3027_v0 = vpop.permute.xlu0 %3026 }
 0xb8b   : > { %v11067_v61 = vpop.f32.mrf.mxu1  ;;  %v3057_v9 = vsel %vm1573_vm11, %v3053_v6, %v3027_v0 }
 0xb8c   : > { %3028 = vrot.lane.b32.xlu1 %v12374_v11, %s13907_s2  ;;  %s13911_s2 = smov 32  }
 0xb8d   : > { %v2995_v62 = vpop.f32.mrf.mxu1 }
 0xb8e   : > { %3046 = vrot.lane.b32.xlu0 %v11067_v61, %s13905_s30 }
 0xb90   : > { %3044 = vrot.lane.b32.xlu1 %v2995_v62, %s13905_s30  ;;  %s1051_s30 = scalar_lea.vmem %s13941_s5, %s12142_s1  ;;  %s13944_s5 = smov 32  }
 0xb94   : > { %3075 = vrot.lane.b32.xlu1 %v12419_v1, %s13913_s4 }
 0xbf4   : > { %v3043_v4 = vpop.permute.xlu0 %3042 }
 0xbf5   : > { %v3062_v11 = vsel %vm3060_vm12, %v3057_v9, %v3043_v4 }
 0xbf6   : > { %v3041_v8 = vpop.permute.xlu1 %3040 }
 0xbf7   : > { %v3061_v10 = vsel %vm3060_vm12, %v3056_v7, %v3041_v8 }
 0xbf8   : > { %v3015_v14 = vpop.permute.xlu0 %3014  ;;  %11076 = vmatprep.mubr.msk.f32.mxu0 %vm1172_vm0, %v3061_v10 }
 0xbf9   : > { %11077 = vmatmul.mubr.msk.f32.vlgmr.msra.gmra.mxu0 %vm1172_vm0, %v3062_v11  ;;  %v3055_v18 = vsel %vm1396_vm10, %v12260_v56, %v3015_v14 }
 0xbfa   : > { %v3013_v54 = vpop.permute.xlu1 %3012 }
 0xbfb   : > { %v3054_v52 = vsel %vm1396_vm10, %v12263_v59, %v3013_v54 }
 0xbfc   : > { %v3031_v15 = vpop.permute.xlu0 %3030 }
 0xbfd   : > { %v3059_v23 = vsel %vm1573_vm11, %v3055_v18, %v3031_v15 }
 0xbfe   : > { %v3029_v16 = vpop.permute.xlu1 %3028 }
 0xbff   : > { %v3058_v19 = vsel %vm1573_vm11, %v3054_v52, %v3029_v16 }
 0xc00   : > { %v3047_v17 = vpop.permute.xlu0 %3046 }
 0xc01   : > { %v3064_v12 = vsel %vm3060_vm12, %v3059_v23, %v3047_v17 }
 0xc02   : > { %v3045_v22 = vpop.permute.xlu1 %3044 }
 0xc03   : > { %v3063_v24 = vsel %vm3060_vm12, %v3058_v19, %v3045_v22 }
 0xc04   : > { %11079 = vmatprep.mubr.msk.f32.mxu0 %vm1172_vm0, %v3063_v24 }
 0xc05   : > { %11080 = vmatmul.mubr.msk.f32.gmra.mxu0 %vm1172_vm0, %v3064_v12 }
 0xc06   : > { %v12443_v59 = vpop.permute.xlu1 %3075 }
 0xcb9   : > { %v11078_v25 = vpop.f32.mrf.mxu0 }
 0xcba   : > { %v3162_v56 = vadd.f32 %v11078_v25, %v12443_v59 }
 0xcbb   : > { %v3156_v26 = vpop.f32.mrf.mxu0 }
 0xcbc   : > { %v3157_v20 = vadd.f32 %v3156_v26, %v12443_v59  ;;  %v12456_v27 = vadd.f32 %v11914_v13, %v3162_v56 }
 0xcbe   : > { %v12460_v32 = vadd.f32 %v11915_v30, %v3157_v20  ;;  %v3182_v28 = vsel %vm1172_vm0, %v12456_v27, 0.0 }
 0xcbf   : > { %3183 = vadd.xlane.f32.xlu1 %v3182_v28 }
 0xcc0   : > { %v3179_v31 = vsel %vm1172_vm0, %v12460_v32, 0.0 }
 0xcc1   : > { %3180 = vadd.xlane.f32.xlu0 %v3179_v31 }
 0xcc3   : > { %3633 = vadd.xlane.f32.xlu1 %v3632_v35 }
 0xcc5   : > { %v11081_v40 = vpop.f32.mrf.mxu0 }
 0xcc6   : > { %v3172_v41 = vadd.f32 %v11081_v40, %v12443_v59 }
 0xcc7   : > { %v3166_v42 = vpop.f32.mrf.mxu0  ;;  %3639 = vadd.xlane.f32.xlu1 %v3638_v39 }
 0xcc8   : > { %v12471_v43 = vadd.f32 %v11916_v38, %v3172_v41  ;;  %v3167_v44 = vadd.f32 %v3166_v42, %v12443_v59 }
 0xcca   : > { %v12475_v47 = vadd.f32 %v11917_v46, %v3167_v44  ;;  %v3188_v21 = vsel %vm1172_vm0, %v12471_v43, 0.0 }
 0xccb   : > { %3189 = vadd.xlane.f32.xlu0 %v3188_v21 }
 0xccc   : > { %v3185_v48 = vsel %vm1172_vm0, %v12475_v47, 0.0 }
 0xccf   : > { %3186 = vadd.xlane.f32.xlu0 %v3185_v48 }
 0xcd3   : > { %3630 = vadd.xlane.f32.xlu0 %v3629_v49 }
 0xcd7   : > { %3636 = vadd.xlane.f32.xlu0 %v3635_v51 }
 0xd48   : > { %v3184_v53 = vpop.xlane.xlu1 %3183 }
 0xd49   : > { %v3192_v55 = vmul.f32 0.03125, %v3184_v53 }
 0xd4a   : > { %v3181_v57 = vpop.xlane.xlu0 %3180 }
 0xd4b   : > { %v12486_v58 = vsub.f32 %v12456_v27, %v3192_v55  ;;  %v3191_v60 = vmul.f32 0.03125, %v3181_v57 }
 0xd4c   : > { %v3634_v61 = vpop.xlane.xlu1 %3633 }
 0xd4d   : > { %v12489_v62 = vsub.f32 %v12460_v32, %v3191_v60  ;;  %v3200_v63 = vmul.f32 %v12486_v58, %v12486_v58  ;;  %v3642_v4 = vmul.f32 0.03125, %v3634_v61 }
 0xd4f   : > { %v3206_v2 = vsel %vm1172_vm0, %v3200_v63, 0.0  ;;  %v3199_v0 = vmul.f32 %v12489_v62, %v12489_v62  ;;  %v12497_v8 = vsub.f32 %v1152_v29, %v3642_v4 }
 0xd50   : > { %3207 = vadd.xlane.f32.xlu1 %v3206_v2  ;;  %v3640_v5 = vpop.xlane.xlu1 %3639 }
 0xd51   : > { %v3203_v3 = vsel %vm1172_vm0, %v3199_v0, 0.0  ;;  %v3644_v9 = vmul.f32 0.03125, %v3640_v5  ;;  %v3650_v16 = vmul.f32 %v12497_v8, %v12497_v8 }
 0xd52   : > { %3204 = vadd.xlane.f32.xlu0 %v3203_v3 }
 0xd53   : > { %v12502_v54 = vsub.f32 %v1154_v33, %v3644_v9  ;;  %v3656_v22 = vsel %vm1172_vm0, %v3650_v16, 0.0 }
 0xd54   : > { %v3190_v6 = vpop.xlane.xlu0 %3189 }
 0xd55   : > { %v3194_v7 = vmul.f32 0.03125, %v3190_v6  ;;  %v3652_v24 = vmul.f32 %v12502_v54, %v12502_v54 }
 0xd57   : > { %v12500_v10 = vsub.f32 %v12471_v43, %v3194_v7  ;;  %v3662_v20 = vsel %vm1172_vm0, %v3652_v24, 0.0 }
 0xd58   : > { %v3187_v11 = vpop.xlane.xlu0 %3186 }
 0xd59   : > { %v3193_v14 = vmul.f32 0.03125, %v3187_v11  ;;  %v3202_v15 = vmul.f32 %v12500_v10, %v12500_v10 }
 0xd5b   : > { %v12509_v52 = vsub.f32 %v12475_v47, %v3193_v14  ;;  %v3212_v17 = vsel %vm1172_vm0, %v3202_v15, 0.0 }
 0xd5c   : > { %3213 = vadd.xlane.f32.xlu1 %v3212_v17  ;;  %v3631_v18 = vpop.xlane.xlu0 %3630 }
 0xd5d   : > { %v3641_v19 = vmul.f32 0.03125, %v3631_v18  ;;  %v3201_v23 = vmul.f32 %v12509_v52, %v12509_v52 }
 0xd5f   : > { %v12517_v12 = vsub.f32 %v1151_v45, %v3641_v19  ;;  %v3209_v25 = vsel %vm1172_vm0, %v3201_v23, 0.0 }
 0xd60   : > { %3657 = vadd.xlane.f32.xlu1 %v3656_v22  ;;  %3210 = vadd.xlane.f32.xlu0 %v3209_v25  ;;  %v3637_v56 = vpop.xlane.xlu0 %3636 }
 0xd61   : > { %v3643_v26 = vmul.f32 0.03125, %v3637_v56  ;;  %v3649_v13 = vmul.f32 %v12517_v12, %v12517_v12 }
 0xd63   : > { %v12523_v29 = vsub.f32 %v1153_v50, %v3643_v26  ;;  %v3653_v30 = vsel %vm1172_vm0, %v3649_v13, 0.0 }
 0xd64   : > { %3663 = vadd.xlane.f32.xlu1 %v3662_v20  ;;  %3654 = vadd.xlane.f32.xlu0 %v3653_v30 }
 0xd65   : > { %v3651_v28 = vmul.f32 %v12523_v29, %v12523_v29 }
 0xd67   : > { %v3659_v31 = vsel %vm1172_vm0, %v3651_v28, 0.0 }
 0xd68   : > { %3660 = vadd.xlane.f32.xlu0 %v3659_v31 }
 0xdd9   : > { %v3208_v35 = vpop.xlane.xlu1 %3207 }
 0xdda   : > { %v3216_v33 = vmul.f32 0.032258064, %v3208_v35 }
 0xddb   : > { %v3205_v39 = vpop.xlane.xlu0 %3204 }
 0xddc   : > { %11690 = vrsqrt.f32 %v3216_v33  ;;  %v3215_v40 = vmul.f32 0.032258064, %v3205_v39  ;;  %vm3228_vm13 = vcmp.eq.f32.partialorder %v3216_v33, inf  ;;  %v3231_v49 = vand.u32 2147483648, %v3216_v33 }
 0xddd   : > { %vm3230_vm14 = vcmp.eq.f32.partialorder %v3216_v33, 0.0 }
 0xdde   : > { %11692 = vrsqrt.f32 %v3215_v40  ;;  %vm3221_vm15 = vcmp.eq.f32.partialorder %v3215_v40, inf  ;;  %v3224_v61 = vand.u32 2147483648, %v3215_v40  ;;  %vm3223_vm1 = vcmp.eq.f32.partialorder %v3215_v40, 0.0 }
 0xde5   : > { %v3214_v41 = vpop.xlane.xlu1 %3213 }
 0xde6   : > { %v3218_v42 = vmul.f32 0.032258064, %v3214_v41 }
 0xde8   : > { %11694 = vrsqrt.f32 %v3218_v42  ;;  %vm3242_vm2 = vcmp.eq.f32.partialorder %v3218_v42, inf  ;;  %v3245_v14 = vand.u32 2147483648, %v3218_v42  ;;  %vm3244_vm3 = vcmp.eq.f32.partialorder %v3218_v42, 0.0 }
 0xde9   : > { %v11691_v38 = vpop.eup %11690  ;;  %v3658_v44 = vpop.xlane.xlu1 %3657 }
 0xdea   : > { %v3211_v46 = vpop.xlane.xlu0 %3210  ;;  %v3227_v21 = vmul.f32 %v11691_v38, %v3216_v33  ;;  %v3666_v45 = vmul.f32 0.032258064, %v3658_v44 }
 0xdeb   : > { %v3217_v48 = vmul.f32 0.032258064, %v3211_v46  ;;  %v11693_v50 = vpop.eup %11692 }
 0xdec   : > { %v3229_v51 = vsel %vm3228_vm13, %v3216_v33, %v3227_v21  ;;  %11696 = vrsqrt.f32 %v3666_v45  ;;  %v3220_v55 = vmul.f32 %v11693_v50, %v3215_v40  ;;  %vm3678_vm4 = vcmp.eq.f32.partialorder %v3666_v45, inf }
 0xded   : > { %v3232_v53 = vsel %vm3230_vm14, %v3231_v49, %v3229_v51  ;;  %11698 = vrsqrt.f32 %v3217_v48  ;;  %v3664_v57 = vpop.xlane.xlu1 %3663  ;;  %vm3680_vm5 = vcmp.eq.f32.partialorder %v3666_v45, 0.0  ;;  %v3681_v23 = vand.u32 2147483648, %v3666_v45 }
 0xdee   : > { %v3655_v60 = vpop.xlane.xlu0 %3654  ;;  %v12529_v63 = vmul.f32 0.032258064, %v3664_v57  ;;  %v3222_v2 = vsel %vm3221_vm15, %v3215_v40, %v3220_v55  ;;  %v3248_v3 = vadd.f32 1e-06, %v3232_v53  ;;  %vm3235_vm6 = vcmp.eq.f32.partialorder %v3217_v48, inf }
 0xdef   : > { %v3665_v0 = vmul.f32 0.032258064, %v3655_v60  ;;  %v3225_v4 = vsel %vm3223_vm1, %v3224_v61, %v3222_v2  ;;  %v3238_v56 = vand.u32 2147483648, %v3217_v48  ;;  %vm3237_vm7 = vcmp.eq.f32.partialorder %v3217_v48, 0.0 }
 0xdf0   : > { %11700 = vrsqrt.f32 %v12529_v63  ;;  %v3247_v7 = vadd.f32 1e-06, %v3225_v4  ;;  %vm3692_vm8 = vcmp.eq.f32.partialorder %v12529_v63, inf  ;;  %vm3694_vm13 = vcmp.eq.f32.partialorder %v12529_v63, 0.0 }
 0xdf1   : > { %11702 = vrsqrt.f32 %v3665_v0  ;;  %vm3671_vm14 = vcmp.eq.f32.partialorder %v3665_v0, inf  ;;  %v3674_v41 = vand.u32 2147483648, %v3665_v0  ;;  %vm3673_vm15 = vcmp.eq.f32.partialorder %v3665_v0, 0.0 }
 0xdf2   : > { %v3661_v5 = vpop.xlane.xlu0 %3660  ;;  %11704 = vrcp.f32 %v3248_v3 }
 0xdf3   : > { %v3667_v6 = vmul.f32 0.032258064, %v3661_v5 }
 0xdf5   : > { %11706 = vrsqrt.f32 %v3667_v6  ;;  %v11695_v9 = vpop.eup %11694  ;;  %vm3685_vm1 = vcmp.eq.f32.partialorder %v3667_v6, inf  ;;  %v3688_v50 = vand.u32 2147483648, %v3667_v6 }
 0xdf6   : > { %11708 = vrcp.f32 %v3247_v7  ;;  %v3241_v11 = vmul.f32 %v11695_v9, %v3218_v42  ;;  %v3287_v7 = vld [vmem:[%s1051_s30 + $0x18] sm:$0xff]  ;;  %v10300_v9 = vld [vmem:[%s12134_s8 + $0x3] ss:$0 sm:$0xff] }
 0xdf7   : > { %11082 = vmatprep.subr.mxu1 %v3287_v7 }
 0xdf8   : > { %v3243_v15 = vsel %vm3242_vm2, %v3218_v42, %v3241_v11  ;;  %vm3687_vm2 = vcmp.eq.f32.partialorder %v3667_v6, 0.0  ;;  %11083 = vmatpush3.msra.mxu1 %v3287_v7 }
 0xdf9   : > { %v11697_v16 = vpop.eup %11696  ;;  %v3246_v17 = vsel %vm3244_vm3, %v3245_v14, %v3243_v15  ;;  %v3284_v15 = vld [vmem:[%s1051_s30] sm:$0xff] }
 0xdfa   : > { %v11699_v18 = vpop.eup %11698  ;;  %v3677_v19 = vmul.f32 %v11697_v16, %v3666_v45  ;;  %v3250_v22 = vadd.f32 1e-06, %v3246_v17  ;;  %v3737_v17 = vld [vmem:[%s12566_s6 + $0x18] sm:$0xff] }
 0xdfb   : > { %v3234_v24 = vmul.f32 %v11699_v18, %v3217_v48 }
 0xdfc   : > { %v3679_v25 = vsel %vm3678_vm4, %v3666_v45, %v3677_v19  ;;  %11710 = vrcp.f32 %v3250_v22  ;;  %v3695_v45 = vand.u32 2147483648, %v12529_v63 }
 0xdfd   : > { %v11701_v26 = vpop.eup %11700  ;;  %v3682_v20 = vsel %vm3680_vm5, %v3681_v23, %v3679_v25  ;;  %v3236_v13 = vsel %vm3235_vm6, %v3217_v48, %v3234_v24 }
 0xdfe   : > { %v11703_v30 = vpop.eup %11702  ;;  %v3239_v28 = vsel %vm3237_vm7, %v3238_v56, %v3236_v13  ;;  %v3691_v31 = vmul.f32 %v11701_v26, %v12529_v63  ;;  %v3698_v40 = vadd.f32 1e-06, %v3682_v20 }
 0xdff   : > { %v11705_v35 = vpop.eup %11704  ;;  %v3670_v33 = vmul.f32 %v11703_v30, %v3665_v0  ;;  %v3249_v39 = vadd.f32 1e-06, %v3239_v28 }
 0xe00   : > { %v3254_v42 = vmul.f32 %v11705_v35, %v12486_v58  ;;  %v3693_v44 = vsel %vm3692_vm8, %v12529_v63, %v3691_v31 }
 0xe01   : > { %v3672_v46 = vsel %vm3671_vm14, %v3665_v0, %v3670_v33  ;;  %11712 = vrcp.f32 %v3249_v39  ;;  %v3696_v58 = vsel %vm3694_vm13, %v3695_v45, %v3693_v44 }
 0xe02   : > { %v11707_v38 = vpop.eup %11706  ;;  %v3675_v48 = vsel %vm3673_vm15, %v3674_v41, %v3672_v46  ;;  %3266 = vrot.lane.b32.xlu1 %v3254_v42, %s13940_s0  ;;  %11714 = vrcp.f32 %v3698_v40  ;;  %v3700_v61 = vadd.f32 1e-06, %v3696_v58  ;;  %v3738_v46 = vld [vmem:[%s12134_s8 + $0x3] sm:$0x3]  ;;  %v3736_v58 = vld [vmem:[%s12566_s6 + $0x10] sm:$0xff] }
 0xe03   : > { %v11709_v21 = vpop.eup %11708  ;;  %v3684_v49 = vmul.f32 %v11707_v38, %v3667_v6  ;;  %v3697_v53 = vadd.f32 1e-06, %v3675_v48 }
 0xe04   : > { %v3252_v51 = vmul.f32 %v11709_v21, %v12489_v62 }
 0xe05   : > { %v3686_v55 = vsel %vm3685_vm1, %v3667_v6, %v3684_v49  ;;  %11716 = vrcp.f32 %v3697_v53  ;;  %v3743_v49 = vrot.slane %v3738_v46, %v12152_v36 }
 0xe06   : > { %v3689_v57 = vsel %vm3687_vm2, %v3688_v50, %v3686_v55  ;;  %3264 = vrot.lane.b32.xlu0 %v3252_v51, %s13940_s0  ;;  %v3747_v50 = vrot.slane %v3738_v46, %v12155_v37  ;;  %v3735_v55 = vld [vmem:[%s12566_s6 + $0x8] sm:$0xff] }
 0xe07   : > { %v3699_v60 = vadd.f32 1e-06, %v3689_v57  ;;  %v3734_v57 = vld [vmem:[%s12566_s6] sm:$0xff]  ;;  %s13945_s6 = smov 88  }
 0xe09   : > { %11718 = vrcp.f32 %v3699_v60  ;;  %v11711_v2 = vpop.eup %11710 }
 0xe0a   : > { %v3258_v0 = vmul.f32 %v11711_v2, %v12500_v10  ;;  %11720 = vrcp.f32 %v3700_v61 }
 0xe0c   : > { %3270 = vrot.lane.b32.xlu1 %v3258_v0, %s13940_s0 }
 0xe0e   : > { %v11713_v62 = vpop.eup %11712 }
 0xe0f   : > { %v3256_v63 = vmul.f32 %v11713_v62, %v12509_v52  ;;  %v11715_v3 = vpop.eup %11714  ;;  %v3286_v52 = vld [vmem:[%s1051_s30 + $0x10] sm:$0xff] }
 0xe10   : > { %v3704_v5 = vmul.f32 %v11715_v3, %v12497_v8  ;;  %11084 = vmatprep.subr.mxu1 %v3286_v52 }
 0xe11   : > { %3268 = vrot.lane.b32.xlu1 %v3256_v63, %s13940_s0  ;;  %11085 = vmatpush3.msra.mxu1 %v3286_v52 }
 0xe12   : > { %v11717_v4 = vpop.eup %11716 }
 0xe13   : > { %v3702_v6 = vmul.f32 %v11717_v4, %v12517_v12  ;;  %v3285_v12 = vld [vmem:[%s1051_s30 + $0x8] sm:$0xff]  ;;  %s12580_s30 = sshll.u32 %s12128_s7, 6 }
 0xe14   : > { %11086 = vmatprep.subr.mxu1 %v3285_v12 }
 0xe15   : > { %3716 = vrot.lane.b32.xlu1 %v3704_v5, %s13911_s2  ;;  %3714 = vrot.lane.b32.xlu0 %v3702_v6, %s13911_s2 }
 0xe16   : > { %v11719_v10 = vpop.eup %11718  ;;  %11087 = vmatpush3.msra.mxu1 %v3285_v12 }
 0xe17   : > { %v3706_v11 = vmul.f32 %v11719_v10, %v12523_v29  ;;  %v11721_v8 = vpop.eup %11720  ;;  %11088 = vmatprep.subr.mxu1 %v3284_v15  ;;  %v12624_v10 = vld [vmem:[%s12134_s8 + $0x2] ss:$0 sm:$0xff] }
 0xe18   : > { %v3708_v14 = vmul.f32 %v11721_v8, %v12502_v54  ;;  %11089 = vmatpush3.msra.mxu1 %v3284_v15 }
 0xe19   : > { %3622 = vrot.lane.b32.xlu0 %v10300_v9, %s13913_s4  ;;  %3718 = vrot.lane.b32.xlu1 %v3706_v11, %s13911_s2 }
 0xe1a   : > { %11118 = vmatprep.subr.mxu1 %v3737_v17 }
 0xe1d   : > { %3720 = vrot.lane.b32.xlu0 %v3708_v14, %s13911_s2  ;;  %s12587_s2 = scalar_lea.vmem %s13943_s25, %s12580_s30  ;;  %s13948_s25 = smov 80  }
 0xe1e   : > { %v3411_v28 = vld [vmem:[%s12587_s2 + $0x38] sm:$0xff]  ;;  %v3409_v42 = vld [vmem:[%s12587_s2 + $0x28] sm:$0xff]  ;;  %v3408_v38 = vld [vmem:[%s12587_s2 + $0x20] sm:$0xff] }
 0xe1f   : > { %11096 = vmatprep.subr.mxu0 %v3411_v28  ;;  %v3407_v3 = vld [vmem:[%s12587_s2 + $0x18] sm:$0xff]  ;;  %v3406_v4 = vld [vmem:[%s12587_s2 + $0x10] sm:$0xff]  ;;  %v3405_v5 = vld [vmem:[%s12587_s2 + $0x8] sm:$0xff] }
 0xe20   : > { %11097 = vmatpush3.msra.mxu0 %v3411_v28  ;;  %v3404_v6 = vld [vmem:[%s12587_s2] sm:$0xff] }
 0xe74   : > { %v3267_v29 = vpop.permute.xlu1 %3266 }
 0xe75   : > { %v3277_v16 = vmul.f32 %v12419_v1, %v3267_v29 }
 0xe77   : > { %v3281_v18 = vadd.f32 %v3277_v16, %v12443_v59 }
 0xe78   : > { %v3265_v54 = vpop.permute.xlu0 %3264 }
 0xe79   : > { %v3276_v19 = vmul.f32 %v12419_v1, %v3265_v54  ;;  %3301 = vrot.lane.b32.xlu0 %v3281_v18, %s13940_s0 }
 0xe7b   : > { %v3280_v22 = vadd.f32 %v3276_v19, %v12443_v59 }
 0xe7d   : > { %3299 = vrot.lane.b32.xlu1 %v3280_v22, %s13940_s0 }
 0xe7e   : > { %v3271_v23 = vpop.permute.xlu1 %3270 }
 0xe7f   : > { %v3279_v24 = vmul.f32 %v12419_v1, %v3271_v23 }
 0xe81   : > { %v3283_v25 = vadd.f32 %v3279_v24, %v12443_v59 }
 0xe83   : > { %v3269_v56 = vpop.permute.xlu1 %3268  ;;  %3305 = vrot.lane.b32.xlu0 %v3283_v25, %s13940_s0 }
 0xe84   : > { %v3278_v26 = vmul.f32 %v12419_v1, %v3269_v56  ;;  %v3410_v1 = vld [vmem:[%s12587_s2 + $0x30] sm:$0xff]  ;;  %s13946_s2 = smov 120  }
 0xe85   : > { %11098 = vmatprep.subr.mxu0 %v3410_v1 }
 0xe86   : > { %v3282_v20 = vadd.f32 %v3278_v26, %v12443_v59  ;;  %11099 = vmatpush3.msra.mxu0 %v3410_v1 }
 0xe87   : > { %v3717_v13 = vpop.permute.xlu1 %3716  ;;  %v3715_v30 = vpop.permute.xlu0 %3714  ;;  %11100 = vmatprep.subr.mxu0 %v3409_v42 }
 0xe88   : > { %3303 = vrot.lane.b32.xlu1 %v3282_v20, %s13940_s0  ;;  %v3727_v31 = vmul.f32 %v10300_v9, %v3717_v13  ;;  %v3726_v59 = vmul.f32 %v10300_v9, %v3715_v30  ;;  %11101 = vmatpush3.msra.mxu0 %v3409_v42 }
 0xe89   : > { %11102 = vmatprep.subr.mxu0 %v3408_v38 }
 0xe8a   : > { %11103 = vmatpush3.msra.mxu0 %v3408_v38 }
 0xe8b   : > { %v3719_v35 = vpop.permute.xlu1 %3718  ;;  %v12591_v33 = vpop.permute.xlu0 %3622  ;;  %11104 = vmatprep.subr.mxu0 %v3407_v3 }
 0xe8c   : > { %v3728_v39 = vmul.f32 %v10300_v9, %v3719_v35  ;;  %v3731_v40 = vadd.f32 %v3727_v31, %v12591_v33  ;;  %v3730_v41 = vadd.f32 %v3726_v59, %v12591_v33  ;;  %11105 = vmatpush3.msra.mxu0 %v3407_v3 }
 0xe8d   : > { %11106 = vmatprep.subr.mxu0 %v3406_v4 }
 0xe8e   : > { %3754 = vrot.lane.b32.xlu0 %v3731_v40, %s13913_s4  ;;  %3752 = vrot.lane.b32.xlu1 %v3730_v41, %s13913_s4  ;;  %v3732_v45 = vadd.f32 %v3728_v39, %v12591_v33 }
 0xe8f   : > { %v3721_v44 = vpop.permute.xlu0 %3720  ;;  %11107 = vmatpush3.msra.mxu0 %v3406_v4 }
 0xe90   : > { %v3729_v21 = vmul.f32 %v10300_v9, %v3721_v44  ;;  %11108 = vmatprep.subr.mxu0 %v3405_v5 }
 0xe91   : > { %11109 = vmatpush3.msra.mxu0 %v3405_v5 }
 0xe92   : > { %v3733_v48 = vadd.f32 %v3729_v21, %v12591_v33  ;;  %3756 = vrot.lane.b32.xlu1 %v3732_v45, %s13913_s4  ;;  %11110 = vmatprep.subr.mxu0 %v3404_v6 }
 0xe93   : > { %11111 = vmatpush3.msra.mxu0 %v3404_v6 }
 0xe94   : > { %3758 = vrot.lane.b32.xlu0 %v3733_v48, %s13913_s4 }
 0xe96   : > { %3760 = vrot.lane.b32.xlu1 %v3743_v49, %s13944_s5 }
 0xe98   : > { %3762 = vrot.lane.b32.xlu0 %v3747_v50, %s13944_s5 }
 0xeeb   : > { %v3302_v53 = vpop.permute.xlu0 %3301 }
 0xeef   : > { %v3300_v51 = vpop.permute.xlu1 %3299 }
 0xef0   : > { %11090 = vmatprep.mubr.msk.f32.mxu1 %vm1172_vm0, %v3300_v51 }
 0xef1   : > { %11091 = vmatmul.mubr.msk.f32.vlgmr.msra.gmra.mxu1 %vm1172_vm0, %v3302_v53 }
 0xef2   : > { %11119 = vmatpush3.msra.mxu1 %v3737_v17 }
 0xef3   : > { %11120 = vmatprep.subr.mxu1 %v3736_v58 }
 0xef4   : > { %11121 = vmatpush3.msra.mxu1 %v3736_v58 }
 0xef5   : > { %11122 = vmatprep.subr.mxu1 %v3735_v55  ;;  %v3306_v61 = vpop.permute.xlu0 %3305 }
 0xef6   : > { %11123 = vmatpush3.msra.mxu1 %v3735_v55 }
 0xef7   : > { %11124 = vmatprep.subr.mxu1 %v3734_v57 }
 0xef8   : > { %11125 = vmatpush3.msra.mxu1 %v3734_v57 }
 0xefa   : > { %v3304_v60 = vpop.permute.xlu1 %3303 }
 0xefb   : > { %11093 = vmatprep.mubr.msk.f32.mxu1 %vm1172_vm0, %v3304_v60 }
 0xefc   : > { %11094 = vmatmul.mubr.msk.f32.gmra.mxu1 %vm1172_vm0, %v3306_v61 }
 0xf00   : > { %v3753_v2 = vpop.permute.xlu1 %3752  ;;  %v3755_v0 = vpop.permute.xlu0 %3754 }
 0xf01   : > { %11126 = vmatprep.mubr.msk.f32.mxu1 %vm1172_vm0, %v3753_v2 }
 0xf02   : > { %11127 = vmatmul.mubr.msk.f32.vlgmr.msra.gmra.mxu1 %vm1172_vm0, %v3755_v0 }
 0xf04   : > { %v3757_v62 = vpop.permute.xlu1 %3756 }
 0xf05   : > { %11129 = vmatprep.mubr.msk.f32.mxu1 %vm1172_vm0, %v3757_v62 }
 0xf06   : > { %v3759_v63 = vpop.permute.xlu0 %3758 }
 0xf07   : > { %11130 = vmatmul.mubr.msk.f32.gmra.mxu1 %vm1172_vm0, %v3759_v63 }
 0xf08   : > { %v3761_v15 = vpop.permute.xlu1 %3760 }
 0xf0a   : > { %v3763_v29 = vpop.permute.xlu0 %3762 }
 0xf0b   : > { %v3764_v54 = vsel %vm1172_vm0, %v3761_v15, %v3763_v29 }
 0xfb1   : > { %v11092_v7 = vpop.f32.mrf.mxu1 }
 0xfb2   : > { %v3387_v52 = vadd.f32 %v11092_v7, %v12624_v10 }
 0xfb3   : > { %v3381_v9 = vpop.f32.mrf.mxu1 }
 0xfb4   : > { %v3382_v11 = vadd.f32 %v12624_v10, %v3381_v9  ;;  %v3401_v12 = vmax.f32 %v3387_v52, 0.0 }
 0xfb6   : > { %v3400_v8 = vmax.f32 %v3382_v11, 0.0 }
 0xfb8   : > { %11112 = vmatprep.mubr.msk.f32.mxu0 %vm1290_vm9, %v3400_v8 }
 0xfb9   : > { %11113 = vmatmul.mubr.msk.f32.vlgmr.msra.gmra.mxu0 %vm1290_vm9, %v3401_v12 }
 0xfbc   : > { %v11095_v14 = vpop.f32.mrf.mxu1 }
 0xfbd   : > { %v3397_v16 = vadd.f32 %v11095_v14, %v12624_v10 }
 0xfbe   : > { %v3391_v17 = vpop.f32.mrf.mxu1 }
 0xfbf   : > { %v3392_v18 = vadd.f32 %v12624_v10, %v3391_v17  ;;  %v3403_v22 = vmax.f32 %v3397_v16, 0.0 }
 0xfc1   : > { %v3402_v19 = vmax.f32 %v3392_v18, 0.0 }
 0xfc2   : > { %v11128_v23 = vpop.f32.mrf.mxu1 }
 0xfc3   : > { %v12633_v24 = vadd.f32 %v11128_v23, %v3764_v54  ;;  %11115 = vmatprep.mubr.msk.f32.mxu0 %vm1290_vm9, %v3402_v19 }
 0xfc4   : > { %11116 = vmatmul.mubr.msk.f32.gmra.mxu0 %vm1290_vm9, %v3403_v22  ;;  %v3840_v25 = vpop.f32.mrf.mxu1 }
 0xfc5   : > { %v12637_v56 = vadd.f32 %v3840_v25, %v3764_v54  ;;  %3863 = vrot.lane.b32.xlu1 %v12633_v24, %s13913_s4 }
 0xfc7   : > { %v11131_v26 = vpop.f32.mrf.mxu1  ;;  %3861 = vrot.lane.b32.xlu0 %v12637_v56, %s13913_s4  ;;  %11136 = vmatprep.mubr.msk.f32.mxu1 %vm1396_vm10, %v12637_v56 }
 0xfc8   : > { %v12645_v20 = vadd.f32 %v11131_v26, %v3764_v54 }
 0xfc9   : > { %v3850_v13 = vpop.f32.mrf.mxu1 }
 0xfca   : > { %v12647_v30 = vadd.f32 %v3850_v13, %v3764_v54  ;;  %3952 = vrot.lane.b32.xlu1 %v12645_v20, %s13913_s4 }
 0xfcc   : > { %11143 = vmatprep.mubr.msk.f32.mxu0 %vm1396_vm10, %v12647_v30  ;;  %3950 = vrot.lane.b32.xlu0 %v12647_v30, %s13913_s4  ;;  %s13949_s4 = smov 112  }
0x1037   : > { %v3864_v28 = vpop.permute.xlu1 %3863 }
0x1038   : > { %11132 = vmatprep.subr.msk.mxu1 %vm1396_vm10, %v3864_v28 }
0x1039   : > { %11133 = vmatpush3.xpose.msk.msra.mxu1 %vm1396_vm10, %v3864_v28  ;;  %v3862_v1 = vpop.permute.xlu0 %3861 }
0x103a   : > { %11134 = vmatprep.subr.msk.mxu1 %vm1396_vm10, %v3862_v1 }
0x103c   : > { %v3953_v31 = vpop.permute.xlu1 %3952 }
0x103d   : > { %11135 = vmatpush3.xpose.msk.msra.mxu1 %vm1396_vm10, %v3862_v1  ;;  %11139 = vmatprep.subr.msk.mxu0 %vm1396_vm10, %v3953_v31 }
0x103e   : > { %11140 = vmatpush3.xpose.msk.msra.mxu0 %vm1396_vm10, %v3953_v31  ;;  %v3951_v59 = vpop.permute.xlu0 %3950 }
0x103f   : > { %11141 = vmatprep.subr.msk.mxu0 %vm1396_vm10, %v3951_v59 }
0x1040   : > { %11137 = vmatmul.mubr.msk.f32.vlgmr.msra.gmra.mxu1 %vm1396_vm10, %v12633_v24 }
0x1042   : > { %11142 = vmatpush3.xpose.msk.msra.mxu0 %vm1396_vm10, %v3951_v59 }
0x1045   : > { %11144 = vmatmul.mubr.msk.f32.vlgmr.msra.gmra.mxu0 %vm1396_vm10, %v12645_v20 }
0x1079   : > { %v12667_v35 = vpop.f32.mrf.mxu0 }
0x107b   : > { %v12669_v39 = vpop.f32.mrf.mxu0 }
0x1084   : > { %v12671_v40 = vpop.f32.mrf.mxu0 }
0x1086   : > { %v12673_v44 = vpop.f32.mrf.mxu0 }
0x1100   : > { %v11138_v41 = vpop.f32.mrf.mxu1 }
0x1101   : > { %v4038_v42 = vmul.f32 0.35355338, %v11138_v41 }
0x1102   : > { %v3939_v38 = vpop.f32.mrf.mxu1 }
0x1103   : > { %v4037_v46 = vmul.f32 0.35355338, %v3939_v38  ;;  %v4044_v21 = vsel %vm1573_vm11, %v4038_v42, -inf }
0x1104   : > { %4045 = vmax.xlane.f32.xlu0 %v4044_v21 }
0x1105   : > { %v11145_v45 = vpop.f32.mrf.mxu0  ;;  %v4041_v48 = vsel %vm1573_vm11, %v4037_v46, -inf }
0x1106   : > { %4042 = vmax.xlane.f32.xlu1 %v4041_v48  ;;  %v4040_v51 = vmul.f32 0.35355338, %v11145_v45 }
0x1107   : > { %v4028_v49 = vpop.f32.mrf.mxu0 }
0x1108   : > { %v4039_v50 = vmul.f32 0.35355338, %v4028_v49  ;;  %v4050_v58 = vsel %vm1573_vm11, %v4040_v51, -inf }
0x110a   : > { %v4047_v53 = vsel %vm1573_vm11, %v4039_v50, -inf }
0x110b   : > { %4048 = vmax.xlane.f32.xlu0 %v4047_v53 }
0x110f   : > { %4051 = vmax.xlane.f32.xlu0 %v4050_v58 }
0x1117   : > { %4087 = vrot.lane.b32.xlu1 %v12633_v24, %s13940_s0 }
0x111b   : > { %4174 = vrot.lane.b32.xlu1 %v12645_v20, %s13940_s0 }
0x111f   : > { %4265 = vrot.lane.b32.xlu1 %v12633_v24, %s13945_s6 }
0x1123   : > { %4172 = vrot.lane.b32.xlu1 %v12647_v30, %s13940_s0 }
0x1125   : > { %4085 = vrot.lane.b32.xlu0 %v12637_v56, %s13940_s0 }
0x1127   : > { %4356 = vrot.lane.b32.xlu1 %v12645_v20, %s13945_s6 }
0x1129   : > { %4263 = vrot.lane.b32.xlu0 %v12637_v56, %s13945_s6 }
0x112b   : > { %4261 = vrot.lane.b32.xlu1 %v12633_v24, %s13946_s2 }
0x112d   : > { %4259 = vrot.lane.b32.xlu0 %v12637_v56, %s13946_s2 }
0x118d   : > { %v4046_v55 = vpop.xlane.xlu0 %4045 }
0x118e   : > { %v4054_v57 = vsub.f32 %v4038_v42, %v4046_v55 }
0x118f   : > { %v4043_v60 = vpop.xlane.xlu1 %4042 }
0x1190   : > { %v4059_v61 = vmul.f32 1.442695, %v4054_v57  ;;  %v4053_v2 = vsub.f32 %v4037_v46, %v4043_v60 }
0x1192   : > { %11722 = vpow2.f32 %v4059_v61  ;;  %v4057_v0 = vmul.f32 1.442695, %v4053_v2 }
0x1193   : > { %v4088_v62 = vpop.permute.xlu1 %4087 }
0x1194   : > { %11724 = vpow2.f32 %v4057_v0  ;;  %v4049_v63 = vpop.xlane.xlu0 %4048  ;;  %11146 = vmatprep.subr.mxu1 %v4088_v62 }
0x1195   : > { %v4055_v3 = vsub.f32 %v4039_v50, %v4049_v63  ;;  %11147 = vmatpush3.msra.mxu1 %v4088_v62 }
0x1197   : > { %v4061_v4 = vmul.f32 1.442695, %v4055_v3  ;;  %v4175_v5 = vpop.permute.xlu1 %4174 }
0x1198   : > { %v4052_v6 = vpop.xlane.xlu0 %4051 }
0x1199   : > { %11726 = vpow2.f32 %v4061_v4  ;;  %v4056_v7 = vsub.f32 %v4040_v51, %v4052_v6 }
0x119b   : > { %v4063_v52 = vmul.f32 1.442695, %v4056_v7  ;;  %v4266_v9 = vpop.permute.xlu1 %4265 }
0x119c   : > { %v4086_v11 = vpop.permute.xlu0 %4085  ;;  %11160 = vmatprep.subr.msk.mxu0 %vm1396_vm10, %v4266_v9 }
0x119d   : > { %11728 = vpow2.f32 %v4063_v52  ;;  %11148 = vmatprep.subr.mxu1 %v4086_v11  ;;  %11161 = vmatpush3.xpose.msk.msra.mxu0 %vm1396_vm10, %v4266_v9 }
0x119e   : > { %11149 = vmatpush3.msra.mxu1 %v4086_v11 }
0x119f   : > { %v11723_v8 = vpop.eup %11722  ;;  %11153 = vmatprep.subr.mxu1 %v4175_v5  ;;  %v4173_v12 = vpop.permute.xlu1 %4172 }
0x11a0   : > { %v4264_v14 = vpop.permute.xlu0 %4263  ;;  %v4068_v15 = vsel %vm1573_vm11, %v11723_v8, 0.0 }
0x11a1   : > { %v11725_v29 = vpop.eup %11724  ;;  %4069 = vadd.xlane.f32.xlu0 %v4068_v15  ;;  %11162 = vmatprep.subr.msk.mxu0 %vm1396_vm10, %v4264_v14 }
0x11a2   : > { %11163 = vmatpush3.xpose.msk.msra.mxu0 %vm1396_vm10, %v4264_v14  ;;  %v4065_v16 = vsel %vm1573_vm11, %v11725_v29, 0.0 }
0x11a3   : > { %4066 = vadd.xlane.f32.xlu1 %v4065_v16  ;;  %v4357_v17 = vpop.permute.xlu1 %4356 }
0x11a4   : > { %v4260_v18 = vpop.permute.xlu0 %4259 }
0x11a5   : > { %11164 = vmatprep.mubr.msk.f32.mxu0 %vm1396_vm10, %v4260_v18 }
0x11a6   : > { %v11727_v54 = vpop.eup %11726 }
0x11a7   : > { %v4262_v19 = vpop.permute.xlu1 %4261  ;;  %v4071_v22 = vsel %vm1573_vm11, %v11727_v54, 0.0 }
0x11a8   : > { %4072 = vadd.xlane.f32.xlu1 %v4071_v22  ;;  %11165 = vmatmul.mubr.msk.f32.vlgmr.msra.gmra.mxu0 %vm1396_vm10, %v4262_v19 }
0x11aa   : > { %v11729_v23 = vpop.eup %11728 }
0x11ab   : > { %v4074_v25 = vsel %vm1573_vm11, %v11729_v23, 0.0 }
0x11ac   : > { %4075 = vadd.xlane.f32.xlu0 %v4074_v25 }
0x11b9   : > { %4350 = vrot.lane.b32.xlu1 %v12647_v30, %s13946_s2 }
0x11c2   : > { %4354 = vrot.lane.b32.xlu0 %v12647_v30, %s13945_s6 }
0x11c6   : > { %4352 = vrot.lane.b32.xlu0 %v12645_v20, %s13946_s2 }
0x122a   : > { %v4070_v26 = vpop.xlane.xlu0 %4069 }
0x122b   : > { %11730 = vrcp.f32 %v4070_v26 }
0x122c   : > { %v4067_v13 = vpop.xlane.xlu1 %4066 }
0x122d   : > { %11732 = vrcp.f32 %v4067_v13 }
0x1231   : > { %v4073_v28 = vpop.xlane.xlu1 %4072 }
0x1232   : > { %11734 = vrcp.f32 %v4073_v28 }
0x1235   : > { %v4076_v1 = vpop.xlane.xlu0 %4075  ;;  %v4351_v48 = vpop.permute.xlu1 %4350 }
0x1236   : > { %11736 = vrcp.f32 %v4076_v1 }
0x1238   : > { %v11731_v31 = vpop.eup %11730 }
0x1239   : > { %v4082_v42 = vmul.f32 %v11731_v31, %v11723_v8  ;;  %v4355_v49 = vpop.permute.xlu0 %4354 }
0x123a   : > { %v11733_v59 = vpop.eup %11732 }
0x123b   : > { %v4081_v41 = vmul.f32 %v11733_v59, %v11725_v29 }
0x123d   : > { %11150 = vmatprep.mubr.msk.f32.mxu1 %vm1573_vm11, %v4081_v41  ;;  %v4353_v50 = vpop.permute.xlu0 %4352 }
0x123e   : > { %11151 = vmatmul.mubr.msk.f32.vlgmr.msra.gmra.mxu1 %vm1573_vm11, %v4082_v42 }
0x123f   : > { %v11735_v38 = vpop.eup %11734  ;;  %11154 = vmatpush3.msra.mxu1 %v4175_v5 }
0x1240   : > { %11155 = vmatprep.subr.mxu1 %v4173_v12  ;;  %v4083_v46 = vmul.f32 %v11735_v38, %v11727_v54 }
0x1241   : > { %11156 = vmatpush3.msra.mxu1 %v4173_v12 }
0x1242   : > { %11167 = vmatprep.subr.msk.mxu1 %vm1396_vm10, %v4357_v17  ;;  %11157 = vmatprep.mubr.msk.f32.mxu1 %vm1573_vm11, %v4083_v46 }
0x1243   : > { %v11737_v21 = vpop.eup %11736 }
0x1244   : > { %v4084_v45 = vmul.f32 %v11737_v21, %v11729_v23 }
0x1246   : > { %11158 = vmatmul.mubr.msk.f32.vlgmr.msra.gmra.mxu1 %vm1573_vm11, %v4084_v45 }
0x1247   : > { %11168 = vmatpush3.xpose.msk.msra.mxu1 %vm1396_vm10, %v4357_v17  ;;  %11171 = vmatprep.mubr.msk.f32.mxu1 %vm1396_vm10, %v4351_v48 }
0x1248   : > { %11169 = vmatprep.subr.msk.mxu1 %vm1396_vm10, %v4355_v49 }
0x124b   : > { %11170 = vmatpush3.xpose.msk.msra.mxu1 %vm1396_vm10, %v4355_v49 }
0x124e   : > { %11172 = vmatmul.mubr.msk.f32.vlgmr.msra.gmra.mxu1 %vm1396_vm10, %v4353_v50 }
0x1268   : > { %v11166_v51 = vpop.f32.mrf.mxu0 }
0x1269   : > { %v4442_v53 = vmul.f32 0.35355338, %v11166_v51 }
0x126a   : > { %v4341_v58 = vpop.f32.mrf.mxu0 }
0x126b   : > { %v4441_v55 = vmul.f32 0.35355338, %v4341_v58  ;;  %v4448_v57 = vsel %vm1573_vm11, %v4442_v53, -inf }
0x126c   : > { %4449 = vmax.xlane.f32.xlu0 %v4448_v57 }
0x126d   : > { %v4445_v60 = vsel %vm1573_vm11, %v4441_v55, -inf }
0x126e   : > { %4446 = vmax.xlane.f32.xlu1 %v4445_v60 }
0x12f5   : > { %v4450_v62 = vpop.xlane.xlu0 %4449 }
0x12f6   : > { %v4458_v3 = vsub.f32 %v4442_v53, %v4450_v62 }
0x12f7   : > { %v4447_v61 = vpop.xlane.xlu1 %4446 }
0x12f8   : > { %v4457_v2 = vsub.f32 %v4441_v55, %v4447_v61  ;;  %v4463_v5 = vmul.f32 1.442695, %v4458_v3 }
0x12fa   : > { %v4461_v0 = vmul.f32 1.442695, %v4457_v2 }
0x12fc   : > { %11738 = vpow2.f32 %v4461_v0 }
0x12fd   : > { %11740 = vpow2.f32 %v4463_v5 }
0x12fe   : > { %v12725_v63 = vpop.f32.mrf.mxu1 }
0x1300   : > { %v12727_v4 = vpop.f32.mrf.mxu1 }
0x1306   : > { %v12729_v6 = vpop.f32.mrf.mxu1 }
0x1308   : > { %v12732_v9 = vpop.f32.mrf.mxu1 }
0x1309   : > { %v11739_v7 = vpop.eup %11738 }
0x130a   : > { %v4469_v52 = vsel %vm1573_vm11, %v11739_v7, 0.0  ;;  %v11741_v16 = vpop.eup %11740 }
0x130b   : > { %4470 = vadd.xlane.f32.xlu1 %v4469_v52  ;;  %v4472_v17 = vsel %vm1573_vm11, %v11741_v16, 0.0 }
0x130e   : > { %v11173_v11 = vpop.f32.mrf.mxu1 }
0x130f   : > { %v4444_v14 = vmul.f32 0.35355338, %v11173_v11 }
0x1310   : > { %v4432_v8 = vpop.f32.mrf.mxu1 }
0x1311   : > { %v4443_v12 = vmul.f32 0.35355338, %v4432_v8  ;;  %v4454_v29 = vsel %vm1573_vm11, %v4444_v14, -inf }
0x1313   : > { %v4451_v15 = vsel %vm1573_vm11, %v4443_v12, -inf }
0x1314   : > { %4452 = vmax.xlane.f32.xlu0 %v4451_v15 }
0x1318   : > { %4455 = vmax.xlane.f32.xlu0 %v4454_v29 }
0x131c   : > { %4473 = vadd.xlane.f32.xlu0 %v4472_v17  ;;  %4491 = vrot.lane.b32.xlu1 %v12633_v24, %s13947_s3 }
0x1320   : > { %4578 = vrot.lane.b32.xlu1 %v12645_v20, %s13947_s3 }
0x1324   : > { %4669 = vrot.lane.b32.xlu1 %v12633_v24, %s13948_s25 }
0x1328   : > { %4576 = vrot.lane.b32.xlu1 %v12647_v30, %s13947_s3 }
0x132c   : > { %4760 = vrot.lane.b32.xlu1 %v12645_v20, %s13948_s25 }
0x1330   : > { %4665 = vrot.lane.b32.xlu1 %v12633_v24, %s13949_s4 }
0x1332   : > { %4489 = vrot.lane.b32.xlu0 %v12637_v56, %s13947_s3  ;;  %s13950_s3 = smov 48  }
0x1336   : > { %4667 = vrot.lane.b32.xlu0 %v12637_v56, %s13948_s25 }
0x133a   : > { %4663 = vrot.lane.b32.xlu0 %v12637_v56, %s13949_s4 }
0x1394   : > { %v4471_v18 = vpop.xlane.xlu1 %4470 }
0x1395   : > { %11742 = vrcp.f32 %v4471_v18 }
0x1398   : > { %v4492_v54 = vpop.permute.xlu1 %4491 }
0x1399   : > { %11174 = vmatprep.subr.mxu0 %v4492_v54 }
0x139a   : > { %11175 = vmatpush3.msra.mxu0 %v4492_v54 }
0x139c   : > { %v4579_v19 = vpop.permute.xlu1 %4578 }
0x139d   : > { %v4453_v22 = vpop.xlane.xlu0 %4452  ;;  %11181 = vmatprep.subr.mxu1 %v4579_v19 }
0x139e   : > { %v4459_v23 = vsub.f32 %v4443_v12, %v4453_v22  ;;  %11182 = vmatpush3.msra.mxu1 %v4579_v19 }
0x13a0   : > { %v4465_v25 = vmul.f32 1.442695, %v4459_v23  ;;  %v4670_v26 = vpop.permute.xlu1 %4669 }
0x13a1   : > { %v4456_v13 = vpop.xlane.xlu0 %4455 }
0x13a2   : > { %v11743_v28 = vpop.eup %11742  ;;  %11744 = vpow2.f32 %v4465_v25  ;;  %v4460_v1 = vsub.f32 %v4444_v14, %v4456_v13 }
0x13a3   : > { %v4485_v31 = vmul.f32 %v11743_v28, %v11739_v7 }
0x13a4   : > { %v4467_v59 = vmul.f32 1.442695, %v4460_v1  ;;  %v4577_v41 = vpop.permute.xlu1 %4576 }
0x13a5   : > { %v4474_v42 = vpop.xlane.xlu0 %4473  ;;  %11178 = vmatprep.mubr.msk.f32.mxu0 %vm1573_vm11, %v4485_v31  ;;  %11183 = vmatprep.subr.mxu1 %v4577_v41 }
0x13a6   : > { %11746 = vpow2.f32 %v4467_v59  ;;  %11184 = vmatpush3.msra.mxu1 %v4577_v41 }
0x13a7   : > { %11748 = vrcp.f32 %v4474_v42 }
0x13a8   : > { %v4761_v38 = vpop.permute.xlu1 %4760 }
0x13a9   : > { %v4490_v46 = vpop.permute.xlu0 %4489  ;;  %11195 = vmatprep.subr.msk.mxu1 %vm1396_vm10, %v4761_v38 }
0x13aa   : > { %11176 = vmatprep.subr.mxu0 %v4490_v46 }
0x13ab   : > { %11177 = vmatpush3.msra.mxu0 %v4490_v46 }
0x13ac   : > { %11188 = vmatprep.subr.msk.mxu0 %vm1396_vm10, %v4670_v26  ;;  %v4666_v55 = vpop.permute.xlu1 %4665 }
0x13ad   : > { %v4668_v48 = vpop.permute.xlu0 %4667 }
0x13af   : > { %v11745_v21 = vpop.eup %11744 }
0x13b0   : > { %v4475_v45 = vsel %vm1573_vm11, %v11745_v21, 0.0 }
0x13b1   : > { %4476 = vadd.xlane.f32.xlu1 %v4475_v45  ;;  %v4664_v58 = vpop.permute.xlu0 %4663 }
0x13b3   : > { %v11747_v49 = vpop.eup %11746 }
0x13b4   : > { %v11749_v50 = vpop.eup %11748  ;;  %v4478_v51 = vsel %vm1573_vm11, %v11747_v49, 0.0 }
0x13b5   : > { %4479 = vadd.xlane.f32.xlu0 %v4478_v51  ;;  %v4486_v53 = vmul.f32 %v11749_v50, %v11741_v16 }
0x13b7   : > { %11179 = vmatmul.mubr.msk.f32.vlgmr.msra.gmra.mxu0 %vm1573_vm11, %v4486_v53 }
0x13b8   : > { %11189 = vmatpush3.xpose.msk.msra.mxu0 %vm1396_vm10, %v4670_v26  ;;  %11192 = vmatprep.mubr.msk.f32.mxu0 %vm1396_vm10, %v4664_v58 }
0x13b9   : > { %11190 = vmatprep.subr.msk.mxu0 %vm1396_vm10, %v4668_v48 }
0x13bc   : > { %11191 = vmatpush3.xpose.msk.msra.mxu0 %vm1396_vm10, %v4668_v48 }
0x13bf   : > { %11193 = vmatmul.mubr.msk.f32.vlgmr.msra.gmra.mxu0 %vm1396_vm10, %v4666_v55 }
0x13c2   : > { %4754 = vrot.lane.b32.xlu1 %v12647_v30, %s13949_s4 }
0x13cb   : > { %4758 = vrot.lane.b32.xlu0 %v12647_v30, %s13948_s25 }
0x13cf   : > { %4756 = vrot.lane.b32.xlu0 %v12645_v20, %s13949_s4 }
0x143a   : > { %v4477_v57 = vpop.xlane.xlu1 %4476 }
0x143b   : > { %11750 = vrcp.f32 %v4477_v57 }
0x143e   : > { %v4480_v60 = vpop.xlane.xlu0 %4479  ;;  %v4755_v3 = vpop.permute.xlu1 %4754 }
0x143f   : > { %11752 = vrcp.f32 %v4480_v60 }
0x1442   : > { %v4759_v5 = vpop.permute.xlu0 %4758 }
0x1446   : > { %v4757_v7 = vpop.permute.xlu0 %4756 }
0x1448   : > { %v11751_v61 = vpop.eup %11750 }
0x1449   : > { %v4487_v2 = vmul.f32 %v11751_v61, %v11745_v21 }
0x144b   : > { %11185 = vmatprep.mubr.msk.f32.mxu1 %vm1573_vm11, %v4487_v2 }
0x144c   : > { %v11753_v0 = vpop.eup %11752 }
0x144d   : > { %v4488_v62 = vmul.f32 %v11753_v0, %v11747_v49 }
0x144f   : > { %11186 = vmatmul.mubr.msk.f32.vlgmr.msra.gmra.mxu1 %vm1573_vm11, %v4488_v62 }
0x1450   : > { %11196 = vmatpush3.xpose.msk.msra.mxu1 %vm1396_vm10, %v4761_v38  ;;  %11199 = vmatprep.mubr.msk.f32.mxu1 %vm1396_vm10, %v4755_v3 }
0x1451   : > { %11197 = vmatprep.subr.msk.mxu1 %vm1396_vm10, %v4759_v5 }
0x1454   : > { %11198 = vmatpush3.xpose.msk.msra.mxu1 %vm1396_vm10, %v4759_v5 }
0x1457   : > { %11200 = vmatmul.mubr.msk.f32.vlgmr.msra.gmra.mxu1 %vm1396_vm10, %v4757_v7 }
0x1477   : > { %v12779_v52 = vpop.f32.mrf.mxu0 }
0x1479   : > { %v12781_v11 = vpop.f32.mrf.mxu0 }
0x147f   : > { %v11194_v8 = vpop.f32.mrf.mxu0 }
0x1480   : > { %v4846_v12 = vmul.f32 0.35355338, %v11194_v8 }
0x1481   : > { %v4745_v14 = vpop.f32.mrf.mxu0 }
0x1482   : > { %v4845_v15 = vmul.f32 0.35355338, %v4745_v14  ;;  %v4852_v29 = vsel %vm1573_vm11, %v4846_v12, -inf }
0x1483   : > { %4853 = vmax.xlane.f32.xlu0 %v4852_v29 }
0x1484   : > { %v4849_v16 = vsel %vm1573_vm11, %v4845_v15, -inf }
0x1485   : > { %4850 = vmax.xlane.f32.xlu1 %v4849_v16 }
0x150c   : > { %v4854_v17 = vpop.xlane.xlu0 %4853 }
0x150d   : > { %v4862_v18 = vsub.f32 %v4846_v12, %v4854_v17 }
0x150e   : > { %v4851_v54 = vpop.xlane.xlu1 %4850 }
0x150f   : > { %v4861_v19 = vsub.f32 %v4845_v15, %v4851_v54  ;;  %v4867_v22 = vmul.f32 1.442695, %v4862_v18  ;;  %v12785_v25 = vpop.f32.mrf.mxu1 }
0x1511   : > { %v4865_v23 = vmul.f32 1.442695, %v4861_v19  ;;  %v12787_v26 = vpop.f32.mrf.mxu1 }
0x1513   : > { %11754 = vpow2.f32 %v4865_v23 }
0x1514   : > { %11756 = vpow2.f32 %v4867_v22 }
0x1517   : > { %v11201_v13 = vpop.f32.mrf.mxu1 }
0x1518   : > { %v4848_v31 = vmul.f32 0.35355338, %v11201_v13 }
0x1519   : > { %v4836_v28 = vpop.f32.mrf.mxu1 }
0x151a   : > { %v4847_v1 = vmul.f32 0.35355338, %v4836_v28  ;;  %v4858_v42 = vsel %vm1573_vm11, %v4848_v31, -inf }
0x151c   : > { %v4855_v59 = vsel %vm1573_vm11, %v4847_v1, -inf }
0x151d   : > { %4856 = vmax.xlane.f32.xlu0 %v4855_v59 }
0x1520   : > { %v11755_v41 = vpop.eup %11754 }
0x1521   : > { %v11757_v38 = vpop.eup %11756  ;;  %4859 = vmax.xlane.f32.xlu0 %v4858_v42  ;;  %v4873_v46 = vsel %vm1573_vm11, %v11755_v41, 0.0 }
0x1522   : > { %4874 = vadd.xlane.f32.xlu1 %v4873_v46  ;;  %v4876_v21 = vsel %vm1573_vm11, %v11757_v38, 0.0 }
0x1525   : > { %4877 = vadd.xlane.f32.xlu0 %v4876_v21 }
0x1533   : > { %4895 = vrot.lane.b32.xlu1 %v12633_v24, %s13950_s3 }
0x1537   : > { %4982 = vrot.lane.b32.xlu1 %v12645_v20, %s13950_s3 }
0x153b   : > { %5073 = vrot.lane.b32.xlu1 %v12633_v24, %s13951_s23  ;;  %4893 = vrot.lane.b32.xlu0 %v12637_v56, %s13950_s3 }
0x153f   : > { %4980 = vrot.lane.b32.xlu1 %v12647_v30, %s13950_s3  ;;  %5071 = vrot.lane.b32.xlu0 %v12637_v56, %s13951_s23  ;;  %s13953_s3 = smov 40  }
0x1543   : > { %5164 = vrot.lane.b32.xlu1 %v12645_v20, %s13951_s23  ;;  %5067 = vrot.lane.b32.xlu0 %v12637_v56, %s13952_s29 }
0x1547   : > { %5069 = vrot.lane.b32.xlu1 %v12633_v24, %s13952_s29 }
0x15a6   : > { %v4857_v45 = vpop.xlane.xlu0 %4856 }
0x15a7   : > { %v4863_v48 = vsub.f32 %v4847_v1, %v4857_v45 }
0x15a9   : > { %v4869_v49 = vmul.f32 1.442695, %v4863_v48 }
0x15aa   : > { %v4860_v50 = vpop.xlane.xlu0 %4859 }
0x15ab   : > { %11758 = vpow2.f32 %v4869_v49  ;;  %v4864_v51 = vsub.f32 %v4848_v31, %v4860_v50  ;;  %v4875_v53 = vpop.xlane.xlu1 %4874 }
0x15ac   : > { %11760 = vrcp.f32 %v4875_v53 }
0x15ad   : > { %v4871_v58 = vmul.f32 1.442695, %v4864_v51 }
0x15ae   : > { %v4878_v55 = vpop.xlane.xlu0 %4877 }
0x15af   : > { %11762 = vpow2.f32 %v4871_v58  ;;  %v4896_v57 = vpop.permute.xlu1 %4895 }
0x15b0   : > { %11764 = vrcp.f32 %v4878_v55  ;;  %11202 = vmatprep.subr.mxu0 %v4896_v57 }
0x15b1   : > { %11203 = vmatpush3.msra.mxu0 %v4896_v57 }
0x15b2   : > { %v4894_v60 = vpop.permute.xlu0 %4893 }
0x15b3   : > { %v4983_v61 = vpop.permute.xlu1 %4982  ;;  %11204 = vmatprep.subr.mxu0 %v4894_v60 }
0x15b4   : > { %11209 = vmatprep.subr.mxu1 %v4983_v61  ;;  %11205 = vmatpush3.msra.mxu0 %v4894_v60 }
0x15b5   : > { %11210 = vmatpush3.msra.mxu1 %v4983_v61 }
0x15b6   : > { %v5072_v5 = vpop.permute.xlu0 %5071 }
0x15b7   : > { %v5074_v2 = vpop.permute.xlu1 %5073 }
0x15b8   : > { %v11759_v0 = vpop.eup %11758  ;;  %11216 = vmatprep.subr.msk.mxu0 %vm1396_vm10, %v5074_v2 }
0x15b9   : > { %v11761_v62 = vpop.eup %11760  ;;  %v4879_v3 = vsel %vm1573_vm11, %v11759_v0, 0.0 }
0x15ba   : > { %4880 = vadd.xlane.f32.xlu1 %v4879_v3  ;;  %v4889_v7 = vmul.f32 %v11761_v62, %v11755_v41  ;;  %v5068_v17 = vpop.permute.xlu0 %5067 }
0x15bb   : > { %v4981_v8 = vpop.permute.xlu1 %4980 }
0x15bc   : > { %v11763_v12 = vpop.eup %11762  ;;  %11206 = vmatprep.mubr.msk.f32.mxu0 %vm1573_vm11, %v4889_v7  ;;  %11211 = vmatprep.subr.mxu1 %v4981_v8 }
0x15bd   : > { %v11765_v14 = vpop.eup %11764  ;;  %11212 = vmatpush3.msra.mxu1 %v4981_v8  ;;  %v4882_v15 = vsel %vm1573_vm11, %v11763_v12, 0.0 }
0x15be   : > { %4883 = vadd.xlane.f32.xlu0 %v4882_v15  ;;  %v4890_v29 = vmul.f32 %v11765_v14, %v11757_v38 }
0x15bf   : > { %v5165_v16 = vpop.permute.xlu1 %5164 }
0x15c0   : > { %11207 = vmatmul.mubr.msk.f32.vlgmr.msra.gmra.mxu0 %vm1573_vm11, %v4890_v29  ;;  %11223 = vmatprep.subr.msk.mxu1 %vm1396_vm10, %v5165_v16 }
0x15c1   : > { %11217 = vmatpush3.xpose.msk.msra.mxu0 %vm1396_vm10, %v5074_v2  ;;  %11220 = vmatprep.mubr.msk.f32.mxu0 %vm1396_vm10, %v5068_v17 }
0x15c2   : > { %11218 = vmatprep.subr.msk.mxu0 %vm1396_vm10, %v5072_v5 }
0x15c3   : > { %v5070_v18 = vpop.permute.xlu1 %5069 }
0x15c5   : > { %11219 = vmatpush3.xpose.msk.msra.mxu0 %vm1396_vm10, %v5072_v5 }
0x15c8   : > { %11221 = vmatmul.mubr.msk.f32.vlgmr.msra.gmra.mxu0 %vm1396_vm10, %v5070_v18 }
0x15cb   : > { %5158 = vrot.lane.b32.xlu1 %v12647_v30, %s13952_s29 }
0x15d4   : > { %5162 = vrot.lane.b32.xlu0 %v12647_v30, %s13951_s23 }
0x15d8   : > { %5160 = vrot.lane.b32.xlu0 %v12645_v20, %s13952_s29 }
0x1643   : > { %v4881_v54 = vpop.xlane.xlu1 %4880 }
0x1644   : > { %11766 = vrcp.f32 %v4881_v54 }
0x1647   : > { %v4884_v19 = vpop.xlane.xlu0 %4883  ;;  %v5159_v1 = vpop.permute.xlu1 %5158 }
0x1648   : > { %11768 = vrcp.f32 %v4884_v19 }
0x164b   : > { %v5163_v31 = vpop.permute.xlu0 %5162 }
0x164f   : > { %v5161_v59 = vpop.permute.xlu0 %5160 }
0x1651   : > { %v11767_v22 = vpop.eup %11766 }
0x1652   : > { %v4891_v23 = vmul.f32 %v11767_v22, %v11759_v0 }
0x1654   : > { %11213 = vmatprep.mubr.msk.f32.mxu1 %vm1573_vm11, %v4891_v23 }
0x1655   : > { %v11769_v13 = vpop.eup %11768 }
0x1656   : > { %v4892_v28 = vmul.f32 %v11769_v13, %v11763_v12 }
0x1658   : > { %11214 = vmatmul.mubr.msk.f32.vlgmr.msra.gmra.mxu1 %vm1573_vm11, %v4892_v28 }
0x1659   : > { %11224 = vmatpush3.xpose.msk.msra.mxu1 %vm1396_vm10, %v5165_v16  ;;  %11227 = vmatprep.mubr.msk.f32.mxu1 %vm1396_vm10, %v5159_v1 }
0x165a   : > { %11225 = vmatprep.subr.msk.mxu1 %vm1396_vm10, %v5163_v31 }
0x165d   : > { %11226 = vmatpush3.xpose.msk.msra.mxu1 %vm1396_vm10, %v5163_v31 }
0x1660   : > { %11228 = vmatmul.mubr.msk.f32.vlgmr.msra.gmra.mxu1 %vm1396_vm10, %v5161_v59 }
0x1680   : > { %v12835_v41 = vpop.f32.mrf.mxu0 }
0x1682   : > { %v4971_v42 = vpop.f32.mrf.mxu0 }
0x1688   : > { %v11222_v38 = vpop.f32.mrf.mxu0 }
0x1689   : > { %v5250_v46 = vmul.f32 0.35355338, %v11222_v38 }
0x168a   : > { %v5149_v21 = vpop.f32.mrf.mxu0 }
0x168b   : > { %v5249_v45 = vmul.f32 0.35355338, %v5149_v21  ;;  %v5256_v48 = vsel %vm1573_vm11, %v5250_v46, -inf }
0x168c   : > { %5257 = vmax.xlane.f32.xlu0 %v5256_v48 }
0x168d   : > { %v5253_v49 = vsel %vm1573_vm11, %v5249_v45, -inf }
0x168e   : > { %5254 = vmax.xlane.f32.xlu1 %v5253_v49  ;;  %v5534_v49 = vld [vmem:[%s1066_s22 + $0x18] sm:$0xff] }
0x1715   : > { %v5258_v50 = vpop.xlane.xlu0 %5257 }
0x1716   : > { %v5266_v51 = vsub.f32 %v5250_v46, %v5258_v50  ;;  %v5533_v50 = vld [vmem:[%s1066_s22 + $0x10] sm:$0xff] }
0x1717   : > { %v5255_v53 = vpop.xlane.xlu1 %5254 }
0x1718   : > { %v5265_v58 = vsub.f32 %v5249_v45, %v5255_v53  ;;  %v5271_v55 = vmul.f32 1.442695, %v5266_v51  ;;  %v12839_v60 = vpop.f32.mrf.mxu1  ;;  %v5532_v51 = vld [vmem:[%s1066_s22 + $0x8] sm:$0xff]  ;;  %v5531_v53 = vld [vmem:[%s1066_s22] sm:$0xff]  ;;  %s13434_s22 = scalar_lea.vmem %s13868_s12, %s12580_s30 }
0x171a   : > { %v5269_v57 = vmul.f32 1.442695, %v5265_v58  ;;  %v12841_v61 = vpop.f32.mrf.mxu1 }
0x171c   : > { %11770 = vpow2.f32 %v5269_v57 }
0x171d   : > { %11772 = vpow2.f32 %v5271_v55 }
0x1720   : > { %v11229_v2 = vpop.f32.mrf.mxu1 }
0x1721   : > { %v5252_v3 = vmul.f32 0.35355338, %v11229_v2 }
0x1722   : > { %v5240_v0 = vpop.f32.mrf.mxu1 }
0x1723   : > { %v5251_v62 = vmul.f32 0.35355338, %v5240_v0  ;;  %v5262_v8 = vsel %vm1573_vm11, %v5252_v3, -inf  ;;  %v12884_v0 = vld [vmem:[%s12134_s8 + $0x4] ss:$0 sm:$0xff] }
0x1725   : > { %v5259_v5 = vsel %vm1573_vm11, %v5251_v62, -inf }
0x1726   : > { %5260 = vmax.xlane.f32.xlu0 %v5259_v5 }
0x1729   : > { %v11771_v7 = vpop.eup %11770 }
0x172a   : > { %v11773_v12 = vpop.eup %11772  ;;  %5263 = vmax.xlane.f32.xlu0 %v5262_v8  ;;  %v5277_v14 = vsel %vm1573_vm11, %v11771_v7, 0.0 }
0x172b   : > { %5278 = vadd.xlane.f32.xlu1 %v5277_v14  ;;  %v5280_v15 = vsel %vm1573_vm11, %v11773_v12, 0.0 }
0x172e   : > { %5281 = vadd.xlane.f32.xlu0 %v5280_v15 }
0x173c   : > { %5299 = vrot.lane.b32.xlu1 %v12633_v24, %s13953_s3 }
0x1740   : > { %5386 = vrot.lane.b32.xlu1 %v12645_v20, %s13953_s3 }
0x17af   : > { %v5261_v29 = vpop.xlane.xlu0 %5260 }
0x17b0   : > { %v5267_v16 = vsub.f32 %v5251_v62, %v5261_v29 }
0x17b2   : > { %v5273_v17 = vmul.f32 1.442695, %v5267_v16 }
0x17b3   : > { %v5264_v18 = vpop.xlane.xlu0 %5263 }
0x17b4   : > { %11774 = vpow2.f32 %v5273_v17  ;;  %v5268_v54 = vsub.f32 %v5252_v3, %v5264_v18  ;;  %v5279_v19 = vpop.xlane.xlu1 %5278 }
0x17b5   : > { %11776 = vrcp.f32 %v5279_v19 }
0x17b6   : > { %v5275_v22 = vmul.f32 1.442695, %v5268_v54 }
0x17b7   : > { %v5282_v38 = vpop.xlane.xlu0 %5281 }
0x17b8   : > { %11778 = vpow2.f32 %v5275_v22  ;;  %v5300_v23 = vpop.permute.xlu1 %5299 }
0x17b9   : > { %11230 = vmatprep.subr.mxu0 %v5300_v23  ;;  %11780 = vrcp.f32 %v5282_v38 }
0x17ba   : > { %11231 = vmatpush3.msra.mxu0 %v5300_v23 }
0x17bc   : > { %v5387_v13 = vpop.permute.xlu1 %5386 }
0x17bd   : > { %11237 = vmatprep.subr.mxu1 %v5387_v13 }
0x17be   : > { %11238 = vmatpush3.msra.mxu1 %v5387_v13 }
0x17c1   : > { %v11775_v24 = vpop.eup %11774 }
0x17c2   : > { %v11777_v28 = vpop.eup %11776  ;;  %v5283_v20 = vsel %vm1573_vm11, %v11775_v24, 0.0 }
0x17c3   : > { %5284 = vadd.xlane.f32.xlu1 %v5283_v20  ;;  %v5293_v1 = vmul.f32 %v11777_v28, %v11771_v7 }
0x17c5   : > { %v11779_v31 = vpop.eup %11778  ;;  %11234 = vmatprep.mubr.msk.f32.mxu0 %vm1573_vm11, %v5293_v1 }
0x17c6   : > { %v5286_v59 = vsel %vm1573_vm11, %v11779_v31, 0.0 }
0x17c7   : > { %5287 = vadd.xlane.f32.xlu0 %v5286_v59 }
0x17d4   : > { %5384 = vrot.lane.b32.xlu1 %v12647_v30, %s13953_s3 }
0x17d8   : > { %5475 = vrot.lane.b32.xlu1 %v12781_v11, %s13954_s24  ;;  %v11781_v11 = vpop.eup %11780 }
0x17dc   : > { %5491 = vrot.lane.b32.xlu1 %v4971_v42, %s13955_s26 }
0x17dd   : > { %5297 = vrot.lane.b32.xlu0 %v12637_v56, %s13953_s3  ;;  %v5294_v56 = vmul.f32 %v11781_v11, %v11773_v12  ;;  %s1076_s3 = scalar_lea.vmem %s13959_s9, %s12142_s1 }
0x17e1   : > { %5477 = vrot.lane.b32.xlu0 %v12779_v52, %s13954_s24 }
0x17e5   : > { %5493 = vrot.lane.b32.xlu0 %v12835_v41, %s13955_s26 }
0x184c   : > { %v5285_v46 = vpop.xlane.xlu1 %5284 }
0x184d   : > { %11782 = vrcp.f32 %v5285_v46 }
0x1850   : > { %v5288_v21 = vpop.xlane.xlu0 %5287  ;;  %v5385_v30 = vpop.permute.xlu1 %5384 }
0x1851   : > { %11784 = vrcp.f32 %v5288_v21  ;;  %11239 = vmatprep.subr.mxu1 %v5385_v30 }
0x1852   : > { %11240 = vmatpush3.msra.mxu1 %v5385_v30 }
0x1854   : > { %v5298_v42 = vpop.permute.xlu0 %5297 }
0x1855   : > { %11232 = vmatprep.subr.mxu0 %v5298_v42 }
0x1856   : > { %11233 = vmatpush3.msra.mxu0 %v5298_v42  ;;  %v11918_v42 = vld [vmem:[%s12452_s27 + $0x8] sm:$0xff] }
0x1857   : > { %11235 = vmatmul.mubr.msk.f32.vlgmr.msra.gmra.mxu0 %vm1573_vm11, %v5294_v56  ;;  %11244 = vmatprep.subr.mxu0 %v5534_v49 }
0x1858   : > { %11245 = vmatpush3.msra.mxu0 %v5534_v49 }
0x1859   : > { %11246 = vmatprep.subr.mxu0 %v5533_v50 }
0x185a   : > { %v11783_v52 = vpop.eup %11782  ;;  %11247 = vmatpush3.msra.mxu0 %v5533_v50 }
0x185b   : > { %v5295_v45 = vmul.f32 %v11783_v52, %v11775_v24  ;;  %11248 = vmatprep.subr.mxu0 %v5532_v51  ;;  %v11919_v52 = vld [vmem:[%s12452_s27] sm:$0xff] }
0x185c   : > { %11249 = vmatpush3.msra.mxu0 %v5532_v51 }
0x185d   : > { %11241 = vmatprep.mubr.msk.f32.mxu1 %vm1573_vm11, %v5295_v45  ;;  %11250 = vmatprep.subr.mxu0 %v5531_v53 }
0x185e   : > { %v11785_v41 = vpop.eup %11784  ;;  %11251 = vmatpush3.msra.mxu0 %v5531_v53 }
0x185f   : > { %v5296_v48 = vmul.f32 %v11785_v41, %v11779_v31 }
0x1861   : > { %11242 = vmatmul.mubr.msk.f32.vlgmr.msra.gmra.mxu1 %vm1573_vm11, %v5296_v48 }
0x1917   : > { %v11236_v58 = vpop.f32.mrf.mxu0 }
0x1918   : > { %5509 = vrot.lane.b32.xlu0 %v11236_v58, %s13957_s21 }
0x1919   : > { %v5375_v55 = vpop.f32.mrf.mxu0 }
0x191a   : > { %5507 = vrot.lane.b32.xlu1 %v5375_v55, %s13957_s21 }
0x191c   : > { %5481 = vrot.lane.b32.xlu0 %v12785_v25, %s13954_s24  ;;  %v5478_v25 = vpop.permute.xlu0 %5477 }
0x191d   : > { %v5520_v5 = vsel %vm1396_vm10, %v12725_v63, %v5478_v25 }
0x191e   : > { %5479 = vrot.lane.b32.xlu1 %v12787_v26, %s13954_s24  ;;  %v5476_v26 = vpop.permute.xlu1 %5475 }
0x1920   : > { %5497 = vrot.lane.b32.xlu0 %v12839_v60, %s13955_s26  ;;  %v5494_v60 = vpop.permute.xlu0 %5493 }
0x1921   : > { %v11243_v57 = vpop.f32.mrf.mxu1  ;;  %v5524_v12 = vsel %vm1573_vm11, %v5520_v5, %v5494_v60  ;;  %v11920_v60 = vld [vmem:[%s12452_s27 + $0x18] sm:$0xff]  ;;  %v11921_v5 = vld [vmem:[%s12452_s27 + $0x10] sm:$0xff] }
0x1922   : > { %5495 = vrot.lane.b32.xlu1 %v12841_v61, %s13955_s26  ;;  %v5492_v62 = vpop.permute.xlu1 %5491  ;;  %v5519_v61 = vsel %vm1396_vm10, %v12727_v4, %v5476_v26 }
0x1923   : > { %v5462_v2 = vpop.f32.mrf.mxu1  ;;  %v5523_v7 = vsel %vm1573_vm11, %v5519_v61, %v5492_v62 }
0x1924   : > { %5513 = vrot.lane.b32.xlu0 %v11243_v57, %s13957_s21 }
0x1926   : > { %5511 = vrot.lane.b32.xlu1 %v5462_v2, %s13957_s21 }
0x1928   : > { %5541 = vrot.lane.b32.xlu0 %v12884_v0, %s13940_s0 }
0x192a   : > { %3412 = vrot.lane.b32.xlu1 %v12624_v10, %s13940_s0 }
0x198a   : > { %v5510_v3 = vpop.permute.xlu0 %5509 }
0x198b   : > { %v5528_v10 = vsel %vm3060_vm12, %v5524_v12, %v5510_v3 }
0x198c   : > { %v5508_v8 = vpop.permute.xlu1 %5507 }
0x198d   : > { %v5527_v14 = vsel %vm3060_vm12, %v5523_v7, %v5508_v8 }
0x198e   : > { %v5482_v15 = vpop.permute.xlu0 %5481  ;;  %11252 = vmatprep.mubr.msk.f32.mxu0 %vm1172_vm0, %v5527_v14 }
0x198f   : > { %11253 = vmatmul.mubr.msk.f32.vlgmr.msra.gmra.mxu0 %vm1172_vm0, %v5528_v10  ;;  %v5522_v18 = vsel %vm1396_vm10, %v12729_v6, %v5482_v15 }
0x1990   : > { %v5480_v29 = vpop.permute.xlu1 %5479 }
0x1991   : > { %v5521_v63 = vsel %vm1396_vm10, %v12732_v9, %v5480_v29 }
0x1992   : > { %v5498_v16 = vpop.permute.xlu0 %5497 }
0x1993   : > { %v5526_v22 = vsel %vm1573_vm11, %v5522_v18, %v5498_v16 }
0x1994   : > { %v5496_v4 = vpop.permute.xlu1 %5495 }
0x1995   : > { %v5525_v54 = vsel %vm1573_vm11, %v5521_v63, %v5496_v4 }
0x1996   : > { %v5514_v17 = vpop.permute.xlu0 %5513 }
0x1997   : > { %v5530_v13 = vsel %vm3060_vm12, %v5526_v22, %v5514_v17 }
0x1998   : > { %v5512_v19 = vpop.permute.xlu1 %5511 }
0x1999   : > { %v5529_v23 = vsel %vm3060_vm12, %v5525_v54, %v5512_v19 }
0x199a   : > { %11255 = vmatprep.mubr.msk.f32.mxu0 %vm1172_vm0, %v5529_v23 }
0x199b   : > { %11256 = vmatmul.mubr.msk.f32.gmra.mxu0 %vm1172_vm0, %v5530_v13 }
0x199c   : > { %v3413_v24 = vpop.permute.xlu1 %3412 }
0x199d   : > { %v3499_v9 = vadd.f32 %v12667_v35, %v3413_v24  ;;  %v3494_v28 = vadd.f32 %v12669_v39, %v3413_v24  ;;  %v3504_v6 = vadd.f32 %v12673_v44, %v3413_v24  ;;  %v3509_v46 = vadd.f32 %v12671_v40, %v3413_v24 }
0x199f   : > { %v3513_v20 = vadd.f32 %v3499_v9, %v12456_v27  ;;  %v3512_v1 = vadd.f32 %v3494_v28, %v12460_v32  ;;  %v3514_v38 = vadd.f32 %v3504_v6, %v12475_v47  ;;  %v3515_v39 = vadd.f32 %v3509_v46, %v12471_v43  ;;  %v5542_v32 = vpop.permute.xlu0 %5541 }
0x19a1   : > { %v3519_v31 = vsel %vm1172_vm0, %v3513_v20, 0.0  ;;  %v3516_v59 = vsel %vm1172_vm0, %v3512_v1, 0.0  ;;  %v3522_v35 = vsel %vm1172_vm0, %v3514_v38, 0.0  ;;  %v3525_v27 = vsel %vm1172_vm0, %v3515_v39, 0.0 }
0x19a2   : > { %3520 = vadd.xlane.f32.xlu0 %v3519_v31  ;;  %3517 = vadd.xlane.f32.xlu1 %v3516_v59 }
0x19a6   : > { %3523 = vadd.xlane.f32.xlu0 %v3522_v35 }
0x19aa   : > { %3526 = vadd.xlane.f32.xlu0 %v3525_v27 }
0x1a2b   : > { %v3521_v44 = vpop.xlane.xlu0 %3520  ;;  %v3518_v48 = vpop.xlane.xlu1 %3517 }
0x1a2c   : > { %v3529_v49 = vmul.f32 0.03125, %v3521_v44  ;;  %v3528_v51 = vmul.f32 0.03125, %v3518_v48 }
0x1a2e   : > { %v12933_v58 = vsub.f32 %v3513_v20, %v3529_v49  ;;  %v12935_v25 = vsub.f32 %v3512_v1, %v3528_v51 }
0x1a2f   : > { %v3524_v56 = vpop.xlane.xlu0 %3523 }
0x1a30   : > { %v3530_v26 = vmul.f32 0.03125, %v3524_v56  ;;  %v3537_v12 = vmul.f32 %v12933_v58, %v12933_v58  ;;  %v3536_v15 = vmul.f32 %v12935_v25, %v12935_v25 }
0x1a32   : > { %v12949_v14 = vsub.f32 %v3514_v38, %v3530_v26  ;;  %v3543_v29 = vsel %vm1172_vm0, %v3537_v12, 0.0  ;;  %v3540_v4 = vsel %vm1172_vm0, %v3536_v15, 0.0 }
0x1a33   : > { %v3527_v50 = vpop.xlane.xlu0 %3526 }
0x1a34   : > { %v3531_v55 = vmul.f32 0.03125, %v3527_v50  ;;  %v3538_v63 = vmul.f32 %v12949_v14, %v12949_v14 }
0x1a36   : > { %v12940_v61 = vsub.f32 %v3515_v39, %v3531_v55  ;;  %v3546_v18 = vsel %vm1172_vm0, %v3538_v63, 0.0 }
0x1a38   : > { %v3539_v16 = vmul.f32 %v12940_v61, %v12940_v61 }
0x1a3a   : > { %v3549_v17 = vsel %vm1172_vm0, %v3539_v16, 0.0 }
0x1a4f   : > { %v11254_v21 = vpop.f32.mrf.mxu0 }
0x1a50   : > { %v5628_v30 = vadd.f32 %v11254_v21, %v5542_v32 }
0x1a51   : > { %v5622_v11 = vpop.f32.mrf.mxu0 }
0x1a52   : > { %v12924_v47 = vadd.f32 %v11918_v42, %v5628_v30  ;;  %v5623_v40 = vadd.f32 %v5622_v11, %v5542_v32 }
0x1a54   : > { %v12927_v45 = vadd.f32 %v11919_v52, %v5623_v40  ;;  %v5648_v43 = vsel %vm1172_vm0, %v12924_v47, 0.0 }
0x1a55   : > { %5649 = vadd.xlane.f32.xlu0 %v5648_v43 }
0x1a56   : > { %v5645_v41 = vsel %vm1172_vm0, %v12927_v45, 0.0 }
0x1a57   : > { %5646 = vadd.xlane.f32.xlu1 %v5645_v41 }
0x1a5b   : > { %v11257_v53 = vpop.f32.mrf.mxu0 }
0x1a5c   : > { %v5638_v57 = vadd.f32 %v11257_v53, %v5542_v32 }
0x1a5d   : > { %v5632_v2 = vpop.f32.mrf.mxu0 }
0x1a5e   : > { %v12938_v62 = vadd.f32 %v11920_v60, %v5638_v57  ;;  %v5633_v3 = vadd.f32 %v5632_v2, %v5542_v32 }
0x1a60   : > { %v12943_v7 = vadd.f32 %v11921_v5, %v5633_v3  ;;  %v5654_v8 = vsel %vm1172_vm0, %v12938_v62, 0.0 }
0x1a61   : > { %5655 = vadd.xlane.f32.xlu0 %v5654_v8 }
0x1a62   : > { %v5651_v10 = vsel %vm1172_vm0, %v12943_v7, 0.0 }
0x1a63   : > { %5652 = vadd.xlane.f32.xlu1 %v5651_v10 }
0x1a65   : > { %3544 = vadd.xlane.f32.xlu0 %v3543_v29 }
0x1a67   : > { %3541 = vadd.xlane.f32.xlu1 %v3540_v4 }
0x1a69   : > { %3550 = vadd.xlane.f32.xlu0 %v3549_v17 }
0x1a6b   : > { %3547 = vadd.xlane.f32.xlu1 %v3546_v18 }
0x1ade   : > { %v5650_v54 = vpop.xlane.xlu0 %5649 }
0x1adf   : > { %v5658_v19 = vmul.f32 0.03125, %v5650_v54 }
0x1ae0   : > { %v5647_v22 = vpop.xlane.xlu1 %5646 }
0x1ae1   : > { %v12964_v23 = vsub.f32 %v12924_v47, %v5658_v19  ;;  %v5657_v13 = vmul.f32 0.03125, %v5647_v22 }
0x1ae3   : > { %v12967_v24 = vsub.f32 %v12927_v45, %v5657_v13  ;;  %v5666_v9 = vmul.f32 %v12964_v23, %v12964_v23 }
0x1ae5   : > { %v5672_v28 = vsel %vm1172_vm0, %v5666_v9, 0.0  ;;  %v5665_v6 = vmul.f32 %v12967_v24, %v12967_v24 }
0x1ae6   : > { %5673 = vadd.xlane.f32.xlu0 %v5672_v28 }
0x1ae7   : > { %v5669_v20 = vsel %vm1172_vm0, %v5665_v6, 0.0 }
0x1ae8   : > { %5670 = vadd.xlane.f32.xlu1 %v5669_v20 }
0x1aea   : > { %v5656_v1 = vpop.xlane.xlu0 %5655 }
0x1aeb   : > { %v5660_v31 = vmul.f32 0.03125, %v5656_v1 }
0x1aec   : > { %v5653_v59 = vpop.xlane.xlu1 %5652 }
0x1aed   : > { %v12976_v38 = vsub.f32 %v12938_v62, %v5660_v31  ;;  %v5659_v46 = vmul.f32 0.03125, %v5653_v59 }
0x1aee   : > { %v3545_v35 = vpop.xlane.xlu0 %3544 }
0x1aef   : > { %v12979_v39 = vsub.f32 %v12943_v7, %v5659_v46  ;;  %v3553_v27 = vmul.f32 0.032258064, %v3545_v35  ;;  %v5668_v32 = vmul.f32 %v12976_v38, %v12976_v38 }
0x1af0   : > { %v3542_v44 = vpop.xlane.xlu1 %3541 }
0x1af1   : > { %11786 = vrsqrt.f32 %v3553_v27  ;;  %v3552_v21 = vmul.f32 0.032258064, %v3542_v44  ;;  %v5678_v30 = vsel %vm1172_vm0, %v5668_v32, 0.0  ;;  %v5667_v42 = vmul.f32 %v12979_v39, %v12979_v39 }
0x1af2   : > { %v3551_v11 = vpop.xlane.xlu0 %3550  ;;  %5679 = vadd.xlane.f32.xlu0 %v5678_v30  ;;  %vm3565_vm3 = vcmp.eq.f32.partialorder %v3553_v27, inf  ;;  %v3568_v49 = vand.u32 2147483648, %v3553_v27  ;;  %vm3567_vm4 = vcmp.eq.f32.partialorder %v3553_v27, 0.0 }
0x1af3   : > { %v3555_v40 = vmul.f32 0.032258064, %v3551_v11  ;;  %11788 = vrsqrt.f32 %v3552_v21  ;;  %v5675_v52 = vsel %vm1172_vm0, %v5667_v42, 0.0  ;;  %vm3558_vm5 = vcmp.eq.f32.partialorder %v3552_v21, inf }
0x1af4   : > { %v3548_v56 = vpop.xlane.xlu1 %3547  ;;  %5676 = vadd.xlane.f32.xlu1 %v5675_v52  ;;  %v3561_v2 = vand.u32 2147483648, %v3552_v21  ;;  %vm3560_vm6 = vcmp.eq.f32.partialorder %v3552_v21, 0.0 }
0x1af5   : > { %11790 = vrsqrt.f32 %v3555_v40  ;;  %v3554_v43 = vmul.f32 0.032258064, %v3548_v56  ;;  %vm3579_vm7 = vcmp.eq.f32.partialorder %v3555_v40, inf  ;;  %v3582_v10 = vand.u32 2147483648, %v3555_v40 }
0x1af6   : > { %vm3581_vm8 = vcmp.eq.f32.partialorder %v3555_v40, 0.0 }
0x1af7   : > { %11792 = vrsqrt.f32 %v3554_v43  ;;  %vm3572_vm13 = vcmp.eq.f32.partialorder %v3554_v43, inf  ;;  %v3575_v4 = vand.u32 2147483648, %v3554_v43  ;;  %vm3574_vm14 = vcmp.eq.f32.partialorder %v3554_v43, 0.0 }
0x1afe   : > { %v11787_v41 = vpop.eup %11786 }
0x1aff   : > { %v3564_v48 = vmul.f32 %v11787_v41, %v3553_v27 }
0x1b00   : > { %v11789_v50 = vpop.eup %11788 }
0x1b01   : > { %v3566_v51 = vsel %vm3565_vm3, %v3553_v27, %v3564_v48  ;;  %v3557_v57 = vmul.f32 %v11789_v50, %v3552_v21 }
0x1b02   : > { %v11791_v53 = vpop.eup %11790  ;;  %v3569_v55 = vsel %vm3567_vm4, %v3568_v49, %v3566_v51 }
0x1b03   : > { %v3578_v26 = vmul.f32 %v11791_v53, %v3555_v40  ;;  %v3585_v60 = vadd.f32 1e-06, %v3569_v55  ;;  %v3559_v3 = vsel %vm3558_vm5, %v3552_v21, %v3557_v57 }
0x1b04   : > { %v11793_v5 = vpop.eup %11792  ;;  %v3562_v8 = vsel %vm3560_vm6, %v3561_v2, %v3559_v3 }
0x1b05   : > { %v3580_v12 = vsel %vm3579_vm7, %v3555_v40, %v3578_v26  ;;  %11794 = vrcp.f32 %v3585_v60  ;;  %v3571_v15 = vmul.f32 %v11793_v5, %v3554_v43  ;;  %v3584_v29 = vadd.f32 1e-06, %v3562_v8  ;;  %v5871_v5 = vld [vmem:[%s1076_s3 + $0x18] sm:$0xff] }
0x1b06   : > { %v3583_v16 = vsel %vm3581_vm8, %v3582_v10, %v3580_v12  ;;  %11272 = vmatprep.subr.mxu0 %v5871_v5 }
0x1b07   : > { %v3573_v63 = vsel %vm3572_vm13, %v3554_v43, %v3571_v15  ;;  %11796 = vrcp.f32 %v3584_v29  ;;  %v3587_v54 = vadd.f32 1e-06, %v3583_v16  ;;  %11273 = vmatpush3.msra.mxu0 %v5871_v5  ;;  %v5870_v16 = vld [vmem:[%s1076_s3 + $0x10] sm:$0xff] }
0x1b08   : > { %v3576_v17 = vsel %vm3574_vm14, %v3575_v4, %v3573_v63  ;;  %11274 = vmatprep.subr.mxu0 %v5870_v16  ;;  %v13004_v4 = vld [vmem:[%s12134_s8 + $0x5] ss:$0 sm:$0xff]  ;;  %v5869_v63 = vld [vmem:[%s1076_s3 + $0x8] sm:$0xff] }
0x1b09   : > { %v3586_v18 = vadd.f32 1e-06, %v3576_v17  ;;  %11275 = vmatpush3.msra.mxu0 %v5870_v16 }
0x1b0a   : > { %11276 = vmatprep.subr.mxu0 %v5869_v63 }
0x1b0b   : > { %11798 = vrcp.f32 %v3586_v18  ;;  %11277 = vmatpush3.msra.mxu0 %v5869_v63 }
0x1b0c   : > { %11800 = vrcp.f32 %v3587_v54  ;;  %v11922_v54 = vld [vmem:[%s12134_s8 + $0x2] ss:$0 sm:$0xff] }
0x1b12   : > { %v11795_v19 = vpop.eup %11794 }
0x1b13   : > { %v3591_v22 = vmul.f32 %v11795_v19, %v12933_v58 }
0x1b14   : > { %v11797_v13 = vpop.eup %11796 }
0x1b15   : > { %3602 = vrot.lane.b32.xlu0 %v3591_v22, %s13958_s16  ;;  %v3589_v9 = vmul.f32 %v11797_v13, %v12935_v25 }
0x1b17   : > { %3600 = vrot.lane.b32.xlu1 %v3589_v9, %s13958_s16 }
0x1b18   : > { %v11799_v28 = vpop.eup %11798 }
0x1b19   : > { %v3593_v6 = vmul.f32 %v11799_v28, %v12949_v14  ;;  %v11801_v20 = vpop.eup %11800 }
0x1b1a   : > { %v3595_v1 = vmul.f32 %v11801_v20, %v12940_v61 }
0x1b1b   : > { %3604 = vrot.lane.b32.xlu1 %v3593_v6, %s13958_s16 }
0x1b1f   : > { %3606 = vrot.lane.b32.xlu1 %v3595_v1, %s13958_s16 }
0x1b6f   : > { %v5674_v31 = vpop.xlane.xlu0 %5673 }
0x1b70   : > { %v5682_v59 = vmul.f32 0.032258064, %v5674_v31 }
0x1b71   : > { %v5671_v58 = vpop.xlane.xlu1 %5670 }
0x1b72   : > { %11802 = vrsqrt.f32 %v5682_v59  ;;  %v5681_v46 = vmul.f32 0.032258064, %v5671_v58  ;;  %vm5694_vm15 = vcmp.eq.f32.partialorder %v5682_v59, inf  ;;  %v5697_v14 = vand.u32 2147483648, %v5682_v59 }
0x1b73   : > { %vm5696_vm1 = vcmp.eq.f32.partialorder %v5682_v59, 0.0 }
0x1b74   : > { %11804 = vrsqrt.f32 %v5681_v46  ;;  %vm5687_vm2 = vcmp.eq.f32.partialorder %v5681_v46, inf  ;;  %v5690_v40 = vand.u32 2147483648, %v5681_v46  ;;  %vm5689_vm3 = vcmp.eq.f32.partialorder %v5681_v46, 0.0 }
0x1b7b   : > { %v5680_v35 = vpop.xlane.xlu0 %5679 }
0x1b7c   : > { %v5684_v25 = vmul.f32 0.032258064, %v5680_v35 }
0x1b7d   : > { %v5677_v44 = vpop.xlane.xlu1 %5676 }
0x1b7e   : > { %11806 = vrsqrt.f32 %v5684_v25  ;;  %v5683_v21 = vmul.f32 0.032258064, %v5677_v44  ;;  %vm5708_vm4 = vcmp.eq.f32.partialorder %v5684_v25, inf  ;;  %v5711_v50 = vand.u32 2147483648, %v5684_v25 }
0x1b7f   : > { %v11803_v27 = vpop.eup %11802  ;;  %vm5710_vm5 = vcmp.eq.f32.partialorder %v5684_v25, 0.0 }
0x1b80   : > { %v5693_v32 = vmul.f32 %v11803_v27, %v5682_v59  ;;  %11808 = vrsqrt.f32 %v5683_v21  ;;  %vm5701_vm6 = vcmp.eq.f32.partialorder %v5683_v21, inf  ;;  %v5704_v26 = vand.u32 2147483648, %v5683_v21 }
0x1b81   : > { %v11805_v30 = vpop.eup %11804  ;;  %vm5703_vm7 = vcmp.eq.f32.partialorder %v5683_v21, 0.0 }
0x1b82   : > { %v5695_v11 = vsel %vm5694_vm15, %v5682_v59, %v5693_v32  ;;  %v5686_v42 = vmul.f32 %v11805_v30, %v5681_v46 }
0x1b83   : > { %v5698_v61 = vsel %vm5696_vm1, %v5697_v14, %v5695_v11 }
0x1b84   : > { %v5714_v56 = vadd.f32 1e-06, %v5698_v61  ;;  %v5688_v52 = vsel %vm5687_vm2, %v5681_v46, %v5686_v42 }
0x1b85   : > { %v5691_v43 = vsel %vm5689_vm3, %v5690_v40, %v5688_v52 }
0x1b86   : > { %11810 = vrcp.f32 %v5714_v56  ;;  %v5713_v41 = vadd.f32 1e-06, %v5691_v43 }
0x1b87   : > { %v3603_v17 = vpop.permute.xlu0 %3602 }
0x1b88   : > { %11812 = vrcp.f32 %v5713_v41  ;;  %v3613_v19 = vmul.f32 %v11922_v54, %v3603_v17 }
0x1b89   : > { %v3601_v18 = vpop.permute.xlu1 %3600 }
0x1b8a   : > { %v3626_v28 = vadd.f32 %v12591_v33, %v3613_v19  ;;  %v3612_v6 = vmul.f32 %v11922_v54, %v3601_v18 }
0x1b8b   : > { %v11807_v48 = vpop.eup %11806 }
0x1b8c   : > { %v5707_v49 = vmul.f32 %v11807_v48, %v5684_v25 }
0x1b8d   : > { %v11809_v53 = vpop.eup %11808  ;;  %v3605_v9 = vpop.permute.xlu1 %3604 }
0x1b8e   : > { %v5709_v51 = vsel %vm5708_vm4, %v5684_v25, %v5707_v49  ;;  %v5700_v57 = vmul.f32 %v11809_v53, %v5683_v21  ;;  %v3614_v59 = vmul.f32 %v11922_v54, %v3605_v9 }
0x1b8f   : > { %v5712_v55 = vsel %vm5710_vm5, %v5711_v50, %v5709_v51 }
0x1b90   : > { %v5716_v2 = vadd.f32 1e-06, %v5712_v55  ;;  %v5702_v3 = vsel %vm5701_vm6, %v5683_v21, %v5700_v57 }
0x1b91   : > { %v5705_v8 = vsel %vm5703_vm7, %v5704_v26, %v5702_v3  ;;  %v3607_v58 = vpop.permute.xlu1 %3606 }
0x1b92   : > { %11814 = vrcp.f32 %v5716_v2  ;;  %v5715_v10 = vadd.f32 1e-06, %v5705_v8  ;;  %v3615_v46 = vmul.f32 %v11922_v54, %v3607_v58 }
0x1b93   : > { %v11811_v60 = vpop.eup %11810 }
0x1b94   : > { %v5720_v12 = vmul.f32 %v11811_v60, %v12964_v23  ;;  %11816 = vrcp.f32 %v5715_v10  ;;  %v5868_v23 = vld [vmem:[%s1076_s3] sm:$0xff]  ;;  %s13960_s3 = sld [smem:[#allocation13_spill]]  ;;  %v3628_v35 = vadd.f32 %v12591_v33, %v3615_v46 }
0x1b95   : > { %v11813_v15 = vpop.eup %11812  ;;  %11278 = vmatprep.subr.mxu0 %v5868_v23 }
0x1b96   : > { %5732 = vrot.lane.b32.xlu0 %v5720_v12, %s13958_s16  ;;  %v5718_v29 = vmul.f32 %v11813_v15, %v12967_v24  ;;  %11279 = vmatpush3.msra.mxu0 %v5868_v23 }
0x1b98   : > { %5730 = vrot.lane.b32.xlu1 %v5718_v29, %s13958_s16 }
0x1b9a   : > { %s1071_s9 = scalar_lea.vmem %s13960_s3, %s12142_s1 }
0x1b9b   : > { %v5762_v1 = vld [vmem:[%s1071_s9 + $0x18] sm:$0xff]  ;;  %v5761_v31 = vld [vmem:[%s1071_s9 + $0x10] sm:$0xff]  ;;  %v5760_v25 = vld [vmem:[%s1071_s9 + $0x8] sm:$0xff] }
0x1b9c   : > { %5752 = vrot.lane.b32.xlu1 %v13004_v4, %s13958_s16  ;;  %11258 = vmatprep.subr.mxu1 %v5762_v1  ;;  %v5759_v27 = vld [vmem:[%s1071_s9] sm:$0xff]  ;;  %s13965_s9 = sld [smem:[#allocation15_spill]] }
0x1b9d   : > { %11259 = vmatpush3.msra.mxu1 %v5762_v1 }
0x1b9e   : > { %11260 = vmatprep.subr.mxu1 %v5761_v31 }
0x1b9f   : > { %v11815_v24 = vpop.eup %11814  ;;  %11261 = vmatpush3.msra.mxu1 %v5761_v31 }
0x1ba0   : > { %v5724_v22 = vmul.f32 %v11815_v24, %v12976_v38  ;;  %v3625_v38 = vadd.f32 %v12591_v33, %v3612_v6  ;;  %11262 = vmatprep.subr.mxu1 %v5760_v25 }
0x1ba1   : > { %v11817_v13 = vpop.eup %11816  ;;  %11263 = vmatpush3.msra.mxu1 %v5760_v25 }
0x1ba2   : > { %5736 = vrot.lane.b32.xlu1 %v5724_v22, %s13958_s16  ;;  %v5722_v20 = vmul.f32 %v11817_v13, %v12979_v39  ;;  %v3627_v39 = vadd.f32 %v12591_v33, %v3614_v59  ;;  %11264 = vmatprep.subr.mxu1 %v5759_v27 }
0x1ba3   : > { %11265 = vmatpush3.msra.mxu1 %v5759_v27 }
0x1ba4   : > { %5734 = vrot.lane.b32.xlu0 %v5722_v20, %s13958_s16 }
0x1ba6   : > { %5878 = vrot.lane.b32.xlu1 %v3626_v28, %s13944_s5 }
0x1ba8   : > { %5876 = vrot.lane.b32.xlu0 %v3625_v38, %s13944_s5 }
0x1bac   : > { %5880 = vrot.lane.b32.xlu0 %v3627_v39, %s13944_s5 }
0x1bb0   : > { %5882 = vrot.lane.b32.xlu0 %v3628_v35, %s13944_s5 }
0x1c08   : > { %v5733_v14 = vpop.permute.xlu0 %5732 }
0x1c09   : > { %v5743_v11 = vmul.f32 %v12884_v0, %v5733_v14 }
0x1c0a   : > { %v5731_v32 = vpop.permute.xlu1 %5730 }
0x1c0b   : > { %v5742_v44 = vmul.f32 %v12884_v0, %v5731_v32 }
0x1c0e   : > { %v5753_v21 = vpop.permute.xlu1 %5752 }
0x1c0f   : > { %v5755_v30 = vadd.f32 %v5753_v21, %v5742_v44  ;;  %v5756_v61 = vadd.f32 %v5753_v21, %v5743_v11 }
0x1c11   : > { %5767 = vrot.lane.b32.xlu1 %v5755_v30, %s13944_s5 }
0x1c14   : > { %v5737_v33 = vpop.permute.xlu1 %5736 }
0x1c15   : > { %v5745_v42 = vmul.f32 %v12884_v0, %v5737_v33  ;;  %5769 = vrot.lane.b32.xlu1 %v5756_v61, %s13944_s5 }
0x1c16   : > { %v5735_v56 = vpop.permute.xlu0 %5734 }
0x1c17   : > { %v5758_v40 = vadd.f32 %v5753_v21, %v5745_v42  ;;  %v5744_v52 = vmul.f32 %v12884_v0, %v5735_v56 }
0x1c18   : > { %v5879_v48 = vpop.permute.xlu1 %5878 }
0x1c19   : > { %5773 = vrot.lane.b32.xlu1 %v5758_v40, %s13944_s5  ;;  %v5757_v43 = vadd.f32 %v5753_v21, %v5744_v52 }
0x1c1a   : > { %v5877_v41 = vpop.permute.xlu0 %5876 }
0x1c1b   : > { %11280 = vmatprep.mubr.msk.f32.mxu0 %vm1172_vm0, %v5877_v41  ;;  %5771 = vrot.lane.b32.xlu0 %v5757_v43, %s13944_s5 }
0x1c1c   : > { %11281 = vmatmul.mubr.msk.f32.vlgmr.msra.gmra.mxu0 %vm1172_vm0, %v5879_v48 }
0x1c1e   : > { %v5881_v49 = vpop.permute.xlu0 %5880 }
0x1c1f   : > { %11283 = vmatprep.mubr.msk.f32.mxu0 %vm1172_vm0, %v5881_v49  ;;  %5884 = vrot.lane.b32.xlu0 %v13004_v4, %s13940_s0 }
0x1c22   : > { %v5883_v50 = vpop.permute.xlu0 %5882 }
0x1c23   : > { %11284 = vmatmul.mubr.msk.f32.gmra.mxu0 %vm1172_vm0, %v5883_v50 }
0x1c83   : > { %v5768_v0 = vpop.permute.xlu1 %5767 }
0x1c84   : > { %11266 = vmatprep.mubr.msk.f32.mxu1 %vm1172_vm0, %v5768_v0 }
0x1c87   : > { %v5770_v51 = vpop.permute.xlu1 %5769 }
0x1c88   : > { %11267 = vmatmul.mubr.msk.f32.vlgmr.msra.gmra.mxu1 %vm1172_vm0, %v5770_v51 }
0x1c8b   : > { %v5774_v55 = vpop.permute.xlu1 %5773 }
0x1c8d   : > { %v5772_v53 = vpop.permute.xlu0 %5771 }
0x1c8e   : > { %11269 = vmatprep.mubr.msk.f32.mxu1 %vm1172_vm0, %v5772_v53 }
0x1c8f   : > { %11270 = vmatmul.mubr.msk.f32.gmra.mxu1 %vm1172_vm0, %v5774_v55 }
0x1c91   : > { %v5885_v57 = vpop.permute.xlu0 %5884 }
0x1cdc   : > { %v11282_v2 = vpop.f32.mrf.mxu0 }
0x1cdd   : > { %v13043_v26 = vadd.f32 %v11282_v2, %v5885_v57 }
0x1cde   : > { %v5961_v60 = vpop.f32.mrf.mxu0 }
0x1cdf   : > { %v13045_v3 = vadd.f32 %v5961_v60, %v5885_v57  ;;  %11286 = vmatprep.subr.msk.mxu1 %vm1396_vm10, %v13043_v26 }
0x1ce0   : > { %11287 = vmatpush3.xpose.msk.msra.mxu1 %vm1396_vm10, %v13043_v26 }
0x1ce1   : > { %11288 = vmatprep.subr.msk.mxu1 %vm1396_vm10, %v13045_v3 }
0x1ce3   : > { %v11285_v5 = vpop.f32.mrf.mxu0 }
0x1ce4   : > { %v13053_v8 = vadd.f32 %v11285_v5, %v5885_v57  ;;  %11289 = vmatpush3.xpose.msk.msra.mxu1 %vm1396_vm10, %v13045_v3 }
0x1ce5   : > { %v5971_v12 = vpop.f32.mrf.mxu0 }
0x1ce6   : > { %v13057_v10 = vadd.f32 %v5971_v12, %v5885_v57  ;;  %11293 = vmatprep.subr.msk.mxu0 %vm1396_vm10, %v13053_v8 }
0x1ce7   : > { %11294 = vmatpush3.xpose.msk.msra.mxu0 %vm1396_vm10, %v13053_v8 }
0x1ce8   : > { %11295 = vmatprep.subr.msk.mxu0 %vm1396_vm10, %v13057_v10 }
0x1ceb   : > { %11296 = vmatpush3.xpose.msk.msra.mxu0 %vm1396_vm10, %v13057_v10 }
0x1d48   : > { %v11268_v15 = vpop.f32.mrf.mxu1 }
0x1d49   : > { %v13069_v4 = vadd.f32 %v11268_v15, %v5753_v21 }
0x1d4a   : > { %v5849_v29 = vpop.f32.mrf.mxu1 }
0x1d4b   : > { %v13067_v16 = vadd.f32 %v5849_v29, %v5753_v21 }
0x1d4d   : > { %11290 = vmatprep.mubr.msk.f32.mxu1 %vm1396_vm10, %v13067_v16 }
0x1d4e   : > { %11291 = vmatmul.mubr.msk.f32.vlgmr.msra.gmra.mxu1 %vm1396_vm10, %v13069_v4 }
0x1d4f   : > { %v11271_v63 = vpop.f32.mrf.mxu1 }
0x1d50   : > { %v13077_v18 = vadd.f32 %v11271_v63, %v5753_v21 }
0x1d51   : > { %v5859_v23 = vpop.f32.mrf.mxu1 }
0x1d52   : > { %v13075_v17 = vadd.f32 %v5859_v23, %v5753_v21 }
0x1d54   : > { %11297 = vmatprep.mubr.msk.f32.mxu0 %vm1396_vm10, %v13075_v17 }
0x1d55   : > { %11298 = vmatmul.mubr.msk.f32.vlgmr.msra.gmra.mxu0 %vm1396_vm10, %v13077_v18 }
0x1e0e   : > { %v11292_v24 = vpop.f32.mrf.mxu1 }
0x1e0f   : > { %v6155_v54 = vmul.f32 0.35355338, %v11292_v24 }
0x1e10   : > { %v6058_v19 = vpop.f32.mrf.mxu1 }
0x1e11   : > { %v6154_v22 = vmul.f32 0.35355338, %v6058_v19  ;;  %v6161_v13 = vsel %vm1573_vm11, %v6155_v54, -inf }
0x1e12   : > { %6162 = vmax.xlane.f32.xlu0 %v6161_v13 }
0x1e13   : > { %v6158_v9 = vsel %vm1573_vm11, %v6154_v22, -inf }
0x1e14   : > { %6159 = vmax.xlane.f32.xlu1 %v6158_v9 }
0x1e15   : > { %v11299_v28 = vpop.f32.mrf.mxu0 }
0x1e16   : > { %v6157_v1 = vmul.f32 0.35355338, %v11299_v28 }
0x1e17   : > { %v6145_v6 = vpop.f32.mrf.mxu0 }
0x1e18   : > { %v6156_v20 = vmul.f32 0.35355338, %v6145_v6  ;;  %v6167_v38 = vsel %vm1573_vm11, %v6157_v1, -inf }
0x1e1a   : > { %v6164_v31 = vsel %vm1573_vm11, %v6156_v20, -inf }
0x1e1b   : > { %6165 = vmax.xlane.f32.xlu0 %v6164_v31 }
0x1e1f   : > { %6168 = vmax.xlane.f32.xlu0 %v6167_v38 }
0x1e9b   : > { %v6163_v59 = vpop.xlane.xlu0 %6162 }
0x1e9c   : > { %v6171_v58 = vsub.f32 %v6155_v54, %v6163_v59 }
0x1e9d   : > { %v6160_v39 = vpop.xlane.xlu1 %6159 }
0x1e9e   : > { %v6176_v46 = vmul.f32 1.442695, %v6171_v58  ;;  %v6170_v35 = vsub.f32 %v6154_v22, %v6160_v39 }
0x1ea0   : > { %11818 = vpow2.f32 %v6176_v46  ;;  %v6174_v25 = vmul.f32 1.442695, %v6170_v35 }
0x1ea2   : > { %11820 = vpow2.f32 %v6174_v25 }
0x1ea4   : > { %v6166_v21 = vpop.xlane.xlu0 %6165 }
0x1ea5   : > { %v6172_v33 = vsub.f32 %v6156_v20, %v6166_v21 }
0x1ea7   : > { %v6178_v42 = vmul.f32 1.442695, %v6172_v33 }
0x1ea8   : > { %v6169_v30 = vpop.xlane.xlu0 %6168 }
0x1ea9   : > { %v6173_v11 = vsub.f32 %v6157_v1, %v6169_v30 }
0x1eab   : > { %v6180_v61 = vmul.f32 1.442695, %v6173_v11 }
0x1ead   : > { %v11819_v27 = vpop.eup %11818  ;;  %11822 = vpow2.f32 %v6180_v61 }
0x1eae   : > { %v6185_v32 = vsel %vm1573_vm11, %v11819_v27, 0.0  ;;  %11824 = vpow2.f32 %v6178_v42 }
0x1eaf   : > { %v11821_v44 = vpop.eup %11820  ;;  %6186 = vadd.xlane.f32.xlu0 %v6185_v32 }
0x1eb0   : > { %v6182_v14 = vsel %vm1573_vm11, %v11821_v44, 0.0 }
0x1eb1   : > { %6183 = vadd.xlane.f32.xlu1 %v6182_v14 }
0x1eba   : > { %v11823_v40 = vpop.eup %11822 }
0x1ebb   : > { %v6191_v56 = vsel %vm1573_vm11, %v11823_v40, 0.0  ;;  %v11825_v52 = vpop.eup %11824 }
0x1ebc   : > { %v6188_v43 = vsel %vm1573_vm11, %v11825_v52, 0.0 }
0x1ec2   : > { %6382 = vrot.lane.b32.xlu1 %v13043_v26, %s13946_s2 }
0x1ec5   : > { %6204 = vrot.lane.b32.xlu0 %v13043_v26, %s13958_s16 }
0x1ec6   : > { %6380 = vrot.lane.b32.xlu1 %v13045_v3, %s13946_s2 }
0x1ec9   : > { %6376 = vrot.lane.b32.xlu0 %v13067_v16, %s13946_s2 }
0x1eca   : > { %6202 = vrot.lane.b32.xlu1 %v13045_v3, %s13958_s16 }
0x1ecd   : > { %6289 = vrot.lane.b32.xlu0 %v13057_v10, %s13958_s16 }
0x1ece   : > { %6291 = vrot.lane.b32.xlu1 %v13053_v8, %s13958_s16 }
0x1ed2   : > { %6378 = vrot.lane.b32.xlu1 %v13069_v4, %s13946_s2 }
0x1ed6   : > { %6473 = vrot.lane.b32.xlu1 %v13053_v8, %s13946_s2 }
0x1eec   : > { %6192 = vadd.xlane.f32.xlu0 %v6191_v56 }
0x1efa   : > { %6189 = vadd.xlane.f32.xlu1 %v6188_v43 }
0x1f02   : > { %6471 = vrot.lane.b32.xlu0 %v13057_v10, %s13946_s2 }
0x1f06   : > { %6469 = vrot.lane.b32.xlu0 %v13077_v18, %s13946_s2 }
0x1f0b   : > { %6467 = vrot.lane.b32.xlu1 %v13075_v17, %s13946_s2  ;;  %s13962_s2 = sld [smem:[#allocation17_spill]] }
0x1f38   : > { %v6187_v41 = vpop.xlane.xlu0 %6186 }
0x1f39   : > { %11826 = vrcp.f32 %v6187_v41 }
0x1f3a   : > { %v6184_v48 = vpop.xlane.xlu1 %6183 }
0x1f3b   : > { %11828 = vrcp.f32 %v6184_v48 }
0x1f3c   : > { %v6205_v49 = vpop.permute.xlu0 %6204 }
0x1f3d   : > { %11300 = vmatprep.subr.mxu1 %v6205_v49 }
0x1f3e   : > { %v6383_v50 = vpop.permute.xlu1 %6382  ;;  %11301 = vmatpush3.msra.mxu1 %v6205_v49 }
0x1f3f   : > { %11314 = vmatprep.subr.msk.mxu0 %vm1396_vm10, %v6383_v50 }
0x1f40   : > { %11315 = vmatpush3.xpose.msk.msra.mxu0 %vm1396_vm10, %v6383_v50  ;;  %v6377_v0 = vpop.permute.xlu0 %6376 }
0x1f41   : > { %11318 = vmatprep.mubr.msk.f32.mxu0 %vm1396_vm10, %v6377_v0 }
0x1f42   : > { %v6381_v51 = vpop.permute.xlu1 %6380 }
0x1f43   : > { %11316 = vmatprep.subr.msk.mxu0 %vm1396_vm10, %v6381_v51 }
0x1f44   : > { %11317 = vmatpush3.xpose.msk.msra.mxu0 %vm1396_vm10, %v6381_v51  ;;  %v6290_v12 = vpop.permute.xlu0 %6289 }
0x1f46   : > { %v6203_v53 = vpop.permute.xlu1 %6202  ;;  %v11827_v55 = vpop.eup %11826 }
0x1f47   : > { %11302 = vmatprep.subr.mxu1 %v6203_v53  ;;  %v13122_v5 = vmul.f32 %v11827_v55, %v11819_v27 }
0x1f48   : > { %v11829_v57 = vpop.eup %11828  ;;  %11303 = vmatpush3.msra.mxu1 %v6203_v53 }
0x1f49   : > { %v13120_v2 = vmul.f32 %v11829_v57, %v11821_v44 }
0x1f4a   : > { %v6292_v60 = vpop.permute.xlu1 %6291 }
0x1f4b   : > { %11304 = vmatprep.mubr.msk.f32.mxu1 %vm1573_vm11, %v13120_v2  ;;  %11307 = vmatprep.subr.mxu1 %v6292_v60 }
0x1f4c   : > { %11305 = vmatmul.mubr.msk.f32.vlgmr.msra.gmra.mxu1 %vm1573_vm11, %v13122_v5 }
0x1f4d   : > { %11308 = vmatpush3.msra.mxu1 %v6292_v60 }
0x1f4e   : > { %11309 = vmatprep.subr.mxu1 %v6290_v12  ;;  %v6379_v15 = vpop.permute.xlu1 %6378 }
0x1f4f   : > { %11310 = vmatpush3.msra.mxu1 %v6290_v12  ;;  %11319 = vmatmul.mubr.msk.f32.vlgmr.msra.gmra.mxu0 %vm1396_vm10, %v6379_v15 }
0x1f52   : > { %v6474_v29 = vpop.permute.xlu1 %6473 }
0x1f53   : > { %11321 = vmatprep.subr.msk.mxu1 %vm1396_vm10, %v6474_v29 }
0x1f75   : > { %v6193_v63 = vpop.xlane.xlu0 %6192 }
0x1f76   : > { %11830 = vrcp.f32 %v6193_v63 }
0x1f79   : > { %v6472_v9 = vpop.permute.xlu0 %6471 }
0x1f7d   : > { %v6470_v28 = vpop.permute.xlu0 %6469 }
0x1f83   : > { %v6190_v23 = vpop.xlane.xlu1 %6189  ;;  %v11831_v24 = vpop.eup %11830 }
0x1f84   : > { %11832 = vrcp.f32 %v6190_v23  ;;  %v13132_v22 = vmul.f32 %v11831_v24, %v11823_v40 }
0x1f87   : > { %v6468_v13 = vpop.permute.xlu1 %6467 }
0x1f91   : > { %v11833_v54 = vpop.eup %11832 }
0x1f92   : > { %v13130_v19 = vmul.f32 %v11833_v54, %v11825_v52 }
0x1f94   : > { %11311 = vmatprep.mubr.msk.f32.mxu1 %vm1573_vm11, %v13130_v19 }
0x1f95   : > { %11312 = vmatmul.mubr.msk.f32.vlgmr.msra.gmra.mxu1 %vm1573_vm11, %v13132_v22 }
0x1f96   : > { %11322 = vmatpush3.xpose.msk.msra.mxu1 %vm1396_vm10, %v6474_v29  ;;  %11325 = vmatprep.mubr.msk.f32.mxu1 %vm1396_vm10, %v6468_v13 }
0x1f97   : > { %11323 = vmatprep.subr.msk.mxu1 %vm1396_vm10, %v6472_v9 }
0x1f9a   : > { %11324 = vmatpush3.xpose.msk.msra.mxu1 %vm1396_vm10, %v6472_v9 }
0x1f9d   : > { %11326 = vmatmul.mubr.msk.f32.vlgmr.msra.gmra.mxu1 %vm1396_vm10, %v6470_v28 }
0x200c   : > { %v13145_v58 = vpop.f32.mrf.mxu1 }
0x200e   : > { %v13147_v39 = vpop.f32.mrf.mxu1 }
0x200f   : > { %v11320_v6 = vpop.f32.mrf.mxu0 }
0x2010   : > { %v6559_v20 = vmul.f32 0.35355338, %v11320_v6 }
0x2011   : > { %v6458_v1 = vpop.f32.mrf.mxu0 }
0x2012   : > { %v6558_v31 = vmul.f32 0.35355338, %v6458_v1  ;;  %v6565_v38 = vsel %vm1573_vm11, %v6559_v20, -inf }
0x2013   : > { %6566 = vmax.xlane.f32.xlu0 %v6565_v38 }
0x2014   : > { %v6562_v59 = vsel %vm1573_vm11, %v6558_v31, -inf }
0x2015   : > { %6563 = vmax.xlane.f32.xlu1 %v6562_v59 }
0x2055   : > { %v13149_v46 = vpop.f32.mrf.mxu1 }
0x2057   : > { %v13151_v35 = vpop.f32.mrf.mxu1 }
0x205d   : > { %v11327_v25 = vpop.f32.mrf.mxu1 }
0x205e   : > { %v6561_v44 = vmul.f32 0.35355338, %v11327_v25 }
0x205f   : > { %v6549_v27 = vpop.f32.mrf.mxu1 }
0x2060   : > { %v6560_v32 = vmul.f32 0.35355338, %v6549_v27  ;;  %v6571_v21 = vsel %vm1573_vm11, %v6561_v44, -inf }
0x2062   : > { %v6568_v14 = vsel %vm1573_vm11, %v6560_v32, -inf }
0x2063   : > { %6569 = vmax.xlane.f32.xlu0 %v6568_v14 }
0x2067   : > { %6572 = vmax.xlane.f32.xlu0 %v6571_v21 }
0x209c   : > { %v6567_v30 = vpop.xlane.xlu0 %6566 }
0x209d   : > { %v6575_v11 = vsub.f32 %v6559_v20, %v6567_v30 }
0x209e   : > { %v6564_v61 = vpop.xlane.xlu1 %6563 }
0x209f   : > { %v6580_v33 = vmul.f32 1.442695, %v6575_v11  ;;  %v6574_v42 = vsub.f32 %v6558_v31, %v6564_v61 }
0x20a1   : > { %11834 = vpow2.f32 %v6580_v33  ;;  %v6578_v40 = vmul.f32 1.442695, %v6574_v42 }
0x20a3   : > { %11836 = vpow2.f32 %v6578_v40 }
0x20ae   : > { %v11835_v56 = vpop.eup %11834 }
0x20af   : > { %v6589_v52 = vsel %vm1573_vm11, %v11835_v56, 0.0 }
0x20b0   : > { %v11837_v43 = vpop.eup %11836  ;;  %6590 = vadd.xlane.f32.xlu0 %v6589_v52 }
0x20b1   : > { %v6586_v41 = vsel %vm1573_vm11, %v11837_v43, 0.0 }
0x20b2   : > { %6587 = vadd.xlane.f32.xlu1 %v6586_v41 }
0x20c3   : > { %6612 = vrot.lane.b32.xlu1 %v13043_v26, %s13945_s6 }
0x20c6   : > { %6610 = vrot.lane.b32.xlu0 %v13045_v3, %s13945_s6 }
0x20c7   : > { %6790 = vrot.lane.b32.xlu1 %v13043_v26, %s13949_s4 }
0x20ca   : > { %6784 = vrot.lane.b32.xlu0 %v13067_v16, %s13949_s4 }
0x20cb   : > { %6788 = vrot.lane.b32.xlu1 %v13045_v3, %s13949_s4 }
0x20ce   : > { %6697 = vrot.lane.b32.xlu0 %v13057_v10, %s13945_s6 }
0x20cf   : > { %6699 = vrot.lane.b32.xlu1 %v13053_v8, %s13945_s6  ;;  %s1081_s6 = scalar_lea.vmem %s13866_s10, %s12142_s1 }
0x20d3   : > { %6786 = vrot.lane.b32.xlu1 %v13069_v4, %s13949_s4 }
0x20d7   : > { %6881 = vrot.lane.b32.xlu1 %v13053_v8, %s13949_s4 }
0x20ec   : > { %v6570_v48 = vpop.xlane.xlu0 %6569 }
0x20ed   : > { %v6576_v49 = vsub.f32 %v6560_v32, %v6570_v48 }
0x20ef   : > { %v6582_v50 = vmul.f32 1.442695, %v6576_v49 }
0x20f0   : > { %v6573_v0 = vpop.xlane.xlu0 %6572 }
0x20f1   : > { %11838 = vpow2.f32 %v6582_v50  ;;  %v6577_v51 = vsub.f32 %v6561_v44, %v6573_v0 }
0x20f3   : > { %v6584_v53 = vmul.f32 1.442695, %v6577_v51 }
0x20f5   : > { %11840 = vpow2.f32 %v6584_v53 }
0x20fe   : > { %v11839_v55 = vpop.eup %11838 }
0x20ff   : > { %v6592_v57 = vsel %vm1573_vm11, %v11839_v55, 0.0 }
0x2100   : > { %6593 = vadd.xlane.f32.xlu1 %v6592_v57 }
0x2102   : > { %v11841_v60 = vpop.eup %11840 }
0x2103   : > { %v6595_v12 = vsel %vm1573_vm11, %v11841_v60, 0.0 }
0x2104   : > { %6596 = vadd.xlane.f32.xlu0 %v6595_v12 }
0x2111   : > { %6875 = vrot.lane.b32.xlu1 %v13075_v17, %s13949_s4 }
0x211a   : > { %6879 = vrot.lane.b32.xlu0 %v13057_v10, %s13949_s4 }
0x211e   : > { %6877 = vrot.lane.b32.xlu0 %v13077_v18, %s13949_s4 }
0x2139   : > { %v6591_v15 = vpop.xlane.xlu0 %6590 }
0x213a   : > { %11842 = vrcp.f32 %v6591_v15 }
0x213b   : > { %v6588_v29 = vpop.xlane.xlu1 %6587 }
0x213c   : > { %11844 = vrcp.f32 %v6588_v29 }
0x213d   : > { %v6611_v23 = vpop.permute.xlu0 %6610 }
0x213f   : > { %v6613_v63 = vpop.permute.xlu1 %6612 }
0x2140   : > { %11328 = vmatprep.subr.mxu0 %v6613_v63 }
0x2141   : > { %11329 = vmatpush3.msra.mxu0 %v6613_v63  ;;  %v6785_v54 = vpop.permute.xlu0 %6784 }
0x2142   : > { %11330 = vmatprep.subr.mxu0 %v6611_v23 }
0x2143   : > { %v6791_v24 = vpop.permute.xlu1 %6790  ;;  %11331 = vmatpush3.msra.mxu0 %v6611_v23 }
0x2144   : > { %11342 = vmatprep.subr.msk.mxu0 %vm1396_vm10, %v6791_v24 }
0x2145   : > { %v6698_v31 = vpop.permute.xlu0 %6697 }
0x2147   : > { %v6789_v13 = vpop.permute.xlu1 %6788  ;;  %v11843_v9 = vpop.eup %11842 }
0x2148   : > { %v13186_v1 = vmul.f32 %v11843_v9, %v11835_v56 }
0x2149   : > { %v11845_v28 = vpop.eup %11844 }
0x214a   : > { %v13184_v6 = vmul.f32 %v11845_v28, %v11837_v43 }
0x214b   : > { %v6700_v20 = vpop.permute.xlu1 %6699 }
0x214c   : > { %11332 = vmatprep.mubr.msk.f32.mxu0 %vm1573_vm11, %v13184_v6  ;;  %11335 = vmatprep.subr.mxu1 %v6700_v20 }
0x214d   : > { %11333 = vmatmul.mubr.msk.f32.vlgmr.msra.gmra.mxu0 %vm1573_vm11, %v13186_v1  ;;  %11336 = vmatpush3.msra.mxu1 %v6700_v20 }
0x214e   : > { %11343 = vmatpush3.xpose.msk.msra.mxu0 %vm1396_vm10, %v6791_v24  ;;  %11337 = vmatprep.subr.mxu1 %v6698_v31 }
0x214f   : > { %11344 = vmatprep.subr.msk.mxu0 %vm1396_vm10, %v6789_v13  ;;  %11346 = vmatprep.mubr.msk.f32.mxu0 %vm1396_vm10, %v6785_v54  ;;  %v6787_v38 = vpop.permute.xlu1 %6786 }
0x2150   : > { %11338 = vmatpush3.msra.mxu1 %v6698_v31 }
0x2152   : > { %11345 = vmatpush3.xpose.msk.msra.mxu0 %vm1396_vm10, %v6789_v13 }
0x2153   : > { %v6882_v59 = vpop.permute.xlu1 %6881 }
0x2154   : > { %11349 = vmatprep.subr.msk.mxu1 %vm1396_vm10, %v6882_v59 }
0x2155   : > { %11347 = vmatmul.mubr.msk.f32.vlgmr.msra.gmra.mxu0 %vm1396_vm10, %v6787_v38 }
0x2189   : > { %v6594_v25 = vpop.xlane.xlu1 %6593 }
0x218a   : > { %11846 = vrcp.f32 %v6594_v25 }
0x218d   : > { %v6597_v27 = vpop.xlane.xlu0 %6596  ;;  %v6876_v30 = vpop.permute.xlu1 %6875 }
0x218e   : > { %11848 = vrcp.f32 %v6597_v27 }
0x2191   : > { %v6880_v11 = vpop.permute.xlu0 %6879 }
0x2195   : > { %v6878_v61 = vpop.permute.xlu0 %6877 }
0x2197   : > { %v11847_v32 = vpop.eup %11846 }
0x2198   : > { %v13198_v44 = vmul.f32 %v11847_v32, %v11839_v55 }
0x219a   : > { %11339 = vmatprep.mubr.msk.f32.mxu1 %vm1573_vm11, %v13198_v44 }
0x219b   : > { %v11849_v14 = vpop.eup %11848 }
0x219c   : > { %v13202_v21 = vmul.f32 %v11849_v14, %v11841_v60 }
0x219e   : > { %11340 = vmatmul.mubr.msk.f32.vlgmr.msra.gmra.mxu1 %vm1573_vm11, %v13202_v21 }
0x219f   : > { %11350 = vmatpush3.xpose.msk.msra.mxu1 %vm1396_vm10, %v6882_v59  ;;  %11353 = vmatprep.mubr.msk.f32.mxu1 %vm1396_vm10, %v6876_v30 }
0x21a0   : > { %11351 = vmatprep.subr.msk.mxu1 %vm1396_vm10, %v6880_v11 }
0x21a3   : > { %11352 = vmatpush3.xpose.msk.msra.mxu1 %vm1396_vm10, %v6880_v11 }
0x21a6   : > { %11354 = vmatmul.mubr.msk.f32.vlgmr.msra.gmra.mxu1 %vm1396_vm10, %v6878_v61 }
0x220d   : > { %v13211_v33 = vpop.f32.mrf.mxu0 }
0x220f   : > { %v13213_v42 = vpop.f32.mrf.mxu0 }
0x2215   : > { %v11348_v40 = vpop.f32.mrf.mxu0 }
0x2216   : > { %v6967_v56 = vmul.f32 0.35355338, %v11348_v40 }
0x2217   : > { %v6866_v52 = vpop.f32.mrf.mxu0 }
0x2218   : > { %v6966_v43 = vmul.f32 0.35355338, %v6866_v52  ;;  %v6973_v41 = vsel %vm1573_vm11, %v6967_v56, -inf }
0x2219   : > { %6974 = vmax.xlane.f32.xlu0 %v6973_v41  ;;  %v6607_v41 = vadd.f32 %v13186_v1, %v13122_v5 }
0x221a   : > { %v6970_v48 = vsel %vm1573_vm11, %v6966_v43, -inf }
0x221b   : > { %6971 = vmax.xlane.f32.xlu1 %v6970_v48 }
0x225e   : > { %v13217_v49 = vpop.f32.mrf.mxu1 }
0x2260   : > { %v13219_v50 = vpop.f32.mrf.mxu1 }
0x2266   : > { %v11355_v0 = vpop.f32.mrf.mxu1 }
0x2267   : > { %v6969_v55 = vmul.f32 0.35355338, %v11355_v0  ;;  %v6606_v0 = vadd.f32 %v13184_v6, %v13120_v2 }
0x2268   : > { %v6957_v51 = vpop.f32.mrf.mxu1 }
0x2269   : > { %v6968_v53 = vmul.f32 0.35355338, %v6957_v51  ;;  %v6979_v60 = vsel %vm1573_vm11, %v6969_v55, -inf }
0x226b   : > { %v6976_v57 = vsel %vm1573_vm11, %v6968_v53, -inf }
0x226c   : > { %6977 = vmax.xlane.f32.xlu0 %v6976_v57 }
0x2270   : > { %6980 = vmax.xlane.f32.xlu0 %v6979_v60 }
0x22a2   : > { %v6975_v12 = vpop.xlane.xlu0 %6974 }
0x22a3   : > { %v6983_v15 = vsub.f32 %v6967_v56, %v6975_v12 }
0x22a4   : > { %v6972_v29 = vpop.xlane.xlu1 %6971 }
0x22a5   : > { %v6988_v63 = vmul.f32 1.442695, %v6983_v15  ;;  %v6982_v23 = vsub.f32 %v6966_v43, %v6972_v29  ;;  %v6608_v15 = vadd.f32 %v13198_v44, %v13130_v19 }
0x22a7   : > { %11850 = vpow2.f32 %v6988_v63  ;;  %v6986_v24 = vmul.f32 1.442695, %v6982_v23 }
0x22a9   : > { %11852 = vpow2.f32 %v6986_v24  ;;  %v6609_v24 = vadd.f32 %v13202_v21, %v13132_v22 }
0x22b4   : > { %v11851_v54 = vpop.eup %11850 }
0x22b5   : > { %v6997_v13 = vsel %vm1573_vm11, %v11851_v54, 0.0 }
0x22b6   : > { %v11853_v9 = vpop.eup %11852  ;;  %6998 = vadd.xlane.f32.xlu0 %v6997_v13 }
0x22b7   : > { %v6994_v28 = vsel %vm1573_vm11, %v11853_v9, 0.0 }
0x22b8   : > { %6995 = vadd.xlane.f32.xlu1 %v6994_v28 }
0x22c9   : > { %7020 = vrot.lane.b32.xlu1 %v13043_v26, %s13948_s25 }
0x22cc   : > { %7018 = vrot.lane.b32.xlu0 %v13045_v3, %s13948_s25 }
0x22cd   : > { %7198 = vrot.lane.b32.xlu1 %v13043_v26, %s13952_s29 }
0x22d0   : > { %7192 = vrot.lane.b32.xlu0 %v13067_v16, %s13952_s29 }
0x22d1   : > { %7196 = vrot.lane.b32.xlu1 %v13045_v3, %s13952_s29 }
0x22d4   : > { %7105 = vrot.lane.b32.xlu0 %v13057_v10, %s13948_s25 }
0x22d5   : > { %7107 = vrot.lane.b32.xlu1 %v13053_v8, %s13948_s25 }
0x22d9   : > { %7194 = vrot.lane.b32.xlu1 %v13069_v4, %s13952_s29 }
0x22dd   : > { %7289 = vrot.lane.b32.xlu1 %v13053_v8, %s13952_s29 }
0x22f5   : > { %v6978_v20 = vpop.xlane.xlu0 %6977 }
0x22f6   : > { %v6984_v31 = vsub.f32 %v6968_v53, %v6978_v20 }
0x22f8   : > { %v6990_v38 = vmul.f32 1.442695, %v6984_v31 }
0x22f9   : > { %v6981_v59 = vpop.xlane.xlu0 %6980 }
0x22fa   : > { %11854 = vpow2.f32 %v6990_v38  ;;  %v6985_v16 = vsub.f32 %v6969_v55, %v6981_v59 }
0x22fc   : > { %v6992_v25 = vmul.f32 1.442695, %v6985_v16 }
0x22fe   : > { %11856 = vpow2.f32 %v6992_v25 }
0x2307   : > { %v11855_v27 = vpop.eup %11854 }
0x2308   : > { %v7000_v32 = vsel %vm1573_vm11, %v11855_v27, 0.0 }
0x2309   : > { %7001 = vadd.xlane.f32.xlu1 %v7000_v32 }
0x230b   : > { %v11857_v14 = vpop.eup %11856 }
0x230c   : > { %v7003_v30 = vsel %vm1573_vm11, %v11857_v14, 0.0 }
0x230d   : > { %7004 = vadd.xlane.f32.xlu0 %v7003_v30 }
0x231a   : > { %7283 = vrot.lane.b32.xlu1 %v13075_v17, %s13952_s29 }
0x2323   : > { %7287 = vrot.lane.b32.xlu0 %v13057_v10, %s13952_s29 }
0x2327   : > { %7285 = vrot.lane.b32.xlu0 %v13077_v18, %s13952_s29 }
0x233f   : > { %v6999_v4 = vpop.xlane.xlu0 %6998 }
0x2340   : > { %11858 = vrcp.f32 %v6999_v4 }
0x2341   : > { %v6996_v11 = vpop.xlane.xlu1 %6995 }
0x2342   : > { %11860 = vrcp.f32 %v6996_v11 }
0x2343   : > { %v7019_v40 = vpop.permute.xlu0 %7018 }
0x2345   : > { %v7021_v61 = vpop.permute.xlu1 %7020 }
0x2346   : > { %11356 = vmatprep.subr.mxu0 %v7021_v61 }
0x2347   : > { %11357 = vmatpush3.msra.mxu0 %v7021_v61  ;;  %v7193_v52 = vpop.permute.xlu0 %7192 }
0x2348   : > { %11358 = vmatprep.subr.mxu0 %v7019_v40 }
0x2349   : > { %v7199_v56 = vpop.permute.xlu1 %7198  ;;  %11359 = vmatpush3.msra.mxu0 %v7019_v40 }
0x234a   : > { %11370 = vmatprep.subr.msk.mxu0 %vm1396_vm10, %v7199_v56 }
0x234b   : > { %v7106_v60 = vpop.permute.xlu0 %7105 }
0x234d   : > { %v11859_v17 = vpop.eup %11858  ;;  %v7197_v43 = vpop.permute.xlu1 %7196 }
0x234e   : > { %v7011_v18 = vmul.f32 %v11859_v17, %v11851_v54 }
0x234f   : > { %v11861_v48 = vpop.eup %11860 }
0x2350   : > { %v7010_v51 = vmul.f32 %v11861_v48, %v11853_v9  ;;  %v13256_v53 = vadd.f32 %v7011_v18, %v6607_v41 }
0x2351   : > { %v7108_v55 = vpop.permute.xlu1 %7107 }
0x2352   : > { %v13258_v57 = vadd.f32 %v7010_v51, %v6606_v0  ;;  %11360 = vmatprep.mubr.msk.f32.mxu0 %vm1573_vm11, %v7010_v51  ;;  %11363 = vmatprep.subr.mxu1 %v7108_v55 }
0x2353   : > { %11361 = vmatmul.mubr.msk.f32.vlgmr.msra.gmra.mxu0 %vm1573_vm11, %v7011_v18  ;;  %11364 = vmatpush3.msra.mxu1 %v7108_v55 }
0x2354   : > { %11371 = vmatpush3.xpose.msk.msra.mxu0 %vm1396_vm10, %v7199_v56  ;;  %11365 = vmatprep.subr.mxu1 %v7106_v60 }
0x2355   : > { %11372 = vmatprep.subr.msk.mxu0 %vm1396_vm10, %v7197_v43  ;;  %11374 = vmatprep.mubr.msk.f32.mxu0 %vm1396_vm10, %v7193_v52  ;;  %v7195_v2 = vpop.permute.xlu1 %7194 }
0x2356   : > { %11366 = vmatpush3.msra.mxu1 %v7106_v60 }
0x2358   : > { %11373 = vmatpush3.xpose.msk.msra.mxu0 %vm1396_vm10, %v7197_v43 }
0x2359   : > { %v7290_v5 = vpop.permute.xlu1 %7289 }
0x235a   : > { %11377 = vmatprep.subr.msk.mxu1 %vm1396_vm10, %v7290_v5 }
0x235b   : > { %11375 = vmatmul.mubr.msk.f32.vlgmr.msra.gmra.mxu0 %vm1396_vm10, %v7195_v2 }
0x2392   : > { %v7002_v6 = vpop.xlane.xlu1 %7001 }
0x2393   : > { %11862 = vrcp.f32 %v7002_v6 }
0x2396   : > { %v7005_v1 = vpop.xlane.xlu0 %7004  ;;  %v7284_v13 = vpop.permute.xlu1 %7283 }
0x2397   : > { %11864 = vrcp.f32 %v7005_v1 }
0x239a   : > { %v7288_v28 = vpop.permute.xlu0 %7287 }
0x239e   : > { %v7286_v19 = vpop.permute.xlu0 %7285 }
0x23a0   : > { %v11863_v12 = vpop.eup %11862 }
0x23a1   : > { %v7012_v29 = vmul.f32 %v11863_v12, %v11855_v27 }
0x23a3   : > { %v13270_v63 = vadd.f32 %v7012_v29, %v6608_v15  ;;  %11367 = vmatprep.mubr.msk.f32.mxu1 %vm1573_vm11, %v7012_v29 }
0x23a4   : > { %v11865_v23 = vpop.eup %11864 }
0x23a5   : > { %v7013_v54 = vmul.f32 %v11865_v23, %v11857_v14 }
0x23a7   : > { %v13275_v9 = vadd.f32 %v7013_v54, %v6609_v24  ;;  %11368 = vmatmul.mubr.msk.f32.vlgmr.msra.gmra.mxu1 %vm1573_vm11, %v7013_v54 }
0x23a8   : > { %11378 = vmatpush3.xpose.msk.msra.mxu1 %vm1396_vm10, %v7290_v5  ;;  %11381 = vmatprep.mubr.msk.f32.mxu1 %vm1396_vm10, %v7284_v13 }
0x23a9   : > { %11379 = vmatprep.subr.msk.mxu1 %vm1396_vm10, %v7288_v28 }
0x23ac   : > { %11380 = vmatpush3.xpose.msk.msra.mxu1 %vm1396_vm10, %v7288_v28 }
0x23af   : > { %11382 = vmatmul.mubr.msk.f32.vlgmr.msra.gmra.mxu1 %vm1396_vm10, %v7286_v19 }
0x2413   : > { %v11362_v44 = vpop.f32.mrf.mxu0 }
0x2415   : > { %v7096_v22 = vpop.f32.mrf.mxu0 }
0x241b   : > { %v11376_v21 = vpop.f32.mrf.mxu0 }
0x241c   : > { %v7375_v20 = vmul.f32 0.35355338, %v11376_v21 }
0x241d   : > { %v7274_v31 = vpop.f32.mrf.mxu0 }
0x241e   : > { %v7374_v38 = vmul.f32 0.35355338, %v7274_v31  ;;  %v7381_v59 = vsel %vm1573_vm11, %v7375_v20, -inf }
0x241f   : > { %7382 = vmax.xlane.f32.xlu0 %v7381_v59 }
0x2420   : > { %v7378_v16 = vsel %vm1573_vm11, %v7374_v38, -inf }
0x2421   : > { %7379 = vmax.xlane.f32.xlu1 %v7378_v16  ;;  %v7667_v16 = vld [vmem:[%s1081_s6 + $0x18] sm:$0xff] }
0x2467   : > { %v13285_v25 = vpop.f32.mrf.mxu1 }
0x2469   : > { %v13287_v27 = vpop.f32.mrf.mxu1 }
0x246f   : > { %v11383_v32 = vpop.f32.mrf.mxu1 }
0x2470   : > { %v7377_v4 = vmul.f32 0.35355338, %v11383_v32  ;;  %v7666_v32 = vld [vmem:[%s1081_s6 + $0x10] sm:$0xff] }
0x2471   : > { %v7365_v14 = vpop.f32.mrf.mxu1 }
0x2472   : > { %v7376_v30 = vmul.f32 0.35355338, %v7365_v14  ;;  %v7387_v61 = vsel %vm1573_vm11, %v7377_v4, -inf  ;;  %v7665_v14 = vld [vmem:[%s1081_s6 + $0x8] sm:$0xff] }
0x2474   : > { %v7384_v11 = vsel %vm1573_vm11, %v7376_v30, -inf }
0x2475   : > { %7385 = vmax.xlane.f32.xlu0 %v7384_v11 }
0x2479   : > { %7388 = vmax.xlane.f32.xlu0 %v7387_v61 }
0x24a8   : > { %v7383_v40 = vpop.xlane.xlu0 %7382 }
0x24a9   : > { %v7391_v56 = vsub.f32 %v7375_v20, %v7383_v40 }
0x24aa   : > { %v7380_v17 = vpop.xlane.xlu1 %7379 }
0x24ab   : > { %v7396_v52 = vmul.f32 1.442695, %v7391_v56  ;;  %v7390_v43 = vsub.f32 %v7374_v38, %v7380_v17 }
0x24ad   : > { %11866 = vpow2.f32 %v7396_v52  ;;  %v7394_v41 = vmul.f32 1.442695, %v7390_v43 }
0x24af   : > { %11868 = vpow2.f32 %v7394_v41 }
0x24ba   : > { %v11867_v18 = vpop.eup %11866 }
0x24bb   : > { %v7405_v48 = vsel %vm1573_vm11, %v11867_v18, 0.0 }
0x24bc   : > { %v11869_v0 = vpop.eup %11868  ;;  %7406 = vadd.xlane.f32.xlu0 %v7405_v48 }
0x24bd   : > { %v7402_v51 = vsel %vm1573_vm11, %v11869_v0, 0.0 }
0x24be   : > { %7403 = vadd.xlane.f32.xlu1 %v7402_v51 }
0x24cf   : > { %7428 = vrot.lane.b32.xlu1 %v13043_v26, %s13951_s23 }
0x24d3   : > { %7515 = vrot.lane.b32.xlu1 %v13053_v8, %s13951_s23 }
0x24fe   : > { %v7386_v55 = vpop.xlane.xlu0 %7385 }
0x24ff   : > { %v7392_v60 = vsub.f32 %v7376_v30, %v7386_v55 }
0x2501   : > { %v7398_v2 = vmul.f32 1.442695, %v7392_v60 }
0x2502   : > { %v7389_v5 = vpop.xlane.xlu0 %7388 }
0x2503   : > { %11870 = vpow2.f32 %v7398_v2  ;;  %v7393_v6 = vsub.f32 %v7377_v4, %v7389_v5 }
0x2505   : > { %v7400_v1 = vmul.f32 1.442695, %v7393_v6 }
0x2507   : > { %11872 = vpow2.f32 %v7400_v1 }
0x2510   : > { %v11871_v12 = vpop.eup %11870 }
0x2511   : > { %v7408_v15 = vsel %vm1573_vm11, %v11871_v12, 0.0 }
0x2512   : > { %7409 = vadd.xlane.f32.xlu1 %v7408_v15  ;;  %v13362_v15 = vld [vmem:[%s12134_s8 + $0x6] ss:$0 sm:$0xff] }
0x2514   : > { %v11873_v29 = vpop.eup %11872 }
0x2515   : > { %v7411_v23 = vsel %vm1573_vm11, %v11873_v29, 0.0 }
0x2516   : > { %7412 = vadd.xlane.f32.xlu0 %v7411_v23 }
0x2523   : > { %7513 = vrot.lane.b32.xlu1 %v13057_v10, %s13951_s23 }
0x2527   : > { %7604 = vrot.lane.b32.xlu1 %v13213_v42, %s13954_s24 }
0x252b   : > { %7620 = vrot.lane.b32.xlu1 %v7096_v22, %s13955_s26 }
0x252c   : > { %7426 = vrot.lane.b32.xlu0 %v13045_v3, %s13951_s23 }
0x2530   : > { %7606 = vrot.lane.b32.xlu0 %v13211_v33, %s13954_s24 }
0x2534   : > { %7622 = vrot.lane.b32.xlu0 %v11362_v44, %s13955_s26 }
0x2545   : > { %v7407_v3 = vpop.xlane.xlu0 %7406 }
0x2547   : > { %v7404_v26 = vpop.xlane.xlu1 %7403 }
0x2548   : > { %11874 = vrcp.f32 %v7404_v26 }
0x2549   : > { %11876 = vrcp.f32 %v7407_v3 }
0x254b   : > { %v7429_v8 = vpop.permute.xlu1 %7428 }
0x254c   : > { %11384 = vmatprep.subr.mxu0 %v7429_v8 }
0x254d   : > { %11385 = vmatpush3.msra.mxu0 %v7429_v8 }
0x254f   : > { %v7516_v24 = vpop.permute.xlu1 %7515 }
0x2550   : > { %11391 = vmatprep.subr.mxu1 %v7516_v24 }
0x2551   : > { %11392 = vmatpush3.msra.mxu1 %v7516_v24 }
0x2555   : > { %v11875_v10 = vpop.eup %11874 }
0x2556   : > { %v7418_v42 = vmul.f32 %v11875_v10, %v11869_v0  ;;  %v11877_v19 = vpop.eup %11876 }
0x2557   : > { %v13313_v22 = vmul.f32 %v11877_v19, %v11867_v18 }
0x2558   : > { %11388 = vmatprep.mubr.msk.f32.mxu0 %vm1573_vm11, %v7418_v42  ;;  %v13311_v54 = vadd.f32 %v7418_v42, %v13258_v57 }
0x259b   : > { %v7410_v33 = vpop.xlane.xlu1 %7409 }
0x259c   : > { %11878 = vrcp.f32 %v7410_v33 }
0x259f   : > { %v7514_v13 = vpop.permute.xlu1 %7513  ;;  %v7413_v28 = vpop.xlane.xlu0 %7412 }
0x25a0   : > { %11880 = vrcp.f32 %v7413_v28  ;;  %11393 = vmatprep.subr.mxu1 %v7514_v13 }
0x25a1   : > { %11394 = vmatpush3.msra.mxu1 %v7514_v13 }
0x25a3   : > { %v7427_v44 = vpop.permute.xlu0 %7426  ;;  %v7605_v40 = vpop.permute.xlu1 %7604 }
0x25a4   : > { %11386 = vmatprep.subr.mxu0 %v7427_v44 }
0x25a5   : > { %11387 = vmatpush3.msra.mxu0 %v7427_v44 }
0x25a6   : > { %11389 = vmatmul.mubr.msk.f32.vlgmr.msra.gmra.mxu0 %vm1573_vm11, %v13313_v22  ;;  %11398 = vmatprep.subr.mxu0 %v7667_v16 }
0x25a7   : > { %11399 = vmatpush3.msra.mxu0 %v7667_v16  ;;  %v7607_v61 = vpop.permute.xlu0 %7606  ;;  %v7621_v17 = vpop.permute.xlu1 %7620 }
0x25a8   : > { %11400 = vmatprep.subr.mxu0 %v7666_v32 }
0x25a9   : > { %v11879_v57 = vpop.eup %11878  ;;  %11401 = vmatpush3.msra.mxu0 %v7666_v32 }
0x25aa   : > { %v7420_v21 = vmul.f32 %v11879_v57, %v11871_v12  ;;  %11402 = vmatprep.subr.mxu0 %v7665_v14 }
0x25ab   : > { %11403 = vmatpush3.msra.mxu0 %v7665_v14  ;;  %v7623_v56 = vpop.permute.xlu0 %7622 }
0x25ac   : > { %11395 = vmatprep.mubr.msk.f32.mxu1 %vm1573_vm11, %v7420_v21  ;;  %v13319_v20 = vadd.f32 %v7420_v21, %v13270_v63  ;;  %v7664_v63 = vld [vmem:[%s1081_s6] sm:$0xff] }
0x25ad   : > { %v11881_v31 = vpop.eup %11880  ;;  %11404 = vmatprep.subr.mxu0 %v7664_v63 }
0x25ae   : > { %v7421_v38 = vmul.f32 %v11881_v31, %v11873_v29  ;;  %11405 = vmatpush3.msra.mxu0 %v7664_v63 }
0x25b0   : > { %11396 = vmatmul.mubr.msk.f32.vlgmr.msra.gmra.mxu1 %vm1573_vm11, %v7421_v38  ;;  %v13323_v59 = vadd.f32 %v7421_v38, %v13275_v9 }
0x2666   : > { %v11390_v30 = vpop.f32.mrf.mxu0 }
0x2667   : > { %7638 = vrot.lane.b32.xlu0 %v11390_v30, %s13957_s21 }
0x2668   : > { %v7504_v9 = vpop.f32.mrf.mxu0 }
0x2669   : > { %7636 = vrot.lane.b32.xlu1 %v7504_v9, %s13957_s21 }
0x266b   : > { %7610 = vrot.lane.b32.xlu0 %v13217_v49, %s13954_s24 }
0x266d   : > { %7608 = vrot.lane.b32.xlu1 %v13219_v50, %s13954_s24  ;;  %v7648_v50 = vsel %vm1396_vm10, %v13147_v39, %v7605_v40  ;;  %s11950_s24 = smov 100  }
0x266e   : > { %v7652_v52 = vsel %vm1573_vm11, %v7648_v50, %v7621_v17 }
0x266f   : > { %7626 = vrot.lane.b32.xlu0 %v13285_v25, %s13955_s26  ;;  %v7649_v25 = vsel %vm1396_vm10, %v13145_v58, %v7607_v61 }
0x2670   : > { %v11397_v4 = vpop.f32.mrf.mxu1 }
0x2671   : > { %7624 = vrot.lane.b32.xlu1 %v13287_v27, %s13955_s26  ;;  %v7653_v27 = vsel %vm1573_vm11, %v7649_v25, %v7623_v56  ;;  %s1086_s26 = scalar_lea.vmem %s13867_s11, %s12142_s1 }
0x2672   : > { %v7591_v11 = vpop.f32.mrf.mxu1 }
0x2673   : > { %7642 = vrot.lane.b32.xlu0 %v11397_v4, %s13957_s21 }
0x2675   : > { %7640 = vrot.lane.b32.xlu1 %v7591_v11, %s13957_s21  ;;  %s1114_s21 = scalar_lea.vmem %s13873_s17, %s12142_s1 }
0x26d9   : > { %v7639_v49 = vpop.permute.xlu0 %7638 }
0x26da   : > { %v7657_v18 = vsel %vm3060_vm12, %v7653_v27, %v7639_v49 }
0x26db   : > { %v7637_v43 = vpop.permute.xlu1 %7636 }
0x26dc   : > { %v7656_v41 = vsel %vm3060_vm12, %v7652_v52, %v7637_v43 }
0x26dd   : > { %11406 = vmatprep.mubr.msk.f32.mxu0 %vm1172_vm0, %v7656_v41  ;;  %v7611_v48 = vpop.permute.xlu0 %7610 }
0x26de   : > { %11407 = vmatmul.mubr.msk.f32.vlgmr.msra.gmra.mxu0 %vm1172_vm0, %v7657_v18  ;;  %v7651_v60 = vsel %vm1396_vm10, %v13149_v46, %v7611_v48 }
0x26df   : > { %v7609_v0 = vpop.permute.xlu1 %7608 }
0x26e0   : > { %v7650_v55 = vsel %vm1396_vm10, %v13151_v35, %v7609_v0 }
0x26e1   : > { %v7627_v39 = vpop.permute.xlu0 %7626 }
0x26e2   : > { %v7655_v6 = vsel %vm1573_vm11, %v7651_v60, %v7627_v39 }
0x26e3   : > { %v7625_v51 = vpop.permute.xlu1 %7624 }
0x26e4   : > { %v7654_v2 = vsel %vm1573_vm11, %v7650_v55, %v7625_v51 }
0x26e5   : > { %v7643_v58 = vpop.permute.xlu0 %7642 }
0x26e6   : > { %v7659_v12 = vsel %vm3060_vm12, %v7655_v6, %v7643_v58 }
0x26e7   : > { %v7641_v5 = vpop.permute.xlu1 %7640 }
0x26e8   : > { %v7658_v1 = vsel %vm3060_vm12, %v7654_v2, %v7641_v5 }
0x26e9   : > { %11409 = vmatprep.mubr.msk.f32.mxu0 %vm1172_vm0, %v7658_v1 }
0x26ea   : > { %11410 = vmatmul.mubr.msk.f32.gmra.mxu0 %vm1172_vm0, %v7659_v12 }
0x279e   : > { %v11408_v35 = vpop.f32.mrf.mxu0 }
0x279f   : > { %v7759_v29 = vadd.f32 %v11408_v35, %v13362_v15 }
0x27a0   : > { %v7753_v23 = vpop.f32.mrf.mxu0 }
0x27a1   : > { %v13366_v46 = vadd.f32 %v7759_v29, %v12924_v47  ;;  %v7754_v26 = vadd.f32 %v13362_v15, %v7753_v23 }
0x27a3   : > { %v13370_v8 = vadd.f32 %v7754_v26, %v12927_v45  ;;  %v7779_v24 = vsel %vm1172_vm0, %v13366_v46, 0.0 }
0x27a4   : > { %7780 = vadd.xlane.f32.xlu0 %v7779_v24 }
0x27a5   : > { %v7776_v10 = vsel %vm1172_vm0, %v13370_v8, 0.0 }
0x27a6   : > { %7777 = vadd.xlane.f32.xlu1 %v7776_v10 }
0x27aa   : > { %v11411_v42 = vpop.f32.mrf.mxu0 }
0x27ab   : > { %v7769_v33 = vadd.f32 %v11411_v42, %v13362_v15 }
0x27ac   : > { %v7763_v3 = vpop.f32.mrf.mxu0 }
0x27ad   : > { %v7764_v47 = vadd.f32 %v13362_v15, %v7763_v3  ;;  %v13382_v45 = vadd.f32 %v7769_v33, %v12938_v62 }
0x27af   : > { %v13379_v13 = vadd.f32 %v7764_v47, %v12943_v7  ;;  %v7785_v19 = vsel %vm1172_vm0, %v13382_v45, 0.0 }
0x27b1   : > { %v7782_v28 = vsel %vm1172_vm0, %v13379_v13, 0.0 }
0x27b2   : > { %7783 = vadd.xlane.f32.xlu0 %v7782_v28 }
0x27b6   : > { %7786 = vadd.xlane.f32.xlu0 %v7785_v19 }
0x282d   : > { %v7781_v44 = vpop.xlane.xlu0 %7780 }
0x282e   : > { %v7789_v57 = vmul.f32 0.03125, %v7781_v44 }
0x282f   : > { %v7778_v21 = vpop.xlane.xlu1 %7777 }
0x2830   : > { %v13389_v31 = vsub.f32 %v13366_v46, %v7789_v57  ;;  %v7788_v38 = vmul.f32 0.03125, %v7778_v21 }
0x2832   : > { %v13392_v7 = vsub.f32 %v13370_v8, %v7788_v38  ;;  %v7797_v62 = vmul.f32 %v13389_v31, %v13389_v31 }
0x2834   : > { %v7803_v16 = vsel %vm1172_vm0, %v7797_v62, 0.0  ;;  %v7796_v32 = vmul.f32 %v13392_v7, %v13392_v7 }
0x2835   : > { %7804 = vadd.xlane.f32.xlu0 %v7803_v16  ;;  %v7886_v16 = vld [vmem:[%s1086_s26 + $0x18] sm:$0xff] }
0x2836   : > { %v7800_v14 = vsel %vm1172_vm0, %v7796_v32, 0.0  ;;  %11412 = vmatprep.subr.mxu1 %v7886_v16 }
0x2837   : > { %7801 = vadd.xlane.f32.xlu1 %v7800_v14  ;;  %11413 = vmatpush3.msra.mxu1 %v7886_v16 }
0x283b   : > { %v7784_v63 = vpop.xlane.xlu0 %7783 }
0x283c   : > { %v7790_v30 = vmul.f32 0.03125, %v7784_v63  ;;  %v7884_v63 = vld [vmem:[%s1086_s26 + $0x8] sm:$0xff] }
0x283e   : > { %v13401_v9 = vsub.f32 %v13379_v13, %v7790_v30 }
0x283f   : > { %v7787_v4 = vpop.xlane.xlu0 %7786 }
0x2840   : > { %v7791_v11 = vmul.f32 0.03125, %v7787_v4  ;;  %v7798_v61 = vmul.f32 %v13401_v9, %v13401_v9 }
0x2842   : > { %v13406_v40 = vsub.f32 %v13382_v45, %v7791_v11  ;;  %v7806_v56 = vsel %vm1172_vm0, %v7798_v61, 0.0 }
0x2843   : > { %7807 = vadd.xlane.f32.xlu1 %v7806_v56 }
0x2844   : > { %v7799_v17 = vmul.f32 %v13406_v40, %v13406_v40 }
0x2846   : > { %v7809_v49 = vsel %vm1172_vm0, %v7799_v17, 0.0 }
0x2847   : > { %7810 = vadd.xlane.f32.xlu0 %v7809_v49 }
0x28be   : > { %v7805_v50 = vpop.xlane.xlu0 %7804 }
0x28bf   : > { %v7813_v52 = vmul.f32 0.032258064, %v7805_v50 }
0x28c0   : > { %v7802_v25 = vpop.xlane.xlu1 %7801 }
0x28c1   : > { %11882 = vrsqrt.f32 %v7813_v52  ;;  %v7812_v43 = vmul.f32 0.032258064, %v7802_v25  ;;  %vm7825_vm12 = vcmp.eq.f32.partialorder %v7813_v52, inf  ;;  %v7828_v0 = vand.u32 2147483648, %v7813_v52  ;;  %v8017_v25 = vld [vmem:[%s13434_s22 + $0x28] sm:$0xff] }
0x28c2   : > { %vm7827_vm8 = vcmp.eq.f32.partialorder %v7813_v52, 0.0 }
0x28c3   : > { %11884 = vrsqrt.f32 %v7812_v43  ;;  %vm7818_vm13 = vcmp.eq.f32.partialorder %v7812_v43, inf  ;;  %v7821_v6 = vand.u32 2147483648, %v7812_v43  ;;  %vm7820_vm14 = vcmp.eq.f32.partialorder %v7812_v43, 0.0 }
0x28cc   : > { %v7808_v27 = vpop.xlane.xlu1 %7807 }
0x28cd   : > { %v7814_v41 = vmul.f32 0.032258064, %v7808_v27 }
0x28ce   : > { %v11883_v18 = vpop.eup %11882 }
0x28cf   : > { %v7824_v48 = vmul.f32 %v11883_v18, %v7813_v52  ;;  %11886 = vrsqrt.f32 %v7814_v41  ;;  %vm7832_vm15 = vcmp.eq.f32.partialorder %v7814_v41, inf  ;;  %v7835_v26 = vand.u32 2147483648, %v7814_v41  ;;  %v7887_v18 = vld [vmem:[%s12134_s8 + $0x6] sm:$0x3] }
0x28d0   : > { %v7811_v39 = vpop.xlane.xlu0 %7810  ;;  %v11885_v51 = vpop.eup %11884  ;;  %vm7834_vm1 = vcmp.eq.f32.partialorder %v7814_v41, 0.0 }
0x28d1   : > { %v7826_v55 = vsel %vm7825_vm12, %v7813_v52, %v7824_v48  ;;  %v7815_v58 = vmul.f32 0.032258064, %v7811_v39  ;;  %v7817_v2 = vmul.f32 %v11885_v51, %v7812_v43  ;;  %v8018_v52 = vld [vmem:[%s13434_s22 + $0x30] sm:$0xff]  ;;  %v7892_v51 = vrot.slane %v7887_v18, %v12152_v36 }
0x28d2   : > { %v7829_v60 = vsel %vm7827_vm8, %v7828_v0, %v7826_v55 }
0x28d3   : > { %v7845_v5 = vadd.f32 1e-06, %v7829_v60  ;;  %11888 = vrsqrt.f32 %v7815_v58  ;;  %v7819_v1 = vsel %vm7818_vm13, %v7812_v43, %v7817_v2  ;;  %vm7839_vm2 = vcmp.eq.f32.partialorder %v7815_v58, inf }
0x28d4   : > { %v7822_v12 = vsel %vm7820_vm14, %v7821_v6, %v7819_v1  ;;  %v7842_v28 = vand.u32 2147483648, %v7815_v58  ;;  %vm7841_vm3 = vcmp.eq.f32.partialorder %v7815_v58, 0.0  ;;  %v8015_v6 = vld [vmem:[%s13434_s22 + $0x18] sm:$0xff]  ;;  %v8014_v1 = vld [vmem:[%s13434_s22 + $0x10] sm:$0xff] }
0x28d5   : > { %11890 = vrcp.f32 %v7845_v5  ;;  %v7844_v35 = vadd.f32 1e-06, %v7822_v12  ;;  %v8013_v12 = vld [vmem:[%s13434_s22 + $0x8] sm:$0xff] }
0x28d7   : > { %11892 = vrcp.f32 %v7844_v35  ;;  %v8012_v35 = vld [vmem:[%s13434_s22] sm:$0xff] }
0x28dc   : > { %v11887_v29 = vpop.eup %11886 }
0x28dd   : > { %v7831_v23 = vmul.f32 %v11887_v29, %v7814_v41  ;;  %v13458_v29 = vld [vmem:[%s12134_s8 + $0x7] ss:$0 sm:$0xff] }
0x28df   : > { %v7833_v24 = vsel %vm7832_vm15, %v7814_v41, %v7831_v23  ;;  %v8016_v41 = vld [vmem:[%s13434_s22 + $0x20] sm:$0xff] }
0x28e0   : > { %v11889_v10 = vpop.eup %11888  ;;  %v7836_v42 = vsel %vm7834_vm1, %v7835_v26, %v7833_v24 }
0x28e1   : > { %v7846_v3 = vadd.f32 1e-06, %v7836_v42  ;;  %v7838_v33 = vmul.f32 %v11889_v10, %v7815_v58 }
0x28e2   : > { %v11891_v47 = vpop.eup %11890 }
0x28e3   : > { %v7840_v19 = vsel %vm7839_vm2, %v7815_v58, %v7838_v33  ;;  %v7851_v44 = vmul.f32 %v11891_v47, %v13389_v31  ;;  %11894 = vrcp.f32 %v7846_v3  ;;  %v7885_v31 = vld [vmem:[%s1086_s26 + $0x10] sm:$0xff]  ;;  %v7896_v58 = vrot.slane %v7887_v18, %v12155_v37 }
0x28e4   : > { %v7843_v57 = vsel %vm7841_vm3, %v7842_v28, %v7840_v19  ;;  %v11893_v21 = vpop.eup %11892  ;;  %11414 = vmatprep.subr.mxu1 %v7885_v31 }
0x28e5   : > { %v7847_v38 = vadd.f32 1e-06, %v7843_v57  ;;  %7862 = vrot.lane.b32.xlu0 %v7851_v44, %s13944_s5  ;;  %v7849_v62 = vmul.f32 %v11893_v21, %v13392_v7  ;;  %11415 = vmatpush3.msra.mxu1 %v7885_v31  ;;  %v7883_v7 = vld [vmem:[%s1086_s26] sm:$0xff] }
0x28e6   : > { %11416 = vmatprep.subr.mxu1 %v7884_v63 }
0x28e7   : > { %11896 = vrcp.f32 %v7847_v38  ;;  %7860 = vrot.lane.b32.xlu1 %v7849_v62, %s13944_s5  ;;  %11417 = vmatpush3.msra.mxu1 %v7884_v63 }
0x28e8   : > { %11418 = vmatprep.subr.mxu1 %v7883_v7 }
0x28e9   : > { %11419 = vmatpush3.msra.mxu1 %v7883_v7 }
0x28eb   : > { %7876 = vrot.lane.b32.xlu1 %v13362_v15, %s13958_s16 }
0x28f0   : > { %v11895_v32 = vpop.eup %11894 }
0x28f1   : > { %v7853_v14 = vmul.f32 %v11895_v32, %v13401_v9 }
0x28f3   : > { %7864 = vrot.lane.b32.xlu1 %v7853_v14, %s13944_s5 }
0x28f4   : > { %v11897_v30 = vpop.eup %11896 }
0x28f5   : > { %v7855_v4 = vmul.f32 %v11897_v30, %v13406_v40  ;;  %v8019_v40 = vld [vmem:[%s13434_s22 + $0x38] sm:$0xff]  ;;  %s13963_s22 = sld [smem:[#allocation4_spill]] }
0x28f6   : > { %11426 = vmatprep.subr.mxu0 %v8019_v40 }
0x28f7   : > { %7866 = vrot.lane.b32.xlu1 %v7855_v4, %s13944_s5  ;;  %11427 = vmatpush3.msra.mxu0 %v8019_v40 }
0x28f8   : > { %11428 = vmatprep.subr.mxu0 %v8018_v52 }
0x28f9   : > { %11429 = vmatpush3.msra.mxu0 %v8018_v52 }
0x28fa   : > { %11430 = vmatprep.subr.mxu0 %v8017_v25 }
0x28fb   : > { %11431 = vmatpush3.msra.mxu0 %v8017_v25 }
0x28fc   : > { %11432 = vmatprep.subr.mxu0 %v8016_v41 }
0x28fd   : > { %11433 = vmatpush3.msra.mxu0 %v8016_v41 }
0x28fe   : > { %11434 = vmatprep.subr.mxu0 %v8015_v6 }
0x28ff   : > { %11435 = vmatpush3.msra.mxu0 %v8015_v6 }
0x2900   : > { %11436 = vmatprep.subr.mxu0 %v8014_v1 }
0x2901   : > { %11437 = vmatpush3.msra.mxu0 %v8014_v1 }
0x2902   : > { %11438 = vmatprep.subr.mxu0 %v8013_v12 }
0x2903   : > { %11439 = vmatpush3.msra.mxu0 %v8013_v12 }
0x2904   : > { %11440 = vmatprep.subr.mxu0 %v8012_v35 }
0x2905   : > { %11441 = vmatpush3.msra.mxu0 %v8012_v35 }
0x2957   : > { %v7863_v11 = vpop.permute.xlu0 %7862 }
0x2958   : > { %v7873_v9 = vmul.f32 %v13362_v15, %v7863_v11 }
0x2959   : > { %v7861_v61 = vpop.permute.xlu1 %7860 }
0x295a   : > { %v7872_v56 = vmul.f32 %v13362_v15, %v7861_v61 }
0x295d   : > { %v7877_v17 = vpop.permute.xlu1 %7876 }
0x295e   : > { %v7879_v49 = vadd.f32 %v7877_v17, %v7872_v56  ;;  %v7880_v50 = vadd.f32 %v7877_v17, %v7873_v9 }
0x2960   : > { %7901 = vrot.lane.b32.xlu0 %v7879_v49, %s13958_s16  ;;  %7903 = vrot.lane.b32.xlu1 %v7880_v50, %s13958_s16 }
0x2965   : > { %v7865_v43 = vpop.permute.xlu1 %7864 }
0x2966   : > { %v7874_v27 = vmul.f32 %v13362_v15, %v7865_v43 }
0x2968   : > { %v7881_v48 = vadd.f32 %v7877_v17, %v7874_v27 }
0x2969   : > { %v7867_v0 = vpop.permute.xlu1 %7866 }
0x296a   : > { %v7875_v39 = vmul.f32 %v13362_v15, %v7867_v0  ;;  %7905 = vrot.lane.b32.xlu0 %v7881_v48, %s13958_s16 }
0x296c   : > { %v7882_v55 = vadd.f32 %v7877_v17, %v7875_v39 }
0x296e   : > { %7907 = vrot.lane.b32.xlu1 %v7882_v55, %s13958_s16  ;;  %7909 = vrot.lane.b32.xlu0 %v7892_v51, %s13944_s5 }
0x2972   : > { %7911 = vrot.lane.b32.xlu1 %v7896_v58, %s13944_s5  ;;  %8026 = vrot.lane.b32.xlu0 %v13458_v29, %s13958_s16  ;;  %s13568_s16 = scalar_lea.vmem %s13874_s18, %s12580_s30 }
0x29d2   : > { %v7904_v60 = vpop.permute.xlu1 %7903  ;;  %v7902_v2 = vpop.permute.xlu0 %7901 }
0x29d3   : > { %11420 = vmatprep.mubr.msk.f32.mxu1 %vm1172_vm0, %v7902_v2 }
0x29d4   : > { %11421 = vmatmul.mubr.msk.f32.vlgmr.msra.gmra.mxu1 %vm1172_vm0, %v7904_v60 }
0x29dc   : > { %v7906_v15 = vpop.permute.xlu0 %7905 }
0x29dd   : > { %11423 = vmatprep.mubr.msk.f32.mxu1 %vm1172_vm0, %v7906_v15 }
0x29e0   : > { %v7908_v5 = vpop.permute.xlu1 %7907  ;;  %v7910_v26 = vpop.permute.xlu0 %7909 }
0x29e1   : > { %11424 = vmatmul.mubr.msk.f32.gmra.mxu1 %vm1172_vm0, %v7908_v5 }
0x29e4   : > { %v7912_v23 = vpop.permute.xlu1 %7911  ;;  %v13467_v16 = vpop.permute.xlu0 %8026 }
0x29e5   : > { %v7913_v24 = vsel %vm1172_vm0, %v7910_v26, %v7912_v23 }
0x2a94   : > { %v11422_v10 = vpop.f32.mrf.mxu1 }
0x2a95   : > { %v7995_v42 = vadd.f32 %v11422_v10, %v7913_v24 }
0x2a96   : > { %v7989_v3 = vpop.f32.mrf.mxu1 }
0x2a97   : > { %v7990_v33 = vadd.f32 %v7989_v3, %v7913_v24  ;;  %v8009_v28 = vmax.f32 %v7995_v42, 0.0 }
0x2a99   : > { %v8008_v47 = vmax.f32 %v7990_v33, 0.0 }
0x2a9b   : > { %11442 = vmatprep.mubr.msk.f32.mxu0 %vm1290_vm9, %v8008_v47 }
0x2a9c   : > { %11443 = vmatmul.mubr.msk.f32.vlgmr.msra.gmra.mxu0 %vm1290_vm9, %v8009_v28 }
0x2aa1   : > { %v11425_v19 = vpop.f32.mrf.mxu1 }
0x2aa2   : > { %v8005_v44 = vadd.f32 %v11425_v19, %v7913_v24 }
0x2aa3   : > { %v7999_v57 = vpop.f32.mrf.mxu1 }
0x2aa4   : > { %v8000_v21 = vadd.f32 %v7999_v57, %v7913_v24  ;;  %v8011_v62 = vmax.f32 %v8005_v44, 0.0 }
0x2aa6   : > { %v8010_v38 = vmax.f32 %v8000_v21, 0.0 }
0x2aa8   : > { %11445 = vmatprep.mubr.msk.f32.mxu0 %vm1290_vm9, %v8010_v38 }
0x2aa9   : > { %11446 = vmatmul.mubr.msk.f32.gmra.mxu0 %vm1290_vm9, %v8011_v62 }
0x2b5c   : > { %v11444_v31 = vpop.f32.mrf.mxu0 }
0x2b5d   : > { %v8113_v32 = vadd.f32 %v11444_v31, %v13467_v16 }
0x2b5e   : > { %v8107_v14 = vpop.f32.mrf.mxu0 }
0x2b5f   : > { %v8108_v63 = vadd.f32 %v8107_v14, %v13467_v16  ;;  %v8127_v7 = vadd.f32 %v8113_v32, %v13366_v46 }
0x2b61   : > { %v8126_v30 = vadd.f32 %v8108_v63, %v13370_v8  ;;  %v8133_v4 = vsel %vm1172_vm0, %v8127_v7, 0.0 }
0x2b62   : > { %8134 = vadd.xlane.f32.xlu0 %v8133_v4 }
0x2b63   : > { %v8130_v11 = vsel %vm1172_vm0, %v8126_v30, 0.0 }
0x2b64   : > { %8131 = vadd.xlane.f32.xlu1 %v8130_v11 }
0x2b69   : > { %v11447_v61 = vpop.f32.mrf.mxu0 }
0x2b6a   : > { %v8123_v56 = vadd.f32 %v11447_v61, %v13467_v16 }
0x2b6b   : > { %v8117_v9 = vpop.f32.mrf.mxu0 }
0x2b6c   : > { %v8118_v17 = vadd.f32 %v8117_v9, %v13467_v16  ;;  %v8129_v50 = vadd.f32 %v8123_v56, %v13382_v45 }
0x2b6e   : > { %v8128_v49 = vadd.f32 %v8118_v17, %v13379_v13  ;;  %v8139_v8 = vsel %vm1172_vm0, %v8129_v50, 0.0 }
0x2b70   : > { %v8136_v46 = vsel %vm1172_vm0, %v8128_v49, 0.0 }
0x2b71   : > { %8137 = vadd.xlane.f32.xlu0 %v8136_v46 }
0x2b75   : > { %8140 = vadd.xlane.f32.xlu0 %v8139_v8 }
0x2beb   : > { %v8135_v40 = vpop.xlane.xlu0 %8134 }
0x2bec   : > { %v8143_v52 = vmul.f32 0.03125, %v8135_v40 }
0x2bed   : > { %v8132_v25 = vpop.xlane.xlu1 %8131 }
0x2bee   : > { %v13481_v43 = vsub.f32 %v8127_v7, %v8143_v52  ;;  %v8142_v27 = vmul.f32 0.03125, %v8132_v25  ;;  %v8258_v25 = vld [vmem:[%s1096_s28 + $0x18] sm:$0xff] }
0x2bef   : > { %11448 = vmatprep.subr.mxu1 %v8258_v25 }
0x2bf0   : > { %v13483_v41 = vsub.f32 %v8126_v30, %v8142_v27  ;;  %v8151_v18 = vmul.f32 %v13481_v43, %v13481_v43  ;;  %v8257_v27 = vld [vmem:[%s1096_s28 + $0x10] sm:$0xff]  ;;  %11449 = vmatpush3.msra.mxu1 %v8258_v25  ;;  %v10450_v25 = vld [vmem:[%s12134_s8 + $0x9] ss:$0 sm:$0xff] }
0x2bf1   : > { %11450 = vmatprep.subr.mxu1 %v8257_v27 }
0x2bf2   : > { %v8157_v13 = vsel %vm1172_vm0, %v8151_v18, 0.0  ;;  %v8150_v45 = vmul.f32 %v13483_v41, %v13483_v41  ;;  %11451 = vmatpush3.msra.mxu1 %v8257_v27  ;;  %v13578_v27 = vld [vmem:[%s12134_s8 + $0x9] sm:$0x3] }
0x2bf3   : > { %8158 = vadd.xlane.f32.xlu0 %v8157_v13 }
0x2bf4   : > { %v8154_v48 = vsel %vm1172_vm0, %v8150_v45, 0.0  ;;  %v8256_v45 = vld [vmem:[%s1096_s28 + $0x8] sm:$0xff] }
0x2bf5   : > { %8155 = vadd.xlane.f32.xlu1 %v8154_v48  ;;  %11452 = vmatprep.subr.mxu1 %v8256_v45  ;;  %v8255_v48 = vld [vmem:[%s1096_s28] sm:$0xff]  ;;  %s11951_s28 = smov 36  }
0x2bf6   : > { %11453 = vmatpush3.msra.mxu1 %v8256_v45  ;;  %v9128_v45 = vsub.s32 4, %v12148_v34 }
0x2bf7   : > { %11454 = vmatprep.subr.mxu1 %v8255_v48 }
0x2bf8   : > { %11455 = vmatpush3.msra.mxu1 %v8255_v48 }
0x2bfa   : > { %v8138_v0 = vpop.xlane.xlu0 %8137 }
0x2bfb   : > { %v8144_v39 = vmul.f32 0.03125, %v8138_v0 }
0x2bfd   : > { %v13491_v51 = vsub.f32 %v8128_v49, %v8144_v39 }
0x2bfe   : > { %v8141_v55 = vpop.xlane.xlu0 %8140 }
0x2bff   : > { %v8145_v58 = vmul.f32 0.03125, %v8141_v55  ;;  %v8152_v60 = vmul.f32 %v13491_v51, %v13491_v51 }
0x2c01   : > { %v13495_v2 = vsub.f32 %v8129_v50, %v8145_v58  ;;  %v8160_v15 = vsel %vm1172_vm0, %v8152_v60, 0.0 }
0x2c02   : > { %8161 = vadd.xlane.f32.xlu1 %v8160_v15 }
0x2c03   : > { %v8153_v5 = vmul.f32 %v13495_v2, %v13495_v2 }
0x2c05   : > { %v8163_v6 = vsel %vm1172_vm0, %v8153_v5, 0.0 }
0x2c06   : > { %8164 = vadd.xlane.f32.xlu0 %v8163_v6 }
0x2c7c   : > { %v8159_v1 = vpop.xlane.xlu0 %8158 }
0x2c7d   : > { %v8167_v12 = vmul.f32 0.032258064, %v8159_v1 }
0x2c7e   : > { %v8156_v35 = vpop.xlane.xlu1 %8155 }
0x2c7f   : > { %11898 = vrsqrt.f32 %v8167_v12  ;;  %v8166_v23 = vmul.f32 0.032258064, %v8156_v35  ;;  %vm8179_vm4 = vcmp.eq.f32.partialorder %v8167_v12, inf  ;;  %v8182_v3 = vand.u32 2147483648, %v8167_v12 }
0x2c80   : > { %vm8181_vm5 = vcmp.eq.f32.partialorder %v8167_v12, 0.0 }
0x2c81   : > { %11900 = vrsqrt.f32 %v8166_v23  ;;  %vm8172_vm6 = vcmp.eq.f32.partialorder %v8166_v23, inf  ;;  %v8175_v38 = vand.u32 2147483648, %v8166_v23  ;;  %vm8174_vm7 = vcmp.eq.f32.partialorder %v8166_v23, 0.0 }
0x2c8b   : > { %v8162_v26 = vpop.xlane.xlu1 %8161 }
0x2c8c   : > { %v8168_v24 = vmul.f32 0.032258064, %v8162_v26  ;;  %v11899_v10 = vpop.eup %11898  ;;  %v11923_v26 = vld [vmem:[%s12452_s27] sm:$0xff] }
0x2c8d   : > { %v8178_v42 = vmul.f32 %v11899_v10, %v8167_v12  ;;  %v11924_v10 = vld [vmem:[%s12452_s27 + $0x8] sm:$0xff] }
0x2c8e   : > { %11902 = vrsqrt.f32 %v8168_v24  ;;  %v11901_v47 = vpop.eup %11900  ;;  %vm8186_vm12 = vcmp.eq.f32.partialorder %v8168_v24, inf  ;;  %v8189_v7 = vand.u32 2147483648, %v8168_v24  ;;  %vm8188_vm8 = vcmp.eq.f32.partialorder %v8168_v24, 0.0 }
0x2c8f   : > { %v8165_v33 = vpop.xlane.xlu0 %8164  ;;  %v8180_v28 = vsel %vm8179_vm4, %v8167_v12, %v8178_v42  ;;  %v8171_v57 = vmul.f32 %v11901_v47, %v8166_v23  ;;  %v11926_v47 = vld [vmem:[%s12452_s27 + $0x18] sm:$0xff] }
0x2c90   : > { %v8169_v19 = vmul.f32 0.032258064, %v8165_v33  ;;  %v8183_v44 = vsel %vm8181_vm5, %v8182_v3, %v8180_v28  ;;  %v11925_v3 = vld [vmem:[%s12452_s27 + $0x10] sm:$0xff] }
0x2c91   : > { %v8199_v21 = vadd.f32 1e-06, %v8183_v44  ;;  %v8173_v62 = vsel %vm8172_vm6, %v8166_v23, %v8171_v57 }
0x2c92   : > { %11904 = vrsqrt.f32 %v8169_v19  ;;  %v8176_v31 = vsel %vm8174_vm7, %v8175_v38, %v8173_v62  ;;  %vm8193_vm13 = vcmp.eq.f32.partialorder %v8169_v19, inf  ;;  %v8196_v17 = vand.u32 2147483648, %v8169_v19 }
0x2c93   : > { %11906 = vrcp.f32 %v8199_v21  ;;  %v8198_v32 = vadd.f32 1e-06, %v8176_v31  ;;  %vm8195_vm14 = vcmp.eq.f32.partialorder %v8169_v19, 0.0  ;;  %v8582_v21 = vld [vmem:[%s1114_s21 + $0x18] sm:$0xff] }
0x2c95   : > { %11908 = vrcp.f32 %v8198_v32 }
0x2c9b   : > { %v11903_v14 = vpop.eup %11902 }
0x2c9c   : > { %v8185_v63 = vmul.f32 %v11903_v14, %v8168_v24 }
0x2c9e   : > { %v8187_v30 = vsel %vm8186_vm12, %v8168_v24, %v8185_v63 }
0x2c9f   : > { %v11905_v4 = vpop.eup %11904  ;;  %v8190_v11 = vsel %vm8188_vm8, %v8189_v7, %v8187_v30  ;;  %v8581_v7 = vld [vmem:[%s1114_s21 + $0x10] sm:$0xff]  ;;  %v8580_v30 = vld [vmem:[%s1114_s21 + $0x8] sm:$0xff] }
0x2ca0   : > { %v8200_v61 = vadd.f32 1e-06, %v8190_v11  ;;  %v8192_v9 = vmul.f32 %v11905_v4, %v8169_v19  ;;  %v11907_v56 = vpop.eup %11906  ;;  %v8579_v4 = vld [vmem:[%s1114_s21] sm:$0xff]  ;;  %s13961_s21 = sld [smem:[#allocation16_spill]] }
0x2ca1   : > { %v8205_v50 = vmul.f32 %v11907_v56, %v13481_v43 }
0x2ca2   : > { %v8194_v49 = vsel %vm8193_vm13, %v8169_v19, %v8192_v9  ;;  %11910 = vrcp.f32 %v8200_v61  ;;  %v11909_v8 = vpop.eup %11908  ;;  %v13534_v19 = vld [vmem:[%s12134_s8 + $0x8] ss:$0 sm:$0xff] }
0x2ca3   : > { %v8197_v46 = vsel %vm8195_vm14, %v8196_v17, %v8194_v49  ;;  %8217 = vrot.lane.b32.xlu0 %v8205_v50, %s13940_s0  ;;  %v8203_v52 = vmul.f32 %v11909_v8, %v13483_v41  ;;  %v8683_v8 = vld [vmem:[%s12134_s8 + $0x8] sm:$0x3] }
0x2ca4   : > { %v8201_v40 = vadd.f32 1e-06, %v8197_v46  ;;  %v8682_v46 = vld [vmem:[%s13568_s16 + $0x38] sm:$0xff] }
0x2ca5   : > { %8215 = vrot.lane.b32.xlu1 %v8203_v52, %s13940_s0  ;;  %v8692_v52 = vrot.slane %v8683_v8, %v12155_v37 }
0x2ca6   : > { %11912 = vrcp.f32 %v8201_v40  ;;  %v8688_v40 = vrot.slane %v8683_v8, %v12152_v36 }
0x2caf   : > { %v11911_v18 = vpop.eup %11910 }
0x2cb0   : > { %v8207_v43 = vmul.f32 %v11911_v18, %v13491_v51  ;;  %v8936_v18 = vrot.slane %v13578_v27, %v12155_v37 }
0x2cb2   : > { %8219 = vrot.lane.b32.xlu1 %v8207_v43, %s13940_s0  ;;  %v9120_v43 = vsub.s32 2, %v12148_v34 }
0x2cb3   : > { %v11913_v13 = vpop.eup %11912 }
0x2cb4   : > { %v8209_v41 = vmul.f32 %v11913_v13, %v13495_v2  ;;  %v13585_v13 = vld [vmem:[%s12134_s8 + $0xa] sm:$0x1f]  ;;  %s10216_s8 = sshll.u32 %s12128_s7, 2 }
0x2cb5   : > { %v9129_v48 = vrot.slane %v13585_v13, %v9128_v45 }
0x2cb6   : > { %8221 = vrot.lane.b32.xlu1 %v8209_v41, %s13940_s0  ;;  %v9121_v41 = vrot.slane %v13585_v13, %v9120_v43 }
0x2d15   : > { %v8218_v0 = vpop.permute.xlu0 %8217 }
0x2d16   : > { %v8228_v39 = vmul.f32 %v13458_v29, %v8218_v0 }
0x2d17   : > { %v8216_v55 = vpop.permute.xlu1 %8215 }
0x2d18   : > { %v8232_v51 = vadd.f32 %v8228_v39, %v13467_v16  ;;  %v8227_v58 = vmul.f32 %v13458_v29, %v8216_v55 }
0x2d1a   : > { %8241 = vrot.lane.b32.xlu0 %v8232_v51, %s13940_s0  ;;  %v8231_v60 = vadd.f32 %v8227_v58, %v13467_v16 }
0x2d1c   : > { %8239 = vrot.lane.b32.xlu1 %v8231_v60, %s13940_s0 }
0x2d24   : > { %v8220_v2 = vpop.permute.xlu1 %8219 }
0x2d25   : > { %v8229_v15 = vmul.f32 %v13458_v29, %v8220_v2 }
0x2d27   : > { %v8233_v5 = vadd.f32 %v8229_v15, %v13467_v16  ;;  %v8681_v15 = vld [vmem:[%s13568_s16 + $0x30] sm:$0xff] }
0x2d28   : > { %v8222_v6 = vpop.permute.xlu1 %8221 }
0x2d29   : > { %v8230_v1 = vmul.f32 %v13458_v29, %v8222_v6  ;;  %8243 = vrot.lane.b32.xlu1 %v8233_v5, %s13940_s0  ;;  %v8680_v5 = vld [vmem:[%s13568_s16 + $0x28] sm:$0xff]  ;;  %v8679_v6 = vld [vmem:[%s13568_s16 + $0x20] sm:$0xff] }
0x2d2b   : > { %v8234_v12 = vadd.f32 %v8230_v1, %v13467_v16  ;;  %v8678_v1 = vld [vmem:[%s13568_s16 + $0x18] sm:$0xff] }
0x2d2d   : > { %8245 = vrot.lane.b32.xlu0 %v8234_v12, %s13940_s0  ;;  %s10482_s0 = sshll.u32 %s12128_s7, 4  ;;  %8369 = vrot.lane.b32.xlu1 %v13534_v19, %s13949_s4  ;;  %s10215_s4 = sshll.u32 %s12128_s7, 3 }
0x2d2e   : > { %s1101_s23 = scalar_lea.vmem %s13870_s14, %s10482_s0  ;;  %s1105_s25 = scalar_lea.vmem %s13871_s15, %s10215_s4 }
0x2d2f   : > { %v8368_v44 = vld [vmem:[%s1101_s23 + $0x8] sm:$0xff]  ;;  %v8367_v57 = vld [vmem:[%s1101_s23] sm:$0xff]  ;;  %s1124_s0 = scalar_lea.vmem %s13875_s19, %s12580_s30  ;;  %s13618_s23 = scalar_lea.vmem %s13876_s20, %s12580_s30 }
0x2d30   : > { %11462 = vmatprep.subr.mxu1 %v8368_v44  ;;  %v8473_v50 = vld [vmem:[%s1105_s25] sm:$0xff]  ;;  %s10487_s30 = sshll.u32 %s12128_s7, 9  ;;  %s11953_s7 = smov 3  }
0x2d31   : > { %8583 = vrot.lane.b32.xlu0 %v13534_v19, %s11950_s24  ;;  %11472 = vmatprep.subr.mxu0 %v8473_v50  ;;  %s13725_s25 = scalar_lea.vmem %s13962_s2, %s10487_s30  ;;  %s13968_s2 = sld [smem:[#allocation19_spill]] }
0x2d32   : > { %11473 = vmatpush3.msra.mxu0 %v8473_v50  ;;  %8693 = vrot.lane.b32.xlu1 %v8688_v40, %s11951_s28  ;;  %v8924_v50 = vld [vmem:[%s13618_s23 + $0x28] sm:$0xff] }
0x2d33   : > { %11494 = vmatprep.subr.mxu0 %v8682_v46 }
0x2d35   : > { %8695 = vrot.lane.b32.xlu0 %v8692_v52, %s11951_s28 }
0x2d36   : > { %8815 = vrot.lane.b32.xlu1 %v10450_v25, %s11950_s24  ;;  %s13647_s24 = scalar_lea.vmem %s13961_s21, %s10487_s30  ;;  %s13966_s30 = sld [smem:[#allocation3_spill]] }
0x2d3a   : > { %8939 = vrot.lane.b32.xlu1 %v8936_v18, %s11951_s28 }
0x2d3c   : > { %s13967_s27 = sshll.u32 %s13966_s30, 5 }
0x2d3e   : > { %9134 = vrot.lane.b32.xlu1 %v9121_v41, %s11951_s28 }
0x2d42   : > { %9138 = vrot.lane.b32.xlu1 %v9129_v48, %s11951_s28 }
0x2d46   : > { %8474 = vrot.lane.b32.xlu1 %v13534_v19, %s13952_s29 }
0x2d8c   : > { %v8242_v35 = vpop.permute.xlu0 %8241 }
0x2d8d   : > { %v8252_v42 = vadd.f32 %v11924_v10, %v8242_v35  ;;  %v8677_v35 = vld [vmem:[%s13568_s16 + $0x10] sm:$0xff] }
0x2d8e   : > { %v8240_v23 = vpop.permute.xlu1 %8239 }
0x2d8f   : > { %v8251_v24 = vadd.f32 %v11923_v26, %v8240_v23 }
0x2d91   : > { %11456 = vmatprep.mubr.msk.f32.mxu1 %vm1172_vm0, %v8251_v24 }
0x2d92   : > { %11457 = vmatmul.mubr.msk.f32.vlgmr.msra.gmra.mxu1 %vm1172_vm0, %v8252_v42 }
0x2d93   : > { %11463 = vmatpush3.msra.mxu1 %v8368_v44 }
0x2d94   : > { %11464 = vmatprep.subr.mxu1 %v8367_v57 }
0x2d95   : > { %11465 = vmatpush3.msra.mxu1 %v8367_v57 }
0x2d96   : > { %11480 = vmatprep.subr.mxu1 %v8582_v21 }
0x2d9b   : > { %v8244_v29 = vpop.permute.xlu1 %8243 }
0x2d9c   : > { %v8253_v33 = vadd.f32 %v11925_v3, %v8244_v29 }
0x2d9e   : > { %11459 = vmatprep.mubr.msk.f32.mxu1 %vm1172_vm0, %v8253_v33 }
0x2d9f   : > { %v8246_v16 = vpop.permute.xlu0 %8245  ;;  %v8370_v0 = vpop.permute.xlu1 %8369 }
0x2da0   : > { %v8254_v28 = vadd.f32 %v11926_v47, %v8246_v16 }
0x2da2   : > { %11460 = vmatmul.mubr.msk.f32.gmra.mxu1 %vm1172_vm0, %v8254_v28 }
0x2da3   : > { %v8584_v10 = vpop.permute.xlu0 %8583 }
0x2da4   : > { %v8694_v18 = vpop.permute.xlu1 %8693 }
0x2da7   : > { %v8696_v25 = vpop.permute.xlu0 %8695 }
0x2e52   : > { %v11458_v38 = vpop.f32.mrf.mxu1 }
0x2e53   : > { %v8350_v62 = vadd.f32 %v11458_v38, %v13534_v19 }
0x2e54   : > { %v8344_v31 = vpop.f32.mrf.mxu1 }
0x2e55   : > { %v8345_v32 = vadd.f32 %v13534_v19, %v8344_v31  ;;  %v8364_v63 = vmax.f32 %v8350_v62, 0.0 }
0x2e57   : > { %v8363_v14 = vmax.f32 %v8345_v32, 0.0 }
0x2e59   : > { %11466 = vmatprep.mubr.msk.f32.mxu1 %vm1573_vm11, %v8363_v14 }
0x2e5a   : > { %11467 = vmatmul.mubr.msk.f32.vlgmr.msra.gmra.mxu1 %vm1573_vm11, %v8364_v63  ;;  %v8808_v63 = vld [vmem:[%s1124_s0 + $0x38] sm:$0xff] }
0x2e5b   : > { %11481 = vmatpush3.msra.mxu1 %v8582_v21 }
0x2e5c   : > { %11482 = vmatprep.subr.mxu1 %v8581_v7 }
0x2e5d   : > { %11483 = vmatpush3.msra.mxu1 %v8581_v7  ;;  %v8807_v7 = vld [vmem:[%s1124_s0 + $0x30] sm:$0xff] }
0x2e5e   : > { %11484 = vmatprep.subr.mxu1 %v8580_v30 }
0x2e5f   : > { %11485 = vmatpush3.msra.mxu1 %v8580_v30  ;;  %v8806_v30 = vld [vmem:[%s1124_s0 + $0x28] sm:$0xff] }
0x2e60   : > { %11486 = vmatprep.subr.mxu1 %v8579_v4 }
0x2e61   : > { %11487 = vmatpush3.msra.mxu1 %v8579_v4  ;;  %v8805_v4 = vld [vmem:[%s1124_s0 + $0x20] sm:$0xff] }
0x2e62   : > { %v11461_v11 = vpop.f32.mrf.mxu1  ;;  %11516 = vmatprep.subr.mxu1 %v8808_v63 }
0x2e63   : > { %v8360_v61 = vadd.f32 %v11461_v11, %v13534_v19  ;;  %v8804_v11 = vld [vmem:[%s1124_s0 + $0x18] sm:$0xff] }
0x2e64   : > { %v8354_v9 = vpop.f32.mrf.mxu1 }
0x2e65   : > { %v8355_v56 = vadd.f32 %v13534_v19, %v8354_v9  ;;  %v8366_v49 = vmax.f32 %v8360_v61, 0.0  ;;  %v8803_v61 = vld [vmem:[%s1124_s0 + $0x10] sm:$0xff]  ;;  %v8802_v9 = vld [vmem:[%s1124_s0 + $0x8] sm:$0xff] }
0x2e67   : > { %v8365_v17 = vmax.f32 %v8355_v56, 0.0  ;;  %v8801_v56 = vld [vmem:[%s1124_s0] sm:$0xff] }
0x2e69   : > { %11469 = vmatprep.mubr.msk.f32.mxu1 %vm1573_vm11, %v8365_v17  ;;  %v8926_v17 = vld [vmem:[%s13618_s23 + $0x38] sm:$0xff] }
0x2e6a   : > { %11470 = vmatmul.mubr.msk.f32.gmra.mxu1 %vm1573_vm11, %v8366_v49  ;;  %v8925_v49 = vld [vmem:[%s13618_s23 + $0x30] sm:$0xff] }
0x2e6b   : > { %11488 = vmatprep.mubr.msk.f32.mxu1 %vm1172_vm0, %v8251_v24 }
0x2e6e   : > { %11489 = vmatmul.mubr.msk.f32.vlgmr.msra.gmra.mxu1 %vm1172_vm0, %v8252_v42  ;;  %v8676_v42 = vld [vmem:[%s13568_s16 + $0x8] sm:$0xff] }
0x2e6f   : > { %11491 = vmatprep.mubr.msk.f32.mxu1 %vm1172_vm0, %v8253_v33  ;;  %v8675_v33 = vld [vmem:[%s13568_s16] sm:$0xff]  ;;  %11517 = vmatpush3.msra.mxu1 %v8808_v63  ;;  %v9069_v63 = vld [vmem:[%s13647_s24 + $0xc8] sm:$0xff] }
0x2e70   : > { %11518 = vmatprep.subr.mxu1 %v8807_v7 }
0x2e71   : > { %11519 = vmatpush3.msra.mxu1 %v8807_v7  ;;  %v9068_v7 = vld [vmem:[%s13647_s24 + $0xc0] sm:$0xff] }
0x2e72   : > { %11492 = vmatmul.mubr.msk.f32.gmra.mxu1 %vm1172_vm0, %v8254_v28  ;;  %11520 = vmatprep.subr.mxu1 %v8806_v30  ;;  %vm8697_vm0 = vcmask 293888  }
0x2e73   : > { %11521 = vmatpush3.msra.mxu1 %v8806_v30  ;;  %v8698_v41 = vsel %vm8697_vm0, %v8694_v18, %v8696_v25  ;;  %v9065_v30 = vld [vmem:[%s13647_s24 + $0xa8] sm:$0xff] }
0x2e74   : > { %11522 = vmatprep.subr.mxu1 %v8805_v4 }
0x2e75   : > { %11523 = vmatpush3.msra.mxu1 %v8805_v4  ;;  %v9064_v4 = vld [vmem:[%s13647_s24 + $0xa0] sm:$0xff] }
0x2e76   : > { %11524 = vmatprep.subr.mxu1 %v8804_v11 }
0x2e77   : > { %11525 = vmatpush3.msra.mxu1 %v8804_v11  ;;  %v9061_v11 = vld [vmem:[%s13647_s24 + $0x88] sm:$0xff] }
0x2e78   : > { %11526 = vmatprep.subr.mxu1 %v8803_v61 }
0x2e79   : > { %11527 = vmatpush3.msra.mxu1 %v8803_v61  ;;  %v9060_v61 = vld [vmem:[%s13647_s24 + $0x80] sm:$0xff] }
0x2e7a   : > { %11528 = vmatprep.subr.mxu1 %v8802_v9 }
0x2e7b   : > { %11529 = vmatpush3.msra.mxu1 %v8802_v9  ;;  %v9057_v9 = vld [vmem:[%s13647_s24 + $0x68] sm:$0xff] }
0x2e7c   : > { %11530 = vmatprep.subr.mxu1 %v8801_v56 }
0x2e7d   : > { %11531 = vmatpush3.msra.mxu1 %v8801_v56 }
0x2f1a   : > { %v11468_v39 = vpop.f32.mrf.mxu1 }
0x2f1b   : > { %v8456_v51 = vadd.f32 %v11468_v39, %v8370_v0 }
0x2f1c   : > { %v8450_v55 = vpop.f32.mrf.mxu1 }
0x2f1d   : > { %v8451_v58 = vadd.f32 %v8450_v55, %v8370_v0  ;;  %v8470_v2 = vmax.f32 %v8456_v51, 0.0 }
0x2f1f   : > { %v8469_v60 = vmax.f32 %v8451_v58, 0.0 }
0x2f21   : > { %11474 = vmatprep.mubr.msk.f32.mxu0 %vm1396_vm10, %v8469_v60 }
0x2f22   : > { %11475 = vmatmul.mubr.msk.f32.vlgmr.msra.gmra.mxu0 %vm1396_vm10, %v8470_v2 }
0x2f23   : > { %11495 = vmatpush3.msra.mxu0 %v8682_v46  ;;  %v8923_v46 = vld [vmem:[%s13618_s23 + $0x20] sm:$0xff] }
0x2f24   : > { %11496 = vmatprep.subr.mxu0 %v8681_v15 }
0x2f25   : > { %11497 = vmatpush3.msra.mxu0 %v8681_v15 }
0x2f26   : > { %11498 = vmatprep.subr.mxu0 %v8680_v5 }
0x2f27   : > { %11499 = vmatpush3.msra.mxu0 %v8680_v5 }
0x2f28   : > { %11500 = vmatprep.subr.mxu0 %v8679_v6 }
0x2f29   : > { %11501 = vmatpush3.msra.mxu0 %v8679_v6 }
0x2f2a   : > { %v11471_v12 = vpop.f32.mrf.mxu1  ;;  %11502 = vmatprep.subr.mxu0 %v8678_v1 }
0x2f2b   : > { %v8466_v23 = vadd.f32 %v11471_v12, %v8370_v0  ;;  %11503 = vmatpush3.msra.mxu0 %v8678_v1  ;;  %v8922_v1 = vld [vmem:[%s13618_s23 + $0x18] sm:$0xff]  ;;  %v8921_v12 = vld [vmem:[%s13618_s23 + $0x10] sm:$0xff] }
0x2f2c   : > { %v8460_v26 = vpop.f32.mrf.mxu1  ;;  %11504 = vmatprep.subr.mxu0 %v8677_v35 }
0x2f2d   : > { %v8461_v24 = vadd.f32 %v8460_v26, %v8370_v0  ;;  %11505 = vmatpush3.msra.mxu0 %v8677_v35  ;;  %v8472_v16 = vmax.f32 %v8466_v23, 0.0  ;;  %v8920_v35 = vld [vmem:[%s13618_s23 + $0x8] sm:$0xff]  ;;  %v8919_v23 = vld [vmem:[%s13618_s23] sm:$0xff]  ;;  %v8932_v26 = vrot.slane %v13578_v27, %v12152_v36  ;;  %s1109_s23 = scalar_lea.vmem %s13965_s9, %s10216_s8 }
0x2f2e   : > { %v11490_v29 = vpop.f32.mrf.mxu1  ;;  %11506 = vmatprep.subr.mxu0 %v8676_v42  ;;  %v9093_v27 = vld [vmem:[%s13647_s24 + $0x188] sm:$0xff] }
0x2f2f   : > { %v8471_v3 = vmax.f32 %v8461_v24, 0.0  ;;  %v8658_v47 = vadd.f32 %v11490_v29, %v8584_v10  ;;  %11507 = vmatpush3.msra.mxu0 %v8676_v42  ;;  %v9105_v24 = vld [vmem:[%s13647_s24 + $0x1e8] sm:$0xff]  ;;  %v9104_v42 = vld [vmem:[%s13647_s24 + $0x1e0] sm:$0xff]  ;;  %8937 = vrot.lane.b32.xlu0 %v8932_v26, %s11951_s28  ;;  %v9083_v26 = vld [vmem:[%s13647_s24 + $0x138] sm:$0xff] }
0x2f30   : > { %v8652_v28 = vpop.f32.mrf.mxu1  ;;  %11508 = vmatprep.subr.mxu0 %v8675_v33  ;;  %9148 = vmatprep.subr.mxu1 %v9105_v24  ;;  %v9101_v29 = vld [vmem:[%s13647_s24 + $0x1c8] sm:$0xff]  ;;  %v9082_v24 = vld [vmem:[%s13647_s24 + $0x130] sm:$0xff] }
0x2f31   : > { %v8653_v19 = vadd.f32 %v8652_v28, %v8584_v10  ;;  %11477 = vmatprep.mubr.msk.f32.mxu0 %vm1396_vm10, %v8471_v3  ;;  %11509 = vmatpush3.msra.mxu0 %v8675_v33  ;;  %v8672_v21 = vmax.f32 %v8658_v47, 0.0  ;;  %v9100_v3 = vld [vmem:[%s13647_s24 + $0x1c0] sm:$0xff]  ;;  %v9097_v33 = vld [vmem:[%s13647_s24 + $0x1a8] sm:$0xff] }
0x2f32   : > { %11478 = vmatmul.mubr.msk.f32.gmra.mxu0 %vm1396_vm10, %v8472_v16  ;;  %v11493_v44 = vpop.f32.mrf.mxu1  ;;  %11538 = vmatprep.subr.mxu0 %v8926_v17  ;;  %v9096_v16 = vld [vmem:[%s13647_s24 + $0x1a0] sm:$0xff]  ;;  %v9089_v28 = vld [vmem:[%s13647_s24 + $0x168] sm:$0xff]  ;;  %vm9738_vm10 = vcmask 31744  }
0x2f33   : > { %v8671_v57 = vmax.f32 %v8653_v19, 0.0  ;;  %v8668_v38 = vadd.f32 %v11493_v44, %v8584_v10  ;;  %v9092_v47 = vld [vmem:[%s13647_s24 + $0x180] sm:$0xff]  ;;  %v9085_v44 = vld [vmem:[%s13647_s24 + $0x148] sm:$0xff] }
0x2f34   : > { %v8662_v62 = vpop.f32.mrf.mxu1  ;;  %v9088_v19 = vld [vmem:[%s13647_s24 + $0x160] sm:$0xff] }
0x2f35   : > { %v8663_v31 = vadd.f32 %v8662_v62, %v8584_v10  ;;  %11510 = vmatprep.mubr.msk.f32.mxu0 %vm1290_vm9, %v8671_v57  ;;  %v8674_v14 = vmax.f32 %v8668_v38, 0.0  ;;  %v9107_v10 = vld [vmem:[%s13647_s24 + $0x1f8] sm:$0xff]  ;;  %v9084_v57 = vld [vmem:[%s13647_s24 + $0x140] sm:$0xff]  ;;  %v9077_v62 = vld [vmem:[%s13647_s24 + $0x108] sm:$0xff] }
0x2f36   : > { %11511 = vmatmul.mubr.msk.f32.vlgmr.msra.gmra.mxu0 %vm1290_vm9, %v8672_v21  ;;  %v9081_v21 = vld [vmem:[%s13647_s24 + $0x128] sm:$0xff]  ;;  %v9080_v38 = vld [vmem:[%s13647_s24 + $0x120] sm:$0xff] }
0x2f37   : > { %v8673_v32 = vmax.f32 %v8663_v31, 0.0  ;;  %11539 = vmatpush3.msra.mxu0 %v8926_v17  ;;  %v9076_v31 = vld [vmem:[%s13647_s24 + $0x100] sm:$0xff]  ;;  %v8816_v17 = vpop.permute.xlu1 %8815 }
0x2f38   : > { %11540 = vmatprep.subr.mxu0 %v8925_v49 }
0x2f39   : > { %11513 = vmatprep.mubr.msk.f32.mxu0 %vm1290_vm9, %v8673_v32  ;;  %11541 = vmatpush3.msra.mxu0 %v8925_v49  ;;  %v9073_v32 = vld [vmem:[%s13647_s24 + $0xe8] sm:$0xff] }
0x2f3a   : > { %11514 = vmatmul.mubr.msk.f32.gmra.mxu0 %vm1290_vm9, %v8674_v14  ;;  %11542 = vmatprep.subr.mxu0 %v8924_v50  ;;  %v9072_v14 = vld [vmem:[%s13647_s24 + $0xe0] sm:$0xff] }
0x2f3b   : > { %11543 = vmatpush3.msra.mxu0 %v8924_v50 }
0x2f3c   : > { %11544 = vmatprep.subr.mxu0 %v8923_v46 }
0x2f3d   : > { %11545 = vmatpush3.msra.mxu0 %v8923_v46 }
0x2f3e   : > { %11546 = vmatprep.subr.mxu0 %v8922_v1 }
0x2f3f   : > { %11547 = vmatpush3.msra.mxu0 %v8922_v1  ;;  %v9091_v1 = vld [vmem:[%s13647_s24 + $0x178] sm:$0xff] }
0x2f40   : > { %11548 = vmatprep.subr.mxu0 %v8921_v12 }
0x2f41   : > { %11549 = vmatpush3.msra.mxu0 %v8921_v12  ;;  %v9090_v12 = vld [vmem:[%s13647_s24 + $0x170] sm:$0xff] }
0x2f42   : > { %11550 = vmatprep.subr.mxu0 %v8920_v35 }
0x2f43   : > { %11551 = vmatpush3.msra.mxu0 %v8920_v35  ;;  %v9087_v35 = vld [vmem:[%s13647_s24 + $0x158] sm:$0xff] }
0x2f44   : > { %11552 = vmatprep.subr.mxu0 %v8919_v23 }
0x2f45   : > { %11553 = vmatpush3.msra.mxu0 %v8919_v23  ;;  %v9086_v23 = vld [vmem:[%s13647_s24 + $0x150] sm:$0xff] }
0x2f46   : > { %9237 = vmatprep.subr.mxu0 %v9107_v10  ;;  %v9079_v10 = vld [vmem:[%s13647_s24 + $0x118] sm:$0xff] }
0x2fe2   : > { %v13624_v8 = vpop.f32.mrf.mxu0 }
0x2fe4   : > { %v13626_v40 = vpop.f32.mrf.mxu0 }
0x2ff2   : > { %v13628_v52 = vpop.f32.mrf.mxu0 }
0x2ff4   : > { %v13630_v43 = vpop.f32.mrf.mxu0 }
0x2ff6   : > { %v11512_v45 = vpop.f32.mrf.mxu0 }
0x2ff7   : > { %v8784_v48 = vadd.f32 %v11512_v45, %v8698_v41 }
0x2ff8   : > { %v8778_v0 = vpop.f32.mrf.mxu0 }
0x2ff9   : > { %v8779_v39 = vadd.f32 %v8778_v0, %v8698_v41  ;;  %v8798_v58 = vmax.f32 %v8784_v48, 0.0  ;;  %v9106_v0 = vld [vmem:[%s13647_s24 + $0x1f0] sm:$0xff] }
0x2ffa   : > { %v11515_v51 = vpop.f32.mrf.mxu0 }
0x2ffb   : > { %v8797_v55 = vmax.f32 %v8779_v39, 0.0  ;;  %v8794_v60 = vadd.f32 %v11515_v51, %v8698_v41  ;;  %v9103_v51 = vld [vmem:[%s13647_s24 + $0x1d8] sm:$0xff] }
0x2ffc   : > { %v8788_v2 = vpop.f32.mrf.mxu0 }
0x2ffd   : > { %v8789_v15 = vadd.f32 %v8788_v2, %v8698_v41  ;;  %11532 = vmatprep.mubr.msk.f32.mxu1 %vm1290_vm9, %v8797_v55  ;;  %v8800_v6 = vmax.f32 %v8794_v60, 0.0  ;;  %v9102_v55 = vld [vmem:[%s13647_s24 + $0x1d0] sm:$0xff]  ;;  %v9099_v60 = vld [vmem:[%s13647_s24 + $0x1b8] sm:$0xff] }
0x2ffe   : > { %11533 = vmatmul.mubr.msk.f32.vlgmr.msra.gmra.mxu1 %vm1290_vm9, %v8798_v58 }
0x2fff   : > { %v8799_v5 = vmax.f32 %v8789_v15, 0.0  ;;  %9149 = vmatpush1.msra.mxu1 %v9104_v42  ;;  %v9098_v15 = vld [vmem:[%s13647_s24 + $0x1b0] sm:$0xff] }
0x3000   : > { %9150 = vmatprep.subr.mxu1 %v9101_v29  ;;  %v9078_v42 = vld [vmem:[%s13647_s24 + $0x110] sm:$0xff]  ;;  %v9075_v29 = vld [vmem:[%s13647_s24 + $0xf8] sm:$0xff] }
0x3001   : > { %11535 = vmatprep.mubr.msk.f32.mxu1 %vm1290_vm9, %v8799_v5  ;;  %9151 = vmatpush1.msra.mxu1 %v9100_v3  ;;  %v9095_v5 = vld [vmem:[%s13647_s24 + $0x198] sm:$0xff]  ;;  %v9074_v3 = vld [vmem:[%s13647_s24 + $0xf0] sm:$0xff] }
0x3002   : > { %11536 = vmatmul.mubr.msk.f32.gmra.mxu1 %vm1290_vm9, %v8800_v6  ;;  %9152 = vmatprep.subr.mxu1 %v9097_v33  ;;  %v9094_v6 = vld [vmem:[%s13647_s24 + $0x190] sm:$0xff]  ;;  %v9071_v33 = vld [vmem:[%s13647_s24 + $0xd8] sm:$0xff] }
0x3003   : > { %9153 = vmatpush1.msra.mxu1 %v9096_v16  ;;  %v9070_v16 = vld [vmem:[%s13647_s24 + $0xd0] sm:$0xff] }
0x3004   : > { %9154 = vmatprep.subr.mxu1 %v9093_v27  ;;  %v9067_v27 = vld [vmem:[%s13647_s24 + $0xb8] sm:$0xff] }
0x3005   : > { %9155 = vmatpush1.msra.mxu1 %v9092_v47  ;;  %v9066_v47 = vld [vmem:[%s13647_s24 + $0xb0] sm:$0xff] }
0x3006   : > { %9156 = vmatprep.subr.mxu1 %v9089_v28  ;;  %v9063_v28 = vld [vmem:[%s13647_s24 + $0x98] sm:$0xff] }
0x3007   : > { %9157 = vmatpush1.msra.mxu1 %v9088_v19  ;;  %v9062_v19 = vld [vmem:[%s13647_s24 + $0x90] sm:$0xff] }
0x3008   : > { %9158 = vmatprep.subr.mxu1 %v9085_v44  ;;  %v9059_v44 = vld [vmem:[%s13647_s24 + $0x78] sm:$0xff] }
0x3009   : > { %9159 = vmatpush1.msra.mxu1 %v9084_v57  ;;  %v9056_v57 = vld [vmem:[%s13647_s24 + $0x60] sm:$0xff] }
0x300a   : > { %9160 = vmatprep.subr.mxu1 %v9081_v21  ;;  %v9058_v21 = vld [vmem:[%s13647_s24 + $0x70] sm:$0xff] }
0x300b   : > { %9161 = vmatpush1.msra.mxu1 %v9080_v38  ;;  %v9053_v38 = vld [vmem:[%s13647_s24 + $0x48] sm:$0xff] }
0x300c   : > { %9162 = vmatprep.subr.mxu1 %v9077_v62  ;;  %v9055_v62 = vld [vmem:[%s13647_s24 + $0x58] sm:$0xff] }
0x300d   : > { %9163 = vmatpush1.msra.mxu1 %v9076_v31  ;;  %v9052_v31 = vld [vmem:[%s13647_s24 + $0x40] sm:$0xff] }
0x300e   : > { %9164 = vmatprep.subr.mxu1 %v9073_v32  ;;  %v9054_v32 = vld [vmem:[%s13647_s24 + $0x50] sm:$0xff] }
0x300f   : > { %9165 = vmatpush1.msra.mxu1 %v9072_v14  ;;  %v9049_v14 = vld [vmem:[%s13647_s24 + $0x28] sm:$0xff] }
0x3010   : > { %9166 = vmatprep.subr.mxu1 %v9069_v63  ;;  %v9051_v63 = vld [vmem:[%s13647_s24 + $0x38] sm:$0xff] }
0x3011   : > { %9167 = vmatpush1.msra.mxu1 %v9068_v7  ;;  %v9048_v7 = vld [vmem:[%s13647_s24 + $0x20] sm:$0xff] }
0x3012   : > { %9168 = vmatprep.subr.mxu1 %v9065_v30  ;;  %v9050_v30 = vld [vmem:[%s13647_s24 + $0x30] sm:$0xff] }
0x3013   : > { %9169 = vmatpush1.msra.mxu1 %v9064_v4  ;;  %v9045_v4 = vld [vmem:[%s13647_s24 + $0x8] sm:$0xff] }
0x3014   : > { %9170 = vmatprep.subr.mxu1 %v9061_v11  ;;  %v9047_v11 = vld [vmem:[%s13647_s24 + $0x18] sm:$0xff] }
0x3015   : > { %9171 = vmatpush1.msra.mxu1 %v9060_v61  ;;  %v9044_v61 = vld [vmem:[%s13647_s24] sm:$0xff] }
0x3016   : > { %9172 = vmatprep.subr.mxu1 %v9057_v9  ;;  %v9046_v9 = vld [vmem:[%s13647_s24 + $0x10] sm:$0xff] }
0x3017   : > { %9173 = vmatpush1.msra.mxu1 %v9056_v57  ;;  %v9400_v57 = vld [vmem:[%s13725_s25 + $0x1d0] sm:$0xff] }
0x3018   : > { %9174 = vmatprep.subr.mxu1 %v9053_v38  ;;  %v9384_v38 = vld [vmem:[%s13725_s25 + $0x150] sm:$0xff] }
0x3019   : > { %9175 = vmatpush1.msra.mxu1 %v9052_v31  ;;  %v9399_v31 = vld [vmem:[%s13725_s25 + $0x1c8] sm:$0xff] }
0x301a   : > { %9176 = vmatprep.subr.mxu1 %v9049_v14  ;;  %v9383_v14 = vld [vmem:[%s13725_s25 + $0x148] sm:$0xff] }
0x301b   : > { %9177 = vmatpush1.msra.mxu1 %v9048_v7  ;;  %v9398_v7 = vld [vmem:[%s13725_s25 + $0x1c0] sm:$0xff] }
0x301c   : > { %9178 = vmatprep.subr.mxu1 %v9045_v4  ;;  %v9382_v4 = vld [vmem:[%s13725_s25 + $0x140] sm:$0xff] }
0x301d   : > { %9179 = vmatpush1.msra.mxu1 %v9044_v61  ;;  %v9397_v61 = vld [vmem:[%s13725_s25 + $0x1b8] sm:$0xff] }
0x30be   : > { %v11534_v56 = vpop.f32.mrf.mxu1 }
0x30bf   : > { %v8902_v49 = vadd.f32 %v11534_v56, %v8816_v17  ;;  %v11952_v56 = vmov 0.0  }
0x30c0   : > { %v8896_v50 = vpop.f32.mrf.mxu1  ;;  %9212 = vmatprep.mubr.f32.mxu1 %v11952_v56 }
0x30c1   : > { %v8897_v46 = vadd.f32 %v8896_v50, %v8816_v17  ;;  %v8916_v41 = vmax.f32 %v8902_v49, 0.0  ;;  %v9124_v49 = vsub.s32 3, %v12148_v34  ;;  %v9373_v50 = vld [vmem:[%s13725_s25 + $0xf8] sm:$0xff]  ;;  %v8938_v34 = vpop.permute.xlu0 %8937 }
0x30c2   : > { %v11537_v25 = vpop.f32.mrf.mxu1  ;;  %10841 = vmatprep.subr.mxu1 %v9373_v50  ;;  %v9348_v50 = vld [vmem:[%s13725_s25 + $0x30] sm:$0xff] }
0x30c3   : > { %v8915_v18 = vmax.f32 %v8897_v46, 0.0  ;;  %v8912_v45 = vadd.f32 %v11537_v25, %v8816_v17  ;;  %v9405_v46 = vld [vmem:[%s13725_s25 + $0x1f8] sm:$0xff]  ;;  %v9125_v25 = vrot.slane %v13585_v13, %v9124_v49  ;;  %v9396_v49 = vld [vmem:[%s13725_s25 + $0x1b0] sm:$0xff] }
0x30c4   : > { %v8906_v48 = vpop.f32.mrf.mxu1 }
0x30c5   : > { %v8907_v39 = vadd.f32 %v8906_v48, %v8816_v17  ;;  %11554 = vmatprep.mubr.msk.f32.mxu0 %vm1290_vm9, %v8915_v18  ;;  %v8918_v2 = vmax.f32 %v8912_v45, 0.0  ;;  %v9117_v17 = vrot.slane %v13585_v13, %v12155_v37  ;;  %v9113_v18 = vrot.slane %v13585_v13, %v12152_v36  ;;  %v9372_v36 = vld [vmem:[%s13725_s25 + $0xf0] sm:$0xff] }
0x30c6   : > { %11555 = vmatmul.mubr.msk.f32.vlgmr.msra.gmra.mxu0 %vm1290_vm9, %v8916_v41  ;;  %v8940_v41 = vpop.permute.xlu1 %8939  ;;  %v9404_v13 = vld [vmem:[%s13725_s25 + $0x1f0] sm:$0xff] }
0x30c7   : > { %v8917_v58 = vmax.f32 %v8907_v39, 0.0  ;;  %9238 = vmatpush1.msra.mxu0 %v9106_v0  ;;  %9132 = vrot.lane.b32.xlu0 %v9117_v17, %s11951_s28  ;;  %v8941_v45 = vsel %vm8697_vm0, %v8938_v34, %v8940_v41  ;;  %v9364_v17 = vld [vmem:[%s13725_s25 + $0xb0] sm:$0xff]  ;;  %v9347_v34 = vld [vmem:[%s13725_s25 + $0x28] sm:$0xff]  ;;  %v9362_v41 = vld [vmem:[%s13725_s25 + $0xa0] sm:$0xff] }
0x30c8   : > { %9239 = vmatprep.subr.mxu0 %v9103_v51 }
0x30c9   : > { %11557 = vmatprep.mubr.msk.f32.mxu0 %vm1290_vm9, %v8917_v58  ;;  %9240 = vmatpush1.msra.mxu0 %v9102_v55 }
0x30ca   : > { %11558 = vmatmul.mubr.msk.f32.gmra.mxu0 %vm1290_vm9, %v8918_v2  ;;  %9241 = vmatprep.subr.mxu0 %v9099_v60  ;;  %v9357_v60 = vld [vmem:[%s13725_s25 + $0x78] sm:$0xff]  ;;  %vm9751_vm9 = vcmask 1043456  }
0x30cb   : > { %9242 = vmatpush1.msra.mxu0 %v9098_v15  ;;  %9301 = vmatprep.mubr.f32.mxu0 %v11952_v56  ;;  %v9389_v2 = vld [vmem:[%s13725_s25 + $0x178] sm:$0xff] }
0x30cc   : > { %9243 = vmatprep.subr.mxu0 %v9095_v5  ;;  %9136 = vrot.lane.b32.xlu0 %v9125_v25, %s11951_s28  ;;  %v9363_v25 = vld [vmem:[%s13725_s25 + $0xa8] sm:$0xff] }
0x30cd   : > { %9244 = vmatpush1.msra.mxu0 %v9094_v6  ;;  %v9356_v6 = vld [vmem:[%s13725_s25 + $0x70] sm:$0xff] }
0x30ce   : > { %9245 = vmatprep.subr.mxu0 %v9091_v1  ;;  %v9388_v1 = vld [vmem:[%s13725_s25 + $0x170] sm:$0xff] }
0x30cf   : > { %9246 = vmatpush1.msra.mxu0 %v9090_v12  ;;  %v9371_v12 = vld [vmem:[%s13725_s25 + $0xe8] sm:$0xff] }
0x30d0   : > { %9247 = vmatprep.subr.mxu0 %v9087_v35  ;;  %9130 = vrot.lane.b32.xlu0 %v9113_v18, %s11951_s28  ;;  %v9403_v35 = vld [vmem:[%s13725_s25 + $0x1e8] sm:$0xff]  ;;  %s13964_s28 = sld [smem:[#allocation6_spill]] }
0x30d1   : > { %9248 = vmatpush1.msra.mxu0 %v9086_v23  ;;  %v9395_v18 = vld [vmem:[%s13725_s25 + $0x1a8] sm:$0xff] }
0x30d2   : > { %9249 = vmatprep.subr.mxu0 %v9083_v26 }
0x30d3   : > { %9250 = vmatpush1.msra.mxu0 %v9082_v24  ;;  %v9355_v24 = vld [vmem:[%s13725_s25 + $0x68] sm:$0xff] }
0x30d4   : > { %9251 = vmatprep.subr.mxu0 %v9079_v10  ;;  %v9387_v10 = vld [vmem:[%s13725_s25 + $0x168] sm:$0xff] }
0x30d5   : > { %9252 = vmatpush1.msra.mxu0 %v9078_v42  ;;  %v9370_v42 = vld [vmem:[%s13725_s25 + $0xe0] sm:$0xff] }
0x30d6   : > { %9253 = vmatprep.subr.mxu0 %v9075_v29  ;;  %v9402_v29 = vld [vmem:[%s13725_s25 + $0x1e0] sm:$0xff]  ;;  %s13805_s29 = scalar_lea.vmem %s13964_s28, %s13963_s22  ;;  %s1162_s24 = scalar_lea.vmem %s13964_s28, %s13967_s27 }
0x30d7   : > { %9254 = vmatpush1.msra.mxu0 %v9074_v3 }
0x30d8   : > { %9255 = vmatprep.subr.mxu0 %v9071_v33  ;;  %v9354_v33 = vld [vmem:[%s13725_s25 + $0x60] sm:$0xff] }
0x30d9   : > { %9256 = vmatpush1.msra.mxu0 %v9070_v16  ;;  %v9386_v16 = vld [vmem:[%s13725_s25 + $0x160] sm:$0xff] }
0x30da   : > { %9257 = vmatprep.subr.mxu0 %v9067_v27  ;;  %v9369_v27 = vld [vmem:[%s13725_s25 + $0xd8] sm:$0xff] }
0x30db   : > { %9258 = vmatpush1.msra.mxu0 %v9066_v47  ;;  %v9401_v47 = vld [vmem:[%s13725_s25 + $0x1d8] sm:$0xff] }
0x30dc   : > { %9259 = vmatprep.subr.mxu0 %v9063_v28  ;;  %v9353_v28 = vld [vmem:[%s13725_s25 + $0x58] sm:$0xff] }
0x30dd   : > { %9260 = vmatpush1.msra.mxu0 %v9062_v19  ;;  %v9385_v19 = vld [vmem:[%s13725_s25 + $0x158] sm:$0xff] }
0x30de   : > { %9261 = vmatprep.subr.mxu0 %v9059_v44  ;;  %v9368_v44 = vld [vmem:[%s13725_s25 + $0xd0] sm:$0xff] }
0x30df   : > { %9262 = vmatpush1.msra.mxu0 %v9058_v21  ;;  %v9352_v21 = vld [vmem:[%s13725_s25 + $0x50] sm:$0xff] }
0x30e0   : > { %9263 = vmatprep.subr.mxu0 %v9055_v62  ;;  %v9367_v62 = vld [vmem:[%s13725_s25 + $0xc8] sm:$0xff] }
0x30e1   : > { %9264 = vmatpush1.msra.mxu0 %v9054_v32  ;;  %v9351_v32 = vld [vmem:[%s13725_s25 + $0x48] sm:$0xff] }
0x30e2   : > { %9265 = vmatprep.subr.mxu0 %v9051_v63  ;;  %v9366_v63 = vld [vmem:[%s13725_s25 + $0xc0] sm:$0xff] }
0x30e3   : > { %9266 = vmatpush1.msra.mxu0 %v9050_v30  ;;  %v9350_v30 = vld [vmem:[%s13725_s25 + $0x40] sm:$0xff] }
0x30e4   : > { %9267 = vmatprep.subr.mxu0 %v9047_v11  ;;  %v9365_v11 = vld [vmem:[%s13725_s25 + $0xb8] sm:$0xff] }
0x30e5   : > { %9268 = vmatpush1.msra.mxu0 %v9046_v9  ;;  %v9349_v9 = vld [vmem:[%s13725_s25 + $0x38] sm:$0xff] }
0x30e6   : > { %10885 = vmatprep.subr.mxu0 %v9405_v46  ;;  %v9380_v46 = vld [vmem:[%s13725_s25 + $0x130] sm:$0xff] }
0x3186   : > { %v11556_v37 = vpop.f32.mrf.mxu0 }
0x3187   : > { %v9027_v51 = vadd.f32 %v11556_v37, %v8941_v45  ;;  %v9379_v37 = vld [vmem:[%s13725_s25 + $0x128] sm:$0xff] }
0x3188   : > { %v9021_v48 = vpop.f32.mrf.mxu0 }
0x3189   : > { %v9022_v0 = vadd.f32 %v9021_v48, %v8941_v45  ;;  %v9041_v15 = vmax.f32 %v9027_v51, 0.0  ;;  %v9346_v48 = vld [vmem:[%s13725_s25 + $0x20] sm:$0xff]  ;;  %v9393_v51 = vld [vmem:[%s13725_s25 + $0x198] sm:$0xff] }
0x318a   : > { %v11559_v39 = vpop.f32.mrf.mxu0 }
0x318b   : > { %v9040_v55 = vmax.f32 %v9022_v0, 0.0  ;;  %v9037_v23 = vadd.f32 %v11559_v39, %v8941_v45  ;;  %v9378_v0 = vld [vmem:[%s13725_s25 + $0x120] sm:$0xff]  ;;  %v9361_v39 = vld [vmem:[%s13725_s25 + $0x98] sm:$0xff] }
0x318c   : > { %v9031_v58 = vpop.f32.mrf.mxu0 }
0x318d   : > { %9213 = vmatmul.mubr.f32.vlgmr.msra.gmra.mxu1 %v9040_v55  ;;  %9302 = vmatmul.mubr.f32.vlgmr.msra.gmra.mxu0 %v9040_v55  ;;  %v9032_v5 = vadd.f32 %v9031_v58, %v8941_v45  ;;  %v9043_v3 = vmax.f32 %v9037_v23, 0.0  ;;  %v9394_v45 = vld [vmem:[%s13725_s25 + $0x1a0] sm:$0xff]  ;;  %v9345_v55 = vld [vmem:[%s13725_s25 + $0x18] sm:$0xff] }
0x318e   : > { %9218 = vmatprep.mubr.f32.mxu1 %v11952_v56  ;;  %9307 = vmatprep.mubr.f32.mxu0 %v11952_v56  ;;  %v9377_v58 = vld [vmem:[%s13725_s25 + $0x118] sm:$0xff]  ;;  %v9342_v23 = vld [vmem:[%s13725_s25] sm:$0xff] }
0x318f   : > { %10842 = vmatpush3.msra.mxu1 %v9357_v60  ;;  %10886 = vmatpush3.msra.mxu0 %v9389_v2  ;;  %v9042_v26 = vmax.f32 %v9032_v5, 0.0  ;;  %v9360_v60 = vld [vmem:[%s13725_s25 + $0x90] sm:$0xff]  ;;  %v9391_v5 = vld [vmem:[%s13725_s25 + $0x188] sm:$0xff] }
0x3190   : > { %10843 = vmatprep.subr.mxu1 %v9372_v36  ;;  %10887 = vmatprep.subr.mxu0 %v9404_v13  ;;  %v9392_v2 = vld [vmem:[%s13725_s25 + $0x190] sm:$0xff] }
0x3191   : > { %9219 = vmatmul.mubr.f32.gmra.mxu1 %v9041_v15  ;;  %9308 = vmatmul.mubr.f32.gmra.mxu0 %v9041_v15  ;;  %v9344_v36 = vld [vmem:[%s13725_s25 + $0x10] sm:$0xff]  ;;  %v9359_v15 = vld [vmem:[%s13725_s25 + $0x88] sm:$0xff] }
0x3192   : > { %9224 = vmatprep.mubr.f32.mxu1 %v11952_v56  ;;  %9313 = vmatprep.mubr.f32.mxu0 %v11952_v56  ;;  %v9376_v13 = vld [vmem:[%s13725_s25 + $0x110] sm:$0xff] }
0x3193   : > { %10844 = vmatpush3.msra.mxu1 %v9356_v6  ;;  %10888 = vmatpush3.msra.mxu0 %v9388_v1  ;;  %v9343_v6 = vld [vmem:[%s13725_s25 + $0x8] sm:$0xff] }
0x3194   : > { %10845 = vmatprep.subr.mxu1 %v9371_v12  ;;  %10889 = vmatprep.subr.mxu0 %v9403_v35  ;;  %v9375_v1 = vld [vmem:[%s13725_s25 + $0x108] sm:$0xff]  ;;  %v9358_v12 = vld [vmem:[%s13725_s25 + $0x80] sm:$0xff] }
0x3195   : > { %9225 = vmatmul.mubr.f32.gmra.mxu1 %v9042_v26  ;;  %9314 = vmatmul.mubr.f32.gmra.mxu0 %v9042_v26  ;;  %v9390_v35 = vld [vmem:[%s13725_s25 + $0x180] sm:$0xff] }
0x3196   : > { %9230 = vmatprep.mubr.f32.mxu1 %v11952_v56  ;;  %9319 = vmatprep.mubr.f32.mxu0 %v11952_v56  ;;  %v9381_v56 = vld [vmem:[%s13725_s25 + $0x138] sm:$0xff]  ;;  %v9374_v26 = vld [vmem:[%s13725_s25 + $0x100] sm:$0xff]  ;;  %s1148_s25 = scalar_lea.vmem %s13968_s2, %s12142_s1 }
0x3197   : > { %10846 = vmatpush3.msra.mxu1 %v9355_v24  ;;  %10890 = vmatpush3.msra.mxu0 %v9387_v10  ;;  %v1169_v24 = vld [vmem:[%s13805_s29 + $0x8] sm:$0xff]  ;;  %v9133_v10 = vpop.permute.xlu0 %9132 }
0x3198   : > { %10847 = vmatprep.subr.mxu1 %v9370_v42  ;;  %10891 = vmatprep.subr.mxu0 %v9402_v29  ;;  %v9135_v29 = vpop.permute.xlu1 %9134 }
0x3199   : > { %9231 = vmatmul.mubr.f32.gmra.mxu1 %v9043_v3  ;;  %9320 = vmatmul.mubr.f32.gmra.mxu0 %v9043_v3 }
0x319a   : > { %10848 = vmatpush3.msra.mxu1 %v9354_v33  ;;  %10892 = vmatpush3.msra.mxu0 %v9386_v16 }
0x319b   : > { %10849 = vmatprep.subr.mxu1 %v9369_v27  ;;  %10893 = vmatprep.subr.mxu0 %v9401_v47  ;;  %v9137_v42 = vpop.permute.xlu0 %9136 }
0x319c   : > { %10850 = vmatpush3.msra.mxu1 %v9353_v28  ;;  %10894 = vmatpush3.msra.mxu0 %v9385_v19  ;;  %v9139_v27 = vpop.permute.xlu1 %9138  ;;  %v9142_v47 = vsel %vm8697_vm0, %v9135_v29, %v9137_v42  ;;  %v9141_v19 = vsel %vm8697_vm0, %v9133_v10, %v9135_v29  ;;  %v7423_v29 = vadd.f32 %v13313_v22, %v13256_v53  ;;  %v7662_v53 = vmul.f32 0.25, %v13319_v20  ;;  %v1170_v22 = vld [vmem:[%s13805_s29 + $0x10] sm:$0xff] }
0x319d   : > { %10851 = vmatprep.subr.mxu1 %v9368_v44  ;;  %10895 = vmatprep.subr.mxu0 %v9400_v57  ;;  %v9143_v44 = vsel %vm8697_vm0, %v9137_v42, %v9139_v27 }
0x319e   : > { %10852 = vmatpush3.msra.mxu1 %v9352_v21  ;;  %10896 = vmatpush3.msra.mxu0 %v9384_v38  ;;  %v7661_v27 = vmul.f32 0.25, %v7423_v29 }
0x319f   : > { %10853 = vmatprep.subr.mxu1 %v9367_v62  ;;  %10897 = vmatprep.subr.mxu0 %v9399_v31  ;;  %v9131_v3 = vpop.permute.xlu0 %9130 }
0x31a0   : > { %10854 = vmatpush3.msra.mxu1 %v9351_v32  ;;  %10898 = vmatpush3.msra.mxu0 %v9383_v14  ;;  %v9140_v28 = vsel %vm8697_vm0, %v9131_v3, %v9133_v10 }
0x31a1   : > { %10855 = vmatprep.subr.mxu1 %v9366_v63  ;;  %10899 = vmatprep.subr.mxu0 %v9398_v7 }
0x31a2   : > { %10856 = vmatpush3.msra.mxu1 %v9350_v30  ;;  %10900 = vmatpush3.msra.mxu0 %v9382_v4 }
0x31a3   : > { %10857 = vmatprep.subr.mxu1 %v9365_v11  ;;  %10901 = vmatprep.subr.mxu0 %v9397_v61 }
0x31a4   : > { %10858 = vmatpush3.msra.mxu1 %v9349_v9  ;;  %10902 = vmatpush3.msra.mxu0 %v9381_v56 }
0x31a5   : > { %10859 = vmatprep.subr.mxu1 %v9364_v17  ;;  %10903 = vmatprep.subr.mxu0 %v9396_v49 }
0x31a6   : > { %10860 = vmatpush3.msra.mxu1 %v9348_v50  ;;  %10904 = vmatpush3.msra.mxu0 %v9380_v46  ;;  %v1168_v46 = vld [vmem:[%s13805_s29] sm:$0xff] }
0x31a7   : > { %10861 = vmatprep.subr.mxu1 %v9363_v25  ;;  %10905 = vmatprep.subr.mxu0 %v9395_v18 }
0x31a8   : > { %10862 = vmatpush3.msra.mxu1 %v9347_v34  ;;  %10906 = vmatpush3.msra.mxu0 %v9379_v37 }
0x31a9   : > { %10863 = vmatprep.subr.mxu1 %v9362_v41  ;;  %10907 = vmatprep.subr.mxu0 %v9394_v45 }
0x31aa   : > { %10864 = vmatpush3.msra.mxu1 %v9346_v48  ;;  %10908 = vmatpush3.msra.mxu0 %v9378_v0 }
0x31ab   : > { %10865 = vmatprep.subr.mxu1 %v9361_v39  ;;  %10909 = vmatprep.subr.mxu0 %v9393_v51 }
0x31ac   : > { %10866 = vmatpush3.msra.mxu1 %v9345_v55  ;;  %10910 = vmatpush3.msra.mxu0 %v9377_v58 }
0x31ad   : > { %10867 = vmatprep.subr.mxu1 %v9360_v60  ;;  %10911 = vmatprep.subr.mxu0 %v9392_v2  ;;  %v1171_v60 = vld [vmem:[%s13805_s29 + $0x18] sm:$0xff] }
0x31ae   : > { %10868 = vmatpush3.msra.mxu1 %v9344_v36  ;;  %10912 = vmatpush3.msra.mxu0 %v9376_v13 }
0x31af   : > { %10869 = vmatprep.subr.mxu1 %v9359_v15  ;;  %10913 = vmatprep.subr.mxu0 %v9391_v5 }
0x31b0   : > { %10870 = vmatpush3.msra.mxu1 %v9343_v6  ;;  %10914 = vmatpush3.msra.mxu0 %v9375_v1 }
0x31b1   : > { %10871 = vmatprep.subr.mxu1 %v9358_v12  ;;  %10915 = vmatprep.subr.mxu0 %v9390_v35 }
0x31b2   : > { %10872 = vmatpush3.msra.mxu1 %v9342_v23  ;;  %10916 = vmatpush3.msra.mxu0 %v9374_v26 }
0x31b3   : > { %11560 = vmatprep.subr.mxu1 %v1169_v24 }
0x324d   : > { %v9214_v33 = vpop.f32.mrf.mxu1  ;;  %v9303_v16 = vpop.f32.mrf.mxu0 }
0x324e   : > { %v9215_v57 = vadd.f32 %v9214_v33, %v9140_v28  ;;  %v9304_v21 = vadd.f32 %v9303_v16, %v9142_v47  ;;  %v7660_v16 = vmul.f32 0.25, %v13311_v54  ;;  %v8578_v54 = vld [vmem:[%s1109_s23] sm:$0xf] }
0x324f   : > { %v9216_v38 = vpop.f32.mrf.mxu1  ;;  %v9305_v62 = vpop.f32.mrf.mxu0 }
0x3250   : > { %v9217_v31 = vadd.f32 %v9216_v38, %v9141_v19  ;;  %v9306_v32 = vadd.f32 %v9305_v62, %v9143_v44  ;;  %v9326_v4 = vmax.f32 %v9215_v57, 0.0  ;;  %v9328_v11 = vmax.f32 %v9304_v21, 0.0 }
0x3251   : > { %v9220_v14 = vpop.f32.mrf.mxu1  ;;  %v9309_v63 = vpop.f32.mrf.mxu0 }
0x3252   : > { %v9327_v7 = vmax.f32 %v9217_v31, 0.0  ;;  %v9329_v30 = vmax.f32 %v9306_v32, 0.0  ;;  %v9221_v61 = vadd.f32 %v9220_v14, %v9140_v28  ;;  %v9310_v9 = vadd.f32 %v9309_v63, %v9142_v47 }
0x3253   : > { %v9222_v56 = vpop.f32.mrf.mxu1  ;;  %v9311_v17 = vpop.f32.mrf.mxu0 }
0x3254   : > { %v9223_v49 = vadd.f32 %v9222_v56, %v9141_v19  ;;  %v9312_v50 = vadd.f32 %v9311_v17, %v9143_v44  ;;  %9470 = vmatprep.mubr.f32.mxu1 %v9327_v7  ;;  %9555 = vmatprep.mubr.f32.mxu0 %v9329_v30  ;;  %v9330_v41 = vmax.f32 %v9221_v61, 0.0  ;;  %v9332_v45 = vmax.f32 %v9310_v9, 0.0 }
0x3255   : > { %v9226_v25 = vpop.f32.mrf.mxu1  ;;  %v9315_v18 = vpop.f32.mrf.mxu0  ;;  %9471 = vmatmul.mubr.f32.vlgmr.msra.gmra.mxu1 %v9326_v4  ;;  %9556 = vmatmul.mubr.f32.vlgmr.msra.gmra.mxu0 %v9328_v11 }
0x3256   : > { %v9331_v34 = vmax.f32 %v9223_v49, 0.0  ;;  %v9333_v37 = vmax.f32 %v9312_v50, 0.0  ;;  %11561 = vmatpush3.msra.mxu1 %v1169_v24  ;;  %v9227_v48 = vadd.f32 %v9226_v25, %v9140_v28  ;;  %v9316_v0 = vadd.f32 %v9315_v18, %v9142_v47 }
0x3257   : > { %v9228_v39 = vpop.f32.mrf.mxu1  ;;  %v9317_v51 = vpop.f32.mrf.mxu0  ;;  %11562 = vmatprep.subr.mxu1 %v1168_v46 }
0x3258   : > { %v9229_v55 = vadd.f32 %v9228_v39, %v9141_v19  ;;  %v9318_v58 = vadd.f32 %v9317_v51, %v9143_v44  ;;  %9475 = vmatprep.mubr.f32.mxu1 %v9331_v34  ;;  %9560 = vmatprep.mubr.f32.mxu0 %v9333_v37  ;;  %v9334_v5 = vmax.f32 %v9227_v48, 0.0  ;;  %v9336_v6 = vmax.f32 %v9316_v0, 0.0 }
0x3259   : > { %v9232_v2 = vpop.f32.mrf.mxu1  ;;  %v9321_v36 = vpop.f32.mrf.mxu0  ;;  %9476 = vmatmul.mubr.f32.gmra.mxu1 %v9330_v41  ;;  %9561 = vmatmul.mubr.f32.gmra.mxu0 %v9332_v45 }
0x325a   : > { %v9335_v13 = vmax.f32 %v9229_v55, 0.0  ;;  %v9337_v15 = vmax.f32 %v9318_v58, 0.0  ;;  %11563 = vmatpush3.msra.mxu1 %v1168_v46  ;;  %v9233_v1 = vadd.f32 %v9232_v2, %v9140_v28  ;;  %v9322_v12 = vadd.f32 %v9321_v36, %v9142_v47  ;;  %v8475_v47 = vpop.permute.xlu1 %8474 }
0x325b   : > { %v9234_v35 = vpop.f32.mrf.mxu1  ;;  %v9323_v23 = vpop.f32.mrf.mxu0  ;;  %11567 = vmatprep.subr.mxu1 %v1171_v60  ;;  %v8556_v28 = vadd.f32 %v13626_v40, %v8475_v47  ;;  %v8566_v21 = vadd.f32 %v13630_v43, %v8475_v47  ;;  %v8571_v40 = vadd.f32 %v13628_v52, %v8475_v47 }
0x325c   : > { %v9235_v26 = vadd.f32 %v9234_v35, %v9141_v19  ;;  %v9324_v24 = vadd.f32 %v9323_v23, %v9143_v44  ;;  %9480 = vmatprep.mubr.f32.mxu1 %v9335_v13  ;;  %9565 = vmatprep.mubr.f32.mxu0 %v9337_v15  ;;  %v9338_v3 = vmax.f32 %v9233_v1, 0.0  ;;  %v9340_v33 = vmax.f32 %v9322_v12, 0.0  ;;  %v1163_v15 = vld [vmem:[%s1162_s24] sm:$0xff]  ;;  %v1164_v12 = vld [vmem:[%s1162_s24 + $0x8] sm:$0xff] }
0x325d   : > { %9481 = vmatmul.mubr.f32.gmra.mxu1 %v9334_v5  ;;  %9566 = vmatmul.mubr.f32.gmra.mxu0 %v9336_v6  ;;  %v8561_v19 = vadd.f32 %v13624_v8, %v8475_v47  ;;  %v7663_v44 = vmul.f32 0.25, %v13323_v59  ;;  %v8574_v57 = vmax.f32 %v8556_v28, 0.0  ;;  %v8576_v38 = vmax.f32 %v8566_v21, 0.0 }
0x325e   : > { %v9339_v10 = vmax.f32 %v9235_v26, 0.0  ;;  %v9341_v42 = vmax.f32 %v9324_v24, 0.0  ;;  %v8577_v59 = vmax.f32 %v8571_v40, 0.0 }
0x325f   : > { %v8575_v20 = vmax.f32 %v8561_v19, 0.0 }
0x3260   : > { %9485 = vmatprep.mubr.f32.mxu1 %v9339_v10  ;;  %9570 = vmatprep.mubr.f32.mxu0 %v9341_v42  ;;  %v1165_v42 = vld [vmem:[%s1162_s24 + $0x10] sm:$0xff] }
0x3261   : > { %9486 = vmatmul.mubr.f32.gmra.mxu1 %v9338_v3  ;;  %9571 = vmatmul.mubr.f32.gmra.mxu0 %v9340_v33 }
0x3262   : > { %11564 = vmatprep.mubr.msk.f32.mxu1 %vm1573_vm11, %v7660_v16 }
0x3265   : > { %11565 = vmatmul.mubr.msk.f32.vlgmr.msra.gmra.mxu1 %vm1573_vm11, %v7661_v27  ;;  %v1166_v27 = vld [vmem:[%s1162_s24 + $0x18] sm:$0xff] }
0x3266   : > { %11568 = vmatpush3.msra.mxu1 %v1171_v60  ;;  %11571 = vmatprep.mubr.msk.f32.mxu1 %vm1573_vm11, %v7662_v53 }
0x3267   : > { %11569 = vmatprep.subr.mxu1 %v1170_v22 }
0x3268   : > { %11570 = vmatpush3.msra.mxu1 %v1170_v22 }
0x3269   : > { %11572 = vmatmul.mubr.msk.f32.vlgmr.msra.gmra.mxu1 %vm1573_vm11, %v7663_v44  ;;  %11574 = vmatprep.subr.msk.mxu1 %vm9751_vm9, %v8578_v54  ;;  %vm9860_vm11 = vcmask 23552  }
0x326a   : > { %11576 = vmatprep.mubr.msk.f32.mxu1 %vm9738_vm10, %v8574_v57  ;;  %11575 = vmatpush3.msk.msra.mxu1 %vm9751_vm9, %v8578_v54 }
0x326d   : > { %11577 = vmatmul.mubr.msk.f32.vlgmr.msra.gmra.mxu1 %vm9738_vm10, %v8575_v20 }
0x326e   : > { %11579 = vmatprep.mubr.msk.f32.mxu1 %vm9738_vm10, %v8576_v38 }
0x3271   : > { %11580 = vmatmul.mubr.msk.f32.gmra.mxu1 %vm9738_vm10, %v8577_v59 }
0x3315   : > { %v10873_v8 = vpop.f32.mrf.mxu1  ;;  %v10917_v43 = vpop.f32.mrf.mxu0 }
0x3317   : > { %v10874_v62 = vpop.f32.mrf.mxu1  ;;  %v10918_v31 = vpop.f32.mrf.mxu0 }
0x3318   : > { %v10875_v32 = vadd.f32 %v10874_v62, %v10873_v8  ;;  %v10919_v14 = vadd.f32 %v10918_v31, %v10917_v43 }
0x3319   : > { %v10876_v63 = vpop.f32.mrf.mxu1  ;;  %v10920_v7 = vpop.f32.mrf.mxu0 }
0x331a   : > { %v9558_v30 = vadd.f32 %v10919_v14, %v10875_v32 }
0x331b   : > { %v10877_v4 = vpop.f32.mrf.mxu1  ;;  %v10921_v11 = vpop.f32.mrf.mxu0 }
0x331c   : > { %v10878_v52 = vadd.f32 %v10877_v4, %v10876_v63  ;;  %v10922_v61 = vadd.f32 %v10921_v11, %v10920_v7  ;;  %9848 = vrot.lane.b32.xlu0 %v9558_v30, %s11953_s7 }
0x331d   : > { %v10879_v9 = vpop.f32.mrf.mxu1  ;;  %v10923_v56 = vpop.f32.mrf.mxu0 }
0x331e   : > { %v9563_v17 = vadd.f32 %v10922_v61, %v10878_v52 }
0x331f   : > { %v10880_v49 = vpop.f32.mrf.mxu1  ;;  %v10924_v50 = vpop.f32.mrf.mxu0 }
0x3320   : > { %v10881_v46 = vadd.f32 %v10880_v49, %v10879_v9  ;;  %v10925_v25 = vadd.f32 %v10924_v50, %v10923_v56  ;;  %9850 = vrot.lane.b32.xlu1 %v9563_v17, %s11953_s7 }
0x3321   : > { %v10882_v18 = vpop.f32.mrf.mxu1  ;;  %v10926_v34 = vpop.f32.mrf.mxu0 }
0x3322   : > { %v9568_v37 = vadd.f32 %v10925_v25, %v10881_v46 }
0x3323   : > { %v10883_v41 = vpop.f32.mrf.mxu1  ;;  %v10927_v45 = vpop.f32.mrf.mxu0 }
0x3324   : > { %v10884_v48 = vadd.f32 %v10883_v41, %v10882_v18  ;;  %v10928_v0 = vadd.f32 %v10927_v45, %v10926_v34  ;;  %9852 = vrot.lane.b32.xlu0 %v9568_v37, %s11953_s7 }
0x3325   : > { %v11566_v51 = vpop.f32.mrf.mxu1 }
0x3326   : > { %v9573_v39 = vadd.f32 %v10928_v0, %v10884_v48 }
0x3327   : > { %v9648_v55 = vpop.f32.mrf.mxu1 }
0x3328   : > { %9854 = vrot.lane.b32.xlu1 %v9573_v39, %s11953_s7 }
0x3329   : > { %v11573_v58 = vpop.f32.mrf.mxu1 }
0x332b   : > { %v9729_v60 = vpop.f32.mrf.mxu1 }
0x332d   : > { %v11578_v2 = vpop.f32.mrf.mxu1 }
0x332e   : > { %v9827_v6 = vadd.f32 %v11578_v2, %v11566_v51 }
0x332f   : > { %v9821_v36 = vpop.f32.mrf.mxu1 }
0x3330   : > { %v9822_v13 = vadd.f32 %v9821_v36, %v9648_v55  ;;  %v9841_v24 = vsub.f32 %v9827_v6, %v1164_v12 }
0x3331   : > { %v11581_v5 = vpop.f32.mrf.mxu1 }
0x3332   : > { %v9840_v1 = vsub.f32 %v9822_v13, %v1163_v15  ;;  %v9837_v33 = vadd.f32 %v11581_v5, %v11573_v58 }
0x3333   : > { %v9831_v35 = vpop.f32.mrf.mxu1 }
0x3334   : > { %v9832_v10 = vadd.f32 %v9831_v35, %v9729_v60  ;;  %v9843_v53 = vsub.f32 %v9837_v33, %v1166_v27 }
0x3336   : > { %v9842_v16 = vsub.f32 %v9832_v10, %v1165_v42 }
0x338e   : > { %v9849_v23 = vpop.permute.xlu0 %9848 }
0x338f   : > { %v9861_v26 = vsel %vm9860_vm11, %v9840_v1, %v9849_v23 }
0x3390   : > { %9865 = vst.msk [vmem:[%s1148_s25] sm:$0xff] %vm9738_vm10, %v9861_v26 }
0x3392   : > { %v9851_v29 = vpop.permute.xlu1 %9850 }
0x3393   : > { %v9862_v3 = vsel %vm9860_vm11, %v9841_v24, %v9851_v29 }
0x3394   : > { %9866 = vst.msk [vmem:[%s1148_s25 + $0x8] sm:$0xff] %vm9738_vm10, %v9862_v3 }
0x3396   : > { %v9853_v47 = vpop.permute.xlu0 %9852 }
0x3397   : > { %v9863_v28 = vsel %vm9860_vm11, %v9842_v16, %v9853_v47 }
0x3398   : > { %9867 = vst.msk [vmem:[%s1148_s25 + $0x10] sm:$0xff] %vm9738_vm10, %v9863_v28 }
0x339a   : > { %v9855_v22 = vpop.permute.xlu1 %9854 }
0x339b   : > { %v9864_v54 = vsel %vm9860_vm11, %v9843_v53, %v9855_v22 }
0x339c   : > { %9868 = vst.msk [vmem:[%s1148_s25 + $0x18] sm:$0xff] %vm9738_vm10, %v9864_v54 }
0x339d PF: > { %s13969_s1 = sld [smem:[#allocation2_spill]] }
0x33a3   : > { %s34_s5 = sadd.s32 1, %s13969_s1  }
0x33a4   : > { %p31_p4 = scmp.ge.s32.totalorder %s34_s5, 4  }
0x33a6   :  { %33 = sbr.rel (!%p31_p4) target bundleno = 16 (0x10), region = 213 }

</bundles_post_ra>
